<compile_context>
chip_gen: v7x
topology: tpu7x:2x2x1
jax: 0.10.0
libtpu: 0.0.40
codegen_flags: <defaults>
</compile_context>

<pallas_src>
import math

import jax
import jax.numpy as jnp
from jax import lax
from jax.experimental import pallas as pl
from jax.experimental.pallas import tpu as pltpu


# ----------------------------------------------------------------------------
# Kernels
# ----------------------------------------------------------------------------

def _conv_relu_pool_kernel(p_ref, w_ref, b_ref, o_ref):
    """Fused conv-as-matmul + bias + ReLU + 2x2 max-pool.

    p_ref : (4, TN, K) bf16  im2col patches; leading dim = pool-window member
                             (hr, wr); rows within a slab ordered (b, ho, wo).
    w_ref : (K, C)     bf16  conv weight, K ordered (kh, kw, cin).
    b_ref : (1, C)     f32   conv bias.
    o_ref : (TN, C)          pooled output, rows (b, ho, wo) = NHWC flatten.
    """
    four, tn, k = p_ref.shape
    p2 = p_ref[...].reshape(four * tn, k)
    y = jnp.dot(p2, w_ref[...], preferred_element_type=jnp.float32)
    y = jnp.maximum(y + b_ref[...], 0.0)
    y = y.reshape(four, tn, y.shape[-1])
    pooled = jnp.maximum(jnp.maximum(y[0], y[1]), jnp.maximum(y[2], y[3]))
    o_ref[...] = pooled.astype(o_ref.dtype)


def _poly_layer_body(x, wb, wp, pbias, gamma, beta):
    """One PolynomialLayer (ReLU base act, LayerNorm, ReLU out) on values.

    x     : (B, In)       f32
    wb    : (In, Out)     bf16  base_weight^T
    wp    : (P, In, Out)  bf16  poly weights for powers 1..P (p=0 folded away)
    pbias : (1, Out)      f32   column sums of the p=0 poly-weight slice
    gamma, beta : (1, Out) f32  LayerNorm affine params
    """
    order = wp.shape[0]

    # base path: F.linear(relu(x), base_weight)
    act = jnp.maximum(x, 0.0)
    base = jnp.dot(act.astype(jnp.bfloat16), wb,
                   preferred_element_type=jnp.float32)

    # global min/max normalization to [-1, 1] (whole tensor, as in torch)
    xmin = jnp.min(x)
    xmax = jnp.max(x)
    denom = xmax - xmin
    scale = 2.0 / jnp.where(denom > 0.0, denom, 1.0)   # guard constant input
    xn = (x - xmin) * scale - 1.0

    # hoisted powers xn^1 .. xn^P (independent of the dots -> back-to-back MXU)
    powers = [xn]
    for _ in range(order - 1):
        powers.append(powers[-1] * xn)

    y = base + pbias                                    # p=0 term folded here
    for p in range(order):
        y = y + jnp.dot(powers[p].astype(jnp.bfloat16), wp[p],
                        preferred_element_type=jnp.float32)

    # LayerNorm (eps=1e-5, affine), f32
    mean = jnp.mean(y, axis=-1, keepdims=True)
    var = jnp.mean(jnp.square(y - mean), axis=-1, keepdims=True)
    yn = (y - mean) * lax.rsqrt(var + 1e-5)
    return jnp.maximum(yn * gamma + beta, 0.0)


def _make_poly_stack_kernel(num_layers):
    """Kernel running the whole stack of PolynomialLayers in one pallas_call."""
    def kernel(*refs):
        x = refs[0][...]
        o_ref = refs[-1]
        idx = 1
        for _ in range(num_layers):
            wb, wp, pb, g, be = refs[idx:idx + 5]
            idx += 5
            x = _poly_layer_body(x, wb[...], wp[...], pb[...], g[...], be[...])
        o_ref[...] = x.astype(o_ref.dtype)
    return kernel


# ----------------------------------------------------------------------------
# pallas_call wrappers
# ----------------------------------------------------------------------------

def _full_spec(shape):
    nd = len(shape)
    return pl.BlockSpec(shape, lambda i, _nd=nd: (0,) * _nd)


def conv3x3_relu_pool(x_nhwc, w_flat, bias_row, out_dtype):
    """3x3 conv (stride 1, pad 1) + ReLU + 2x2 max-pool in one pallas_call.

    Returns (pooled_rows, (B, Ho, Wo, Cout)) with pooled_rows = (B*Ho*Wo, Cout)
    in (b, ho, wo) row order (NHWC flatten of the pooled map).
    """
    b, h, w, _ = x_nhwc.shape
    ho, wo = h // 2, w // 2
    k, cout = w_flat.shape
    n = b * ho * wo

    # im2col in pool-member-major layout (XLA glue: pad + strided slices only;
    # no transpose of the patch minor dim — weight is pre-reordered instead).
    xp = jnp.pad(x_nhwc, ((0, 0), (1, 1), (1, 1), (0, 0)))
    slabs = []
    for hr in range(2):
        for wr in range(2):
            pats = [xp[:, hr + kh:hr + kh + h:2, wr + kw:wr + kw + w:2, :]
                    for kh in range(3) for kw in range(3)]
            pat = jnp.stack(pats, axis=3)                  # (B, Ho, Wo, 9, Cin)
            slabs.append(pat.reshape(n, k))
    patches = jnp.stack(slabs, axis=0).astype(jnp.bfloat16)  # (4, N, 9*Cin)

    tile_n = n if n <= 2048 else math.gcd(n, 2048)          # divides n, mult of 8
    grid = (n // tile_n,)

    out = pl.pallas_call(
        _conv_relu_pool_kernel,
        out_shape=jax.ShapeDtypeStruct((n, cout), out_dtype),
        grid=grid,
        in_specs=[pl.BlockSpec((4, tile_n, k), lambda i: (0, i, 0)),
                  pl.BlockSpec((k, cout), lambda i: (0, 0)),
                  pl.BlockSpec((1, cout), lambda i: (0, 0))],
        out_specs=pl.BlockSpec((tile_n, cout), lambda i: (i, 0)),
        compiler_params=pltpu.CompilerParams(
            dimension_semantics=("parallel",),
            vmem_limit_bytes=64 * 1024 * 1024),
    )(patches, w_flat, bias_row)
    return out, (b, ho, wo, cout)


def poly_stack(x, layers):
    """All PolynomialLayers fused into a single pallas_call.

    Batch is kept as one block so the global min/max normalization keeps the
    reference semantics (would need a separate global reduction if B were tiled).
    """
    b = x.shape[0]
    out_f = layers[-1][0].shape[1]

    args = [x]
    in_specs = [_full_spec(x.shape)]
    for layer_params in layers:
        for a in layer_params:
            args.append(a)
            in_specs.append(_full_spec(a.shape))

    return pl.pallas_call(
        _make_poly_stack_kernel(len(layers)),
        out_shape=jax.ShapeDtypeStruct((b, out_f), jnp.float32),
        grid=(1,),
        in_specs=in_specs,
        out_specs=_full_spec((b, out_f)),
        compiler_params=pltpu.CompilerParams(
            dimension_semantics=("arbitrary",),
            vmem_limit_bytes=64 * 1024 * 1024),
    )(*args)


# ----------------------------------------------------------------------------
# Parameters & forward
# ----------------------------------------------------------------------------

def make_params(key, input_channels=3, output_channels=10,
                neurons_hidden=(64,), polynomial_order=3):
    n_layers = len(neurons_hidden) + 1
    keys = jax.random.split(key, 4 + 2 * n_layers)
    ki = iter(keys)

    def conv_param(cin, cout):
        w = jax.random.normal(next(ki), (cout, cin, 3, 3), jnp.float32) * 0.1
        bias = jax.random.normal(next(ki), (cout,), jnp.float32) * 0.1
        # reorder once: (Cout,Cin,kh,kw) -> (kh,kw,Cin,Cout) -> (9*Cin, Cout)
        w_flat = jnp.transpose(w, (2, 3, 1, 0)).reshape(9 * cin, cout)
        return w_flat.astype(jnp.bfloat16), bias.reshape(1, cout)

    params = {}
    params["conv1_w"], params["conv1_b"] = conv_param(input_channels, 16)
    params["conv2_w"], params["conv2_b"] = conv_param(16, 32)

    # feature-extractor output geometry (torch flattens NCHW via x.view(B,-1))
    chw = (32, 8, 8)                          # (C, H, W) for a 3x32x32 input
    flat_features = chw[0] * chw[1] * chw[2]  # 2048 (matches the reference)

    dims = [flat_features] + list(neurons_hidden) + [output_channels]
    P = polynomial_order
    layers = []
    for li, (in_f, out_f) in enumerate(zip(dims[:-1], dims[1:])):
        wb = jax.random.normal(next(ki), (out_f, in_f), jnp.float32)            # torch (out,in)
        wp = jax.random.normal(next(ki), (out_f, in_f * (P + 1)), jnp.float32)  # torch layout
        wp = wp.reshape(out_f, in_f, P + 1)                                     # [o, j, p]
        if li == 0:
            # absorb the NCHW->NHWC flatten permutation (our conv kernels emit NHWC order)
            c, hh, ww = chw
            wb = wb.reshape(out_f, c, hh, ww).transpose(0, 2, 3, 1).reshape(out_f, in_f)
            wp = (wp.reshape(out_f, c, hh, ww, P + 1)
                    .transpose(0, 2, 3, 1, 4).reshape(out_f, in_f, P + 1))
        pbias = jnp.sum(wp[:, :, 0], axis=1).reshape(1, out_f)                  # fold p=0 (xn**0==1)
        wp_t = jnp.transpose(wp[:, :, 1:], (2, 1, 0)).astype(jnp.bfloat16)      # (P, In, Out)
        wb_t = jnp.transpose(wb).astype(jnp.bfloat16)                           # (In, Out)
        gamma = jnp.ones((1, out_f), jnp.float32)
        beta = jnp.zeros((1, out_f), jnp.float32)
        layers.append((wb_t, wp_t, pbias, gamma, beta))
    params["layers"] = layers
    return params


def polynomial_network_forward(params, x_nchw):
    # NCHW -> NHWC (channels on the lane axis)
    x = jnp.transpose(x_nchw, (0, 2, 3, 1)).astype(jnp.float32)
    b = x.shape[0]

    # conv1 + ReLU + pool (fused); intermediate kept bf16 (it only feeds conv2 patches)
    p1, shp1 = conv3x3_relu_pool(x, params["conv1_w"], params["conv1_b"], jnp.bfloat16)
    x1 = p1.reshape(shp1)                                     # (B, 16, 16, 16) NHWC

    # conv2 + ReLU + pool (fused); f32 out (feeds the min/max normalization)
    p2, _ = conv3x3_relu_pool(x1, params["conv2_w"], params["conv2_b"], jnp.float32)

    # NHWC flatten; the torch NCHW x.view(B,-1) ordering is already absorbed
    # into the first poly layer's weight columns.
    feat = p2.reshape(b, -1)                                  # (B, 2048)

    # fused stack of PolynomialLayers (single pallas_call)
    return poly_stack(feat, params["layers"])                 # (B, output_channels)


if __name__ == "__main__":
    key = jax.random.PRNGKey(0)
    kp, kx = jax.random.split(key)
    params = make_params(kp)
    x = jax.random.normal(kx, (2, 3, 32, 32), jnp.float32)    # NCHW, like PyTorch
    fwd = jax.jit(polynomial_network_forward)
    out = jax.block_until_ready(fwd(params, x))
    assert out.shape == (2, 10), out.shape
    assert bool(jnp.all(jnp.isfinite(out)))
    print("KERNEL_OK")
</pallas_src>

<mosaic_0001>
module attributes {stable_mosaic.version = 11 : i64} {
  func.func @_conv_relu_pool_kernel(%arg0: i32, %arg1: memref<4x512x27xbf16, #tpu.memory_space<vmem>>, %arg2: memref<27x16xbf16, #tpu.memory_space<vmem>>, %arg3: memref<1x16xf32, #tpu.memory_space<vmem>>, %arg4: memref<512x16xbf16, #tpu.memory_space<vmem>>) attributes {dimension_semantics = [#tpu.dimension_semantics<parallel>], iteration_bounds = array<i64: 1>, scalar_prefetch = 0 : i64, scratch_operands = 0 : i64, tpu.core_type = #tpu.core_type<tc>, window_params = [{transform_indices = @transform_0, window_bounds = array<i64: 4, 512, 27>}, {pipeline_mode = #tpu.pipeline_mode<synchronous>, transform_indices = @transform_1, window_bounds = array<i64: 27, 16>}, {pipeline_mode = #tpu.pipeline_mode<synchronous>, transform_indices = @transform_2, window_bounds = array<i64: 1, 16>}, {transform_indices = @transform_3, window_bounds = array<i64: 512, 16>}]} {
    %c0 = arith.constant 0 : index
    %c0_0 = arith.constant 0 : index
    %c0_1 = arith.constant 0 : index
    %0 = vector.load %arg1[%c0, %c0_0, %c0_1] : memref<4x512x27xbf16, #tpu.memory_space<vmem>>, vector<4x512x27xbf16>
    %1 = vector.shape_cast %0 : vector<4x512x27xbf16> to vector<2048x27xbf16>
    %c0_2 = arith.constant 0 : index
    %c0_3 = arith.constant 0 : index
    %2 = vector.load %arg2[%c0_2, %c0_3] : memref<27x16xbf16, #tpu.memory_space<vmem>>, vector<27x16xbf16>
    %cst = arith.constant dense<0.000000e+00> : vector<2048x16xf32>
    %3 = tpu.matmul %1, %2, %cst {dimension_numbers = #tpu.dot_dimension_numbers<[1], [0], [0], [1], [0, 0, 1, 1], [], []>} : vector<2048x27xbf16>, vector<27x16xbf16>, vector<2048x16xf32> -> vector<2048x16xf32>
    %c0_4 = arith.constant 0 : index
    %c0_5 = arith.constant 0 : index
    %4 = vector.load %arg3[%c0_4, %c0_5] : memref<1x16xf32, #tpu.memory_space<vmem>>, vector<1x16xf32>
    %5 = vector.broadcast %4 : vector<1x16xf32> to vector<2048x16xf32>
    %6 = arith.addf %3, %5 : vector<2048x16xf32>
    %cst_6 = arith.constant 0.000000e+00 : f32
    %7 = vector.broadcast %cst_6 : f32 to vector<2048x16xf32>
    %8 = arith.maximumf %6, %7 : vector<2048x16xf32>
    %9 = vector.shape_cast %8 : vector<2048x16xf32> to vector<4x512x16xf32>
    %10 = vector.extract_strided_slice %9 {offsets = [0, 0, 0], sizes = [1, 512, 16], strides = [1, 1, 1]} : vector<4x512x16xf32> to vector<1x512x16xf32>
    %11 = vector.shape_cast %10 : vector<1x512x16xf32> to vector<512x16xf32>
    %12 = vector.extract_strided_slice %9 {offsets = [1, 0, 0], sizes = [1, 512, 16], strides = [1, 1, 1]} : vector<4x512x16xf32> to vector<1x512x16xf32>
    %13 = vector.shape_cast %12 : vector<1x512x16xf32> to vector<512x16xf32>
    %14 = arith.maximumf %11, %13 : vector<512x16xf32>
    %15 = vector.extract_strided_slice %9 {offsets = [2, 0, 0], sizes = [1, 512, 16], strides = [1, 1, 1]} : vector<4x512x16xf32> to vector<1x512x16xf32>
    %16 = vector.shape_cast %15 : vector<1x512x16xf32> to vector<512x16xf32>
    %17 = vector.extract_strided_slice %9 {offsets = [3, 0, 0], sizes = [1, 512, 16], strides = [1, 1, 1]} : vector<4x512x16xf32> to vector<1x512x16xf32>
    %18 = vector.shape_cast %17 : vector<1x512x16xf32> to vector<512x16xf32>
    %19 = arith.maximumf %16, %18 : vector<512x16xf32>
    %20 = arith.maximumf %14, %19 : vector<512x16xf32>
    %21 = arith.truncf %20 : vector<512x16xf32> to vector<512x16xbf16>
    %c0_7 = arith.constant 0 : index
    %c0_8 = arith.constant 0 : index
    %22 = vector.load %arg4[%c0_7, %c0_8] : memref<512x16xbf16, #tpu.memory_space<vmem>>, vector<512x16xbf16>
    tpu.vector_store %arg4[%c0_7, %c0_8], %21 {strides = array<i32>} : memref<512x16xbf16, #tpu.memory_space<vmem>>, vector<512x16xbf16>,
    return
  }
  func.func @transform_0(%arg0: i32) -> (i32, i32, i32) {
    %c0_i32 = arith.constant 0 : i32
    %c0_i32_0 = arith.constant 0 : i32
    %c0_i32_1 = arith.constant 0 : i32
    return %c0_i32, %arg0, %c0_i32_0 : i32, i32, i32
  }
  func.func @transform_1(%arg0: i32) -> (i32, i32) {
    %c0_i32 = arith.constant 0 : i32
    %c0_i32_0 = arith.constant 0 : i32
    %c0_i32_1 = arith.constant 0 : i32
    return %c0_i32, %c0_i32_0 : i32, i32
  }
  func.func @transform_2(%arg0: i32) -> (i32, i32) {
    %c0_i32 = arith.constant 0 : i32
    %c0_i32_0 = arith.constant 0 : i32
    %c0_i32_1 = arith.constant 0 : i32
    return %c0_i32, %c0_i32_0 : i32, i32
  }
  func.func @transform_3(%arg0: i32) -> (i32, i32) {
    %c0_i32 = arith.constant 0 : i32
    %c0_i32_0 = arith.constant 0 : i32
    return %arg0, %c0_i32 : i32, i32
  }
}

module attributes {stable_mosaic.version = 11 : i64} {
  func.func @_conv_relu_pool_kernel(%arg0: i32, %arg1: memref<4x128x144xbf16, #tpu.memory_space<vmem>>, %arg2: memref<144x32xbf16, #tpu.memory_space<vmem>>, %arg3: memref<1x32xf32, #tpu.memory_space<vmem>>, %arg4: memref<128x32xf32, #tpu.memory_space<vmem>>) attributes {dimension_semantics = [#tpu.dimension_semantics<parallel>], iteration_bounds = array<i64: 1>, scalar_prefetch = 0 : i64, scratch_operands = 0 : i64, tpu.core_type = #tpu.core_type<tc>, window_params = [{transform_indices = @transform_0, window_bounds = array<i64: 4, 128, 144>}, {pipeline_mode = #tpu.pipeline_mode<synchronous>, transform_indices = @transform_1, window_bounds = array<i64: 144, 32>}, {pipeline_mode = #tpu.pipeline_mode<synchronous>, transform_indices = @transform_2, window_bounds = array<i64: 1, 32>}, {transform_indices = @transform_3, window_bounds = array<i64: 128, 32>}]} {
    %c0 = arith.constant 0 : index
    %c0_0 = arith.constant 0 : index
    %c0_1 = arith.constant 0 : index
    %0 = vector.load %arg1[%c0, %c0_0, %c0_1] : memref<4x128x144xbf16, #tpu.memory_space<vmem>>, vector<4x128x144xbf16>
    %1 = vector.shape_cast %0 : vector<4x128x144xbf16> to vector<512x144xbf16>
    %c0_2 = arith.constant 0 : index
    %c0_3 = arith.constant 0 : index
    %2 = vector.load %arg2[%c0_2, %c0_3] : memref<144x32xbf16, #tpu.memory_space<vmem>>, vector<144x32xbf16>
    %cst = arith.constant dense<0.000000e+00> : vector<512x32xf32>
    %3 = tpu.matmul %1, %2, %cst {dimension_numbers = #tpu.dot_dimension_numbers<[1], [0], [0], [1], [0, 0, 1, 1], [], []>} : vector<512x144xbf16>, vector<144x32xbf16>, vector<512x32xf32> -> vector<512x32xf32>
    %c0_4 = arith.constant 0 : index
    %c0_5 = arith.constant 0 : index
    %4 = vector.load %arg3[%c0_4, %c0_5] : memref<1x32xf32, #tpu.memory_space<vmem>>, vector<1x32xf32>
    %5 = vector.broadcast %4 : vector<1x32xf32> to vector<512x32xf32>
    %6 = arith.addf %3, %5 : vector<512x32xf32>
    %cst_6 = arith.constant 0.000000e+00 : f32
    %7 = vector.broadcast %cst_6 : f32 to vector<512x32xf32>
    %8 = arith.maximumf %6, %7 : vector<512x32xf32>
    %9 = vector.shape_cast %8 : vector<512x32xf32> to vector<4x128x32xf32>
    %10 = vector.extract_strided_slice %9 {offsets = [0, 0, 0], sizes = [1, 128, 32], strides = [1, 1, 1]} : vector<4x128x32xf32> to vector<1x128x32xf32>
    %11 = vector.shape_cast %10 : vector<1x128x32xf32> to vector<128x32xf32>
    %12 = vector.extract_strided_slice %9 {offsets = [1, 0, 0], sizes = [1, 128, 32], strides = [1, 1, 1]} : vector<4x128x32xf32> to vector<1x128x32xf32>
    %13 = vector.shape_cast %12 : vector<1x128x32xf32> to vector<128x32xf32>
    %14 = arith.maximumf %11, %13 : vector<128x32xf32>
    %15 = vector.extract_strided_slice %9 {offsets = [2, 0, 0], sizes = [1, 128, 32], strides = [1, 1, 1]} : vector<4x128x32xf32> to vector<1x128x32xf32>
    %16 = vector.shape_cast %15 : vector<1x128x32xf32> to vector<128x32xf32>
    %17 = vector.extract_strided_slice %9 {offsets = [3, 0, 0], sizes = [1, 128, 32], strides = [1, 1, 1]} : vector<4x128x32xf32> to vector<1x128x32xf32>
    %18 = vector.shape_cast %17 : vector<1x128x32xf32> to vector<128x32xf32>
    %19 = arith.maximumf %16, %18 : vector<128x32xf32>
    %20 = arith.maximumf %14, %19 : vector<128x32xf32>
    %c0_7 = arith.constant 0 : index
    %c0_8 = arith.constant 0 : index
    %21 = vector.load %arg4[%c0_7, %c0_8] : memref<128x32xf32, #tpu.memory_space<vmem>>, vector<128x32xf32>
    tpu.vector_store %arg4[%c0_7, %c0_8], %20 {strides = array<i32>} : memref<128x32xf32, #tpu.memory_space<vmem>>, vector<128x32xf32>,
    return
  }
  func.func @transform_0(%arg0: i32) -> (i32, i32, i32) {
    %c0_i32 = arith.constant 0 : i32
    %c0_i32_0 = arith.constant 0 : i32
    %c0_i32_1 = arith.constant 0 : i32
    return %c0_i32, %arg0, %c0_i32_0 : i32, i32, i32
  }
  func.func @transform_1(%arg0: i32) -> (i32, i32) {
    %c0_i32 = arith.constant 0 : i32
    %c0_i32_0 = arith.constant 0 : i32
    %c0_i32_1 = arith.constant 0 : i32
    return %c0_i32, %c0_i32_0 : i32, i32
  }
  func.func @transform_2(%arg0: i32) -> (i32, i32) {
    %c0_i32 = arith.constant 0 : i32
    %c0_i32_0 = arith.constant 0 : i32
    %c0_i32_1 = arith.constant 0 : i32
    return %c0_i32, %c0_i32_0 : i32, i32
  }
  func.func @transform_3(%arg0: i32) -> (i32, i32) {
    %c0_i32 = arith.constant 0 : i32
    %c0_i32_0 = arith.constant 0 : i32
    return %arg0, %c0_i32 : i32, i32
  }
}

module attributes {stable_mosaic.version = 11 : i64} {
  func.func @kernel(%arg0: i32, %arg1: memref<2x2048xf32, #tpu.memory_space<vmem>>, %arg2: memref<2048x64xbf16, #tpu.memory_space<vmem>>, %arg3: memref<3x2048x64xbf16, #tpu.memory_space<vmem>>, %arg4: memref<1x64xf32, #tpu.memory_space<vmem>>, %arg5: memref<1x64xf32, #tpu.memory_space<vmem>>, %arg6: memref<1x64xf32, #tpu.memory_space<vmem>>, %arg7: memref<64x10xbf16, #tpu.memory_space<vmem>>, %arg8: memref<3x64x10xbf16, #tpu.memory_space<vmem>>, %arg9: memref<1x10xf32, #tpu.memory_space<vmem>>, %arg10: memref<1x10xf32, #tpu.memory_space<vmem>>, %arg11: memref<1x10xf32, #tpu.memory_space<vmem>>, %arg12: memref<2x10xf32, #tpu.memory_space<vmem>>) attributes {dimension_semantics = [#tpu.dimension_semantics<arbitrary>], iteration_bounds = array<i64: 1>, scalar_prefetch = 0 : i64, scratch_operands = 0 : i64, tpu.core_type = #tpu.core_type<tc>, window_params = [{pipeline_mode = #tpu.pipeline_mode<synchronous>, transform_indices = @transform_0, window_bounds = array<i64: 2, 2048>}, {pipeline_mode = #tpu.pipeline_mode<synchronous>, transform_indices = @transform_1, window_bounds = array<i64: 2048, 64>}, {pipeline_mode = #tpu.pipeline_mode<synchronous>, transform_indices = @transform_2, window_bounds = array<i64: 3, 2048, 64>}, {pipeline_mode = #tpu.pipeline_mode<synchronous>, transform_indices = @transform_3, window_bounds = array<i64: 1, 64>}, {pipeline_mode = #tpu.pipeline_mode<synchronous>, transform_indices = @transform_4, window_bounds = array<i64: 1, 64>}, {pipeline_mode = #tpu.pipeline_mode<synchronous>, transform_indices = @transform_5, window_bounds = array<i64: 1, 64>}, {pipeline_mode = #tpu.pipeline_mode<synchronous>, transform_indices = @transform_6, window_bounds = array<i64: 64, 10>}, {pipeline_mode = #tpu.pipeline_mode<synchronous>, transform_indices = @transform_7, window_bounds = array<i64: 3, 64, 10>}, {pipeline_mode = #tpu.pipeline_mode<synchronous>, transform_indices = @transform_8, window_bounds = array<i64: 1, 10>}, {pipeline_mode = #tpu.pipeline_mode<synchronous>, transform_indices = @transform_9, window_bounds = array<i64: 1, 10>}, {pipeline_mode = #tpu.pipeline_mode<synchronous>, transform_indices = @transform_10, window_bounds = array<i64: 1, 10>}, {pipeline_mode = #tpu.pipeline_mode<synchronous>, transform_indices = @transform_11, window_bounds = array<i64: 2, 10>}]} {
    %c0 = arith.constant 0 : index
    %c0_0 = arith.constant 0 : index
    %0 = vector.load %arg1[%c0, %c0_0] : memref<2x2048xf32, #tpu.memory_space<vmem>>, vector<2x2048xf32>
    %c0_1 = arith.constant 0 : index
    %c0_2 = arith.constant 0 : index
    %1 = vector.load %arg2[%c0_1, %c0_2] : memref<2048x64xbf16, #tpu.memory_space<vmem>>, vector<2048x64xbf16>
    %c0_3 = arith.constant 0 : index
    %c0_4 = arith.constant 0 : index
    %c0_5 = arith.constant 0 : index
    %2 = vector.load %arg3[%c0_3, %c0_4, %c0_5] : memref<3x2048x64xbf16, #tpu.memory_space<vmem>>, vector<3x2048x64xbf16>
    %c0_6 = arith.constant 0 : index
    %c0_7 = arith.constant 0 : index
    %3 = vector.load %arg4[%c0_6, %c0_7] : memref<1x64xf32, #tpu.memory_space<vmem>>, vector<1x64xf32>
    %c0_8 = arith.constant 0 : index
    %c0_9 = arith.constant 0 : index
    %4 = vector.load %arg5[%c0_8, %c0_9] : memref<1x64xf32, #tpu.memory_space<vmem>>, vector<1x64xf32>
    %c0_10 = arith.constant 0 : index
    %c0_11 = arith.constant 0 : index
    %5 = vector.load %arg6[%c0_10, %c0_11] : memref<1x64xf32, #tpu.memory_space<vmem>>, vector<1x64xf32>
    %cst = arith.constant 0.000000e+00 : f32
    %6 = vector.broadcast %cst : f32 to vector<2x2048xf32>
    %7 = arith.maximumf %0, %6 : vector<2x2048xf32>
    %8 = arith.truncf %7 : vector<2x2048xf32> to vector<2x2048xbf16>
    %cst_12 = arith.constant dense<0.000000e+00> : vector<2x64xf32>
    %9 = tpu.matmul %8, %1, %cst_12 {dimension_numbers = #tpu.dot_dimension_numbers<[1], [0], [0], [1], [0, 0, 1, 1], [], []>} : vector<2x2048xbf16>, vector<2048x64xbf16>, vector<2x64xf32> -> vector<2x64xf32>
    %10 = vector.shape_cast %0 : vector<2x2048xf32> to vector<1x2x2048xf32>
    %cst_13 = arith.constant dense<0x7F800000> : vector<1xf32>
    %11 = vector.multi_reduction <minimumf>, %10, %cst_13 [1, 2] : vector<1x2x2048xf32> to vector<1xf32>
    %12 = vector.shape_cast %11 : vector<1xf32> to vector<1x1x1xf32>
    %13 = vector.extract %12[0, 0, 0] : f32 from vector<1x1x1xf32>
    %14 = vector.shape_cast %0 : vector<2x2048xf32> to vector<1x2x2048xf32>
    %cst_14 = arith.constant dense<0xFF800000> : vector<1xf32>
    %15 = vector.multi_reduction <maximumf>, %14, %cst_14 [1, 2] : vector<1x2x2048xf32> to vector<1xf32>
    %16 = vector.shape_cast %15 : vector<1xf32> to vector<1x1x1xf32>
    %17 = vector.extract %16[0, 0, 0] : f32 from vector<1x1x1xf32>
    %18 = arith.subf %17, %13 : f32
    %cst_15 = arith.constant 0.000000e+00 : f32
    %19 = arith.cmpf ogt, %18, %cst_15 : f32
    %cst_16 = arith.constant 1.000000e+00 : f32
    %20 = arith.select %19, %18, %cst_16 : f32
    %cst_17 = arith.constant 2.000000e+00 : f32
    %21 = arith.divf %cst_17, %20 : f32
    %22 = vector.broadcast %13 : f32 to vector<2x2048xf32>
    %23 = arith.subf %0, %22 : vector<2x2048xf32>
    %24 = vector.broadcast %21 : f32 to vector<2x2048xf32>
    %25 = arith.mulf %23, %24 : vector<2x2048xf32>
    %cst_18 = arith.constant 1.000000e+00 : f32
    %26 = vector.broadcast %cst_18 : f32 to vector<2x2048xf32>
    %27 = arith.subf %25, %26 : vector<2x2048xf32>
    %28 = arith.mulf %27, %27 : vector<2x2048xf32>
    %29 = arith.mulf %28, %27 : vector<2x2048xf32>
    %30 = vector.broadcast %3 : vector<1x64xf32> to vector<2x64xf32>
    %31 = arith.addf %9, %30 : vector<2x64xf32>
    %32 = arith.truncf %27 : vector<2x2048xf32> to vector<2x2048xbf16>
    %33 = vector.extract_strided_slice %2 {offsets = [0, 0, 0], sizes = [1, 2048, 64], strides = [1, 1, 1]} : vector<3x2048x64xbf16> to vector<1x2048x64xbf16>
    %34 = vector.shape_cast %33 : vector<1x2048x64xbf16> to vector<2048x64xbf16>
    %cst_19 = arith.constant dense<0.000000e+00> : vector<2x64xf32>
    %35 = tpu.matmul %32, %34, %cst_19 {dimension_numbers = #tpu.dot_dimension_numbers<[1], [0], [0], [1], [0, 0, 1, 1], [], []>} : vector<2x2048xbf16>, vector<2048x64xbf16>, vector<2x64xf32> -> vector<2x64xf32>
    %36 = arith.addf %31, %35 : vector<2x64xf32>
    %37 = arith.truncf %28 : vector<2x2048xf32> to vector<2x2048xbf16>
    %38 = vector.extract_strided_slice %2 {offsets = [1, 0, 0], sizes = [1, 2048, 64], strides = [1, 1, 1]} : vector<3x2048x64xbf16> to vector<1x2048x64xbf16>
    %39 = vector.shape_cast %38 : vector<1x2048x64xbf16> to vector<2048x64xbf16>
    %cst_20 = arith.constant dense<0.000000e+00> : vector<2x64xf32>
    %40 = tpu.matmul %37, %39, %cst_20 {dimension_numbers = #tpu.dot_dimension_numbers<[1], [0], [0], [1], [0, 0, 1, 1], [], []>} : vector<2x2048xbf16>, vector<2048x64xbf16>, vector<2x64xf32> -> vector<2x64xf32>
    %41 = arith.addf %36, %40 : vector<2x64xf32>
    %42 = arith.truncf %29 : vector<2x2048xf32> to vector<2x2048xbf16>
    %43 = vector.extract_strided_slice %2 {offsets = [2, 0, 0], sizes = [1, 2048, 64], strides = [1, 1, 1]} : vector<3x2048x64xbf16> to vector<1x2048x64xbf16>
    %44 = vector.shape_cast %43 : vector<1x2048x64xbf16> to vector<2048x64xbf16>
    %cst_21 = arith.constant dense<0.000000e+00> : vector<2x64xf32>
    %45 = tpu.matmul %42, %44, %cst_21 {dimension_numbers = #tpu.dot_dimension_numbers<[1], [0], [0], [1], [0, 0, 1, 1], [], []>} : vector<2x2048xbf16>, vector<2048x64xbf16>, vector<2x64xf32> -> vector<2x64xf32>
    %46 = arith.addf %41, %45 : vector<2x64xf32>
    %cst_22 = arith.constant dense<0.000000e+00> : vector<2xf32>
    %47 = vector.multi_reduction <add>, %46, %cst_22 [1] : vector<2x64xf32> to vector<2xf32>
    %48 = vector.shape_cast %47 : vector<2xf32> to vector<2x1xf32>
    %cst_23 = arith.constant 6.400000e+01 : f32
    %49 = vector.broadcast %cst_23 : f32 to vector<2x1xf32>
    %50 = arith.divf %48, %49 : vector<2x1xf32>
    %51 = vector.broadcast %50 : vector<2x1xf32> to vector<2x64xf32>
    %52 = arith.subf %46, %51 : vector<2x64xf32>
    %53 = arith.mulf %52, %52 : vector<2x64xf32>
    %cst_24 = arith.constant dense<0.000000e+00> : vector<2xf32>
    %54 = vector.multi_reduction <add>, %53, %cst_24 [1] : vector<2x64xf32> to vector<2xf32>
    %55 = vector.shape_cast %54 : vector<2xf32> to vector<2x1xf32>
    %cst_25 = arith.constant 6.400000e+01 : f32
    %56 = vector.broadcast %cst_25 : f32 to vector<2x1xf32>
    %57 = arith.divf %55, %56 : vector<2x1xf32>
    %58 = vector.broadcast %50 : vector<2x1xf32> to vector<2x64xf32>
    %59 = arith.subf %46, %58 : vector<2x64xf32>
    %cst_26 = arith.constant 9.99999974E-6 : f32
    %60 = vector.broadcast %cst_26 : f32 to vector<2x1xf32>
    %61 = arith.addf %57, %60 : vector<2x1xf32>
    %62 = math.rsqrt %61 : vector<2x1xf32>
    %63 = vector.broadcast %62 : vector<2x1xf32> to vector<2x64xf32>
    %64 = arith.mulf %59, %63 : vector<2x64xf32>
    %65 = vector.broadcast %4 : vector<1x64xf32> to vector<2x64xf32>
    %66 = arith.mulf %64, %65 : vector<2x64xf32>
    %67 = vector.broadcast %5 : vector<1x64xf32> to vector<2x64xf32>
    %68 = arith.addf %66, %67 : vector<2x64xf32>
    %cst_27 = arith.constant 0.000000e+00 : f32
    %69 = vector.broadcast %cst_27 : f32 to vector<2x64xf32>
    %70 = arith.maximumf %68, %69 : vector<2x64xf32>
    %c0_28 = arith.constant 0 : index
    %c0_29 = arith.constant 0 : index
    %71 = vector.load %arg7[%c0_28, %c0_29] : memref<64x10xbf16, #tpu.memory_space<vmem>>, vector<64x10xbf16>
    %c0_30 = arith.constant 0 : index
    %c0_31 = arith.constant 0 : index
    %c0_32 = arith.constant 0 : index
    %72 = vector.load %arg8[%c0_30, %c0_31, %c0_32] : memref<3x64x10xbf16, #tpu.memory_space<vmem>>, vector<3x64x10xbf16>
    %c0_33 = arith.constant 0 : index
    %c0_34 = arith.constant 0 : index
    %73 = vector.load %arg9[%c0_33, %c0_34] : memref<1x10xf32, #tpu.memory_space<vmem>>, vector<1x10xf32>
    %c0_35 = arith.constant 0 : index
    %c0_36 = arith.constant 0 : index
    %74 = vector.load %arg10[%c0_35, %c0_36] : memref<1x10xf32, #tpu.memory_space<vmem>>, vector<1x10xf32>
    %c0_37 = arith.constant 0 : index
    %c0_38 = arith.constant 0 : index
    %75 = vector.load %arg11[%c0_37, %c0_38] : memref<1x10xf32, #tpu.memory_space<vmem>>, vector<1x10xf32>
    %cst_39 = arith.constant 0.000000e+00 : f32
    %76 = vector.broadcast %cst_39 : f32 to vector<2x64xf32>
    %77 = arith.maximumf %70, %76 : vector<2x64xf32>
    %78 = arith.truncf %77 : vector<2x64xf32> to vector<2x64xbf16>
    %cst_40 = arith.constant dense<0.000000e+00> : vector<2x10xf32>
    %79 = tpu.matmul %78, %71, %cst_40 {dimension_numbers = #tpu.dot_dimension_numbers<[1], [0], [0], [1], [0, 0, 1, 1], [], []>} : vector<2x64xbf16>, vector<64x10xbf16>, vector<2x10xf32> -> vector<2x10xf32>
    %80 = vector.shape_cast %70 : vector<2x64xf32> to vector<1x2x64xf32>
    %cst_41 = arith.constant dense<0x7F800000> : vector<1xf32>
    %81 = vector.multi_reduction <minimumf>, %80, %cst_41 [1, 2] : vector<1x2x64xf32> to vector<1xf32>
    %82 = vector.shape_cast %81 : vector<1xf32> to vector<1x1x1xf32>
    %83 = vector.extract %82[0, 0, 0] : f32 from vector<1x1x1xf32>
    %84 = vector.shape_cast %70 : vector<2x64xf32> to vector<1x2x64xf32>
    %cst_42 = arith.constant dense<0xFF800000> : vector<1xf32>
    %85 = vector.multi_reduction <maximumf>, %84, %cst_42 [1, 2] : vector<1x2x64xf32> to vector<1xf32>
    %86 = vector.shape_cast %85 : vector<1xf32> to vector<1x1x1xf32>
    %87 = vector.extract %86[0, 0, 0] : f32 from vector<1x1x1xf32>
    %88 = arith.subf %87, %83 : f32
    %cst_43 = arith.constant 0.000000e+00 : f32
    %89 = arith.cmpf ogt, %88, %cst_43 : f32
    %cst_44 = arith.constant 1.000000e+00 : f32
    %90 = arith.select %89, %88, %cst_44 : f32
    %cst_45 = arith.constant 2.000000e+00 : f32
    %91 = arith.divf %cst_45, %90 : f32
    %92 = vector.broadcast %83 : f32 to vector<2x64xf32>
    %93 = arith.subf %70, %92 : vector<2x64xf32>
    %94 = vector.broadcast %91 : f32 to vector<2x64xf32>
    %95 = arith.mulf %93, %94 : vector<2x64xf32>
    %cst_46 = arith.constant 1.000000e+00 : f32
    %96 = vector.broadcast %cst_46 : f32 to vector<2x64xf32>
    %97 = arith.subf %95, %96 : vector<2x64xf32>
    %98 = arith.mulf %97, %97 : vector<2x64xf32>
    %99 = arith.mulf %98, %97 : vector<2x64xf32>
    %100 = vector.broadcast %73 : vector<1x10xf32> to vector<2x10xf32>
    %101 = arith.addf %79, %100 : vector<2x10xf32>
    %102 = arith.truncf %97 : vector<2x64xf32> to vector<2x64xbf16>
    %103 = vector.extract_strided_slice %72 {offsets = [0, 0, 0], sizes = [1, 64, 10], strides = [1, 1, 1]} : vector<3x64x10xbf16> to vector<1x64x10xbf16>
    %104 = vector.shape_cast %103 : vector<1x64x10xbf16> to vector<64x10xbf16>
    %cst_47 = arith.constant dense<0.000000e+00> : vector<2x10xf32>
    %105 = tpu.matmul %102, %104, %cst_47 {dimension_numbers = #tpu.dot_dimension_numbers<[1], [0], [0], [1], [0, 0, 1, 1], [], []>} : vector<2x64xbf16>, vector<64x10xbf16>, vector<2x10xf32> -> vector<2x10xf32>
    %106 = arith.addf %101, %105 : vector<2x10xf32>
    %107 = arith.truncf %98 : vector<2x64xf32> to vector<2x64xbf16>
    %108 = vector.extract_strided_slice %72 {offsets = [1, 0, 0], sizes = [1, 64, 10], strides = [1, 1, 1]} : vector<3x64x10xbf16> to vector<1x64x10xbf16>
    %109 = vector.shape_cast %108 : vector<1x64x10xbf16> to vector<64x10xbf16>
    %cst_48 = arith.constant dense<0.000000e+00> : vector<2x10xf32>
    %110 = tpu.matmul %107, %109, %cst_48 {dimension_numbers = #tpu.dot_dimension_numbers<[1], [0], [0], [1], [0, 0, 1, 1], [], []>} : vector<2x64xbf16>, vector<64x10xbf16>, vector<2x10xf32> -> vector<2x10xf32>
    %111 = arith.addf %106, %110 : vector<2x10xf32>
    %112 = arith.truncf %99 : vector<2x64xf32> to vector<2x64xbf16>
    %113 = vector.extract_strided_slice %72 {offsets = [2, 0, 0], sizes = [1, 64, 10], strides = [1, 1, 1]} : vector<3x64x10xbf16> to vector<1x64x10xbf16>
    %114 = vector.shape_cast %113 : vector<1x64x10xbf16> to vector<64x10xbf16>
    %cst_49 = arith.constant dense<0.000000e+00> : vector<2x10xf32>
    %115 = tpu.matmul %112, %114, %cst_49 {dimension_numbers = #tpu.dot_dimension_numbers<[1], [0], [0], [1], [0, 0, 1, 1], [], []>} : vector<2x64xbf16>, vector<64x10xbf16>, vector<2x10xf32> -> vector<2x10xf32>
    %116 = arith.addf %111, %115 : vector<2x10xf32>
    %cst_50 = arith.constant dense<0.000000e+00> : vector<2xf32>
    %117 = vector.multi_reduction <add>, %116, %cst_50 [1] : vector<2x10xf32> to vector<2xf32>
    %118 = vector.shape_cast %117 : vector<2xf32> to vector<2x1xf32>
    %cst_51 = arith.constant 1.000000e+01 : f32
    %119 = vector.broadcast %cst_51 : f32 to vector<2x1xf32>
    %120 = arith.divf %118, %119 : vector<2x1xf32>
    %121 = vector.broadcast %120 : vector<2x1xf32> to vector<2x10xf32>
    %122 = arith.subf %116, %121 : vector<2x10xf32>
    %123 = arith.mulf %122, %122 : vector<2x10xf32>
    %cst_52 = arith.constant dense<0.000000e+00> : vector<2xf32>
    %124 = vector.multi_reduction <add>, %123, %cst_52 [1] : vector<2x10xf32> to vector<2xf32>
    %125 = vector.shape_cast %124 : vector<2xf32> to vector<2x1xf32>
    %cst_53 = arith.constant 1.000000e+01 : f32
    %126 = vector.broadcast %cst_53 : f32 to vector<2x1xf32>
    %127 = arith.divf %125, %126 : vector<2x1xf32>
    %128 = vector.broadcast %120 : vector<2x1xf32> to vector<2x10xf32>
    %129 = arith.subf %116, %128 : vector<2x10xf32>
    %cst_54 = arith.constant 9.99999974E-6 : f32
    %130 = vector.broadcast %cst_54 : f32 to vector<2x1xf32>
    %131 = arith.addf %127, %130 : vector<2x1xf32>
    %132 = math.rsqrt %131 : vector<2x1xf32>
    %133 = vector.broadcast %132 : vector<2x1xf32> to vector<2x10xf32>
    %134 = arith.mulf %129, %133 : vector<2x10xf32>
    %135 = vector.broadcast %74 : vector<1x10xf32> to vector<2x10xf32>
    %136 = arith.mulf %134, %135 : vector<2x10xf32>
    %137 = vector.broadcast %75 : vector<1x10xf32> to vector<2x10xf32>
    %138 = arith.addf %136, %137 : vector<2x10xf32>
    %cst_55 = arith.constant 0.000000e+00 : f32
    %139 = vector.broadcast %cst_55 : f32 to vector<2x10xf32>
    %140 = arith.maximumf %138, %139 : vector<2x10xf32>
    %c0_56 = arith.constant 0 : index
    %c0_57 = arith.constant 0 : index
    %141 = vector.load %arg12[%c0_56, %c0_57] : memref<2x10xf32, #tpu.memory_space<vmem>>, vector<2x10xf32>
    tpu.vector_store %arg12[%c0_56, %c0_57], %140 {strides = array<i32>} : memref<2x10xf32, #tpu.memory_space<vmem>>, vector<2x10xf32>,
    return
  }
  func.func @transform_0(%arg0: i32) -> (i32, i32) {
    %c0_i32 = arith.constant 0 : i32
    %c0_i32_0 = arith.constant 0 : i32
    %c0_i32_1 = arith.constant 0 : i32
    return %c0_i32, %c0_i32_0 : i32, i32
  }
  func.func @transform_1(%arg0: i32) -> (i32, i32) {
    %c0_i32 = arith.constant 0 : i32
    %c0_i32_0 = arith.constant 0 : i32
    %c0_i32_1 = arith.constant 0 : i32
    return %c0_i32, %c0_i32_0 : i32, i32
  }
  func.func @transform_2(%arg0: i32) -> (i32, i32, i32) {
    %c0_i32 = arith.constant 0 : i32
    %c0_i32_0 = arith.constant 0 : i32
    %c0_i32_1 = arith.constant 0 : i32
    %c0_i32_2 = arith.constant 0 : i32
    return %c0_i32, %c0_i32_0, %c0_i32_1 : i32, i32, i32
  }
  func.func @transform_3(%arg0: i32) -> (i32, i32) {
    %c0_i32 = arith.constant 0 : i32
    %c0_i32_0 = arith.constant 0 : i32
    %c0_i32_1 = arith.constant 0 : i32
    return %c0_i32, %c0_i32_0 : i32, i32
  }
  func.func @transform_4(%arg0: i32) -> (i32, i32) {
    %c0_i32 = arith.constant 0 : i32
    %c0_i32_0 = arith.constant 0 : i32
    %c0_i32_1 = arith.constant 0 : i32
    return %c0_i32, %c0_i32_0 : i32, i32
  }
  func.func @transform_5(%arg0: i32) -> (i32, i32) {
    %c0_i32 = arith.constant 0 : i32
    %c0_i32_0 = arith.constant 0 : i32
    %c0_i32_1 = arith.constant 0 : i32
    return %c0_i32, %c0_i32_0 : i32, i32
  }
  func.func @transform_6(%arg0: i32) -> (i32, i32) {
    %c0_i32 = arith.constant 0 : i32
    %c0_i32_0 = arith.constant 0 : i32
    %c0_i32_1 = arith.constant 0 : i32
    return %c0_i32, %c0_i32_0 : i32, i32
  }
  func.func @transform_7(%arg0: i32) -> (i32, i32, i32) {
    %c0_i32 = arith.constant 0 : i32
    %c0_i32_0 = arith.constant 0 : i32
    %c0_i32_1 = arith.constant 0 : i32
    %c0_i32_2 = arith.constant 0 : i32
    return %c0_i32, %c0_i32_0, %c0_i32_1 : i32, i32, i32
  }
  func.func @transform_8(%arg0: i32) -> (i32, i32) {
    %c0_i32 = arith.constant 0 : i32
    %c0_i32_0 = arith.constant 0 : i32
    %c0_i32_1 = arith.constant 0 : i32
    return %c0_i32, %c0_i32_0 : i32, i32
  }
  func.func @transform_9(%arg0: i32) -> (i32, i32) {
    %c0_i32 = arith.constant 0 : i32
    %c0_i32_0 = arith.constant 0 : i32
    %c0_i32_1 = arith.constant 0 : i32
    return %c0_i32, %c0_i32_0 : i32, i32
  }
  func.func @transform_10(%arg0: i32) -> (i32, i32) {
    %c0_i32 = arith.constant 0 : i32
    %c0_i32_0 = arith.constant 0 : i32
    %c0_i32_1 = arith.constant 0 : i32
    return %c0_i32, %c0_i32_0 : i32, i32
  }
  func.func @transform_11(%arg0: i32) -> (i32, i32) {
    %c0_i32 = arith.constant 0 : i32
    %c0_i32_0 = arith.constant 0 : i32
    %c0_i32_1 = arith.constant 0 : i32
    return %c0_i32, %c0_i32_0 : i32, i32
  }
}

</mosaic_0001>

<bundles_post_ra>
// kernel: polynomial_network_forward.3
= control target key start
LH: loop header
LB: loop body
LE: loop exit
PB: predicated region body
PF: predicated region fallthrough
CT: control target
= control target key end

     0   :  { %8 = vsyncpa [#allocation3], 0  ;;  %s5748_s0 = inlined_call_operand.hbm [shape: bf16[4,512,27], index: 0, kind: input, shape index: {}]   ;;  %s5749_s1 = inlined_call_operand.hbm [shape: bf16[27,16], index: 1, kind: input, shape index: {}]   ;;  %s5750_s2 = inlined_call_operand.hbm [shape: f32[1,16], index: 2, kind: input, shape index: {}]   ;;  %s5751_s3 = inlined_call_operand.hbm [shape: bf16[512,16], index: 3, kind: output, shape index: {}]  }
   0x1   :  { %9 = vsyncpa [#allocation6], 0 }
   0x2   :  { %10 = vsyncpa [#allocation4], 0  ;;  %s4222_s12 = smov [#allocation5]   ;;  %s4223_s14 = smov [#allocation2]  }
   0x3   :  { %s28_s13 = sshll.u32 %s4222_s12, 4  ;;  %s16_s15 = sshll.u32 %s4223_s14, 4  ;;  %s29_s13 = int_to_ptr.vmem [resolvable:$true] %s28_s13  ;;  %s4249_s15 = int_to_ptr.vmem [resolvable:$true] %s16_s15 }
   0x4   :  { %s4128_s18 = scalar_lea.hbm %s5749_s1, 256 }
   0x5   :  { %p4129_p0 = scmp.ne.s32.totalorder %s5749_s1, %s4128_s18  ;;  %p4132_p1 = scmp.lt.u32.totalorder %s4128_s18, %s5749_s1 }
   0x7   :  { %p4134_p2 = pnand %p4132_p1, %p4129_p0 }
   0x9   :  { %4137 = shalt.err (!%p4134_p2)
}
   0xa   :  { %s4138_s23 = scalar_lea.vmem %s29_s13, 256  ;;  %p4143_p4 = scmp.lt.s32.totalorder %s29_s13, %s29_s13 }
   0xb   :  { %p4139_p3 = scmp.ne.s32.totalorder %s29_s13, %s4138_s23  ;;  %p4144_p5 = scmp.lt.s32.totalorder %s4138_s23, %s4138_s23 }
   0xd   :  { %p4145_p6 = por %p4144_p5, %p4143_p4 }
   0xf   :  { %p4146_p7 = pnand %p4145_p6, %p4139_p3 }
  0x11   :  { %4149 = shalt.err (!%p4146_p7)
}
  0x12   :  { %s4224_s24 = smov 64   ;;  %s4225_s25 = smov 4  }
  0x13   :  { %34 = dma.hbm_to_vmem [thread:$0]  %s5749_s1, 256, %s29_s13, [#allocation6], %s4224_s24, %s4224_s24, %s4225_s25  }
  0x14   :  { %s4150_s30 = scalar_lea.hbm %s5748_s0, 16384 }
  0x15   :  { %p4151_p8 = scmp.ne.s32.totalorder %s5748_s0, %s4150_s30  ;;  %p4154_p9 = scmp.lt.u32.totalorder %s4150_s30, %s5748_s0 }
  0x17   :  { %p4156_p10 = pnand %p4154_p9, %p4151_p8 }
  0x19   :  { %4159 = shalt.err (!%p4156_p10)
}
  0x1a   :  { %s4160_s8 = scalar_lea.vmem %s4249_s15, 16384  ;;  %p4165_p12 = scmp.lt.s32.totalorder %s4249_s15, %s4249_s15 }
  0x1b   :  { %p4161_p11 = scmp.ne.s32.totalorder %s4249_s15, %s4160_s8  ;;  %p4166_p13 = scmp.lt.s32.totalorder %s4160_s8, %s4160_s8 }
  0x1d   :  { %p4167_p0 = por %p4166_p13, %p4165_p12 }
  0x1f   :  { %p4168_p1 = pnand %p4167_p0, %p4161_p11 }
  0x21   :  { %4171 = shalt.err (!%p4168_p1)
}
  0x22   :  { %22 = dma.hbm_to_vmem [thread:$0]  %s5748_s0, 16384, %s4249_s15, [#allocation3], %s4224_s24, %s4224_s24, %s4225_s25  }
  0x23   :  { %s4226_s10 = smov [#allocation7]   ;;  %s4172_s14 = scalar_lea.hbm %s5750_s2, 16 }
  0x24   :  { %s41_s11 = sshll.u32 %s4226_s10, 4  ;;  %p4173_p2 = scmp.ne.s32.totalorder %s5750_s2, %s4172_s14  ;;  %s42_s11 = int_to_ptr.vmem [resolvable:$true] %s41_s11 }
  0x25   :  { %p4176_p3 = scmp.lt.u32.totalorder %s4172_s14, %s5750_s2 }
  0x27   :  { %p4178_p4 = pnand %p4176_p3, %p4173_p2 }
  0x29   :  { %4181 = shalt.err (!%p4178_p4)
}
  0x2a   :  { %s4182_s20 = scalar_lea.vmem %s42_s11, 16  ;;  %s4186_s0 = scalar_lea.vmem %s42_s11, 32 }
  0x2b   :  { %p4183_p5 = scmp.ne.s32.totalorder %s42_s11, %s4182_s20  ;;  %p4187_p6 = scmp.lt.s32.totalorder %s42_s11, %s42_s11 }
  0x2c   :  { %p4188_p7 = scmp.lt.s32.totalorder %s4186_s0, %s4182_s20 }
  0x2e   :  { %p4189_p8 = por %p4188_p7, %p4187_p6 }
  0x30   :  { %p4190_p9 = pnand %p4189_p8, %p4183_p5 }
  0x32   :  { %4193 = shalt.err (!%p4190_p9)
}
  0x33   :  { %44 = dma.hbm_to_vmem [thread:$0]  %s5750_s2, 16, %s42_s11, [#allocation6]  }
  0x34   :  { %4216 = dma.done.wait [#allocation3], 16384  }
  0x35   :  { %4217 = vsyncadd [#allocation3], 4294950912 }
  0x36   :  { %4218 = dma.done.wait [#allocation6], 272  }
  0x37   :  { %4219 = vsyncadd [#allocation6], 4294967024  ;;  %vm1358_vm0 = vcmask 1044480   ;;  %vm1359_vm1 = vcmask 1045504   ;;  %v4227_v0 = vmov 65535   ;;  %vm973_vm2 = vcmask 220160  }
  0x38   :  { %v1360_v1 = vsel %vm1358_vm0, 4294967295, %v4227_v0  ;;  %v3997_v2 = vld [vmem:[#allocation5] sm:$0xff]   ;;  %v3998_v4 = vld [vmem:[#allocation5 + $0x8] sm:$0x3f]   ;;  %v4003_v10 = vld [vmem:[#allocation2 + $0x10] sm:$0xff]   ;;  %vm3126_vm3 = vcmask 125952  }
  0x39   :  { %v1361_v3 = vsel %vm1359_vm1, %v1360_v1, 0  ;;  %3726 = vmatprep.subr.bf16.mxu0 %v3997_v2  ;;  %3986 = vmatprep.subr.bf16.mxu1 %v3997_v2  ;;  %v3999_v5 = vld [vmem:[#allocation2] sm:$0xff]   ;;  %v4001_v8 = vld [vmem:[#allocation2 + $0x8] sm:$0xff]   ;;  %v4004_v11 = vld [vmem:[#allocation2 + $0x210] sm:$0xff]   ;;  %s4228_s2 = smov [#allocation8]  }
  0x3a   :  { %3727 = vmatpush3.bf16.msra.mxu0 %v3997_v2  ;;  %3988 = vmatpush3.bf16.msra.mxu1 %v3997_v2  ;;  %v1363_v6 = vand.u32 %v3998_v4, %v1361_v3  ;;  %v4000_v7 = vld [vmem:[#allocation2 + $0x200] sm:$0xff]   ;;  %v4002_v9 = vld [vmem:[#allocation2 + $0x208] sm:$0xff]   ;;  %v4005_v12 = vld [vmem:[#allocation2 + $0x18] sm:$0xff]   ;;  %s3196_s22 = sshll.u32 %s4228_s2, 4  ;;  %s3197_s22 = int_to_ptr.vmem [resolvable:$true] %s3196_s22 }
  0x3b   :  { %3730 = vmatprep.mubr.msk.bf16.mxu0 %vm973_vm2, %v3999_v5  ;;  %3858 = vmatprep.mubr.msk.bf16.mxu1 %vm973_vm2, %v4000_v7  ;;  %v4006_v13 = vld [vmem:[#allocation2 + $0x218] sm:$0xff]   ;;  %v4007_v14 = vld [vmem:[#allocation2 + $0x20] sm:$0xff]   ;;  %v4009_v16 = vld [vmem:[#allocation2 + $0x28] sm:$0xff]   ;;  %s4194_s23 = scalar_lea.vmem %s3197_s22, 4096  ;;  %p4199_p11 = scmp.lt.s32.totalorder %s3197_s22, %s3197_s22 }
  0x3c   :  { %3728 = vmatprep.subr.bf16.mxu0 %v1363_v6  ;;  %3987 = vmatprep.subr.bf16.mxu1 %v1363_v6  ;;  %v4008_v15 = vld [vmem:[#allocation2 + $0x220] sm:$0xff]   ;;  %v4010_v17 = vld [vmem:[#allocation2 + $0x228] sm:$0xff]   ;;  %v4011_v18 = vld [vmem:[#allocation2 + $0x30] sm:$0xff]   ;;  %p4195_p10 = scmp.ne.s32.totalorder %s3197_s22, %s4194_s23  ;;  %p4200_p12 = scmp.lt.s32.totalorder %s4194_s23, %s4194_s23 }
  0x3d   :  { %v4012_v19 = vld [vmem:[#allocation2 + $0x230] sm:$0xff]   ;;  %v4013_v20 = vld [vmem:[#allocation2 + $0x38] sm:$0xff]   ;;  %v4015_v22 = vld [vmem:[#allocation2 + $0x40] sm:$0xff]  }
  0x3e   :  { %3729 = vmatpush3.bf16.msra.mxu0 %v1363_v6  ;;  %3989 = vmatpush3.bf16.msra.mxu1 %v1363_v6  ;;  %v4014_v21 = vld [vmem:[#allocation2 + $0x238] sm:$0xff]   ;;  %v4016_v23 = vld [vmem:[#allocation2 + $0x240] sm:$0xff]   ;;  %v4017_v24 = vld [vmem:[#allocation2 + $0x48] sm:$0xff]   ;;  %p4201_p13 = por %p4200_p12, %p4199_p11 }
  0x3f   :  { %v4018_v25 = vld [vmem:[#allocation2 + $0x248] sm:$0xff]   ;;  %v4019_v26 = vld [vmem:[#allocation2 + $0x50] sm:$0xff]   ;;  %v4021_v28 = vld [vmem:[#allocation2 + $0x58] sm:$0xff]  }
  0x40   :  { %v4020_v27 = vld [vmem:[#allocation2 + $0x250] sm:$0xff]   ;;  %v4022_v29 = vld [vmem:[#allocation2 + $0x258] sm:$0xff]   ;;  %v4023_v30 = vld [vmem:[#allocation2 + $0x60] sm:$0xff]   ;;  %p4202_p0 = pnand %p4201_p13, %p4195_p10 }
  0x41   :  { %3731 = vmatmul.mubr.msk.bf16.vlgmr.msra.gmra.mrb[0].mxu0 %vm973_vm2, %v4001_v8  ;;  %3859 = vmatmul.mubr.msk.bf16.vlgmr.msra.gmra.mrb[0].mxu1 %vm973_vm2, %v4002_v9  ;;  %v4024_v31 = vld [vmem:[#allocation2 + $0x260] sm:$0xff]   ;;  %v4025_v32 = vld [vmem:[#allocation2 + $0x68] sm:$0xff]   ;;  %v4027_v34 = vld [vmem:[#allocation2 + $0x70] sm:$0xff]  }
  0x42   :  { %3734 = vmatprep.mubr.msk.bf16.mxu0 %vm973_vm2, %v4003_v10  ;;  %3862 = vmatprep.mubr.msk.bf16.mxu1 %vm973_vm2, %v4004_v11  ;;  %v4026_v33 = vld [vmem:[#allocation2 + $0x268] sm:$0xff]   ;;  %v4028_v35 = vld [vmem:[#allocation2 + $0x270] sm:$0xff]   ;;  %v4029_v36 = vld [vmem:[#allocation2 + $0x78] sm:$0xff]  }
  0x43   :  { %v4030_v37 = vld [vmem:[#allocation2 + $0x278] sm:$0xff]   ;;  %v4031_v38 = vld [vmem:[#allocation2 + $0x80] sm:$0xff]   ;;  %v4033_v40 = vld [vmem:[#allocation2 + $0x88] sm:$0xff]  }
  0x44   :  { %v4032_v39 = vld [vmem:[#allocation2 + $0x280] sm:$0xff]   ;;  %v4034_v41 = vld [vmem:[#allocation2 + $0x288] sm:$0xff]   ;;  %v4035_v42 = vld [vmem:[#allocation2 + $0x90] sm:$0xff]  }
  0x45   :  { %v4036_v43 = vld [vmem:[#allocation2 + $0x290] sm:$0xff]   ;;  %v4037_v44 = vld [vmem:[#allocation2 + $0x98] sm:$0xff]   ;;  %v4039_v46 = vld [vmem:[#allocation2 + $0xa0] sm:$0xff]  }
  0x46   :  { %v4038_v45 = vld [vmem:[#allocation2 + $0x298] sm:$0xff]   ;;  %v4040_v47 = vld [vmem:[#allocation2 + $0x2a0] sm:$0xff]   ;;  %v4041_v48 = vld [vmem:[#allocation2 + $0xa8] sm:$0xff]  }
  0x47   :  { %v4042_v49 = vld [vmem:[#allocation2 + $0x2a8] sm:$0xff]   ;;  %v4043_v50 = vld [vmem:[#allocation2 + $0xb0] sm:$0xff]   ;;  %v4045_v52 = vld [vmem:[#allocation2 + $0xb8] sm:$0xff]  }
  0x48   :  { %v4044_v51 = vld [vmem:[#allocation2 + $0x2b0] sm:$0xff]   ;;  %v4046_v53 = vld [vmem:[#allocation2 + $0x2b8] sm:$0xff]   ;;  %v4047_v54 = vld [vmem:[#allocation2 + $0xc0] sm:$0xff]  }
  0x49   :  { %3735 = vmatmul.mubr.msk.bf16.gmra.mrb[4].mxu0 %vm973_vm2, %v4005_v12  ;;  %3863 = vmatmul.mubr.msk.bf16.gmra.mrb[4].mxu1 %vm973_vm2, %v4006_v13  ;;  %v4048_v55 = vld [vmem:[#allocation2 + $0x2c0] sm:$0xff]   ;;  %v4049_v56 = vld [vmem:[#allocation2 + $0xc8] sm:$0xff]   ;;  %v4051_v58 = vld [vmem:[#allocation2 + $0xd0] sm:$0xff]  }
  0x4a   :  { %3738 = vmatprep.mubr.msk.bf16.mxu0 %vm973_vm2, %v4007_v14  ;;  %3866 = vmatprep.mubr.msk.bf16.mxu1 %vm973_vm2, %v4008_v15  ;;  %v4050_v57 = vld [vmem:[#allocation2 + $0x2c8] sm:$0xff]   ;;  %v4052_v59 = vld [vmem:[#allocation2 + $0x2d0] sm:$0xff]   ;;  %v4053_v60 = vld [vmem:[#allocation2 + $0xd8] sm:$0xff]  }
  0x4b   :  { %v4054_v61 = vld [vmem:[#allocation2 + $0x2d8] sm:$0xff]   ;;  %v4055_v62 = vld [vmem:[#allocation2 + $0xe0] sm:$0xff]   ;;  %v4057_v0 = vld [vmem:[#allocation2 + $0xe8] sm:$0xff]  }
  0x4c   :  { %v4056_v63 = vld [vmem:[#allocation2 + $0x2e0] sm:$0xff]   ;;  %v4058_v1 = vld [vmem:[#allocation2 + $0x2e8] sm:$0xff]   ;;  %v4059_v2 = vld [vmem:[#allocation2 + $0xf0] sm:$0xff]  }
  0x4d   :  { %v4060_v3 = vld [vmem:[#allocation2 + $0x2f0] sm:$0xff]   ;;  %v4061_v4 = vld [vmem:[#allocation2 + $0xf8] sm:$0xff]   ;;  %v4063_v6 = vld [vmem:[#allocation2 + $0x100] sm:$0xff]  }
  0x4e   :  { %v4062_v5 = vld [vmem:[#allocation2 + $0x2f8] sm:$0xff]   ;;  %v4064_v7 = vld [vmem:[#allocation2 + $0x300] sm:$0xff]   ;;  %v4065_v8 = vld [vmem:[#allocation2 + $0x108] sm:$0xff]  }
  0x4f   :  { %v4066_v9 = vld [vmem:[#allocation2 + $0x308] sm:$0xff]   ;;  %v4067_v10 = vld [vmem:[#allocation2 + $0x110] sm:$0xff]   ;;  %v4069_v12 = vld [vmem:[#allocation2 + $0x118] sm:$0xff]  }
  0x50   :  { %v4068_v11 = vld [vmem:[#allocation2 + $0x310] sm:$0xff]   ;;  %v4070_v13 = vld [vmem:[#allocation2 + $0x318] sm:$0xff]   ;;  %v4071_v14 = vld [vmem:[#allocation2 + $0x120] sm:$0xff]  }
  0x51   :  { %3739 = vmatmul.mubr.msk.bf16.gmra.mrb[8].mxu0 %vm973_vm2, %v4009_v16  ;;  %3867 = vmatmul.mubr.msk.bf16.gmra.mrb[8].mxu1 %vm973_vm2, %v4010_v17  ;;  %v4072_v15 = vld [vmem:[#allocation2 + $0x320] sm:$0xff]   ;;  %v4073_v16 = vld [vmem:[#allocation2 + $0x128] sm:$0xff]  }
  0x52   :  { %3742 = vmatprep.mubr.msk.bf16.mxu0 %vm973_vm2, %v4011_v18  ;;  %3870 = vmatprep.mubr.msk.bf16.mxu1 %vm973_vm2, %v4012_v19  ;;  %v4074_v17 = vld [vmem:[#allocation2 + $0x328] sm:$0xff]   ;;  %v4075_v18 = vld [vmem:[#allocation2 + $0x130] sm:$0xff]  }
  0x53   :  { %v4076_v19 = vld [vmem:[#allocation2 + $0x330] sm:$0xff]  }
  0x59   :  { %3743 = vmatmul.mubr.msk.bf16.gmra.mrb[12].mxu0 %vm973_vm2, %v4013_v20  ;;  %3871 = vmatmul.mubr.msk.bf16.gmra.mrb[12].mxu1 %vm973_vm2, %v4014_v21  ;;  %v4077_v20 = vld [vmem:[#allocation2 + $0x138] sm:$0xff]  }
  0x5a   :  { %3746 = vmatprep.mubr.msk.bf16.mxu0 %vm973_vm2, %v4015_v22  ;;  %3874 = vmatprep.mubr.msk.bf16.mxu1 %vm973_vm2, %v4016_v23  ;;  %v4078_v21 = vld [vmem:[#allocation2 + $0x338] sm:$0xff]   ;;  %v4079_v22 = vld [vmem:[#allocation2 + $0x140] sm:$0xff]  }
  0x5b   :  { %v4080_v23 = vld [vmem:[#allocation2 + $0x340] sm:$0xff]  }
  0x61   :  { %3747 = vmatmul.mubr.msk.bf16.gmra.mrb[16].mxu0 %vm973_vm2, %v4017_v24  ;;  %3875 = vmatmul.mubr.msk.bf16.gmra.mrb[16].mxu1 %vm973_vm2, %v4018_v25  ;;  %v4081_v24 = vld [vmem:[#allocation2 + $0x148] sm:$0xff]  }
  0x62   :  { %3750 = vmatprep.mubr.msk.bf16.mxu0 %vm973_vm2, %v4019_v26  ;;  %3878 = vmatprep.mubr.msk.bf16.mxu1 %vm973_vm2, %v4020_v27  ;;  %v4082_v25 = vld [vmem:[#allocation2 + $0x348] sm:$0xff]   ;;  %v4083_v26 = vld [vmem:[#allocation2 + $0x150] sm:$0xff]  }
  0x63   :  { %v4084_v27 = vld [vmem:[#allocation2 + $0x350] sm:$0xff]  }
  0x69   :  { %3751 = vmatmul.mubr.msk.bf16.gmra.mrb[20].mxu0 %vm973_vm2, %v4021_v28  ;;  %3879 = vmatmul.mubr.msk.bf16.gmra.mrb[20].mxu1 %vm973_vm2, %v4022_v29  ;;  %v4085_v28 = vld [vmem:[#allocation2 + $0x158] sm:$0xff]  }
  0x6a   :  { %3754 = vmatprep.mubr.msk.bf16.mxu0 %vm973_vm2, %v4023_v30  ;;  %3882 = vmatprep.mubr.msk.bf16.mxu1 %vm973_vm2, %v4024_v31  ;;  %v4086_v29 = vld [vmem:[#allocation2 + $0x358] sm:$0xff]   ;;  %v4087_v30 = vld [vmem:[#allocation2 + $0x160] sm:$0xff]  }
  0x6b   :  { %v4088_v31 = vld [vmem:[#allocation2 + $0x360] sm:$0xff]  }
  0x71   :  { %3755 = vmatmul.mubr.msk.bf16.gmra.mrb[24].mxu0 %vm973_vm2, %v4025_v32  ;;  %3883 = vmatmul.mubr.msk.bf16.gmra.mrb[24].mxu1 %vm973_vm2, %v4026_v33  ;;  %v4089_v32 = vld [vmem:[#allocation2 + $0x168] sm:$0xff]  }
  0x72   :  { %3758 = vmatprep.mubr.msk.bf16.mxu0 %vm973_vm2, %v4027_v34  ;;  %3886 = vmatprep.mubr.msk.bf16.mxu1 %vm973_vm2, %v4028_v35  ;;  %v4090_v33 = vld [vmem:[#allocation2 + $0x368] sm:$0xff]   ;;  %v4091_v34 = vld [vmem:[#allocation2 + $0x170] sm:$0xff]  }
  0x73   :  { %v4092_v35 = vld [vmem:[#allocation2 + $0x370] sm:$0xff]  }
  0x79   :  { %3759 = vmatmul.mubr.msk.bf16.gmra.mrb[28].mxu0 %vm973_vm2, %v4029_v36  ;;  %3887 = vmatmul.mubr.msk.bf16.gmra.mrb[28].mxu1 %vm973_vm2, %v4030_v37  ;;  %v4093_v36 = vld [vmem:[#allocation2 + $0x178] sm:$0xff]  }
  0x7a   :  { %3762 = vmatprep.mubr.msk.bf16.mxu0 %vm973_vm2, %v4031_v38  ;;  %3890 = vmatprep.mubr.msk.bf16.mxu1 %vm973_vm2, %v4032_v39  ;;  %v4094_v37 = vld [vmem:[#allocation2 + $0x378] sm:$0xff]   ;;  %v4095_v38 = vld [vmem:[#allocation2 + $0x180] sm:$0xff]  }
  0x7b   :  { %v4096_v39 = vld [vmem:[#allocation2 + $0x380] sm:$0xff]  }
  0x81   :  { %3763 = vmatmul.mubr.msk.bf16.gmra.mrb[32].mxu0 %vm973_vm2, %v4033_v40  ;;  %3891 = vmatmul.mubr.msk.bf16.gmra.mrb[32].mxu1 %vm973_vm2, %v4034_v41  ;;  %v4097_v40 = vld [vmem:[#allocation2 + $0x188] sm:$0xff]  }
  0x82   :  { %3766 = vmatprep.mubr.msk.bf16.mxu0 %vm973_vm2, %v4035_v42  ;;  %3894 = vmatprep.mubr.msk.bf16.mxu1 %vm973_vm2, %v4036_v43  ;;  %v4098_v41 = vld [vmem:[#allocation2 + $0x388] sm:$0xff]   ;;  %v4099_v42 = vld [vmem:[#allocation2 + $0x190] sm:$0xff]  }
  0x83   :  { %v4100_v43 = vld [vmem:[#allocation2 + $0x390] sm:$0xff]  }
  0x89   :  { %3767 = vmatmul.mubr.msk.bf16.gmra.mrb[36].mxu0 %vm973_vm2, %v4037_v44  ;;  %3895 = vmatmul.mubr.msk.bf16.gmra.mrb[36].mxu1 %vm973_vm2, %v4038_v45  ;;  %v4101_v44 = vld [vmem:[#allocation2 + $0x198] sm:$0xff]  }
  0x8a   :  { %3770 = vmatprep.mubr.msk.bf16.mxu0 %vm973_vm2, %v4039_v46  ;;  %3898 = vmatprep.mubr.msk.bf16.mxu1 %vm973_vm2, %v4040_v47  ;;  %v4102_v45 = vld [vmem:[#allocation2 + $0x398] sm:$0xff]   ;;  %v4103_v46 = vld [vmem:[#allocation2 + $0x1a0] sm:$0xff]  }
  0x8b   :  { %v4104_v47 = vld [vmem:[#allocation2 + $0x3a0] sm:$0xff]  }
  0x91   :  { %3771 = vmatmul.mubr.msk.bf16.gmra.mrb[40].mxu0 %vm973_vm2, %v4041_v48  ;;  %3899 = vmatmul.mubr.msk.bf16.gmra.mrb[40].mxu1 %vm973_vm2, %v4042_v49  ;;  %v4105_v48 = vld [vmem:[#allocation2 + $0x1a8] sm:$0xff]  }
  0x92   :  { %3774 = vmatprep.mubr.msk.bf16.mxu0 %vm973_vm2, %v4043_v50  ;;  %3902 = vmatprep.mubr.msk.bf16.mxu1 %vm973_vm2, %v4044_v51  ;;  %v4106_v49 = vld [vmem:[#allocation2 + $0x3a8] sm:$0xff]   ;;  %v4107_v50 = vld [vmem:[#allocation2 + $0x1b0] sm:$0xff]  }
  0x93   :  { %v4108_v51 = vld [vmem:[#allocation2 + $0x3b0] sm:$0xff]  }
  0x99   :  { %3775 = vmatmul.mubr.msk.bf16.gmra.mrb[44].mxu0 %vm973_vm2, %v4045_v52  ;;  %3903 = vmatmul.mubr.msk.bf16.gmra.mrb[44].mxu1 %vm973_vm2, %v4046_v53 }
  0x9a   :  { %3778 = vmatprep.mubr.msk.bf16.mxu0 %vm973_vm2, %v4047_v54  ;;  %3906 = vmatprep.mubr.msk.bf16.mxu1 %vm973_vm2, %v4048_v55 }
  0xa1   :  { %3779 = vmatmul.mubr.msk.bf16.gmra.mrb[48].mxu0 %vm973_vm2, %v4049_v56  ;;  %3907 = vmatmul.mubr.msk.bf16.gmra.mrb[48].mxu1 %vm973_vm2, %v4050_v57  ;;  %v4109_v56 = vld [vmem:[#allocation2 + $0x1b8] sm:$0xff]  }
  0xa2   :  { %3782 = vmatprep.mubr.msk.bf16.mxu0 %vm973_vm2, %v4051_v58  ;;  %3910 = vmatprep.mubr.msk.bf16.mxu1 %vm973_vm2, %v4052_v59  ;;  %v4110_v57 = vld [vmem:[#allocation2 + $0x3b8] sm:$0xff]  }
  0xa9   :  { %3783 = vmatmul.mubr.msk.bf16.gmra.mrb[52].mxu0 %vm973_vm2, %v4053_v60  ;;  %3911 = vmatmul.mubr.msk.bf16.gmra.mrb[52].mxu1 %vm973_vm2, %v4054_v61  ;;  %v4111_v60 = vld [vmem:[#allocation2 + $0x1c0] sm:$0xff]  }
  0xaa   :  { %3786 = vmatprep.mubr.msk.bf16.mxu0 %vm973_vm2, %v4055_v62  ;;  %3914 = vmatprep.mubr.msk.bf16.mxu1 %vm973_vm2, %v4056_v63  ;;  %v4112_v61 = vld [vmem:[#allocation2 + $0x3c0] sm:$0xff]  }
  0xb1   :  { %3787 = vmatmul.mubr.msk.bf16.gmra.mrb[56].mxu0 %vm973_vm2, %v4057_v0  ;;  %3915 = vmatmul.mubr.msk.bf16.gmra.mrb[56].mxu1 %vm973_vm2, %v4058_v1 }
  0xb2   :  { %3790 = vmatprep.mubr.msk.bf16.mxu0 %vm973_vm2, %v4059_v2  ;;  %3918 = vmatprep.mubr.msk.bf16.mxu1 %vm973_vm2, %v4060_v3 }
  0xb9   :  { %3791 = vmatmul.mubr.msk.bf16.gmra.mrb[60].mxu0 %vm973_vm2, %v4061_v4  ;;  %3919 = vmatmul.mubr.msk.bf16.gmra.mrb[60].mxu1 %vm973_vm2, %v4062_v5  ;;  %v4113_v4 = vld [vmem:[#allocation2 + $0x1c8] sm:$0xff]  }
  0xba   :  { %3794 = vmatprep.mubr.msk.bf16.mxu0 %vm973_vm2, %v4063_v6  ;;  %3922 = vmatprep.mubr.msk.bf16.mxu1 %vm973_vm2, %v4064_v7  ;;  %v4114_v5 = vld [vmem:[#allocation2 + $0x3c8] sm:$0xff]  }
  0xc1   :  { %3795 = vmatmul.mubr.msk.bf16.gmra.mrb[64].mxu0 %vm973_vm2, %v4065_v8  ;;  %3923 = vmatmul.mubr.msk.bf16.gmra.mrb[64].mxu1 %vm973_vm2, %v4066_v9  ;;  %v4115_v8 = vld [vmem:[#allocation2 + $0x1d0] sm:$0xff]  }
  0xc2   :  { %3798 = vmatprep.mubr.msk.bf16.mxu0 %vm973_vm2, %v4067_v10  ;;  %3926 = vmatprep.mubr.msk.bf16.mxu1 %vm973_vm2, %v4068_v11  ;;  %v4116_v9 = vld [vmem:[#allocation2 + $0x3d0] sm:$0xff]  }
  0xc9   :  { %3799 = vmatmul.mubr.msk.bf16.gmra.mrb[68].mxu0 %vm973_vm2, %v4069_v12  ;;  %3927 = vmatmul.mubr.msk.bf16.gmra.mrb[68].mxu1 %vm973_vm2, %v4070_v13 }
  0xca   :  { %3802 = vmatprep.mubr.msk.bf16.mxu0 %vm973_vm2, %v4071_v14  ;;  %3930 = vmatprep.mubr.msk.bf16.mxu1 %vm973_vm2, %v4072_v15 }
  0xd1   :  { %3803 = vmatmul.mubr.msk.bf16.gmra.mrb[72].mxu0 %vm973_vm2, %v4073_v16  ;;  %3931 = vmatmul.mubr.msk.bf16.gmra.mrb[72].mxu1 %vm973_vm2, %v4074_v17  ;;  %v4117_v16 = vld [vmem:[#allocation2 + $0x1d8] sm:$0xff]  }
  0xd2   :  { %3806 = vmatprep.mubr.msk.bf16.mxu0 %vm973_vm2, %v4075_v18  ;;  %3934 = vmatprep.mubr.msk.bf16.mxu1 %vm973_vm2, %v4076_v19  ;;  %v4118_v17 = vld [vmem:[#allocation2 + $0x3d8] sm:$0xff]  }
  0xd9   :  { %3807 = vmatmul.mubr.msk.bf16.gmra.mrb[76].mxu0 %vm973_vm2, %v4077_v20  ;;  %3935 = vmatmul.mubr.msk.bf16.gmra.mrb[76].mxu1 %vm973_vm2, %v4078_v21  ;;  %v4119_v20 = vld [vmem:[#allocation2 + $0x1e0] sm:$0xff]  }
  0xda   :  { %3810 = vmatprep.mubr.msk.bf16.mxu0 %vm973_vm2, %v4079_v22  ;;  %3938 = vmatprep.mubr.msk.bf16.mxu1 %vm973_vm2, %v4080_v23  ;;  %v4120_v21 = vld [vmem:[#allocation2 + $0x3e0] sm:$0xff]  }
  0xe1   :  { %3811 = vmatmul.mubr.msk.bf16.gmra.mrb[80].mxu0 %vm973_vm2, %v4081_v24  ;;  %3939 = vmatmul.mubr.msk.bf16.gmra.mrb[80].mxu1 %vm973_vm2, %v4082_v25 }
  0xe2   :  { %3814 = vmatprep.mubr.msk.bf16.mxu0 %vm973_vm2, %v4083_v26  ;;  %3942 = vmatprep.mubr.msk.bf16.mxu1 %vm973_vm2, %v4084_v27 }
  0xe9   :  { %3815 = vmatmul.mubr.msk.bf16.gmra.mrb[84].mxu0 %vm973_vm2, %v4085_v28  ;;  %3943 = vmatmul.mubr.msk.bf16.gmra.mrb[84].mxu1 %vm973_vm2, %v4086_v29  ;;  %v4121_v28 = vld [vmem:[#allocation2 + $0x1e8] sm:$0xff]  }
  0xea   :  { %3818 = vmatprep.mubr.msk.bf16.mxu0 %vm973_vm2, %v4087_v30  ;;  %3946 = vmatprep.mubr.msk.bf16.mxu1 %vm973_vm2, %v4088_v31  ;;  %v4122_v29 = vld [vmem:[#allocation2 + $0x3e8] sm:$0xff]  }
  0xf1   :  { %3819 = vmatmul.mubr.msk.bf16.gmra.mrb[88].mxu0 %vm973_vm2, %v4089_v32  ;;  %3947 = vmatmul.mubr.msk.bf16.gmra.mrb[88].mxu1 %vm973_vm2, %v4090_v33  ;;  %v4123_v32 = vld [vmem:[#allocation2 + $0x1f0] sm:$0xff]  }
  0xf2   :  { %3822 = vmatprep.mubr.msk.bf16.mxu0 %vm973_vm2, %v4091_v34  ;;  %3950 = vmatprep.mubr.msk.bf16.mxu1 %vm973_vm2, %v4092_v35  ;;  %v4124_v33 = vld [vmem:[#allocation2 + $0x3f0] sm:$0xff]  }
  0xf9   :  { %3823 = vmatmul.mubr.msk.bf16.gmra.mrb[92].mxu0 %vm973_vm2, %v4093_v36  ;;  %3951 = vmatmul.mubr.msk.bf16.gmra.mrb[92].mxu1 %vm973_vm2, %v4094_v37 }
  0xfa   :  { %3826 = vmatprep.mubr.msk.bf16.mxu0 %vm973_vm2, %v4095_v38  ;;  %3954 = vmatprep.mubr.msk.bf16.mxu1 %vm973_vm2, %v4096_v39 }
 0x101   :  { %3827 = vmatmul.mubr.msk.bf16.gmra.mrb[96].mxu0 %vm973_vm2, %v4097_v40  ;;  %3955 = vmatmul.mubr.msk.bf16.gmra.mrb[96].mxu1 %vm973_vm2, %v4098_v41  ;;  %v4125_v40 = vld [vmem:[#allocation2 + $0x1f8] sm:$0xff]  }
 0x102   :  { %3830 = vmatprep.mubr.msk.bf16.mxu0 %vm973_vm2, %v4099_v42  ;;  %3958 = vmatprep.mubr.msk.bf16.mxu1 %vm973_vm2, %v4100_v43  ;;  %v4126_v41 = vld [vmem:[#allocation2 + $0x3f8] sm:$0xff]  }
 0x109   :  { %3831 = vmatmul.mubr.msk.bf16.gmra.mrb[100].mxu0 %vm973_vm2, %v4101_v44  ;;  %3959 = vmatmul.mubr.msk.bf16.gmra.mrb[100].mxu1 %vm973_vm2, %v4102_v45 }
 0x10a   :  { %3834 = vmatprep.mubr.msk.bf16.mxu0 %vm973_vm2, %v4103_v46  ;;  %3962 = vmatprep.mubr.msk.bf16.mxu1 %vm973_vm2, %v4104_v47 }
 0x111   :  { %3835 = vmatmul.mubr.msk.bf16.gmra.mrb[104].mxu0 %vm973_vm2, %v4105_v48  ;;  %3963 = vmatmul.mubr.msk.bf16.gmra.mrb[104].mxu1 %vm973_vm2, %v4106_v49 }
 0x112   :  { %3838 = vmatprep.mubr.msk.bf16.mxu0 %vm973_vm2, %v4107_v50  ;;  %3966 = vmatprep.mubr.msk.bf16.mxu1 %vm973_vm2, %v4108_v51 }
 0x114   :  { %v4408_v52 = vpop.f32.mrb[0].mxu0  ;;  %v4410_v53 = vpop.f32.mrb[0].mxu1 }
 0x115   :  { %v4412_v54 = vpop.f32.mrb[1].mxu0  ;;  %v4414_v55 = vpop.f32.mrb[1].mxu1 }
 0x116   :  { %v4416_v58 = vpop.f32.mrb[2].mxu0  ;;  %v4418_v59 = vpop.f32.mrb[2].mxu1 }
 0x117   :  { %v4420_v62 = vpop.f32.mrb[3].mxu0  ;;  %v4422_v63 = vpop.f32.mrb[3].mxu1 }
 0x119   :  { %3839 = vmatmul.mubr.msk.bf16.gmra.mrb[108].mxu0 %vm973_vm2, %v4109_v56  ;;  %3967 = vmatmul.mubr.msk.bf16.gmra.mrb[108].mxu1 %vm973_vm2, %v4110_v57 }
 0x11a   :  { %3842 = vmatprep.mubr.msk.bf16.mxu0 %vm973_vm2, %v4111_v60  ;;  %3970 = vmatprep.mubr.msk.bf16.mxu1 %vm973_vm2, %v4112_v61 }
 0x11c   :  { %v4428_v0 = vpop.f32.mrb[4].mxu0  ;;  %v4430_v1 = vpop.f32.mrb[4].mxu1 }
 0x11d   :  { %v4432_v2 = vpop.f32.mrb[5].mxu0  ;;  %v4434_v3 = vpop.f32.mrb[5].mxu1 }
 0x11e   :  { %v4436_v6 = vpop.f32.mrb[6].mxu0  ;;  %v4438_v7 = vpop.f32.mrb[6].mxu1 }
 0x11f   :  { %v4440_v10 = vpop.f32.mrb[7].mxu0  ;;  %v4442_v11 = vpop.f32.mrb[7].mxu1 }
 0x121   :  { %3843 = vmatmul.mubr.msk.bf16.gmra.mrb[112].mxu0 %vm973_vm2, %v4113_v4  ;;  %3971 = vmatmul.mubr.msk.bf16.gmra.mrb[112].mxu1 %vm973_vm2, %v4114_v5 }
 0x122   :  { %3846 = vmatprep.mubr.msk.bf16.mxu0 %vm973_vm2, %v4115_v8  ;;  %3974 = vmatprep.mubr.msk.bf16.mxu1 %vm973_vm2, %v4116_v9 }
 0x124   :  { %v4448_v12 = vpop.f32.mrb[8].mxu0  ;;  %v4450_v13 = vpop.f32.mrb[8].mxu1 }
 0x125   :  { %v4452_v14 = vpop.f32.mrb[9].mxu0  ;;  %v4454_v15 = vpop.f32.mrb[9].mxu1 }
 0x126   :  { %v4456_v18 = vpop.f32.mrb[10].mxu0  ;;  %v4458_v19 = vpop.f32.mrb[10].mxu1 }
 0x127   :  { %v4460_v22 = vpop.f32.mrb[11].mxu0  ;;  %v4462_v23 = vpop.f32.mrb[11].mxu1 }
 0x129   :  { %3847 = vmatmul.mubr.msk.bf16.gmra.mrb[116].mxu0 %vm973_vm2, %v4117_v16  ;;  %3975 = vmatmul.mubr.msk.bf16.gmra.mrb[116].mxu1 %vm973_vm2, %v4118_v17 }
 0x12a   :  { %3850 = vmatprep.mubr.msk.bf16.mxu0 %vm973_vm2, %v4119_v20  ;;  %3978 = vmatprep.mubr.msk.bf16.mxu1 %vm973_vm2, %v4120_v21 }
 0x12c   :  { %v4468_v24 = vpop.f32.mrb[12].mxu0  ;;  %v4470_v25 = vpop.f32.mrb[12].mxu1 }
 0x12d   :  { %v4472_v26 = vpop.f32.mrb[13].mxu0  ;;  %v4474_v27 = vpop.f32.mrb[13].mxu1 }
 0x12e   :  { %v4476_v30 = vpop.f32.mrb[14].mxu0  ;;  %v4478_v31 = vpop.f32.mrb[14].mxu1 }
 0x12f   :  { %v4480_v34 = vpop.f32.mrb[15].mxu0  ;;  %v4482_v35 = vpop.f32.mrb[15].mxu1 }
 0x131   :  { %3851 = vmatmul.mubr.msk.bf16.gmra.mrb[120].mxu0 %vm973_vm2, %v4121_v28  ;;  %3979 = vmatmul.mubr.msk.bf16.gmra.mrb[120].mxu1 %vm973_vm2, %v4122_v29 }
 0x132   :  { %3854 = vmatprep.mubr.msk.bf16.mxu0 %vm973_vm2, %v4123_v32  ;;  %3982 = vmatprep.mubr.msk.bf16.mxu1 %vm973_vm2, %v4124_v33 }
 0x134   :  { %v4488_v36 = vpop.f32.mrb[16].mxu0  ;;  %v4490_v37 = vpop.f32.mrb[16].mxu1 }
 0x135   :  { %v4492_v38 = vpop.f32.mrb[17].mxu0  ;;  %v4494_v39 = vpop.f32.mrb[17].mxu1 }
 0x136   :  { %v4496_v42 = vpop.f32.mrb[18].mxu0  ;;  %v4498_v43 = vpop.f32.mrb[18].mxu1 }
 0x137   :  { %v4500_v44 = vpop.f32.mrb[19].mxu0  ;;  %v4502_v45 = vpop.f32.mrb[19].mxu1 }
 0x139   :  { %3855 = vmatmul.mubr.msk.bf16.gmra.mrb[124].mxu0 %vm973_vm2, %v4125_v40  ;;  %3983 = vmatmul.mubr.msk.bf16.gmra.mrb[124].mxu1 %vm973_vm2, %v4126_v41 }
 0x13c   :  { %v4506_v46 = vpop.f32.mrb[20].mxu0  ;;  %v4508_v47 = vpop.f32.mrb[20].mxu1 }
 0x13d   :  { %v4510_v48 = vpop.f32.mrb[21].mxu0  ;;  %v4512_v49 = vpop.f32.mrb[21].mxu1 }
 0x13e   :  { %v4514_v50 = vpop.f32.mrb[22].mxu0  ;;  %v4516_v51 = vpop.f32.mrb[22].mxu1 }
 0x13f   :  { %v4518_v56 = vpop.f32.mrb[23].mxu0  ;;  %v4520_v57 = vpop.f32.mrb[23].mxu1 }
 0x144   :  { %v4522_v60 = vpop.f32.mrb[24].mxu0  ;;  %v4524_v61 = vpop.f32.mrb[24].mxu1 }
 0x145   :  { %v4526_v4 = vpop.f32.mrb[25].mxu0  ;;  %v4528_v5 = vpop.f32.mrb[25].mxu1 }
 0x146   :  { %v4530_v8 = vpop.f32.mrb[26].mxu0  ;;  %v4532_v9 = vpop.f32.mrb[26].mxu1 }
 0x147   :  { %5840 = vst [vmem:[#allocation12_spill] sm:$0xff] %v4532_v9  ;;  %v4534_v16 = vpop.f32.mrb[27].mxu0  ;;  %v4536_v17 = vpop.f32.mrb[27].mxu1  ;;  %v4554_v9 = vld [vmem:[#allocation7] ss:$0 sm:$0xff] }
 0x148   :  { %5841 = vst [vmem:[#allocation13_spill] sm:$0xff] %v4534_v16  ;;  %5842 = vst [vmem:[#allocation14_spill] sm:$0xff] %v4536_v17 }
 0x14c   :  { %v4538_v20 = vpop.f32.mrb[28].mxu0  ;;  %v4540_v21 = vpop.f32.mrb[28].mxu1 }
 0x14d   :  { %5843 = vst [vmem:[#allocation15_spill] sm:$0xff] %v4538_v20  ;;  %5844 = vst [vmem:[#allocation16_spill] sm:$0xff] %v4540_v21  ;;  %v4542_v28 = vpop.f32.mrb[29].mxu0  ;;  %v4544_v29 = vpop.f32.mrb[29].mxu1 }
 0x14e   :  { %5845 = vst [vmem:[#allocation17_spill] sm:$0xff] %v4542_v28  ;;  %5846 = vst [vmem:[#allocation18_spill] sm:$0xff] %v4544_v29  ;;  %v4546_v32 = vpop.f32.mrb[30].mxu0  ;;  %v4548_v33 = vpop.f32.mrb[30].mxu1 }
 0x14f   :  { %5847 = vst [vmem:[#allocation19_spill] sm:$0xff] %v4546_v32  ;;  %5848 = vst [vmem:[#allocation20_spill] sm:$0xff] %v4548_v33  ;;  %v4550_v40 = vpop.f32.mrb[31].mxu0  ;;  %v4552_v41 = vpop.f32.mrb[31].mxu1  ;;  %v4570_v33 = vadd.f32 %v4408_v52, %v4554_v9  ;;  %v4590_v52 = vadd.f32 %v4416_v58, %v4554_v9  ;;  %v4610_v58 = vadd.f32 %v4430_v1, %v4554_v9 }
 0x150   :  { %5849 = vst [vmem:[#allocation21_spill] sm:$0xff] %v4550_v40  ;;  %5850 = vst [vmem:[#allocation22_spill] sm:$0xff] %v4552_v41  ;;  %v4574_v41 = vadd.f32 %v4410_v53, %v4554_v9  ;;  %v4594_v53 = vadd.f32 %v4418_v59, %v4554_v9  ;;  %v4638_v40 = vadd.f32 %v4438_v7, %v4554_v9 }
 0x151   :  { %5859 = vst [vmem:[#allocation31_spill] sm:$0xff] %v4590_v52  ;;  %5864 = vst [vmem:[#allocation36_spill] sm:$0xff] %v4610_v58  ;;  %v4730_v52 = vadd.f32 %v4476_v30, %v4554_v9  ;;  %v4748_v30 = vadd.f32 %v4554_v9, %v4482_v35  ;;  %v4768_v35 = vadd.f32 %v4554_v9, %v4494_v39 }
 0x152   :  { %5860 = vst [vmem:[#allocation32_spill] sm:$0xff] %v4594_v53  ;;  %v4726_v53 = vadd.f32 %v4554_v9, %v4474_v27  ;;  %v4744_v27 = vadd.f32 %v4554_v9, %v4480_v34  ;;  %v4764_v34 = vadd.f32 %v4554_v9, %v4492_v38  ;;  %v4784_v38 = vadd.f32 %v4554_v9, %v4500_v44 }
 0x153   :  { %5878 = vst [vmem:[#allocation50_spill] sm:$0xff] %v4730_v52  ;;  %5881 = vst [vmem:[#allocation53_spill] sm:$0xff] %v4748_v30  ;;  %v4788_v39 = vadd.f32 %v4554_v9, %v4502_v45  ;;  %v4798_v44 = vadd.f32 %v4506_v46, %v4554_v9  ;;  %v4802_v45 = vadd.f32 %v4508_v47, %v4554_v9 }
 0x154   :  { %v4556_v16 = vpop.f32.mrb[32].mxu0  ;;  %v4558_v17 = vpop.f32.mrb[32].mxu1  ;;  %5877 = vst [vmem:[#allocation49_spill] sm:$0xff] %v4726_v53  ;;  %5880 = vst [vmem:[#allocation52_spill] sm:$0xff] %v4744_v27  ;;  %v4830_v30 = vadd.f32 %v4516_v51, %v4554_v9 }
 0x155   :  { %5851 = vst [vmem:[#allocation23_spill] sm:$0xff] %v4556_v16  ;;  %5852 = vst [vmem:[#allocation24_spill] sm:$0xff] %v4558_v17  ;;  %v4560_v20 = vpop.f32.mrb[33].mxu0  ;;  %v4562_v21 = vpop.f32.mrb[33].mxu1  ;;  %v4578_v16 = vadd.f32 %v4554_v9, %v4412_v54  ;;  %v4598_v54 = vadd.f32 %v4554_v9, %v4420_v62  ;;  %v4634_v17 = vadd.f32 %v4436_v6, %v4554_v9 }
 0x156   :  { %5853 = vst [vmem:[#allocation25_spill] sm:$0xff] %v4560_v20  ;;  %5854 = vst [vmem:[#allocation26_spill] sm:$0xff] %v4562_v21  ;;  %v4564_v28 = vpop.f32.mrb[34].mxu0  ;;  %v4566_v29 = vpop.f32.mrb[34].mxu1  ;;  %v4582_v20 = vadd.f32 %v4554_v9, %v4414_v55  ;;  %v4602_v55 = vadd.f32 %v4554_v9, %v4422_v63  ;;  %v4652_v6 = vadd.f32 %v4554_v9, %v4442_v11 }
 0x157   :  { %5855 = vst [vmem:[#allocation27_spill] sm:$0xff] %v4564_v28  ;;  %5856 = vst [vmem:[#allocation28_spill] sm:$0xff] %v4566_v29  ;;  %v4584_v21 = vpop.f32.mrb[35].mxu0  ;;  %v4586_v28 = vpop.f32.mrb[35].mxu1  ;;  %v4630_v29 = vadd.f32 %v4554_v9, %v4434_v3  ;;  %v4648_v3 = vadd.f32 %v4554_v9, %v4440_v10  ;;  %v4664_v62 = vadd.f32 %v4450_v13, %v4554_v9 }
 0x158   :  { %5857 = vst [vmem:[#allocation29_spill] sm:$0xff] %v4584_v21  ;;  %5858 = vst [vmem:[#allocation30_spill] sm:$0xff] %v4586_v28  ;;  %v4606_v21 = vadd.f32 %v4428_v0, %v4554_v9  ;;  %v4626_v28 = vadd.f32 %v4554_v9, %v4432_v2  ;;  %v4668_v10 = vadd.f32 %v4554_v9, %v4452_v14 }
 0x159   :  { %5861 = vst [vmem:[#allocation33_spill] sm:$0xff] %v4598_v54  ;;  %5862 = vst [vmem:[#allocation34_spill] sm:$0xff] %v4602_v55  ;;  %v4660_v55 = vadd.f32 %v4448_v12, %v4554_v9  ;;  %v4672_v11 = vadd.f32 %v4554_v9, %v4454_v15  ;;  %v4680_v12 = vadd.f32 %v4456_v18, %v4554_v9 }
 0x15a   :  { %5863 = vst [vmem:[#allocation35_spill] sm:$0xff] %v4606_v21  ;;  %5865 = vst [vmem:[#allocation37_spill] sm:$0xff] %v4648_v3  ;;  %v4684_v13 = vadd.f32 %v4458_v19, %v4554_v9  ;;  %v4688_v14 = vadd.f32 %v4554_v9, %v4460_v22  ;;  %v4692_v15 = vadd.f32 %v4554_v9, %v4462_v23 }
 0x15b   :  { %5866 = vst [vmem:[#allocation38_spill] sm:$0xff] %v4652_v6  ;;  %5867 = vst [vmem:[#allocation39_spill] sm:$0xff] %v4664_v62  ;;  %v4702_v22 = vadd.f32 %v4468_v24, %v4554_v9  ;;  %v4706_v23 = vadd.f32 %v4470_v25, %v4554_v9  ;;  %v4722_v21 = vadd.f32 %v4554_v9, %v4472_v26 }
 0x15c   :  { %v4620_v32 = vpop.f32.mrb[36].mxu0  ;;  %v4622_v1 = vpop.f32.mrb[36].mxu1  ;;  %5868 = vst [vmem:[#allocation40_spill] sm:$0xff] %v4668_v10  ;;  %5869 = vst [vmem:[#allocation41_spill] sm:$0xff] %v4672_v11  ;;  %v4734_v6 = vadd.f32 %v4478_v31, %v4554_v9  ;;  %v4760_v18 = vadd.f32 %v4490_v37, %v4554_v9  ;;  %v4780_v37 = vadd.f32 %v4498_v43, %v4554_v9 }
 0x15d   :  { %v4640_v0 = vpop.f32.mrb[37].mxu0  ;;  %v4642_v63 = vpop.f32.mrb[37].mxu1  ;;  %5870 = vst [vmem:[#allocation42_spill] sm:$0xff] %v4680_v12  ;;  %5871 = vst [vmem:[#allocation43_spill] sm:$0xff] %v4684_v13  ;;  %v4822_v13 = vadd.f32 %v4554_v9, %v4512_v49  ;;  %v4826_v12 = vadd.f32 %v4514_v50, %v4554_v9  ;;  %v4840_v49 = vadd.f32 %v4554_v9, %v4518_v56 }
 0x15e   :  { %v4654_v59 = vpop.f32.mrb[38].mxu0  ;;  %v4656_v7 = vpop.f32.mrb[38].mxu1  ;;  %5872 = vst [vmem:[#allocation44_spill] sm:$0xff] %v4688_v14  ;;  %5873 = vst [vmem:[#allocation45_spill] sm:$0xff] %v4692_v15  ;;  %v4756_v15 = vadd.f32 %v4488_v36, %v4554_v9  ;;  %v4776_v36 = vadd.f32 %v4496_v42, %v4554_v9  ;;  %v4844_v50 = vadd.f32 %v4554_v9, %v4520_v57 }
 0x15f   :  { %v4674_v2 = vpop.f32.mrb[39].mxu0  ;;  %v4676_v58 = vpop.f32.mrb[39].mxu1  ;;  %5874 = vst [vmem:[#allocation46_spill] sm:$0xff] %v4702_v22  ;;  %5875 = vst [vmem:[#allocation47_spill] sm:$0xff] %v4706_v23  ;;  %v4818_v22 = vadd.f32 %v4554_v9, %v4510_v48  ;;  %v4856_v42 = vadd.f32 %v4524_v61, %v4554_v9  ;;  %v4860_v56 = vadd.f32 %v4554_v9, %v4526_v4  ;;  %v5929_v52 = vld [vmem:[#allocation29_spill] sm:$0xff]  ;;  %v5931_v53 = vld [vmem:[#allocation30_spill] sm:$0xff] }
 0x160   :  { %5876 = vst [vmem:[#allocation48_spill] sm:$0xff] %v4722_v21  ;;  %5879 = vst [vmem:[#allocation51_spill] sm:$0xff] %v4734_v6  ;;  %v4864_v57 = vadd.f32 %v4554_v9, %v4528_v5  ;;  %v5911_v6 = vld [vmem:[#allocation16_spill] sm:$0xff]  ;;  %v5010_v21 = vadd.f32 %v4554_v9, %v4640_v0  ;;  %v5014_v10 = vadd.f32 %v4554_v9, %v4642_v63 }
 0x161   :  { %5882 = vst [vmem:[#allocation54_spill] sm:$0xff] %v4756_v15  ;;  %5883 = vst [vmem:[#allocation55_spill] sm:$0xff] %v4760_v18  ;;  %v5909_v15 = vld [vmem:[#allocation15_spill] sm:$0xff]  ;;  %v5018_v62 = vadd.f32 %v4654_v59, %v4554_v9  ;;  %v5032_v63 = vadd.f32 %v4554_v9, %v4674_v2  ;;  %v5036_v59 = vadd.f32 %v4554_v9, %v4676_v58 }
 0x162   :  { %5884 = vst [vmem:[#allocation56_spill] sm:$0xff] %v4764_v34  ;;  %5885 = vst [vmem:[#allocation57_spill] sm:$0xff] %v4768_v35  ;;  %v5914_v35 = vld [vmem:[#allocation18_spill] sm:$0xff]  ;;  %v5915_v18 = vld [vmem:[#allocation19_spill] sm:$0xff] }
 0x163   :  { %5886 = vst [vmem:[#allocation58_spill] sm:$0xff] %v4776_v36  ;;  %5887 = vst [vmem:[#allocation59_spill] sm:$0xff] %v4780_v37  ;;  %v5907_v37 = vld [vmem:[#allocation14_spill] sm:$0xff]  ;;  %v4918_v34 = vadd.f32 %v4554_v9, %v5914_v35 }
 0x164   :  { %v4716_v3 = vpop.f32.mrb[40].mxu0  ;;  %v4718_v25 = vpop.f32.mrb[40].mxu1  ;;  %5888 = vst [vmem:[#allocation60_spill] sm:$0xff] %v4784_v38  ;;  %5889 = vst [vmem:[#allocation61_spill] sm:$0xff] %v4788_v39  ;;  %v4852_v39 = vadd.f32 %v4522_v60, %v4554_v9  ;;  %v4872_v60 = vadd.f32 %v4530_v8, %v4554_v9  ;;  %v5905_v38 = vld [vmem:[#allocation13_spill] sm:$0xff]  ;;  %v4884_v5 = vadd.f32 %v4554_v9, %v5907_v37 }
 0x165   :  { %v4736_v24 = vpop.f32.mrb[41].mxu0  ;;  %v4738_v19 = vpop.f32.mrb[41].mxu1  ;;  %5890 = vst [vmem:[#allocation62_spill] sm:$0xff] %v4798_v44  ;;  %5891 = vst [vmem:[#allocation63_spill] sm:$0xff] %v4802_v45  ;;  %v5903_v44 = vld [vmem:[#allocation12_spill] sm:$0xff]  ;;  %v4880_v4 = vadd.f32 %v4554_v9, %v5905_v38  ;;  %v4894_v38 = vadd.f32 %v5909_v15, %v4554_v9  ;;  %v4898_v37 = vadd.f32 %v5911_v6, %v4554_v9 }
 0x166   :  { %v4750_v54 = vpop.f32.mrb[42].mxu0  ;;  %v4752_v31 = vpop.f32.mrb[42].mxu1  ;;  %5892 = vst [vmem:[#allocation64_spill] sm:$0xff] %v4818_v22  ;;  %5893 = vst [vmem:[#allocation65_spill] sm:$0xff] %v4822_v13  ;;  %v4876_v61 = vadd.f32 %v5903_v44, %v4554_v9  ;;  %v4922_v8 = vadd.f32 %v5915_v18, %v4554_v9  ;;  %v5925_v13 = vld [vmem:[#allocation27_spill] sm:$0xff]  ;;  %v5927_v22 = vld [vmem:[#allocation28_spill] sm:$0xff]  ;;  %v5052_v2 = vadd.f32 %v4554_v9, %v4736_v24 }
 0x167   :  { %v4770_v26 = vpop.f32.mrb[43].mxu0  ;;  %v4772_v23 = vpop.f32.mrb[43].mxu1  ;;  %5894 = vst [vmem:[#allocation66_spill] sm:$0xff] %v4826_v12  ;;  %5895 = vst [vmem:[#allocation67_spill] sm:$0xff] %v4830_v30  ;;  %v5913_v30 = vld [vmem:[#allocation17_spill] sm:$0xff]  ;;  %v5056_v58 = vadd.f32 %v4554_v9, %v4738_v19 }
 0x168   :  { %5896 = vst [vmem:[#allocation68_spill] sm:$0xff] %v4840_v49  ;;  %5897 = vst [vmem:[#allocation69_spill] sm:$0xff] %v4844_v50  ;;  %v4914_v36 = vadd.f32 %v4554_v9, %v5913_v30  ;;  %v5916_v50 = vld [vmem:[#allocation20_spill] sm:$0xff]  ;;  %v5923_v30 = vld [vmem:[#allocation25_spill] sm:$0xff]  ;;  %v5072_v24 = vadd.f32 %v4554_v9, %v4770_v26  ;;  %v5076_v19 = vadd.f32 %v4554_v9, %v4772_v23 }
 0x169   :  { %5898 = vst [vmem:[#allocation70_spill] sm:$0xff] %v4852_v39  ;;  %5899 = vst [vmem:[#allocation71_spill] sm:$0xff] %v4856_v42  ;;  %v4926_v44 = vadd.f32 %v5916_v50, %v4554_v9 }
 0x16a   :  { %5900 = vst [vmem:[#allocation72_spill] sm:$0xff] %v4860_v56  ;;  %5901 = vst [vmem:[#allocation73_spill] sm:$0xff] %v4864_v57  ;;  %v5921_v56 = vld [vmem:[#allocation23_spill] sm:$0xff] }
 0x16b   :  { %5902 = vst [vmem:[#allocation74_spill] sm:$0xff] %v4872_v60  ;;  %5904 = vst [vmem:[#allocation12_spill] sm:$0xff] %v4876_v61  ;;  %v5917_v61 = vld [vmem:[#allocation21_spill] sm:$0xff]  ;;  %v5919_v60 = vld [vmem:[#allocation22_spill] sm:$0xff]  ;;  %v4948_v42 = vadd.f32 %v5921_v56, %v4554_v9  ;;  %v4968_v56 = vadd.f32 %v5925_v13, %v4554_v9  ;;  %v5048_v13 = vadd.f32 %v4718_v25, %v4554_v9 }
 0x16c   :  { %v4812_v27 = vpop.f32.mrb[44].mxu0  ;;  %v4814_v47 = vpop.f32.mrb[44].mxu1  ;;  %5906 = vst [vmem:[#allocation13_spill] sm:$0xff] %v4880_v4  ;;  %5908 = vst [vmem:[#allocation14_spill] sm:$0xff] %v4884_v5  ;;  %v4936_v35 = vadd.f32 %v4554_v9, %v5917_v61  ;;  %v4940_v18 = vadd.f32 %v4554_v9, %v5919_v60  ;;  %v5922_v4 = vld [vmem:[#allocation24_spill] sm:$0xff]  ;;  %v4956_v61 = vadd.f32 %v4554_v9, %v5923_v30 }
 0x16d   :  { %v4832_v46 = vpop.f32.mrb[45].mxu0  ;;  %v4834_v43 = vpop.f32.mrb[45].mxu1  ;;  %5910 = vst [vmem:[#allocation15_spill] sm:$0xff] %v4894_v38  ;;  %5912 = vst [vmem:[#allocation16_spill] sm:$0xff] %v4898_v37  ;;  %v4952_v38 = vadd.f32 %v5922_v4, %v4554_v9  ;;  %v5924_v37 = vld [vmem:[#allocation26_spill] sm:$0xff]  ;;  %v4972_v4 = vadd.f32 %v5927_v22, %v4554_v9  ;;  %v4976_v30 = vadd.f32 %v4554_v9, %v5929_v52 }
 0x16e   :  { %v4846_v14 = vpop.f32.mrb[46].mxu0  ;;  %v4848_v51 = vpop.f32.mrb[46].mxu1  ;;  %5918 = vst [vmem:[#allocation17_spill] sm:$0xff] %v4936_v35  ;;  %5920 = vst [vmem:[#allocation18_spill] sm:$0xff] %v4940_v18  ;;  %v4960_v60 = vadd.f32 %v4554_v9, %v5924_v37  ;;  %v4980_v37 = vadd.f32 %v4554_v9, %v5931_v53  ;;  %v4990_v52 = vadd.f32 %v4620_v32, %v4554_v9 }
 0x16f   :  { %v4866_v48 = vpop.f32.mrb[47].mxu0  ;;  %v4868_v45 = vpop.f32.mrb[47].mxu1  ;;  %5926 = vst [vmem:[#allocation19_spill] sm:$0xff] %v4968_v56  ;;  %5928 = vst [vmem:[#allocation20_spill] sm:$0xff] %v4972_v4  ;;  %v4994_v53 = vadd.f32 %v4622_v1, %v4554_v9  ;;  %v5022_v18 = vadd.f32 %v4656_v7, %v4554_v9  ;;  %v5068_v25 = vadd.f32 %v4752_v31, %v4554_v9 }
 0x170   :  { %5930 = vst [vmem:[#allocation21_spill] sm:$0xff] %v4976_v30  ;;  %5932 = vst [vmem:[#allocation22_spill] sm:$0xff] %v4980_v37  ;;  %v5044_v37 = vadd.f32 %v4716_v3, %v4554_v9  ;;  %v5064_v3 = vadd.f32 %v4750_v54, %v4554_v9  ;;  %v5086_v26 = vadd.f32 %v4812_v27, %v4554_v9 }
 0x171   :  { %5933 = vst [vmem:[#allocation23_spill] sm:$0xff] %v4990_v52  ;;  %5934 = vst [vmem:[#allocation24_spill] sm:$0xff] %v4994_v53  ;;  %v5090_v23 = vadd.f32 %v4814_v47, %v4554_v9  ;;  %v5102_v47 = vadd.f32 %v4554_v9, %v4832_v46  ;;  %v5106_v30 = vadd.f32 %v4554_v9, %v4834_v43 }
 0x172   :  { %5935 = vst [vmem:[#allocation25_spill] sm:$0xff] %v5022_v18  ;;  %5936 = vst [vmem:[#allocation26_spill] sm:$0xff] %v5032_v63  ;;  %v5110_v54 = vadd.f32 %v4846_v14, %v4554_v9  ;;  %v5114_v31 = vadd.f32 %v4848_v51, %v4554_v9  ;;  %v5120_v46 = vadd.f32 %v4554_v9, %v4866_v48 }
 0x173   :  { %5937 = vst [vmem:[#allocation27_spill] sm:$0xff] %v5036_v59  ;;  %5938 = vst [vmem:[#allocation28_spill] sm:$0xff] %v5068_v25  ;;  %v5124_v43 = vadd.f32 %v4554_v9, %v4868_v45 }
 0x174   :  { %v4908_v49 = vpop.f32.mrb[48].mxu0  ;;  %v4910_v6 = vpop.f32.mrb[48].mxu1  ;;  %5939 = vst [vmem:[#allocation29_spill] sm:$0xff] %v5072_v24  ;;  %5940 = vst [vmem:[#allocation30_spill] sm:$0xff] %v5076_v19 }
 0x175   :  { %v4928_v15 = vpop.f32.mrb[49].mxu0  ;;  %v4930_v5 = vpop.f32.mrb[49].mxu1  ;;  %5941 = vst [vmem:[#allocation75_spill] sm:$0xff] %v5086_v26  ;;  %5942 = vst [vmem:[#allocation76_spill] sm:$0xff] %v5090_v23  ;;  %v5128_v51 = vadd.f32 %v4908_v49, %v4554_v9  ;;  %v5132_v19 = vadd.f32 %v4910_v6, %v4554_v9 }
 0x176   :  { %v4942_v57 = vpop.f32.mrb[50].mxu0  ;;  %v4944_v50 = vpop.f32.mrb[50].mxu1  ;;  %5943 = vst [vmem:[#allocation77_spill] sm:$0xff] %v5114_v31  ;;  %5944 = vst [vmem:[#allocation78_spill] sm:$0xff] %v5120_v46  ;;  %v5136_v4 = vadd.f32 %v4554_v9, %v4928_v15  ;;  %v5140_v48 = vadd.f32 %v4554_v9, %v4930_v5 }
 0x177   :  { %v4962_v39 = vpop.f32.mrb[51].mxu0  ;;  %v4964_v12 = vpop.f32.mrb[51].mxu1  ;;  %5945 = vst [vmem:[#allocation79_spill] sm:$0xff] %v5124_v43  ;;  %v5144_v23 = vadd.f32 %v4942_v57, %v4554_v9  ;;  %v5148_v49 = vadd.f32 %v4944_v50, %v4554_v9 }
 0x178   :  { %v5152_v6 = vadd.f32 %v4554_v9, %v4962_v39  ;;  %v5156_v15 = vadd.f32 %v4554_v9, %v4964_v12 }
 0x179   :  { %5946 = vst [vmem:[#allocation80_spill] sm:$0xff] %v5144_v23  ;;  %5947 = vst [vmem:[#allocation81_spill] sm:$0xff] %v5148_v49 }
 0x17a   :  { %5948 = vst [vmem:[#allocation82_spill] sm:$0xff] %v5152_v6  ;;  %5949 = vst [vmem:[#allocation83_spill] sm:$0xff] %v5156_v15 }
 0x17c   :  { %v5004_v35 = vpop.f32.mrb[52].mxu0  ;;  %v5006_v1 = vpop.f32.mrb[52].mxu1 }
 0x17d   :  { %v5024_v32 = vpop.f32.mrb[53].mxu0  ;;  %v5026_v22 = vpop.f32.mrb[53].mxu1  ;;  %v5166_v39 = vadd.f32 %v5004_v35, %v4554_v9  ;;  %v5170_v12 = vadd.f32 %v5006_v1, %v4554_v9 }
 0x17e   :  { %v5038_v11 = vpop.f32.mrb[54].mxu0  ;;  %v5040_v7 = vpop.f32.mrb[54].mxu1  ;;  %v5182_v1 = vadd.f32 %v4554_v9, %v5024_v32  ;;  %v5186_v26 = vadd.f32 %v4554_v9, %v5026_v22 }
 0x17f   :  { %v5058_v0 = vpop.f32.mrb[55].mxu0  ;;  %v5060_v53 = vpop.f32.mrb[55].mxu1  ;;  %5950 = vst [vmem:[#allocation84_spill] sm:$0xff] %v5166_v39  ;;  %5951 = vst [vmem:[#allocation85_spill] sm:$0xff] %v5170_v12  ;;  %v5190_v57 = vadd.f32 %v5038_v11, %v4554_v9  ;;  %v5194_v50 = vadd.f32 %v5040_v7, %v4554_v9 }
 0x180   :  { %v5200_v32 = vadd.f32 %v4554_v9, %v5058_v0  ;;  %v5204_v22 = vadd.f32 %v4554_v9, %v5060_v53 }
 0x181   :  { %5952 = vst [vmem:[#allocation86_spill] sm:$0xff] %v5190_v57  ;;  %5953 = vst [vmem:[#allocation87_spill] sm:$0xff] %v5194_v50  ;;  %v5970_v57 = vld [vmem:[#allocation31_spill] sm:$0xff] }
 0x182   :  { %5954 = vst [vmem:[#allocation88_spill] sm:$0xff] %v5200_v32  ;;  %5955 = vst [vmem:[#allocation89_spill] sm:$0xff] %v5204_v22 }
 0x184   :  { %v3788_v63 = vpop.f32.mrb[56].mxu0  ;;  %v3916_v18 = vpop.f32.mrb[56].mxu1 }
 0x185   :  { %v1623_v59 = vpop.f32.mrb[57].mxu0  ;;  %v2135_v27 = vpop.f32.mrb[57].mxu1  ;;  %v5209_v7 = vadd.f32 %v3788_v63, %v4554_v9  ;;  %v5212_v15 = vadd.f32 %v3916_v18, %v4554_v9 }
 0x186   :  { %v3789_v14 = vpop.f32.mrb[58].mxu0  ;;  %v3917_v52 = vpop.f32.mrb[58].mxu1  ;;  %v5215_v25 = vadd.f32 %v4554_v9, %v1623_v59  ;;  %v5218_v24 = vadd.f32 %v4554_v9, %v2135_v27 }
 0x187   :  { %v1626_v45 = vpop.f32.mrb[59].mxu0  ;;  %v2138_v56 = vpop.f32.mrb[59].mxu1  ;;  %5956 = vst [vmem:[#allocation90_spill] sm:$0xff] %v5209_v7  ;;  %5957 = vst [vmem:[#allocation91_spill] sm:$0xff] %v5212_v15  ;;  %v5225_v53 = vadd.f32 %v3789_v14, %v4554_v9  ;;  %v5228_v39 = vadd.f32 %v3917_v52, %v4554_v9 }
 0x188   :  { %5958 = vst [vmem:[#allocation92_spill] sm:$0xff] %v5215_v25  ;;  %5959 = vst [vmem:[#allocation93_spill] sm:$0xff] %v5218_v24  ;;  %v5231_v63 = vadd.f32 %v4554_v9, %v1626_v45  ;;  %v5234_v18 = vadd.f32 %v4554_v9, %v2138_v56 }
 0x189   :  { %5960 = vst [vmem:[#allocation94_spill] sm:$0xff] %v5225_v53  ;;  %5961 = vst [vmem:[#allocation95_spill] sm:$0xff] %v5228_v39 }
 0x18a   :  { %5962 = vst [vmem:[#allocation96_spill] sm:$0xff] %v5231_v63  ;;  %5963 = vst [vmem:[#allocation97_spill] sm:$0xff] %v5234_v18 }
 0x18c   :  { %v3792_v46 = vpop.f32.mrb[60].mxu0  ;;  %v3920_v31 = vpop.f32.mrb[60].mxu1 }
 0x18d   :  { %v1639_v43 = vpop.f32.mrb[61].mxu0  ;;  %v2151_v35 = vpop.f32.mrb[61].mxu1  ;;  %v5243_v52 = vadd.f32 %v3792_v46, %v4554_v9  ;;  %v5246_v45 = vadd.f32 %v3920_v31, %v4554_v9 }
 0x18e   :  { %v3793_v11 = vpop.f32.mrb[62].mxu0  ;;  %v5206_v5 = vpop.f32.mrb[62].mxu1  ;;  %v5257_v31 = vadd.f32 %v4554_v9, %v1639_v43  ;;  %v5260_v59 = vadd.f32 %v4554_v9, %v2151_v35 }
 0x18f   :  { %v5220_v0 = vpop.f32.mrb[63].mxu0  ;;  %v5222_v12 = vpop.f32.mrb[63].mxu1  ;;  %5964 = vst [vmem:[#allocation98_spill] sm:$0xff] %v5243_v52  ;;  %5965 = vst [vmem:[#allocation99_spill] sm:$0xff] %v5246_v45 }
 0x194   :  { %v3796_v22 = vpop.f32.mrb[64].mxu0  ;;  %v3924_v32 = vpop.f32.mrb[64].mxu1 }
 0x195   :  { %v1664_v27 = vadd.f32 %v3796_v22, %v4554_v9  ;;  %v2176_v6 = vadd.f32 %v3924_v32, %v4554_v9  ;;  %v1655_v49 = vpop.f32.mrb[65].mxu0  ;;  %v2167_v56 = vpop.f32.mrb[65].mxu1 }
 0x196   :  { %v1656_v46 = vadd.f32 %v4554_v9, %v1655_v49  ;;  %v2168_v18 = vadd.f32 %v4554_v9, %v2167_v56  ;;  %v3797_v63 = vpop.f32.mrb[66].mxu0  ;;  %v3925_v43 = vpop.f32.mrb[66].mxu1  ;;  %v5966_v49 = vmax.f32 %v4570_v33, 0.0  ;;  %v5967_v56 = vmax.f32 %v4574_v41, 0.0 }
 0x197   :  { %v2488_v39 = vmax.f32 %v1664_v27, 0.0  ;;  %v2616_v53 = vmax.f32 %v2176_v6, 0.0  ;;  %v1667_v35 = vadd.f32 %v3797_v63, %v4554_v9  ;;  %v2179_v22 = vadd.f32 %v3925_v43, %v4554_v9  ;;  %v1658_v24 = vpop.f32.mrb[67].mxu0  ;;  %v2170_v32 = vpop.f32.mrb[67].mxu1 }
 0x198   :  { %v2486_v25 = vmax.f32 %v1656_v46, 0.0  ;;  %v2614_v15 = vmax.f32 %v2168_v18, 0.0  ;;  %v1659_v14 = vadd.f32 %v4554_v9, %v1658_v24  ;;  %v2171_v23 = vadd.f32 %v4554_v9, %v2170_v32 }
 0x199   :  { %v2680_v45 = vmax.f32 %v5966_v49, %v2488_v39  ;;  %v2744_v52 = vmax.f32 %v5967_v56, %v2616_v53  ;;  %v2489_v27 = vmax.f32 %v1667_v35, 0.0  ;;  %v2617_v6 = vmax.f32 %v2179_v22, 0.0  ;;  %v5972_v49 = vld [vmem:[#allocation32_spill] sm:$0xff] }
 0x19a   :  { %v5968_v63 = vmax.f32 %v4578_v16, 0.0  ;;  %v5969_v43 = vmax.f32 %v4582_v20, 0.0  ;;  %v2487_v46 = vmax.f32 %v1659_v14, 0.0  ;;  %v2615_v18 = vmax.f32 %v2171_v23, 0.0  ;;  %v5976_v14 = vld [vmem:[#allocation34_spill] sm:$0xff] }
 0x19b   :  { %v5281_v24 = vadd.f32 %v3793_v11, %v4554_v9  ;;  %v2808_v32 = vmax.f32 %v2680_v45, %v2744_v52  ;;  %v5971_v33 = vmax.f32 %v5970_v57, 0.0  ;;  %v5973_v41 = vmax.f32 %v5972_v49, 0.0 }
 0x19c   :  { %v2678_v7 = vmax.f32 %v5968_v63, %v2486_v25  ;;  %v2742_v50 = vmax.f32 %v5969_v43, %v2614_v15  ;;  %v5289_v35 = vadd.f32 %v5206_v5, %v4554_v9  ;;  %v5974_v25 = vld [vmem:[#allocation33_spill] sm:$0xff]  ;;  %v5977_v23 = vmax.f32 %v5976_v14, 0.0  ;;  %v3800_v11 = vpop.f32.mrb[68].mxu0  ;;  %v3928_v56 = vpop.f32.mrb[68].mxu1  ;;  %v5978_v14 = vld [vmem:[#allocation35_spill] sm:$0xff] }
 0x19d   :  { %v2681_v39 = vmax.f32 %v5971_v33, %v2489_v27  ;;  %v2745_v53 = vmax.f32 %v5973_v41, %v2617_v6  ;;  %v5975_v20 = vmax.f32 %v5974_v25, 0.0  ;;  %v3534_v52 = vpack.c.bf16 %v2808_v32, %v2808_v32  ;;  %v1671_v6 = vpop.f32.mrb[69].mxu0  ;;  %v2183_v63 = vpop.f32.mrb[69].mxu1 }
 0x19e   :  { %v2806_v16 = vmax.f32 %v2678_v7, %v2742_v50  ;;  %v2743_v22 = vmax.f32 %v5977_v23, %v2615_v18  ;;  %v1680_v57 = vadd.f32 %v3800_v11, %v4554_v9  ;;  %v2192_v27 = vadd.f32 %v3928_v56, %v4554_v9  ;;  %v3929_v33 = vpop.f32.mrb[70].mxu1  ;;  %v5980_v11 = vld [vmem:[#allocation36_spill] sm:$0xff] }
 0x19f   :  { %v2679_v15 = vmax.f32 %v5975_v20, %v2487_v46  ;;  %v2809_v45 = vmax.f32 %v2681_v39, %v2745_v53  ;;  %v1672_v50 = vadd.f32 %v4554_v9, %v1671_v6  ;;  %v2184_v7 = vadd.f32 %v4554_v9, %v2183_v63  ;;  %v3801_v46 = vpop.f32.mrb[70].mxu0  ;;  %3129 = vst.msk [vmem:[#allocation8 + $0x8] sm:$0xf] %vm3126_vm3, %v3534_v52  ;;  %v2186_v53 = vpop.f32.mrb[71].mxu1 }
 0x1a0   :  { %v3532_v43 = vpack.c.bf16 %v2806_v16, %v2806_v16  ;;  %v2492_v49 = vmax.f32 %v1680_v57, 0.0  ;;  %v2620_v32 = vmax.f32 %v2192_v27, 0.0  ;;  %v1683_v39 = vadd.f32 %v3801_v46, %v4554_v9  ;;  %v1674_v41 = vpop.f32.mrb[71].mxu0 }
 0x1a1   :  { %v2807_v5 = vmax.f32 %v2679_v15, %v2743_v22  ;;  %v3535_v18 = vpack.c.bf16 %v2809_v45, %v2809_v45  ;;  %v2490_v16 = vmax.f32 %v1672_v50, 0.0  ;;  %v2618_v20 = vmax.f32 %v2184_v7, 0.0 }
 0x1a2   :  { %3127 = vst.msk [vmem:[#allocation8] sm:$0xf] %vm3126_vm3, %v3532_v43  ;;  %v2195_v15 = vadd.f32 %v3929_v33, %v4554_v9  ;;  %v5979_v23 = vmax.f32 %v5978_v14, 0.0  ;;  %v5981_v56 = vmax.f32 %v5980_v11, 0.0  ;;  %v2493_v45 = vmax.f32 %v1683_v39, 0.0 }
 0x1a3   :  { %v3533_v25 = vpack.c.bf16 %v2807_v5, %v2807_v5  ;;  %3130 = vst.msk [vmem:[#allocation8 + $0xc] sm:$0xf] %vm3126_vm3, %v3535_v18  ;;  %v1675_v57 = vadd.f32 %v4554_v9, %v1674_v41  ;;  %v5982_v27 = vmax.f32 %v4626_v28, 0.0  ;;  %v5983_v63 = vmax.f32 %v4630_v29, 0.0 }
 0x1a4   :  { %v2684_v22 = vmax.f32 %v5979_v23, %v2492_v49  ;;  %v2748_v52 = vmax.f32 %v5981_v56, %v2620_v32  ;;  %v2621_v5 = vmax.f32 %v2195_v15, 0.0  ;;  %v2187_v50 = vadd.f32 %v4554_v9, %v2186_v53  ;;  %v3932_v29 = vpop.f32.mrb[72].mxu1  ;;  %v5986_v15 = vld [vmem:[#allocation37_spill] sm:$0xff] }
 0x1a5   :  { %3128 = vst.msk [vmem:[#allocation8 + $0x4] sm:$0xf] %vm3126_vm3, %v3533_v25  ;;  %v2682_v6 = vmax.f32 %v5982_v27, %v2490_v16  ;;  %v2746_v43 = vmax.f32 %v5983_v63, %v2618_v20  ;;  %v2482_v7 = vmax.f32 %v5257_v31, 0.0  ;;  %v5984_v33 = vmax.f32 %v4634_v17, 0.0  ;;  %v3804_v16 = vpop.f32.mrb[72].mxu0  ;;  %v2199_v11 = vpop.f32.mrb[73].mxu1 }
 0x1a6   :  { %v2812_v46 = vmax.f32 %v2684_v22, %v2748_v52  ;;  %v2491_v49 = vmax.f32 %v1675_v57, 0.0  ;;  %v2610_v32 = vmax.f32 %v5260_v59, 0.0  ;;  %v5985_v41 = vmax.f32 %v4638_v40, 0.0  ;;  %v1687_v17 = vpop.f32.mrb[73].mxu0  ;;  %v3933_v63 = vpop.f32.mrb[74].mxu1 }
 0x1a7   :  { %v2685_v18 = vmax.f32 %v5984_v33, %v2493_v45  ;;  %v2810_v39 = vmax.f32 %v2682_v6, %v2746_v43  ;;  %v2619_v25 = vmax.f32 %v2187_v50, 0.0  ;;  %v5987_v14 = vmax.f32 %v5986_v15, 0.0  ;;  %v5988_v45 = vld [vmem:[#allocation38_spill] sm:$0xff]  ;;  %v3805_v6 = vpop.f32.mrb[74].mxu0 }
 0x1a8   :  { %v2749_v28 = vmax.f32 %v5985_v41, %v2621_v5  ;;  %v3538_v20 = vpack.c.bf16 %v2812_v46, %v2812_v46  ;;  %v1696_v23 = vadd.f32 %v3804_v16, %v4554_v9  ;;  %v2208_v22 = vadd.f32 %v3932_v29, %v4554_v9  ;;  %v1690_v33 = vpop.f32.mrb[75].mxu0  ;;  %v5991_v29 = vld [vmem:[#allocation39_spill] sm:$0xff] }
 0x1a9   :  { %v2683_v53 = vmax.f32 %v5987_v14, %v2491_v49  ;;  %v3536_v56 = vpack.c.bf16 %v2810_v39, %v2810_v39  ;;  %v5989_v57 = vmax.f32 %v5988_v45, 0.0  ;;  %v1688_v40 = vadd.f32 %v4554_v9, %v1687_v17  ;;  %v2202_v49 = vpop.f32.mrb[75].mxu1  ;;  %v5993_v17 = vld [vmem:[#allocation40_spill] sm:$0xff] }
 0x1aa   :  { %v2813_v52 = vmax.f32 %v2685_v18, %v2749_v28  ;;  %3133 = vst.msk [vmem:[#allocation8 + $0x18] sm:$0xf] %vm3126_vm3, %v3538_v20  ;;  %v2496_v43 = vmax.f32 %v1696_v23, 0.0  ;;  %v2624_v5 = vmax.f32 %v2208_v22, 0.0  ;;  %v2200_v50 = vadd.f32 %v4554_v9, %v2199_v11 }
 0x1ab   :  { %v2747_v27 = vmax.f32 %v5989_v57, %v2619_v25  ;;  %v1699_v46 = vadd.f32 %v3805_v6, %v4554_v9  ;;  %3131 = vst.msk [vmem:[#allocation8 + $0x10] sm:$0xf] %vm3126_vm3, %v3536_v56  ;;  %v2494_v41 = vmax.f32 %v1688_v40, 0.0  ;;  %v2211_v28 = vadd.f32 %v3933_v63, %v4554_v9  ;;  %v5995_v57 = vld [vmem:[#allocation41_spill] sm:$0xff] }
 0x1ac   :  { %v3539_v18 = vpack.c.bf16 %v2813_v52, %v2813_v52  ;;  %v5990_v25 = vmax.f32 %v4660_v55, 0.0  ;;  %v5992_v20 = vmax.f32 %v5991_v29, 0.0  ;;  %v2622_v14 = vmax.f32 %v2200_v50, 0.0  ;;  %v5997_v55 = vld [vmem:[#allocation42_spill] sm:$0xff] }
 0x1ad   :  { %v2811_v39 = vmax.f32 %v2683_v53, %v2747_v27  ;;  %v2497_v23 = vmax.f32 %v1699_v46, 0.0  ;;  %v5994_v11 = vmax.f32 %v5993_v17, 0.0  ;;  %v2625_v56 = vmax.f32 %v2211_v28, 0.0  ;;  %v5999_v46 = vld [vmem:[#allocation43_spill] sm:$0xff]  ;;  %v3936_v28 = vpop.f32.mrb[76].mxu1 }
 0x1ae   :  { %v2688_v16 = vmax.f32 %v5990_v25, %v2496_v43  ;;  %v2752_v15 = vmax.f32 %v5992_v20, %v2624_v5  ;;  %3134 = vst.msk [vmem:[#allocation8 + $0x1c] sm:$0xf] %vm3126_vm3, %v3539_v18  ;;  %v1691_v53 = vadd.f32 %v4554_v9, %v1690_v33  ;;  %v5996_v27 = vmax.f32 %v5995_v57, 0.0 }
 0x1af   :  { %v3537_v22 = vpack.c.bf16 %v2811_v39, %v2811_v39  ;;  %v2686_v45 = vmax.f32 %v5994_v11, %v2494_v41  ;;  %v5998_v6 = vmax.f32 %v5997_v55, 0.0  ;;  %v2203_v43 = vadd.f32 %v4554_v9, %v2202_v49  ;;  %v3808_v41 = vpop.f32.mrb[76].mxu0 }
 0x1b0   :  { %v2816_v52 = vmax.f32 %v2688_v16, %v2752_v15  ;;  %v2750_v40 = vmax.f32 %v5996_v27, %v2622_v14  ;;  %v5348_v5 = vadd.f32 %v4554_v9, %v5220_v0  ;;  %v5352_v50 = vadd.f32 %v4554_v9, %v5222_v12  ;;  %v1703_v20 = vpop.f32.mrb[77].mxu0  ;;  %v2215_v0 = vpop.f32.mrb[77].mxu1  ;;  %v6001_v14 = vld [vmem:[#allocation44_spill] sm:$0xff] }
 0x1b1   :  { %v2689_v63 = vmax.f32 %v5998_v6, %v2497_v23  ;;  %3132 = vst.msk [vmem:[#allocation8 + $0x14] sm:$0xf] %vm3126_vm3, %v3537_v22  ;;  %v6000_v33 = vmax.f32 %v5999_v46, 0.0  ;;  %v2495_v39 = vmax.f32 %v1691_v53, 0.0  ;;  %v2623_v29 = vmax.f32 %v2203_v43, 0.0  ;;  %v3809_v11 = vpop.f32.mrb[78].mxu0 }
 0x1b2   :  { %v3542_v25 = vpack.c.bf16 %v2816_v52, %v2816_v52  ;;  %v2814_v16 = vmax.f32 %v2686_v45, %v2750_v40  ;;  %v1712_v49 = vadd.f32 %v3808_v41, %v4554_v9  ;;  %v6002_v23 = vmax.f32 %v6001_v14, 0.0  ;;  %v6003_v52 = vld [vmem:[#allocation45_spill] sm:$0xff]  ;;  %v1706_v55 = vpop.f32.mrb[79].mxu0 }
 0x1b3   :  { %v2753_v18 = vmax.f32 %v6000_v33, %v2625_v56  ;;  %v2224_v17 = vadd.f32 %v3936_v28, %v4554_v9  ;;  %v1704_v22 = vadd.f32 %v4554_v9, %v1703_v20  ;;  %v3937_v56 = vpop.f32.mrb[78].mxu1  ;;  %v6004_v45 = vmax.f32 %v6003_v52, 0.0 }
 0x1b4   :  { %v2687_v12 = vmax.f32 %v6002_v23, %v2495_v39  ;;  %3137 = vst.msk [vmem:[#allocation8 + $0x28] sm:$0xf] %vm3126_vm3, %v3542_v25  ;;  %v3540_v53 = vpack.c.bf16 %v2814_v16, %v2814_v16  ;;  %v2500_v27 = vmax.f32 %v1712_v49, 0.0  ;;  %v2216_v40 = vadd.f32 %v4554_v9, %v2215_v0  ;;  %v2218_v6 = vpop.f32.mrb[79].mxu1  ;;  %v6005_v39 = vld [vmem:[#allocation46_spill] sm:$0xff]  ;;  %v6009_v0 = vld [vmem:[#allocation48_spill] sm:$0xff] }
 0x1b5   :  { %v2817_v15 = vmax.f32 %v2689_v63, %v2753_v18  ;;  %v2751_v57 = vmax.f32 %v6004_v45, %v2623_v29  ;;  %v2628_v43 = vmax.f32 %v2224_v17, 0.0  ;;  %v2498_v46 = vmax.f32 %v1704_v22, 0.0  ;;  %v6007_v29 = vld [vmem:[#allocation47_spill] sm:$0xff] }
 0x1b6   :  { %v1715_v33 = vadd.f32 %v3809_v11, %v4554_v9  ;;  %3135 = vst.msk [vmem:[#allocation8 + $0x20] sm:$0xf] %vm3126_vm3, %v3540_v53  ;;  %v6006_v41 = vmax.f32 %v6005_v39, 0.0  ;;  %v2626_v25 = vmax.f32 %v2216_v40, 0.0  ;;  %v2227_v16 = vadd.f32 %v3937_v56, %v4554_v9  ;;  %v6011_v11 = vld [vmem:[#allocation49_spill] sm:$0xff]  ;;  %v3812_v39 = vpop.f32.mrb[80].mxu0 }
 0x1b7   :  { %v3543_v63 = vpack.c.bf16 %v2817_v15, %v2817_v15  ;;  %v2815_v18 = vmax.f32 %v2687_v12, %v2751_v57  ;;  %v6008_v49 = vmax.f32 %v6007_v29, 0.0  ;;  %v6010_v15 = vmax.f32 %v6009_v0, 0.0  ;;  %v6017_v0 = vld [vmem:[#allocation52_spill] sm:$0xff] }
 0x1b8   :  { %v2692_v28 = vmax.f32 %v6006_v41, %v2500_v27  ;;  %v2501_v23 = vmax.f32 %v1715_v33, 0.0  ;;  %v1707_v17 = vadd.f32 %v4554_v9, %v1706_v55  ;;  %v6012_v12 = vmax.f32 %v6011_v11, 0.0  ;;  %v6013_v27 = vld [vmem:[#allocation50_spill] sm:$0xff]  ;;  %v3940_v41 = vpop.f32.mrb[80].mxu1  ;;  %v6015_v55 = vld [vmem:[#allocation51_spill] sm:$0xff] }
 0x1b9   :  { %3138 = vst.msk [vmem:[#allocation8 + $0x2c] sm:$0xf] %vm3126_vm3, %v3543_v63  ;;  %v2756_v20 = vmax.f32 %v6008_v49, %v2628_v43  ;;  %v2690_v14 = vmax.f32 %v6010_v15, %v2498_v46  ;;  %v3541_v22 = vpack.c.bf16 %v2815_v18, %v2815_v18  ;;  %v2629_v52 = vmax.f32 %v2227_v16, 0.0  ;;  %v1719_v16 = vpop.f32.mrb[81].mxu0 }
 0x1ba   :  { %v2754_v53 = vmax.f32 %v6012_v12, %v2626_v25  ;;  %v2219_v45 = vadd.f32 %v4554_v9, %v2218_v6  ;;  %v2485_v56 = vmax.f32 %v5281_v24, 0.0  ;;  %v6014_v40 = vmax.f32 %v6013_v27, 0.0  ;;  %v2231_v6 = vpop.f32.mrb[81].mxu1  ;;  %v6019_v12 = vld [vmem:[#allocation53_spill] sm:$0xff] }
 0x1bb   :  { %v2820_v57 = vmax.f32 %v2692_v28, %v2756_v20  ;;  %v2499_v43 = vmax.f32 %v1707_v17, 0.0  ;;  %3136 = vst.msk [vmem:[#allocation8 + $0x24] sm:$0xf] %vm3126_vm3, %v3541_v22  ;;  %v6016_v33 = vmax.f32 %v6015_v55, 0.0  ;;  %v1728_v25 = vadd.f32 %v3812_v39, %v4554_v9  ;;  %v3813_v17 = vpop.f32.mrb[82].mxu0  ;;  %v3941_v11 = vpop.f32.mrb[82].mxu1 }
 0x1bc   :  { %v2693_v63 = vmax.f32 %v6014_v40, %v2501_v23  ;;  %v2818_v46 = vmax.f32 %v2690_v14, %v2754_v53  ;;  %v2627_v29 = vmax.f32 %v2219_v45, 0.0  ;;  %v6018_v28 = vmax.f32 %v6017_v0, 0.0  ;;  %v1722_v27 = vpop.f32.mrb[83].mxu0  ;;  %v2234_v40 = vpop.f32.mrb[83].mxu1 }
 0x1bd   :  { %v2757_v18 = vmax.f32 %v6016_v33, %v2629_v52  ;;  %v3546_v49 = vpack.c.bf16 %v2820_v57, %v2820_v57  ;;  %v2240_v15 = vadd.f32 %v3940_v41, %v4554_v9  ;;  %v1720_v23 = vadd.f32 %v4554_v9, %v1719_v16 }
 0x1be   :  { %v2691_v20 = vmax.f32 %v6018_v28, %v2499_v43  ;;  %v3544_v22 = vpack.c.bf16 %v2818_v46, %v2818_v46  ;;  %v6020_v53 = vmax.f32 %v6019_v12, 0.0  ;;  %v2504_v45 = vmax.f32 %v1728_v25, 0.0  ;;  %v6021_v46 = vld [vmem:[#allocation54_spill] sm:$0xff]  ;;  %v6023_v25 = vld [vmem:[#allocation55_spill] sm:$0xff]  ;;  %v6025_v28 = vld [vmem:[#allocation56_spill] sm:$0xff] }
 0x1bf   :  { %v2821_v14 = vmax.f32 %v2693_v63, %v2757_v18  ;;  %3141 = vst.msk [vmem:[#allocation8 + $0x38] sm:$0xf] %vm3126_vm3, %v3546_v49  ;;  %v2632_v57 = vmax.f32 %v2240_v15, 0.0  ;;  %v2502_v39 = vmax.f32 %v1720_v23, 0.0  ;;  %v2232_v43 = vadd.f32 %v4554_v9, %v2231_v6 }
 0x1c0   :  { %v2755_v52 = vmax.f32 %v6020_v53, %v2627_v29  ;;  %v1731_v41 = vadd.f32 %v3813_v17, %v4554_v9  ;;  %3139 = vst.msk [vmem:[#allocation8 + $0x30] sm:$0xf] %vm3126_vm3, %v3544_v22  ;;  %v6022_v63 = vmax.f32 %v6021_v46, 0.0  ;;  %v2243_v29 = vadd.f32 %v3941_v11, %v4554_v9  ;;  %v5405_v22 = vld [vmem:[#allocation7] ss:$0 sm:$0xff]  ;;  %v6027_v53 = vld [vmem:[#allocation57_spill] sm:$0xff] }
 0x1c1   :  { %v3547_v55 = vpack.c.bf16 %v2821_v14, %v2821_v14  ;;  %v6024_v16 = vmax.f32 %v6023_v25, 0.0  ;;  %v6026_v49 = vmax.f32 %v6025_v28, 0.0  ;;  %v2630_v23 = vmax.f32 %v2232_v43, 0.0  ;;  %v3944_v46 = vpop.f32.mrb[84].mxu1  ;;  %v6037_v9 = vld [vmem:[#allocation62_spill] sm:$0xff] }
 0x1c2   :  { %v2819_v33 = vmax.f32 %v2691_v20, %v2755_v52  ;;  %v2696_v18 = vmax.f32 %v6022_v63, %v2504_v45  ;;  %v2505_v12 = vmax.f32 %v1731_v41, 0.0  ;;  %v2633_v17 = vmax.f32 %v2243_v29, 0.0  ;;  %v3816_v41 = vpop.f32.mrb[84].mxu0 }
 0x1c3   :  { %v2760_v0 = vmax.f32 %v6024_v16, %v2632_v57  ;;  %v2694_v15 = vmax.f32 %v6026_v49, %v2502_v39  ;;  %3142 = vst.msk [vmem:[#allocation8 + $0x3c] sm:$0xf] %vm3126_vm3, %v3547_v55  ;;  %v1723_v20 = vadd.f32 %v5405_v22, %v1722_v27  ;;  %v2235_v14 = vadd.f32 %v5405_v22, %v2234_v40  ;;  %v6029_v57 = vld [vmem:[#allocation58_spill] sm:$0xff]  ;;  %v6031_v55 = vld [vmem:[#allocation59_spill] sm:$0xff]  ;;  %v1735_v25 = vpop.f32.mrb[85].mxu0  ;;  %v2247_v16 = vpop.f32.mrb[85].mxu1 }
 0x1c4   :  { %v3545_v6 = vpack.c.bf16 %v2819_v33, %v2819_v33  ;;  %v6028_v52 = vmax.f32 %v6027_v53, 0.0  ;;  %v6030_v39 = vmax.f32 %v6029_v57, 0.0  ;;  %v6032_v33 = vmax.f32 %v6031_v55, 0.0 }
 0x1c5   :  { %v2824_v11 = vmax.f32 %v2696_v18, %v2760_v0  ;;  %v2503_v29 = vmax.f32 %v1723_v20, 0.0  ;;  %v2631_v27 = vmax.f32 %v2235_v14, 0.0  ;;  %v1744_v40 = vadd.f32 %v5405_v22, %v3816_v41 }
 0x1c6   :  { %v2758_v45 = vmax.f32 %v6028_v52, %v2630_v23  ;;  %v2697_v43 = vmax.f32 %v6030_v39, %v2505_v12  ;;  %3140 = vst.msk [vmem:[#allocation8 + $0x34] sm:$0xf] %vm3126_vm3, %v3545_v6  ;;  %v2761_v63 = vmax.f32 %v6032_v33, %v2633_v17  ;;  %v2256_v28 = vadd.f32 %v5405_v22, %v3944_v46  ;;  %v3817_v23 = vpop.f32.mrb[86].mxu0  ;;  %v3945_v12 = vpop.f32.mrb[86].mxu1  ;;  %v6033_v52 = vld [vmem:[#allocation60_spill] sm:$0xff]  ;;  %v6035_v39 = vld [vmem:[#allocation61_spill] sm:$0xff] }
 0x1c7   :  { %v3550_v18 = vpack.c.bf16 %v2824_v11, %v2824_v11  ;;  %v1736_v49 = vadd.f32 %v5405_v22, %v1735_v25  ;;  %v6034_v6 = vmax.f32 %v6033_v52, 0.0  ;;  %v6036_v17 = vmax.f32 %v6035_v39, 0.0  ;;  %v1738_v55 = vpop.f32.mrb[87].mxu0  ;;  %v2250_v41 = vpop.f32.mrb[87].mxu1 }
 0x1c8   :  { %v2822_v0 = vmax.f32 %v2694_v15, %v2758_v45  ;;  %v2825_v53 = vmax.f32 %v2697_v43, %v2761_v63  ;;  %v2508_v14 = vmax.f32 %v1744_v40, 0.0  ;;  %v2636_v15 = vmax.f32 %v2256_v28, 0.0 }
 0x1c9   :  { %v2695_v57 = vmax.f32 %v6034_v6, %v2503_v29  ;;  %v2759_v20 = vmax.f32 %v6036_v17, %v2631_v27  ;;  %3145 = vst.msk [vmem:[#allocation8 + $0x48] sm:$0xf] %vm3126_vm3, %v3550_v18  ;;  %v2506_v45 = vmax.f32 %v1736_v49, 0.0  ;;  %v2248_v46 = vadd.f32 %v5405_v22, %v2247_v16  ;;  %v6039_v27 = vld [vmem:[#allocation63_spill] sm:$0xff]  ;;  %v6041_v6 = vld [vmem:[#allocation64_spill] sm:$0xff]  ;;  %v6043_v17 = vld [vmem:[#allocation65_spill] sm:$0xff] }
 0x1ca   :  { %v3548_v11 = vpack.c.bf16 %v2822_v0, %v2822_v0  ;;  %v3551_v33 = vpack.c.bf16 %v2825_v53, %v2825_v53  ;;  %v6038_v43 = vmax.f32 %v6037_v9, 0.0  ;;  %v1747_v29 = vadd.f32 %v5405_v22, %v3817_v23 }
 0x1cb   :  { %v2823_v25 = vmax.f32 %v2695_v57, %v2759_v20  ;;  %v6040_v40 = vmax.f32 %v6039_v27, 0.0  ;;  %v6042_v39 = vmax.f32 %v6041_v6, 0.0  ;;  %v2634_v0 = vmax.f32 %v2248_v46, 0.0 }
 0x1cc   :  { %v2700_v63 = vmax.f32 %v6038_v43, %v2508_v14  ;;  %3143 = vst.msk [vmem:[#allocation8 + $0x40] sm:$0xf] %vm3126_vm3, %v3548_v11  ;;  %v2259_v28 = vadd.f32 %v5405_v22, %v3945_v12  ;;  %3146 = vst.msk [vmem:[#allocation8 + $0x4c] sm:$0xf] %vm3126_vm3, %v3551_v33  ;;  %v2509_v49 = vmax.f32 %v1747_v29, 0.0  ;;  %v1739_v9 = vadd.f32 %v5405_v22, %v1738_v55  ;;  %v6045_v12 = vld [vmem:[#allocation66_spill] sm:$0xff] }
 0x1cd   :  { %v2764_v52 = vmax.f32 %v6040_v40, %v2636_v15  ;;  %v2698_v18 = vmax.f32 %v6042_v39, %v2506_v45  ;;  %v3549_v16 = vpack.c.bf16 %v2823_v25, %v2823_v25  ;;  %v2251_v53 = vadd.f32 %v5405_v22, %v2250_v41  ;;  %v3820_v15 = vpop.f32.mrb[88].mxu0  ;;  %v3948_v45 = vpop.f32.mrb[88].mxu1 }
 0x1ce   :  { %v6044_v20 = vmax.f32 %v6043_v17, 0.0  ;;  %v2637_v11 = vmax.f32 %v2259_v28, 0.0  ;;  %v6046_v46 = vmax.f32 %v6045_v12, 0.0  ;;  %v2507_v25 = vmax.f32 %v1739_v9, 0.0  ;;  %v1751_v29 = vpop.f32.mrb[89].mxu0  ;;  %v2263_v41 = vpop.f32.mrb[89].mxu1 }
 0x1cf   :  { %v2828_v57 = vmax.f32 %v2700_v63, %v2764_v52  ;;  %3144 = vst.msk [vmem:[#allocation8 + $0x44] sm:$0xf] %vm3126_vm3, %v3549_v16  ;;  %v2635_v43 = vmax.f32 %v2251_v53, 0.0  ;;  %v1760_v55 = vadd.f32 %v5405_v22, %v3820_v15  ;;  %v6047_v63 = vld [vmem:[#allocation67_spill] sm:$0xff]  ;;  %v2272_v39 = vadd.f32 %v5405_v22, %v3948_v45  ;;  %v3949_v28 = vpop.f32.mrb[90].mxu1  ;;  %v6049_v17 = vld [vmem:[#allocation68_spill] sm:$0xff] }
 0x1d0   :  { %v2762_v14 = vmax.f32 %v6044_v20, %v2634_v0  ;;  %v2701_v33 = vmax.f32 %v6046_v46, %v2509_v49  ;;  %v6048_v52 = vmax.f32 %v6047_v63, 0.0  ;;  %v3821_v0 = vpop.f32.mrb[90].mxu0  ;;  %v6050_v16 = vmax.f32 %v6049_v17, 0.0  ;;  %v6051_v12 = vld [vmem:[#allocation69_spill] sm:$0xff]  ;;  %v2266_v23 = vpop.f32.mrb[91].mxu1  ;;  %v6053_v63 = vld [vmem:[#allocation70_spill] sm:$0xff] }
 0x1d1   :  { %v3554_v27 = vpack.c.bf16 %v2828_v57, %v2828_v57  ;;  %v6052_v49 = vmax.f32 %v6051_v12, 0.0  ;;  %v2512_v53 = vmax.f32 %v1760_v55, 0.0  ;;  %v1752_v15 = vadd.f32 %v5405_v22, %v1751_v29  ;;  %v1754_v46 = vpop.f32.mrb[91].mxu0  ;;  %v6055_v55 = vld [vmem:[#allocation71_spill] sm:$0xff] }
 0x1d2   :  { %v2826_v40 = vmax.f32 %v2698_v18, %v2762_v14  ;;  %v2765_v6 = vmax.f32 %v6048_v52, %v2637_v11  ;;  %v2699_v20 = vmax.f32 %v6050_v16, %v2507_v25  ;;  %v2640_v14 = vmax.f32 %v2272_v39, 0.0 }
 0x1d3   :  { %v2763_v9 = vmax.f32 %v6052_v49, %v2635_v43  ;;  %3149 = vst.msk [vmem:[#allocation8 + $0x58] sm:$0xf] %vm3126_vm3, %v3554_v27  ;;  %v2264_v11 = vadd.f32 %v5405_v22, %v2263_v41  ;;  %v6054_v52 = vmax.f32 %v6053_v63, 0.0  ;;  %v2510_v25 = vmax.f32 %v1752_v15, 0.0 }
 0x1d4   :  { %v3552_v18 = vpack.c.bf16 %v2826_v40, %v2826_v40  ;;  %v2829_v57 = vmax.f32 %v2701_v33, %v2765_v6  ;;  %v1763_v16 = vadd.f32 %v5405_v22, %v3821_v0  ;;  %v6056_v29 = vmax.f32 %v6055_v55, 0.0  ;;  %v6057_v40 = vld [vmem:[#allocation72_spill] sm:$0xff]  ;;  %v6059_v0 = vld [vmem:[#allocation73_spill] sm:$0xff] }
 0x1d5   :  { %v2827_v45 = vmax.f32 %v2699_v20, %v2763_v9  ;;  %v2704_v17 = vmax.f32 %v6054_v52, %v2512_v53  ;;  %v2638_v49 = vmax.f32 %v2264_v11, 0.0  ;;  %v2275_v27 = vadd.f32 %v5405_v22, %v3949_v28  ;;  %v3952_v11 = vpop.f32.mrb[92].mxu1  ;;  %v6061_v28 = vld [vmem:[#allocation74_spill] sm:$0xff] }
 0x1d6   :  { %3147 = vst.msk [vmem:[#allocation8 + $0x50] sm:$0xf] %vm3126_vm3, %v3552_v18  ;;  %v3555_v43 = vpack.c.bf16 %v2829_v57, %v2829_v57  ;;  %v2768_v12 = vmax.f32 %v6056_v29, %v2640_v14  ;;  %v6058_v6 = vmax.f32 %v6057_v40, 0.0  ;;  %v2513_v39 = vmax.f32 %v1763_v16, 0.0  ;;  %v3824_v14 = vpop.f32.mrb[92].mxu0  ;;  %v6063_v29 = vld [vmem:[#allocation12_spill] sm:$0xff] }
 0x1d7   :  { %v3553_v33 = vpack.c.bf16 %v2827_v45, %v2827_v45  ;;  %v1755_v20 = vadd.f32 %v5405_v22, %v1754_v46  ;;  %v6060_v53 = vmax.f32 %v6059_v0, 0.0  ;;  %v2641_v18 = vmax.f32 %v2275_v27, 0.0  ;;  %v1767_v16 = vpop.f32.mrb[93].mxu0 }
 0x1d8   :  { %v2702_v41 = vmax.f32 %v6058_v6, %v2510_v25  ;;  %3150 = vst.msk [vmem:[#allocation8 + $0x5c] sm:$0xf] %vm3126_vm3, %v3555_v43  ;;  %v2832_v9 = vmax.f32 %v2704_v17, %v2768_v12  ;;  %v2267_v57 = vadd.f32 %v5405_v22, %v2266_v23  ;;  %v6062_v45 = vmax.f32 %v6061_v28, 0.0  ;;  %v2279_v17 = vpop.f32.mrb[93].mxu1  ;;  %v3825_v27 = vpop.f32.mrb[94].mxu0  ;;  %v6065_v6 = vld [vmem:[#allocation13_spill] sm:$0xff] }
 0x1d9   :  { %v2766_v15 = vmax.f32 %v6060_v53, %v2638_v49  ;;  %3148 = vst.msk [vmem:[#allocation8 + $0x54] sm:$0xf] %vm3126_vm3, %v3553_v33  ;;  %v2511_v52 = vmax.f32 %v1755_v20, 0.0  ;;  %v1776_v25 = vadd.f32 %v5405_v22, %v3824_v14  ;;  %v2288_v46 = vadd.f32 %v5405_v22, %v3952_v11  ;;  %v3953_v40 = vpop.f32.mrb[94].mxu1  ;;  %v1770_v14 = vpop.f32.mrb[95].mxu0 }
 0x1da   :  { %v2705_v63 = vmax.f32 %v6062_v45, %v2513_v39  ;;  %v3558_v43 = vpack.c.bf16 %v2832_v9, %v2832_v9  ;;  %v6064_v12 = vmax.f32 %v6063_v29, 0.0  ;;  %v2639_v23 = vmax.f32 %v2267_v57, 0.0  ;;  %v2282_v28 = vpop.f32.mrb[95].mxu1  ;;  %v6069_v57 = vld [vmem:[#allocation15_spill] sm:$0xff] }
 0x1db   :  { %v2830_v55 = vmax.f32 %v2702_v41, %v2766_v15  ;;  %v6066_v33 = vmax.f32 %v6065_v6, 0.0  ;;  %v2516_v53 = vmax.f32 %v1776_v25, 0.0  ;;  %v2644_v39 = vmax.f32 %v2288_v46, 0.0  ;;  %v6067_v41 = vld [vmem:[#allocation14_spill] sm:$0xff]  ;;  %v6071_v6 = vld [vmem:[#allocation16_spill] sm:$0xff] }
 0x1dc   :  { %v2769_v49 = vmax.f32 %v6064_v12, %v2641_v18  ;;  %v1768_v20 = vadd.f32 %v5405_v22, %v1767_v16  ;;  %3153 = vst.msk [vmem:[#allocation8 + $0x68] sm:$0xf] %vm3126_vm3, %v3558_v43  ;;  %v6068_v15 = vmax.f32 %v6067_v41, 0.0  ;;  %v2280_v18 = vadd.f32 %v5405_v22, %v2279_v17 }
 0x1dd   :  { %v2703_v0 = vmax.f32 %v6066_v33, %v2511_v52  ;;  %v3556_v11 = vpack.c.bf16 %v2830_v55, %v2830_v55  ;;  %v6070_v29 = vmax.f32 %v6069_v57, 0.0  ;;  %v6072_v52 = vmax.f32 %v6071_v6, 0.0 }
 0x1de   :  { %v2833_v9 = vmax.f32 %v2705_v63, %v2769_v49  ;;  %v2767_v45 = vmax.f32 %v6068_v15, %v2639_v23  ;;  %v2514_v46 = vmax.f32 %v1768_v20, 0.0  ;;  %v1779_v16 = vadd.f32 %v5405_v22, %v3825_v27 }
 0x1df   :  { %v2708_v12 = vmax.f32 %v6070_v29, %v2516_v53  ;;  %v2772_v25 = vmax.f32 %v6072_v52, %v2644_v39  ;;  %3151 = vst.msk [vmem:[#allocation8 + $0x60] sm:$0xf] %vm3126_vm3, %v3556_v11  ;;  %v2642_v55 = vmax.f32 %v2280_v18, 0.0  ;;  %v2291_v63 = vadd.f32 %v5405_v22, %v3953_v40 }
 0x1e0   :  { %v3559_v33 = vpack.c.bf16 %v2833_v9, %v2833_v9  ;;  %v2831_v43 = vmax.f32 %v2703_v0, %v2767_v45  ;;  %v6073_v23 = vmax.f32 %v4914_v36, 0.0  ;;  %v2517_v41 = vmax.f32 %v1779_v16, 0.0  ;;  %v3828_v0 = vpop.f32.mrb[96].mxu0  ;;  %v3956_v9 = vpop.f32.mrb[96].mxu1 }
 0x1e1   :  { %v2836_v49 = vmax.f32 %v2708_v12, %v2772_v25  ;;  %v1771_v53 = vadd.f32 %v5405_v22, %v1770_v14  ;;  %v6074_v20 = vmax.f32 %v4918_v34, 0.0  ;;  %v2645_v15 = vmax.f32 %v2291_v63, 0.0  ;;  %v1783_v29 = vpop.f32.mrb[97].mxu0  ;;  %v2295_v14 = vpop.f32.mrb[97].mxu1 }
 0x1e2   :  { %v2706_v17 = vmax.f32 %v6073_v23, %v2514_v46  ;;  %3154 = vst.msk [vmem:[#allocation8 + $0x6c] sm:$0xf] %vm3126_vm3, %v3559_v33  ;;  %v3557_v39 = vpack.c.bf16 %v2831_v43, %v2831_v43  ;;  %v2283_v11 = vadd.f32 %v5405_v22, %v2282_v28  ;;  %v6075_v40 = vmax.f32 %v4922_v8, 0.0  ;;  %v3829_v25 = vpop.f32.mrb[98].mxu0  ;;  %v3957_v46 = vpop.f32.mrb[98].mxu1  ;;  %v6077_v8 = vld [vmem:[#allocation17_spill] sm:$0xff] }
 0x1e3   :  { %v2770_v27 = vmax.f32 %v6074_v20, %v2642_v55  ;;  %v3562_v45 = vpack.c.bf16 %v2836_v49, %v2836_v49  ;;  %v2515_v36 = vmax.f32 %v1771_v53, 0.0  ;;  %v1792_v57 = vadd.f32 %v5405_v22, %v3828_v0  ;;  %v1786_v49 = vpop.f32.mrb[99].mxu0  ;;  %v2298_v23 = vpop.f32.mrb[99].mxu1 }
 0x1e4   :  { %v2709_v18 = vmax.f32 %v6075_v40, %v2517_v41  ;;  %3152 = vst.msk [vmem:[#allocation8 + $0x64] sm:$0xf] %vm3126_vm3, %v3557_v39  ;;  %v6076_v34 = vmax.f32 %v4926_v44, 0.0  ;;  %v2643_v52 = vmax.f32 %v2283_v11, 0.0  ;;  %v2304_v28 = vadd.f32 %v5405_v22, %v3956_v9  ;;  %v6079_v41 = vld [vmem:[#allocation18_spill] sm:$0xff] }
 0x1e5   :  { %v2834_v12 = vmax.f32 %v2706_v17, %v2770_v27  ;;  %3157 = vst.msk [vmem:[#allocation8 + $0x78] sm:$0xf] %vm3126_vm3, %v3562_v45  ;;  %v6078_v16 = vmax.f32 %v6077_v8, 0.0  ;;  %v2520_v43 = vmax.f32 %v1792_v57, 0.0  ;;  %v1784_v55 = vadd.f32 %v5405_v22, %v1783_v29 }
 0x1e6   :  { %v2773_v6 = vmax.f32 %v6076_v34, %v2645_v15  ;;  %v2296_v63 = vadd.f32 %v5405_v22, %v2295_v14  ;;  %v6080_v53 = vmax.f32 %v6079_v41, 0.0  ;;  %v2648_v20 = vmax.f32 %v2304_v28, 0.0 }
 0x1e7   :  { %v2707_v33 = vmax.f32 %v6078_v16, %v2515_v36  ;;  %v3560_v17 = vpack.c.bf16 %v2834_v12, %v2834_v12  ;;  %v6081_v27 = vmax.f32 %v4948_v42, 0.0  ;;  %v2518_v11 = vmax.f32 %v1784_v55, 0.0  ;;  %v3960_v16 = vpop.f32.mrb[100].mxu1 }
 0x1e8   :  { %v2837_v44 = vmax.f32 %v2709_v18, %v2773_v6  ;;  %v2771_v39 = vmax.f32 %v6080_v53, %v2643_v52  ;;  %v2646_v0 = vmax.f32 %v2296_v63, 0.0  ;;  %v1795_v9 = vadd.f32 %v5405_v22, %v3829_v25 }
 0x1e9   :  { %v2712_v15 = vmax.f32 %v6081_v27, %v2520_v43  ;;  %3155 = vst.msk [vmem:[#allocation8 + $0x70] sm:$0xf] %vm3126_vm3, %v3560_v17  ;;  %v6082_v36 = vmax.f32 %v4952_v38, 0.0  ;;  %v2307_v18 = vadd.f32 %v5405_v22, %v3957_v46  ;;  %v6083_v29 = vmax.f32 %v4956_v61, 0.0  ;;  %v3832_v38 = vpop.f32.mrb[100].mxu0  ;;  %v6085_v46 = vld [vmem:[#allocation19_spill] sm:$0xff] }
 0x1ea   :  { %v3563_v45 = vpack.c.bf16 %v2837_v44, %v2837_v44  ;;  %v2835_v40 = vmax.f32 %v2707_v33, %v2771_v39  ;;  %v6084_v12 = vmax.f32 %v4960_v60, 0.0  ;;  %v2521_v34 = vmax.f32 %v1795_v9, 0.0  ;;  %v1799_v63 = vpop.f32.mrb[101].mxu0  ;;  %v2311_v17 = vpop.f32.mrb[101].mxu1  ;;  %v6087_v44 = vld [vmem:[#allocation20_spill] sm:$0xff] }
 0x1eb   :  { %v2776_v57 = vmax.f32 %v6082_v36, %v2648_v20  ;;  %v2710_v14 = vmax.f32 %v6083_v29, %v2518_v11  ;;  %v1787_v6 = vadd.f32 %v5405_v22, %v1786_v49  ;;  %v2649_v25 = vmax.f32 %v2307_v18, 0.0  ;;  %v3833_v20 = vpop.f32.mrb[102].mxu0  ;;  %v3961_v27 = vpop.f32.mrb[102].mxu1  ;;  %v6089_v11 = vld [vmem:[#allocation21_spill] sm:$0xff]  ;;  %v6091_v29 = vld [vmem:[#allocation22_spill] sm:$0xff] }
 0x1ec   :  { %v2774_v42 = vmax.f32 %v6084_v12, %v2646_v0  ;;  %3158 = vst.msk [vmem:[#allocation8 + $0x7c] sm:$0xf] %vm3126_vm3, %v3563_v45  ;;  %v3561_v52 = vpack.c.bf16 %v2835_v40, %v2835_v40  ;;  %v2299_v8 = vadd.f32 %v5405_v22, %v2298_v23  ;;  %v6086_v43 = vmax.f32 %v6085_v46, 0.0  ;;  %v1802_v36 = vpop.f32.mrb[103].mxu0  ;;  %v6095_v46 = vld [vmem:[#allocation24_spill] sm:$0xff] }
 0x1ed   :  { %v2840_v28 = vmax.f32 %v2712_v15, %v2776_v57  ;;  %v2519_v55 = vmax.f32 %v1787_v6, 0.0  ;;  %v1808_v60 = vadd.f32 %v5405_v22, %v3832_v38  ;;  %v6088_v41 = vmax.f32 %v6087_v44, 0.0  ;;  %v2314_v57 = vpop.f32.mrb[103].mxu1  ;;  %v6093_v6 = vld [vmem:[#allocation23_spill] sm:$0xff] }
 0x1ee   :  { %v2838_v33 = vmax.f32 %v2710_v14, %v2774_v42  ;;  %v2713_v61 = vmax.f32 %v6086_v43, %v2521_v34  ;;  %3156 = vst.msk [vmem:[#allocation8 + $0x74] sm:$0xf] %vm3126_vm3, %v3561_v52  ;;  %v2647_v39 = vmax.f32 %v2299_v8, 0.0  ;;  %v2320_v23 = vadd.f32 %v5405_v22, %v3960_v16 }
 0x1ef   :  { %v3566_v49 = vpack.c.bf16 %v2840_v28, %v2840_v28  ;;  %v2777_v53 = vmax.f32 %v6088_v41, %v2649_v25  ;;  %v6090_v0 = vmax.f32 %v6089_v11, 0.0  ;;  %v2524_v45 = vmax.f32 %v1808_v60, 0.0 }
 0x1f0   :  { %v3564_v15 = vpack.c.bf16 %v2838_v33, %v2838_v33  ;;  %v1800_v40 = vadd.f32 %v5405_v22, %v1799_v63  ;;  %v6092_v14 = vmax.f32 %v6091_v29, 0.0  ;;  %v2652_v42 = vmax.f32 %v2320_v23, 0.0 }
 0x1f1   :  { %v2711_v9 = vmax.f32 %v6090_v0, %v2519_v55  ;;  %3161 = vst.msk [vmem:[#allocation8 + $0x88] sm:$0xf] %vm3126_vm3, %v3566_v49  ;;  %v2841_v18 = vmax.f32 %v2713_v61, %v2777_v53  ;;  %v2312_v34 = vadd.f32 %v5405_v22, %v2311_v17  ;;  %v6094_v52 = vmax.f32 %v6093_v6, 0.0 }
 0x1f2   :  { %v2775_v12 = vmax.f32 %v6092_v14, %v2647_v39  ;;  %3159 = vst.msk [vmem:[#allocation8 + $0x80] sm:$0xf] %vm3126_vm3, %v3564_v15  ;;  %v2522_v25 = vmax.f32 %v1800_v40, 0.0  ;;  %v1811_v8 = vadd.f32 %v5405_v22, %v3833_v20  ;;  %v2323_v38 = vadd.f32 %v5405_v22, %v3961_v27  ;;  %v3836_v27 = vpop.f32.mrb[104].mxu0  ;;  %v3964_v15 = vpop.f32.mrb[104].mxu1 }
 0x1f3   :  { %v2716_v28 = vmax.f32 %v6094_v52, %v2524_v45  ;;  %v3567_v16 = vpack.c.bf16 %v2841_v18, %v2841_v18  ;;  %v6096_v43 = vmax.f32 %v6095_v46, 0.0  ;;  %v2650_v55 = vmax.f32 %v2312_v34, 0.0  ;;  %v1815_v18 = vpop.f32.mrb[105].mxu0  ;;  %v2327_v29 = vpop.f32.mrb[105].mxu1  ;;  %v6104_v46 = vld [vmem:[#allocation27_spill] sm:$0xff] }
 0x1f4   :  { %v2839_v33 = vmax.f32 %v2711_v9, %v2775_v12  ;;  %v6097_v60 = vmax.f32 %v5010_v21, 0.0  ;;  %v2525_v17 = vmax.f32 %v1811_v8, 0.0  ;;  %v2653_v49 = vmax.f32 %v2323_v38, 0.0  ;;  %v6100_v21 = vld [vmem:[#allocation25_spill] sm:$0xff]  ;;  %v3965_v34 = vpop.f32.mrb[106].mxu1 }
 0x1f5   :  { %v2780_v61 = vmax.f32 %v6096_v43, %v2652_v42  ;;  %v1803_v44 = vadd.f32 %v5405_v22, %v1802_v36  ;;  %3162 = vst.msk [vmem:[#allocation8 + $0x8c] sm:$0xf] %vm3126_vm3, %v3567_v16  ;;  %v6098_v39 = vmax.f32 %v5014_v10, 0.0  ;;  %v2315_v20 = vadd.f32 %v5405_v22, %v2314_v57  ;;  %v3837_v42 = vpop.f32.mrb[106].mxu0  ;;  %v2330_v16 = vpop.f32.mrb[107].mxu1 }
 0x1f6   :  { %v2714_v63 = vmax.f32 %v6097_v60, %v2522_v25  ;;  %v3565_v41 = vpack.c.bf16 %v2839_v33, %v2839_v33  ;;  %v6099_v11 = vmax.f32 %v5018_v62, 0.0  ;;  %v6101_v9 = vmax.f32 %v6100_v21, 0.0  ;;  %v6102_v62 = vld [vmem:[#allocation26_spill] sm:$0xff]  ;;  %v1818_v38 = vpop.f32.mrb[107].mxu0 }
 0x1f7   :  { %v2844_v53 = vmax.f32 %v2716_v28, %v2780_v61  ;;  %v2778_v23 = vmax.f32 %v6098_v39, %v2650_v55  ;;  %v2523_v40 = vmax.f32 %v1803_v44, 0.0  ;;  %v1824_v36 = vadd.f32 %v5405_v22, %v3836_v27 }
 0x1f8   :  { %v2717_v0 = vmax.f32 %v6099_v11, %v2525_v17  ;;  %v2781_v45 = vmax.f32 %v6101_v9, %v2653_v49  ;;  %3160 = vst.msk [vmem:[#allocation8 + $0x84] sm:$0xf] %vm3126_vm3, %v3565_v41  ;;  %v2651_v12 = vmax.f32 %v2315_v20, 0.0  ;;  %v2336_v57 = vadd.f32 %v5405_v22, %v3964_v15 }
 0x1f9   :  { %v3570_v14 = vpack.c.bf16 %v2844_v53, %v2844_v53  ;;  %v2842_v10 = vmax.f32 %v2714_v63, %v2778_v23  ;;  %v6103_v52 = vmax.f32 %v6102_v62, 0.0  ;;  %v2528_v25 = vmax.f32 %v1824_v36, 0.0 }
 0x1fa   :  { %v2845_v6 = vmax.f32 %v2717_v0, %v2781_v45  ;;  %v1816_v8 = vadd.f32 %v5405_v22, %v1815_v18  ;;  %v6105_v43 = vmax.f32 %v6104_v46, 0.0  ;;  %v2656_v55 = vmax.f32 %v2336_v57, 0.0  ;;  %v3840_v18 = vpop.f32.mrb[108].mxu0  ;;  %v6115_v46 = vld [vmem:[#allocation30_spill] sm:$0xff] }
 0x1fb   :  { %v2715_v28 = vmax.f32 %v6103_v52, %v2523_v40  ;;  %3165 = vst.msk [vmem:[#allocation8 + $0x98] sm:$0xf] %vm3126_vm3, %v3570_v14  ;;  %v3568_v33 = vpack.c.bf16 %v2842_v10, %v2842_v10  ;;  %v2328_v60 = vadd.f32 %v5405_v22, %v2327_v29  ;;  %v6106_v17 = vmax.f32 %v5044_v37, 0.0  ;;  %v3968_v29 = vpop.f32.mrb[108].mxu1  ;;  %v6111_v52 = vld [vmem:[#allocation28_spill] sm:$0xff] }
 0x1fc   :  { %v2779_v61 = vmax.f32 %v6105_v43, %v2651_v12  ;;  %v3571_v63 = vpack.c.bf16 %v2845_v6, %v2845_v6  ;;  %v2526_v44 = vmax.f32 %v1816_v8, 0.0  ;;  %v1827_v41 = vadd.f32 %v5405_v22, %v3837_v42  ;;  %v1831_v42 = vpop.f32.mrb[109].mxu0 }
 0x1fd   :  { %v2720_v49 = vmax.f32 %v6106_v17, %v2528_v25  ;;  %3163 = vst.msk [vmem:[#allocation8 + $0x90] sm:$0xf] %vm3126_vm3, %v3568_v33  ;;  %v6107_v39 = vmax.f32 %v5048_v13, 0.0  ;;  %v2654_v20 = vmax.f32 %v2328_v60, 0.0  ;;  %v2339_v27 = vadd.f32 %v5405_v22, %v3965_v34  ;;  %v2343_v34 = vpop.f32.mrb[109].mxu1  ;;  %v3841_v8 = vpop.f32.mrb[110].mxu0 }
 0x1fe   :  { %v2843_v53 = vmax.f32 %v2715_v28, %v2779_v61  ;;  %3166 = vst.msk [vmem:[#allocation8 + $0x9c] sm:$0xf] %vm3126_vm3, %v3571_v63  ;;  %v6108_v15 = vmax.f32 %v5052_v2, 0.0  ;;  %v2529_v0 = vmax.f32 %v1827_v41, 0.0  ;;  %v1819_v37 = vadd.f32 %v5405_v22, %v1818_v38  ;;  %v3969_v38 = vpop.f32.mrb[110].mxu1  ;;  %v1834_v63 = vpop.f32.mrb[111].mxu0 }
 0x1ff   :  { %v2784_v23 = vmax.f32 %v6107_v39, %v2656_v55  ;;  %v2331_v21 = vadd.f32 %v5405_v22, %v2330_v16  ;;  %v6109_v40 = vmax.f32 %v5056_v58, 0.0  ;;  %v2657_v13 = vmax.f32 %v2339_v27, 0.0  ;;  %v6113_v16 = vld [vmem:[#allocation29_spill] sm:$0xff]  ;;  %v2346_v17 = vpop.f32.mrb[111].mxu1 }
 0x200   :  { %v2718_v11 = vmax.f32 %v6108_v15, %v2526_v44  ;;  %v3569_v9 = vpack.c.bf16 %v2843_v53, %v2843_v53  ;;  %v6110_v14 = vmax.f32 %v5064_v3, 0.0  ;;  %v2527_v12 = vmax.f32 %v1819_v37, 0.0  ;;  %v6119_v37 = vld [vmem:[#allocation76_spill] sm:$0xff] }
 0x201   :  { %v2848_v45 = vmax.f32 %v2720_v49, %v2784_v23  ;;  %v2782_v36 = vmax.f32 %v6109_v40, %v2654_v20  ;;  %v2655_v57 = vmax.f32 %v2331_v21, 0.0  ;;  %v1840_v2 = vadd.f32 %v5405_v22, %v3840_v18  ;;  %v6117_v23 = vld [vmem:[#allocation75_spill] sm:$0xff] }
 0x202   :  { %v2721_v10 = vmax.f32 %v6110_v14, %v2529_v0  ;;  %3164 = vst.msk [vmem:[#allocation8 + $0x94] sm:$0xf] %vm3126_vm3, %v3569_v9  ;;  %v6112_v28 = vmax.f32 %v6111_v52, 0.0  ;;  %v2352_v25 = vadd.f32 %v5405_v22, %v3968_v29  ;;  %v6114_v3 = vmax.f32 %v6113_v16, 0.0  ;;  %v6124_v16 = vld [vmem:[#allocation77_spill] sm:$0xff] }
 0x203   :  { %v3574_v6 = vpack.c.bf16 %v2848_v45, %v2848_v45  ;;  %v2846_v62 = vmax.f32 %v2718_v11, %v2782_v36  ;;  %v6116_v43 = vmax.f32 %v6115_v46, 0.0  ;;  %v2532_v55 = vmax.f32 %v1840_v2, 0.0 }
 0x204   :  { %v2785_v58 = vmax.f32 %v6112_v28, %v2657_v13  ;;  %v2719_v33 = vmax.f32 %v6114_v3, %v2527_v12  ;;  %v1832_v60 = vadd.f32 %v5405_v22, %v1831_v42  ;;  %v2660_v41 = vmax.f32 %v2352_v25, 0.0 }
 0x205   :  { %v2783_v61 = vmax.f32 %v6116_v43, %v2655_v57  ;;  %3169 = vst.msk [vmem:[#allocation8 + $0xa8] sm:$0xf] %vm3126_vm3, %v3574_v6  ;;  %v3572_v49 = vpack.c.bf16 %v2846_v62, %v2846_v62  ;;  %v2344_v53 = vadd.f32 %v5405_v22, %v2343_v34  ;;  %v6118_v20 = vmax.f32 %v6117_v23, 0.0  ;;  %v3844_v34 = vpop.f32.mrb[112].mxu0  ;;  %v3972_v6 = vpop.f32.mrb[112].mxu1  ;;  %v6128_v23 = vld [vmem:[#allocation79_spill] sm:$0xff] }
 0x206   :  { %v2849_v44 = vmax.f32 %v2721_v10, %v2785_v58  ;;  %v2530_v15 = vmax.f32 %v1832_v60, 0.0  ;;  %v1843_v11 = vadd.f32 %v5405_v22, %v3841_v8  ;;  %v6120_v21 = vmax.f32 %v6119_v37, 0.0  ;;  %v1847_v25 = vpop.f32.mrb[113].mxu0  ;;  %v2359_v8 = vpop.f32.mrb[113].mxu1 }
 0x207   :  { %v2847_v39 = vmax.f32 %v2719_v33, %v2783_v61  ;;  %v2724_v27 = vmax.f32 %v6118_v20, %v2532_v55  ;;  %3167 = vst.msk [vmem:[#allocation8 + $0xa0] sm:$0xf] %vm3126_vm3, %v3572_v49  ;;  %v2658_v45 = vmax.f32 %v2344_v53, 0.0  ;;  %v2355_v40 = vadd.f32 %v5405_v22, %v3969_v38  ;;  %v3845_v43 = vpop.f32.mrb[114].mxu0  ;;  %v3973_v61 = vpop.f32.mrb[114].mxu1  ;;  %v6126_v55 = vld [vmem:[#allocation78_spill] sm:$0xff] }
 0x208   :  { %v3575_v0 = vpack.c.bf16 %v2849_v44, %v2849_v44  ;;  %v2788_v9 = vmax.f32 %v6120_v21, %v2660_v41  ;;  %v6121_v13 = vmax.f32 %v5102_v47, 0.0  ;;  %v2533_v29 = vmax.f32 %v1843_v11, 0.0  ;;  %v1850_v44 = vpop.f32.mrb[115].mxu0  ;;  %v2362_v41 = vpop.f32.mrb[115].mxu1 }
 0x209   :  { %v3573_v36 = vpack.c.bf16 %v2847_v39, %v2847_v39  ;;  %v1835_v14 = vadd.f32 %v5405_v22, %v1834_v63  ;;  %v6122_v12 = vmax.f32 %v5106_v30, 0.0  ;;  %v2661_v2 = vmax.f32 %v2355_v40, 0.0 }
 0x20a   :  { %v2722_v18 = vmax.f32 %v6121_v13, %v2530_v15  ;;  %3170 = vst.msk [vmem:[#allocation8 + $0xac] sm:$0xf] %vm3126_vm3, %v3575_v0  ;;  %v2852_v10 = vmax.f32 %v2724_v27, %v2788_v9  ;;  %v2347_v42 = vadd.f32 %v5405_v22, %v2346_v17  ;;  %v6123_v62 = vmax.f32 %v5110_v54, 0.0 }
 0x20b   :  { %v2786_v57 = vmax.f32 %v6122_v12, %v2658_v45  ;;  %3168 = vst.msk [vmem:[#allocation8 + $0xa4] sm:$0xf] %vm3126_vm3, %v3573_v36  ;;  %v2531_v52 = vmax.f32 %v1835_v14, 0.0  ;;  %v1856_v28 = vadd.f32 %v5405_v22, %v3844_v34  ;;  %v2368_v58 = vadd.f32 %v5405_v22, %v3972_v6  ;;  %v3848_v6 = vpop.f32.mrb[116].mxu0 }
 0x20c   :  { %v2725_v47 = vmax.f32 %v6123_v62, %v2533_v29  ;;  %v3578_v38 = vpack.c.bf16 %v2852_v10, %v2852_v10  ;;  %v6125_v3 = vmax.f32 %v6124_v16, 0.0  ;;  %v2659_v46 = vmax.f32 %v2347_v42, 0.0  ;;  %v3976_v62 = vpop.f32.mrb[116].mxu1  ;;  %v6136_v16 = vld [vmem:[#allocation81_spill] sm:$0xff] }
 0x20d   :  { %v2850_v30 = vmax.f32 %v2722_v18, %v2786_v57  ;;  %v6127_v60 = vmax.f32 %v6126_v55, 0.0  ;;  %v2536_v54 = vmax.f32 %v1856_v28, 0.0  ;;  %v2664_v17 = vmax.f32 %v2368_v58, 0.0  ;;  %v6138_v55 = vld [vmem:[#allocation82_spill] sm:$0xff] }
 0x20e   :  { %v2789_v33 = vmax.f32 %v6125_v3, %v2661_v2  ;;  %v1848_v49 = vadd.f32 %v5405_v22, %v1847_v25  ;;  %3173 = vst.msk [vmem:[#allocation8 + $0xb8] sm:$0xf] %vm3126_vm3, %v3578_v38  ;;  %v6129_v20 = vmax.f32 %v6128_v23, 0.0  ;;  %v2360_v15 = vadd.f32 %v5405_v22, %v2359_v8  ;;  %v1863_v8 = vpop.f32.mrb[117].mxu0  ;;  %v2375_v38 = vpop.f32.mrb[117].mxu1  ;;  %v6140_v23 = vld [vmem:[#allocation83_spill] sm:$0xff] }
 0x20f   :  { %v2723_v63 = vmax.f32 %v6127_v60, %v2531_v52  ;;  %v3576_v53 = vpack.c.bf16 %v2850_v30, %v2850_v30  ;;  %v6130_v11 = vmax.f32 %v5128_v51, 0.0  ;;  %v6131_v37 = vmax.f32 %v5132_v19, 0.0  ;;  %v6134_v52 = vld [vmem:[#allocation80_spill] sm:$0xff] }
 0x210   :  { %v2853_v39 = vmax.f32 %v2725_v47, %v2789_v33  ;;  %v2787_v27 = vmax.f32 %v6129_v20, %v2659_v46  ;;  %v2534_v9 = vmax.f32 %v1848_v49, 0.0  ;;  %v1859_v45 = vadd.f32 %v5405_v22, %v3845_v43  ;;  %v3849_v43 = vpop.f32.mrb[118].mxu0 }
 0x211   :  { %v2728_v0 = vmax.f32 %v6130_v11, %v2536_v54  ;;  %v2792_v21 = vmax.f32 %v6131_v37, %v2664_v17  ;;  %3171 = vst.msk [vmem:[#allocation8 + $0xb0] sm:$0xf] %vm3126_vm3, %v3576_v53  ;;  %v2662_v13 = vmax.f32 %v2360_v15, 0.0  ;;  %v2371_v18 = vadd.f32 %v5405_v22, %v3973_v61  ;;  %v3977_v61 = vpop.f32.mrb[118].mxu1  ;;  %v6142_v11 = vld [vmem:[#allocation84_spill] sm:$0xff] }
 0x212   :  { %v3579_v40 = vpack.c.bf16 %v2853_v39, %v2853_v39  ;;  %v2851_v36 = vmax.f32 %v2723_v63, %v2787_v27  ;;  %v6132_v14 = vmax.f32 %v5136_v4, 0.0  ;;  %v2537_v12 = vmax.f32 %v1859_v45, 0.0 }
 0x213   :  { %v2856_v29 = vmax.f32 %v2728_v0, %v2792_v21  ;;  %v1851_v51 = vadd.f32 %v5405_v22, %v1850_v44  ;;  %v6133_v57 = vmax.f32 %v5140_v48, 0.0  ;;  %v2665_v42 = vmax.f32 %v2371_v18, 0.0  ;;  %v1866_v44 = vpop.f32.mrb[119].mxu0 }
 0x214   :  { %v2726_v10 = vmax.f32 %v6132_v14, %v2534_v9  ;;  %3174 = vst.msk [vmem:[#allocation8 + $0xbc] sm:$0xf] %vm3126_vm3, %v3579_v40  ;;  %v3577_v19 = vpack.c.bf16 %v2851_v36, %v2851_v36  ;;  %v2363_v34 = vadd.f32 %v5405_v22, %v2362_v41  ;;  %v6135_v28 = vmax.f32 %v6134_v52, 0.0  ;;  %v2378_v41 = vpop.f32.mrb[119].mxu1 }
 0x215   :  { %v2790_v2 = vmax.f32 %v6133_v57, %v2662_v13  ;;  %v3582_v47 = vpack.c.bf16 %v2856_v29, %v2856_v29  ;;  %v2535_v4 = vmax.f32 %v1851_v51, 0.0  ;;  %v1872_v25 = vadd.f32 %v5405_v22, %v3848_v6  ;;  %v6144_v13 = vld [vmem:[#allocation85_spill] sm:$0xff]  ;;  %v3980_v52 = vpop.f32.mrb[120].mxu1 }
 0x216   :  { %v2729_v58 = vmax.f32 %v6135_v28, %v2537_v12  ;;  %3172 = vst.msk [vmem:[#allocation8 + $0xb4] sm:$0xf] %vm3126_vm3, %v3577_v19  ;;  %v6137_v48 = vmax.f32 %v6136_v16, 0.0  ;;  %v2663_v33 = vmax.f32 %v2363_v34, 0.0  ;;  %v2384_v46 = vadd.f32 %v5405_v22, %v3976_v62  ;;  %v6150_v16 = vld [vmem:[#allocation87_spill] sm:$0xff] }
 0x217   :  { %v2854_v30 = vmax.f32 %v2726_v10, %v2790_v2  ;;  %3177 = vst.msk [vmem:[#allocation8 + $0xc8] sm:$0xf] %vm3126_vm3, %v3582_v47  ;;  %v6139_v60 = vmax.f32 %v6138_v55, 0.0  ;;  %v2540_v54 = vmax.f32 %v1872_v25, 0.0  ;;  %v1864_v17 = vadd.f32 %v5405_v22, %v1863_v8  ;;  %v3852_v47 = vpop.f32.mrb[120].mxu0 }
 0x218   :  { %v2793_v3 = vmax.f32 %v6137_v48, %v2665_v42  ;;  %v2376_v49 = vadd.f32 %v5405_v22, %v2375_v38  ;;  %v6141_v20 = vmax.f32 %v6140_v23, 0.0  ;;  %v2668_v15 = vmax.f32 %v2384_v46, 0.0  ;;  %v1879_v8 = vpop.f32.mrb[121].mxu0  ;;  %v2391_v38 = vpop.f32.mrb[121].mxu1 }
 0x219   :  { %v2727_v63 = vmax.f32 %v6139_v60, %v2535_v4  ;;  %v3580_v53 = vpack.c.bf16 %v2854_v30, %v2854_v30  ;;  %v6143_v0 = vmax.f32 %v6142_v11, 0.0  ;;  %v2538_v21 = vmax.f32 %v1864_v17, 0.0  ;;  %v6152_v60 = vld [vmem:[#allocation88_spill] sm:$0xff]  ;;  %v6156_v11 = vld [vmem:[#allocation90_spill] sm:$0xff] }
 0x21a   :  { %v2857_v39 = vmax.f32 %v2729_v58, %v2793_v3  ;;  %v2791_v27 = vmax.f32 %v6141_v20, %v2663_v33  ;;  %v2666_v9 = vmax.f32 %v2376_v49, 0.0  ;;  %v1875_v45 = vadd.f32 %v5405_v22, %v3849_v43  ;;  %v6148_v58 = vld [vmem:[#allocation86_spill] sm:$0xff]  ;;  %v3853_v43 = vpop.f32.mrb[122].mxu0 }
 0x21b   :  { %v2732_v37 = vmax.f32 %v6143_v0, %v2540_v54  ;;  %3175 = vst.msk [vmem:[#allocation8 + $0xc0] sm:$0xf] %vm3126_vm3, %v3580_v53  ;;  %v6145_v18 = vmax.f32 %v6144_v13, 0.0  ;;  %v2387_v14 = vadd.f32 %v5405_v22, %v3977_v61  ;;  %v6146_v10 = vmax.f32 %v5182_v1, 0.0  ;;  %v3981_v61 = vpop.f32.mrb[122].mxu1  ;;  %v6158_v13 = vld [vmem:[#allocation91_spill] sm:$0xff] }
 0x21c   :  { %v3583_v40 = vpack.c.bf16 %v2857_v39, %v2857_v39  ;;  %v2855_v36 = vmax.f32 %v2727_v63, %v2791_v27  ;;  %v6147_v51 = vmax.f32 %v5186_v26, 0.0  ;;  %v2541_v57 = vmax.f32 %v1875_v45, 0.0  ;;  %v6154_v39 = vld [vmem:[#allocation89_spill] sm:$0xff] }
 0x21d   :  { %v2796_v29 = vmax.f32 %v6145_v18, %v2668_v15  ;;  %v2730_v12 = vmax.f32 %v6146_v10, %v2538_v21  ;;  %v1867_v2 = vadd.f32 %v5405_v22, %v1866_v44  ;;  %v2669_v6 = vmax.f32 %v2387_v14, 0.0  ;;  %v1882_v44 = vpop.f32.mrb[123].mxu0  ;;  %v6160_v10 = vld [vmem:[#allocation92_spill] sm:$0xff] }
 0x21e   :  { %v2794_v19 = vmax.f32 %v6147_v51, %v2666_v9  ;;  %3178 = vst.msk [vmem:[#allocation8 + $0xcc] sm:$0xf] %vm3126_vm3, %v3583_v40  ;;  %v3581_v42 = vpack.c.bf16 %v2855_v36, %v2855_v36  ;;  %v2379_v62 = vadd.f32 %v5405_v22, %v2378_v41  ;;  %v6149_v4 = vmax.f32 %v6148_v58, 0.0  ;;  %v2394_v41 = vpop.f32.mrb[123].mxu1 }
 0x21f   :  { %v2860_v34 = vmax.f32 %v2732_v37, %v2796_v29  ;;  %v2539_v25 = vmax.f32 %v1867_v2, 0.0  ;;  %v1888_v26 = vadd.f32 %v5405_v22, %v3852_v47  ;;  %v6151_v48 = vmax.f32 %v6150_v16, 0.0  ;;  %v3984_v58 = vpop.f32.mrb[124].mxu1 }
 0x220   :  { %v2858_v28 = vmax.f32 %v2730_v12, %v2794_v19  ;;  %v2733_v1 = vmax.f32 %v6149_v4, %v2541_v57  ;;  %3176 = vst.msk [vmem:[#allocation8 + $0xc4] sm:$0xf] %vm3126_vm3, %v3581_v42  ;;  %v2667_v33 = vmax.f32 %v2379_v62, 0.0  ;;  %v2400_v46 = vadd.f32 %v5405_v22, %v3980_v52  ;;  %v6164_v4 = vld [vmem:[#allocation94_spill] sm:$0xff] }
 0x221   :  { %v3586_v30 = vpack.c.bf16 %v2860_v34, %v2860_v34  ;;  %v2797_v3 = vmax.f32 %v6151_v48, %v2669_v6  ;;  %v6153_v63 = vmax.f32 %v6152_v60, 0.0  ;;  %v2544_v17 = vmax.f32 %v1888_v26, 0.0  ;;  %v6162_v6 = vld [vmem:[#allocation93_spill] sm:$0xff]  ;;  %v6166_v26 = vld [vmem:[#allocation95_spill] sm:$0xff] }
 0x222   :  { %v3584_v55 = vpack.c.bf16 %v2858_v28, %v2858_v28  ;;  %v1880_v49 = vadd.f32 %v5405_v22, %v1879_v8  ;;  %v6155_v23 = vmax.f32 %v6154_v39, 0.0  ;;  %v2672_v27 = vmax.f32 %v2400_v46, 0.0  ;;  %v3856_v28 = vpop.f32.mrb[124].mxu0 }
 0x223   :  { %v2731_v54 = vmax.f32 %v6153_v63, %v2539_v25  ;;  %3181 = vst.msk [vmem:[#allocation8 + $0xd8] sm:$0xf] %vm3126_vm3, %v3586_v30  ;;  %v2861_v53 = vmax.f32 %v2733_v1, %v2797_v3  ;;  %v2392_v15 = vadd.f32 %v5405_v22, %v2391_v38  ;;  %v6157_v0 = vmax.f32 %v6156_v11, 0.0  ;;  %v1895_v48 = vpop.f32.mrb[125].mxu0  ;;  %v2407_v3 = vpop.f32.mrb[125].mxu1 }
 0x224   :  { %v2795_v20 = vmax.f32 %v6155_v23, %v2667_v33  ;;  %3179 = vst.msk [vmem:[#allocation8 + $0xd0] sm:$0xf] %vm3126_vm3, %v3584_v55  ;;  %v2542_v21 = vmax.f32 %v1880_v49, 0.0  ;;  %v1891_v9 = vadd.f32 %v5405_v22, %v3853_v43  ;;  %v2403_v45 = vadd.f32 %v5405_v22, %v3981_v61  ;;  %v3857_v55 = vpop.f32.mrb[126].mxu0  ;;  %v3985_v60 = vpop.f32.mrb[126].mxu1 }
 0x225   :  { %v2736_v37 = vmax.f32 %v6157_v0, %v2544_v17  ;;  %v3587_v40 = vpack.c.bf16 %v2861_v53, %v2861_v53  ;;  %v6159_v18 = vmax.f32 %v6158_v13, 0.0  ;;  %v2670_v14 = vmax.f32 %v2392_v15, 0.0  ;;  %v1898_v53 = vpop.f32.mrb[127].mxu0  ;;  %v2410_v39 = vpop.f32.mrb[127].mxu1 }
 0x226   :  { %v2859_v36 = vmax.f32 %v2731_v54, %v2795_v20  ;;  %v6161_v12 = vmax.f32 %v6160_v10, 0.0  ;;  %v2545_v19 = vmax.f32 %v1891_v9, 0.0  ;;  %v2673_v57 = vmax.f32 %v2403_v45, 0.0  ;;  %v6168_v54 = vld [vmem:[#allocation96_spill] sm:$0xff]  ;;  %v6170_v20 = vld [vmem:[#allocation97_spill] sm:$0xff] }
 0x227   :  { %v2800_v29 = vmax.f32 %v6159_v18, %v2672_v27  ;;  %v1883_v2 = vadd.f32 %v5405_v22, %v1882_v44  ;;  %3182 = vst.msk [vmem:[#allocation8 + $0xdc] sm:$0xf] %vm3126_vm3, %v3587_v40  ;;  %v6163_v62 = vmax.f32 %v6162_v6, 0.0  ;;  %v2395_v52 = vadd.f32 %v5405_v22, %v2394_v41  ;;  %v6174_v18 = vld [vmem:[#allocation99_spill] sm:$0xff] }
 0x228   :  { %v2734_v51 = vmax.f32 %v6161_v12, %v2542_v21  ;;  %v3585_v42 = vpack.c.bf16 %v2859_v36, %v2859_v36  ;;  %v6165_v1 = vmax.f32 %v6164_v4, 0.0  ;;  %v6167_v8 = vmax.f32 %v6166_v26, 0.0  ;;  %v6172_v21 = vld [vmem:[#allocation98_spill] sm:$0xff] }
 0x229   :  { %v2864_v34 = vmax.f32 %v2736_v37, %v2800_v29  ;;  %v2798_v47 = vmax.f32 %v6163_v62, %v2670_v14  ;;  %v2543_v30 = vmax.f32 %v1883_v2, 0.0  ;;  %v1904_v16 = vadd.f32 %v5405_v22, %v3856_v28 }
 0x22a   :  { %v2737_v25 = vmax.f32 %v6165_v1, %v2545_v19  ;;  %v2801_v38 = vmax.f32 %v6167_v8, %v2673_v57  ;;  %3180 = vst.msk [vmem:[#allocation8 + $0xd4] sm:$0xf] %vm3126_vm3, %v3585_v42  ;;  %v2671_v43 = vmax.f32 %v2395_v52, 0.0  ;;  %v2416_v61 = vadd.f32 %v5405_v22, %v3984_v58 }
 0x22b   :  { %v3590_v33 = vpack.c.bf16 %v2864_v34, %v2864_v34  ;;  %v2862_v46 = vmax.f32 %v2734_v51, %v2798_v47  ;;  %v6169_v17 = vmax.f32 %v6168_v54, 0.0  ;;  %v2548_v44 = vmax.f32 %v1904_v16, 0.0 }
 0x22c   :  { %v2865_v63 = vmax.f32 %v2737_v25, %v2801_v38  ;;  %v1896_v41 = vadd.f32 %v5405_v22, %v1895_v48  ;;  %v6171_v27 = vmax.f32 %v6170_v20, 0.0  ;;  %v2676_v11 = vmax.f32 %v2416_v61, 0.0 }
 0x22d   :  { %v2735_v49 = vmax.f32 %v6169_v17, %v2543_v30  ;;  %3185 = vst.msk [vmem:[#allocation8 + $0xe8] sm:$0xf] %vm3126_vm3, %v3590_v33  ;;  %v3588_v23 = vpack.c.bf16 %v2862_v46, %v2862_v46  ;;  %v2408_v0 = vadd.f32 %v5405_v22, %v2407_v3  ;;  %v6173_v9 = vmax.f32 %v6172_v21, 0.0 }
 0x22e   :  { %v2799_v15 = vmax.f32 %v6171_v27, %v2671_v43  ;;  %v3591_v37 = vpack.c.bf16 %v2865_v63, %v2865_v63  ;;  %v2546_v40 = vmax.f32 %v1896_v41, 0.0  ;;  %v1907_v36 = vadd.f32 %v5405_v22, %v3857_v55 }
 0x22f   :  { %v2740_v45 = vmax.f32 %v6173_v9, %v2548_v44  ;;  %3183 = vst.msk [vmem:[#allocation8 + $0xe0] sm:$0xf] %vm3126_vm3, %v3588_v23  ;;  %v6175_v29 = vmax.f32 %v6174_v18, 0.0  ;;  %v2674_v10 = vmax.f32 %v2408_v0, 0.0  ;;  %v2419_v12 = vadd.f32 %v5405_v22, %v3985_v60 }
 0x230   :  { %v2863_v13 = vmax.f32 %v2735_v49, %v2799_v15  ;;  %3186 = vst.msk [vmem:[#allocation8 + $0xec] sm:$0xf] %vm3126_vm3, %v3591_v37  ;;  %v2738_v51 = vmax.f32 %v2482_v7, %v2546_v40  ;;  %v2549_v19 = vmax.f32 %v1907_v36, 0.0  ;;  %v1899_v57 = vadd.f32 %v5405_v22, %v1898_v53 }
 0x231   :  { %v2804_v14 = vmax.f32 %v6175_v29, %v2676_v11  ;;  %v2411_v2 = vadd.f32 %v5405_v22, %v2410_v39  ;;  %v2802_v6 = vmax.f32 %v2610_v32, %v2674_v10  ;;  %v2677_v62 = vmax.f32 %v2419_v12, 0.0 }
 0x232   :  { %v3589_v42 = vpack.c.bf16 %v2863_v13, %v2863_v13  ;;  %v2611_v47 = vmax.f32 %v5352_v50, 0.0  ;;  %v2741_v52 = vmax.f32 %v2485_v56, %v2549_v19  ;;  %v2547_v28 = vmax.f32 %v1899_v57, 0.0 }
 0x233   :  { %v2868_v34 = vmax.f32 %v2740_v45, %v2804_v14  ;;  %v2675_v58 = vmax.f32 %v2411_v2, 0.0  ;;  %v2866_v7 = vmax.f32 %v2738_v51, %v2802_v6  ;;  %v6176_v4 = vmax.f32 %v5289_v35, 0.0 }
 0x234   :  { %3184 = vst.msk [vmem:[#allocation8 + $0xe4] sm:$0xf] %vm3126_vm3, %v3589_v42  ;;  %v6177_v1 = vmax.f32 %v5348_v5, 0.0 }
 0x235   :  { %v3594_v31 = vpack.c.bf16 %v2868_v34, %v2868_v34  ;;  %v2805_v22 = vmax.f32 %v6176_v4, %v2677_v62  ;;  %v2803_v59 = vmax.f32 %v2611_v47, %v2675_v58  ;;  %v3592_v32 = vpack.c.bf16 %v2866_v7, %v2866_v7 }
 0x236   :  { %v2739_v25 = vmax.f32 %v6177_v1, %v2547_v28 }
 0x237   :  { %3189 = vst.msk [vmem:[#allocation8 + $0xf8] sm:$0xf] %vm3126_vm3, %v3594_v31  ;;  %v2869_v50 = vmax.f32 %v2741_v52, %v2805_v22  ;;  %3187 = vst.msk [vmem:[#allocation8 + $0xf0] sm:$0xf] %vm3126_vm3, %v3592_v32 }
 0x238   :  { %v2867_v24 = vmax.f32 %v2739_v25, %v2803_v59 }
 0x239   :  { %v3595_v56 = vpack.c.bf16 %v2869_v50, %v2869_v50 }
 0x23a   :  { %v3593_v26 = vpack.c.bf16 %v2867_v24, %v2867_v24 }
 0x23b   :  { %3190 = vst.msk [vmem:[#allocation8 + $0xfc] sm:$0xf] %vm3126_vm3, %v3595_v56 }
 0x23c   :  { %3188 = vst.msk [vmem:[#allocation8 + $0xf4] sm:$0xf] %vm3126_vm3, %v3593_v26 }
 0x23d   :  { %4205 = shalt.err (!%p4202_p0)
}
 0x23e   :  { %s4206_s28 = scalar_lea.hbm %s5751_s3, 4096 }
 0x23f   :  { %p4207_p1 = scmp.ne.s32.totalorder %s5751_s3, %s4206_s28  ;;  %p4210_p2 = scmp.lt.u32.totalorder %s4206_s28, %s5751_s3 }
 0x241   :  { %p4212_p3 = pnand %p4210_p2, %p4207_p1 }
 0x243   :  { %4215 = shalt.err (!%p4212_p3)
}
 0x244   :  { %3202 = dma.vmem_to_hbm [thread:$0]  %s3197_s22, 4096, %s5751_s3, [#allocation4], %s4224_s24, %s4224_s24, %s4225_s25  }
 0x245   :  { %4220 = dma.done.wait [#allocation4], 4096  }
 0x246   :  { %4221 = vsyncadd [#allocation4], 4294963200 }
 0x247   :  { %3206 = vsyncpa [#allocation3], 1 }
 0x248   :  { %3207 = vsyncpa [#allocation6], 1 }
 0x249   :  { %3208 = vsyncpa [#allocation4], 1 }

// kernel: polynomial_network_forward.4
= control target key start
LH: loop header
LB: loop body
LE: loop exit
PB: predicated region body
PF: predicated region fallthrough
CT: control target
= control target key end

     0   :  { %8 = vsyncpa [#allocation3], 0  ;;  %s1644_s0 = inlined_call_operand.hbm [shape: bf16[4,128,144], index: 0, kind: input, shape index: {}]   ;;  %s1645_s1 = inlined_call_operand.hbm [shape: bf16[144,32], index: 1, kind: input, shape index: {}]   ;;  %s1646_s2 = inlined_call_operand.hbm [shape: f32[1,32], index: 2, kind: input, shape index: {}]   ;;  %s1647_s3 = inlined_call_operand.hbm [shape: f32[128,32], index: 3, kind: output, shape index: {}]  }
   0x1   :  { %9 = vsyncpa [#allocation6], 0 }
   0x2   :  { %10 = vsyncpa [#allocation4], 0  ;;  %s1351_s12 = smov [#allocation5]   ;;  %s1257_s16 = scalar_lea.hbm %s1645_s1, 1152 }
   0x3   :  { %s28_s13 = sshll.u32 %s1351_s12, 4  ;;  %p1258_p0 = scmp.ne.s32.totalorder %s1645_s1, %s1257_s16  ;;  %s29_s13 = int_to_ptr.vmem [resolvable:$true] %s28_s13 }
   0x4   :  { %p1261_p1 = scmp.lt.u32.totalorder %s1257_s16, %s1645_s1 }
   0x6   :  { %p1263_p2 = pnand %p1261_p1, %p1258_p0 }
   0x8   :  { %1266 = shalt.err (!%p1263_p2)
}
   0x9   :  { %s1267_s21 = scalar_lea.vmem %s29_s13, 1152  ;;  %p1272_p4 = scmp.lt.s32.totalorder %s29_s13, %s29_s13 }
   0xa   :  { %p1268_p3 = scmp.ne.s32.totalorder %s29_s13, %s1267_s21  ;;  %p1273_p5 = scmp.lt.s32.totalorder %s1267_s21, %s1267_s21 }
   0xc   :  { %p1274_p6 = por %p1273_p5, %p1272_p4 }
   0xe   :  { %p1275_p7 = pnand %p1274_p6, %p1268_p3 }
  0x10   :  { %1278 = shalt.err (!%p1275_p7)
}
  0x11   :  { %s1352_s22 = smov 64   ;;  %s1353_s23 = smov 4  }
  0x12   :  { %34 = dma.hbm_to_vmem [thread:$0]  %s1645_s1, 1152, %s29_s13, [#allocation6], %s1352_s22, %s1352_s22, %s1353_s23  }
  0x13   :  { %s1354_s26 = smov [#allocation2]   ;;  %s1279_s30 = scalar_lea.hbm %s1644_s0, 8192 }
  0x14   :  { %s16_s27 = sshll.u32 %s1354_s26, 4  ;;  %p1280_p8 = scmp.ne.s32.totalorder %s1644_s0, %s1279_s30  ;;  %s17_s27 = int_to_ptr.vmem [resolvable:$true] %s16_s27 }
  0x15   :  { %p1283_p9 = scmp.lt.u32.totalorder %s1279_s30, %s1644_s0 }
  0x17   :  { %p1285_p10 = pnand %p1283_p9, %p1280_p8 }
  0x19   :  { %1288 = shalt.err (!%p1285_p10)
}
  0x1a   :  { %s1289_s8 = scalar_lea.vmem %s17_s27, 8192  ;;  %p1294_p12 = scmp.lt.s32.totalorder %s17_s27, %s17_s27 }
  0x1b   :  { %p1290_p11 = scmp.ne.s32.totalorder %s17_s27, %s1289_s8  ;;  %p1295_p13 = scmp.lt.s32.totalorder %s1289_s8, %s1289_s8 }
  0x1d   :  { %p1296_p0 = por %p1295_p13, %p1294_p12 }
  0x1f   :  { %p1297_p1 = pnand %p1296_p0, %p1290_p11 }
  0x21   :  { %1300 = shalt.err (!%p1297_p1)
}
  0x22   :  { %s1355_s1 = smov 128   ;;  %s1356_s9 = smov 8  }
  0x23   :  { %22 = dma.hbm_to_vmem [thread:$0]  %s1644_s0, 8192, %s17_s27, [#allocation3], %s1355_s1, %s1355_s1, %s1356_s9  }
  0x24   :  { %s1357_s12 = smov [#allocation7]   ;;  %s1301_s16 = scalar_lea.hbm %s1646_s2, 16 }
  0x25   :  { %s41_s13 = sshll.u32 %s1357_s12, 4  ;;  %p1302_p2 = scmp.ne.s32.totalorder %s1646_s2, %s1301_s16  ;;  %s42_s13 = int_to_ptr.vmem [resolvable:$true] %s41_s13 }
  0x26   :  { %p1305_p3 = scmp.lt.u32.totalorder %s1301_s16, %s1646_s2 }
  0x28   :  { %p1307_p4 = pnand %p1305_p3, %p1302_p2 }
  0x2a   :  { %1310 = shalt.err (!%p1307_p4)
}
  0x2b   :  { %s1311_s21 = scalar_lea.vmem %s42_s13, 16  ;;  %s1315_s0 = scalar_lea.vmem %s42_s13, 32 }
  0x2c   :  { %p1312_p5 = scmp.ne.s32.totalorder %s42_s13, %s1311_s21  ;;  %p1316_p6 = scmp.lt.s32.totalorder %s42_s13, %s42_s13 }
  0x2d   :  { %p1317_p7 = scmp.lt.s32.totalorder %s1315_s0, %s1311_s21 }
  0x2f   :  { %p1318_p8 = por %p1317_p7, %p1316_p6 }
  0x31   :  { %p1319_p9 = pnand %p1318_p8, %p1312_p5 }
  0x33   :  { %1322 = shalt.err (!%p1319_p9)
}
  0x34   :  { %44 = dma.hbm_to_vmem [thread:$0]  %s1646_s2, 16, %s42_s13, [#allocation6]  }
  0x35   :  { %1345 = dma.done.wait [#allocation3], 8192  }
  0x36   :  { %1346 = vsyncadd [#allocation3], 4294959104 }
  0x37   :  { %1347 = dma.done.wait [#allocation6], 1168  }
  0x38   :  { %1348 = vsyncadd [#allocation6], 4294966128  ;;  %v1358_v0 = vmov 0   ;;  %v1152_v1 = vld [vmem:[#allocation5] sm:$0xff]   ;;  %v1153_v2 = vld [vmem:[#allocation5 + $0x8] sm:$0xff]   ;;  %vm486_vm0 = vcmask 130048  }
  0x39   :  { %583 = vmatprep.subr.bf16.mxu0 %v1358_v0  ;;  %1125 = vmatprep.subr.bf16.mxu1 %v1358_v0  ;;  %v1154_v3 = vld [vmem:[#allocation5 + $0x10] sm:$0xff]   ;;  %v1155_v4 = vld [vmem:[#allocation5 + $0x18] sm:$0xff]   ;;  %v1163_v5 = vld [vmem:[#allocation2 + $0x4] ss:$8 sps:$4 sm:$0xff]   ;;  %vm984_vm1 = vcmask 261120   ;;  %s1359_s2 = smov [#allocation8]  }
  0x3a   :  { %584 = vmatpush1.bf16.msra.mxu0 %v1152_v1  ;;  %1134 = vmatpush1.bf16.msra.mxu1 %v1152_v1  ;;  %v1166_v6 = vld [vmem:[#allocation2 + $0x104] ss:$8 sps:$4 sm:$0xff]   ;;  %v1158_v9 = vld [vmem:[#allocation5 + $0x30] sm:$0xff]   ;;  %v1159_v10 = vld [vmem:[#allocation5 + $0x38] sm:$0xff]   ;;  %s1006_s24 = sshll.u32 %s1359_s2, 4  ;;  %s1007_s24 = int_to_ptr.vmem [resolvable:$true] %s1006_s24 }
  0x3b   :  { %585 = vmatprep.subr.bf16.mxu0 %v1358_v0  ;;  %1126 = vmatprep.subr.bf16.mxu1 %v1358_v0  ;;  %v1156_v7 = vld [vmem:[#allocation5 + $0x20] sm:$0xff]   ;;  %v1157_v8 = vld [vmem:[#allocation5 + $0x28] sm:$0xff]   ;;  %v1167_v14 = vld [vmem:[#allocation2 + $0x14] ss:$8 sps:$4 sm:$0xff]   ;;  %s1323_s25 = scalar_lea.vmem %s1007_s24, 2048  ;;  %p1328_p11 = scmp.lt.s32.totalorder %s1007_s24, %s1007_s24 }
  0x3c   :  { %1093 = vmatprep.mubr.msk.bf16.mxu0 %vm486_vm0, %v1163_v5  ;;  %1109 = vmatprep.mubr.msk.bf16.mxu1 %vm486_vm0, %v1166_v6  ;;  %v1160_v11 = vld [vmem:[#allocation5 + $0x40] sm:$0xff]   ;;  %v1169_v15 = vld [vmem:[#allocation2 + $0x114] ss:$8 sps:$4 sm:$0xff]   ;;  %v1171_v16 = vld [vmem:[#allocation2 + $0x10] ss:$8 sps:$4 sm:$0xff]   ;;  %p1324_p10 = scmp.ne.s32.totalorder %s1007_s24, %s1323_s25  ;;  %p1329_p12 = scmp.lt.s32.totalorder %s1323_s25, %s1323_s25 }
  0x3d   :  { %v1161_v12 = vld [vmem:[#allocation2] ss:$8 sps:$4 sm:$0xff]   ;;  %v1172_v17 = vld [vmem:[#allocation2 + $0x110] ss:$8 sps:$4 sm:$0xff]   ;;  %v1173_v18 = vld [vmem:[#allocation2 + $0x24] ss:$8 sps:$4 sm:$0xff]  }
  0x3e   :  { %586 = vmatpush1.bf16.msra.mxu0 %v1153_v2  ;;  %1135 = vmatpush1.bf16.msra.mxu1 %v1153_v2  ;;  %v1164_v13 = vld [vmem:[#allocation2 + $0x100] ss:$8 sps:$4 sm:$0xff]   ;;  %v1175_v19 = vld [vmem:[#allocation2 + $0x124] ss:$8 sps:$4 sm:$0xff]   ;;  %v1179_v22 = vld [vmem:[#allocation2 + $0x34] ss:$8 sps:$4 sm:$0xff]   ;;  %p1330_p13 = por %p1329_p12, %p1328_p11 }
  0x3f   :  { %587 = vmatprep.subr.bf16.mxu0 %v1358_v0  ;;  %1127 = vmatprep.subr.bf16.mxu1 %v1358_v0  ;;  %v1177_v20 = vld [vmem:[#allocation2 + $0x20] ss:$8 sps:$4 sm:$0xff]   ;;  %v1181_v23 = vld [vmem:[#allocation2 + $0x134] ss:$8 sps:$4 sm:$0xff]   ;;  %v1183_v24 = vld [vmem:[#allocation2 + $0x30] ss:$8 sps:$4 sm:$0xff]  }
  0x40   :  { %v1178_v21 = vld [vmem:[#allocation2 + $0x120] ss:$8 sps:$4 sm:$0xff]   ;;  %v1184_v25 = vld [vmem:[#allocation2 + $0x130] ss:$8 sps:$4 sm:$0xff]   ;;  %v1185_v26 = vld [vmem:[#allocation2 + $0x44] ss:$8 sps:$4 sm:$0xff]   ;;  %p1331_p0 = pnand %p1330_p13, %p1324_p10 }
  0x41   :  { %v1187_v27 = vld [vmem:[#allocation2 + $0x144] ss:$8 sps:$4 sm:$0xff]   ;;  %v1189_v28 = vld [vmem:[#allocation2 + $0x40] ss:$8 sps:$4 sm:$0xff]   ;;  %v1191_v30 = vld [vmem:[#allocation2 + $0x54] ss:$8 sps:$4 sm:$0xff]  }
  0x42   :  { %588 = vmatpush1.bf16.msra.mxu0 %v1154_v3  ;;  %1136 = vmatpush1.bf16.msra.mxu1 %v1154_v3  ;;  %v1190_v29 = vld [vmem:[#allocation2 + $0x140] ss:$8 sps:$4 sm:$0xff]   ;;  %v1193_v31 = vld [vmem:[#allocation2 + $0x154] ss:$8 sps:$4 sm:$0xff]   ;;  %v1195_v32 = vld [vmem:[#allocation2 + $0x50] ss:$8 sps:$4 sm:$0xff]  }
  0x43   :  { %589 = vmatprep.subr.bf16.mxu0 %v1358_v0  ;;  %1128 = vmatprep.subr.bf16.mxu1 %v1358_v0  ;;  %v1196_v33 = vld [vmem:[#allocation2 + $0x150] ss:$8 sps:$4 sm:$0xff]   ;;  %v1197_v34 = vld [vmem:[#allocation2 + $0x64] ss:$8 sps:$4 sm:$0xff]   ;;  %v1201_v36 = vld [vmem:[#allocation2 + $0x60] ss:$8 sps:$4 sm:$0xff]  }
  0x44   :  { %v1199_v35 = vld [vmem:[#allocation2 + $0x164] ss:$8 sps:$4 sm:$0xff]   ;;  %v1202_v37 = vld [vmem:[#allocation2 + $0x160] ss:$8 sps:$4 sm:$0xff]   ;;  %v1203_v38 = vld [vmem:[#allocation2 + $0x74] ss:$8 sps:$4 sm:$0xff]  }
  0x45   :  { %v1205_v39 = vld [vmem:[#allocation2 + $0x174] ss:$8 sps:$4 sm:$0xff]   ;;  %v1207_v40 = vld [vmem:[#allocation2 + $0x70] ss:$8 sps:$4 sm:$0xff]   ;;  %v1209_v42 = vld [vmem:[#allocation2 + $0x84] ss:$8 sps:$4 sm:$0xff]  }
  0x46   :  { %590 = vmatpush1.bf16.msra.mxu0 %v1155_v4  ;;  %1137 = vmatpush1.bf16.msra.mxu1 %v1155_v4  ;;  %v1208_v41 = vld [vmem:[#allocation2 + $0x170] ss:$8 sps:$4 sm:$0xff]   ;;  %v1211_v43 = vld [vmem:[#allocation2 + $0x184] ss:$8 sps:$4 sm:$0xff]   ;;  %v1213_v44 = vld [vmem:[#allocation2 + $0x80] ss:$8 sps:$4 sm:$0xff]  }
  0x47   :  { %591 = vmatprep.subr.bf16.mxu0 %v1358_v0  ;;  %1129 = vmatprep.subr.bf16.mxu1 %v1358_v0  ;;  %v1214_v45 = vld [vmem:[#allocation2 + $0x180] ss:$8 sps:$4 sm:$0xff]   ;;  %v1215_v46 = vld [vmem:[#allocation2 + $0x94] ss:$8 sps:$4 sm:$0xff]   ;;  %v1219_v48 = vld [vmem:[#allocation2 + $0x90] ss:$8 sps:$4 sm:$0xff]  }
  0x48   :  { %v1217_v47 = vld [vmem:[#allocation2 + $0x194] ss:$8 sps:$4 sm:$0xff]   ;;  %v1220_v49 = vld [vmem:[#allocation2 + $0x190] ss:$8 sps:$4 sm:$0xff]   ;;  %v1221_v50 = vld [vmem:[#allocation2 + $0xa4] ss:$8 sps:$4 sm:$0xff]  }
  0x49   :  { %v1223_v51 = vld [vmem:[#allocation2 + $0x1a4] ss:$8 sps:$4 sm:$0xff]   ;;  %v1225_v52 = vld [vmem:[#allocation2 + $0xa0] ss:$8 sps:$4 sm:$0xff]   ;;  %v1227_v54 = vld [vmem:[#allocation2 + $0xb4] ss:$8 sps:$4 sm:$0xff]  }
  0x4a   :  { %592 = vmatpush1.bf16.msra.mxu0 %v1156_v7  ;;  %1138 = vmatpush1.bf16.msra.mxu1 %v1156_v7  ;;  %v1226_v53 = vld [vmem:[#allocation2 + $0x1a0] ss:$8 sps:$4 sm:$0xff]   ;;  %v1229_v55 = vld [vmem:[#allocation2 + $0x1b4] ss:$8 sps:$4 sm:$0xff]   ;;  %v1231_v56 = vld [vmem:[#allocation2 + $0xb0] ss:$8 sps:$4 sm:$0xff]  }
  0x4b   :  { %593 = vmatprep.subr.bf16.mxu0 %v1358_v0  ;;  %1130 = vmatprep.subr.bf16.mxu1 %v1358_v0  ;;  %v1232_v57 = vld [vmem:[#allocation2 + $0x1b0] ss:$8 sps:$4 sm:$0xff]   ;;  %v1233_v58 = vld [vmem:[#allocation2 + $0xc4] ss:$8 sps:$4 sm:$0xff]   ;;  %v1237_v60 = vld [vmem:[#allocation2 + $0xc0] ss:$8 sps:$4 sm:$0xff]  }
  0x4c   :  { %v1235_v59 = vld [vmem:[#allocation2 + $0x1c4] ss:$8 sps:$4 sm:$0xff]   ;;  %v1238_v61 = vld [vmem:[#allocation2 + $0x1c0] ss:$8 sps:$4 sm:$0xff]   ;;  %v1239_v62 = vld [vmem:[#allocation2 + $0xd4] ss:$8 sps:$4 sm:$0xff]  }
  0x4d   :  { %v1241_v63 = vld [vmem:[#allocation2 + $0x1d4] ss:$8 sps:$4 sm:$0xff]   ;;  %v1244_v1 = vld [vmem:[#allocation2 + $0x1d0] ss:$8 sps:$4 sm:$0xff]   ;;  %v1245_v2 = vld [vmem:[#allocation2 + $0xe4] ss:$8 sps:$4 sm:$0xff]  }
  0x4e   :  { %594 = vmatpush1.bf16.msra.mxu0 %v1157_v8  ;;  %1139 = vmatpush1.bf16.msra.mxu1 %v1157_v8  ;;  %v1247_v3 = vld [vmem:[#allocation2 + $0x1e4] ss:$8 sps:$4 sm:$0xff]   ;;  %v1249_v4 = vld [vmem:[#allocation2 + $0xe0] ss:$8 sps:$4 sm:$0xff]   ;;  %v1251_v6 = vld [vmem:[#allocation2 + $0xf4] ss:$8 sps:$4 sm:$0xff]  }
  0x4f   :  { %595 = vmatprep.subr.bf16.mxu0 %v1358_v0  ;;  %1131 = vmatprep.subr.bf16.mxu1 %v1358_v0  ;;  %v1250_v5 = vld [vmem:[#allocation2 + $0x1e0] ss:$8 sps:$4 sm:$0xff]   ;;  %v1253_v7 = vld [vmem:[#allocation2 + $0x1f4] ss:$8 sps:$4 sm:$0xff]   ;;  %v1255_v8 = vld [vmem:[#allocation2 + $0xf0] ss:$8 sps:$4 sm:$0xff]  }
  0x52   :  { %596 = vmatpush1.bf16.msra.mxu0 %v1158_v9  ;;  %1140 = vmatpush1.bf16.msra.mxu1 %v1158_v9  ;;  %v1256_v9 = vld [vmem:[#allocation2 + $0x1f0] ss:$8 sps:$4 sm:$0xff]  }
  0x53   :  { %597 = vmatprep.subr.bf16.mxu0 %v1358_v0  ;;  %1132 = vmatprep.subr.bf16.mxu1 %v1358_v0 }
  0x56   :  { %598 = vmatpush1.bf16.msra.mxu0 %v1159_v10  ;;  %1141 = vmatpush1.bf16.msra.mxu1 %v1159_v10 }
  0x57   :  { %599 = vmatprep.subr.bf16.mxu0 %v1358_v0  ;;  %1133 = vmatprep.subr.bf16.mxu1 %v1358_v0  ;;  %v1243_v0 = vld [vmem:[#allocation2 + $0xd0] ss:$8 sps:$4 sm:$0xff]  }
  0x5a   :  { %600 = vmatpush1.bf16.msra.mxu0 %v1160_v11  ;;  %1142 = vmatpush1.bf16.msra.mxu1 %v1160_v11 }
  0x5d   :  { %616 = vmatmul.mubr.bf16.vlgmr.msra.gmra.mrb[0].mxu0 %v1161_v12  ;;  %744 = vmatmul.mubr.bf16.vlgmr.msra.gmra.mrb[0].mxu1 %v1164_v13 }
  0x5e   :  { %1094 = vmatprep.mubr.msk.bf16.mxu0 %vm486_vm0, %v1167_v14  ;;  %1110 = vmatprep.mubr.msk.bf16.mxu1 %vm486_vm0, %v1169_v15 }
  0x65   :  { %624 = vmatmul.mubr.bf16.gmra.mrb[4].mxu0 %v1171_v16  ;;  %752 = vmatmul.mubr.bf16.gmra.mrb[4].mxu1 %v1172_v17 }
  0x66   :  { %1095 = vmatprep.mubr.msk.bf16.mxu0 %vm486_vm0, %v1173_v18  ;;  %1111 = vmatprep.mubr.msk.bf16.mxu1 %vm486_vm0, %v1175_v19 }
  0x6d   :  { %632 = vmatmul.mubr.bf16.gmra.mrb[8].mxu0 %v1177_v20  ;;  %760 = vmatmul.mubr.bf16.gmra.mrb[8].mxu1 %v1178_v21 }
  0x6e   :  { %1096 = vmatprep.mubr.msk.bf16.mxu0 %vm486_vm0, %v1179_v22  ;;  %1112 = vmatprep.mubr.msk.bf16.mxu1 %vm486_vm0, %v1181_v23 }
  0x75   :  { %640 = vmatmul.mubr.bf16.gmra.mrb[12].mxu0 %v1183_v24  ;;  %768 = vmatmul.mubr.bf16.gmra.mrb[12].mxu1 %v1184_v25 }
  0x76   :  { %1097 = vmatprep.mubr.msk.bf16.mxu0 %vm486_vm0, %v1185_v26  ;;  %1113 = vmatprep.mubr.msk.bf16.mxu1 %vm486_vm0, %v1187_v27 }
  0x7d   :  { %648 = vmatmul.mubr.bf16.gmra.mrb[16].mxu0 %v1189_v28  ;;  %776 = vmatmul.mubr.bf16.gmra.mrb[16].mxu1 %v1190_v29 }
  0x7e   :  { %1098 = vmatprep.mubr.msk.bf16.mxu0 %vm486_vm0, %v1191_v30  ;;  %1114 = vmatprep.mubr.msk.bf16.mxu1 %vm486_vm0, %v1193_v31 }
  0x85   :  { %656 = vmatmul.mubr.bf16.gmra.mrb[20].mxu0 %v1195_v32  ;;  %784 = vmatmul.mubr.bf16.gmra.mrb[20].mxu1 %v1196_v33 }
  0x86   :  { %1099 = vmatprep.mubr.msk.bf16.mxu0 %vm486_vm0, %v1197_v34  ;;  %1115 = vmatprep.mubr.msk.bf16.mxu1 %vm486_vm0, %v1199_v35 }
  0x8d   :  { %664 = vmatmul.mubr.bf16.gmra.mrb[24].mxu0 %v1201_v36  ;;  %792 = vmatmul.mubr.bf16.gmra.mrb[24].mxu1 %v1202_v37 }
  0x8e   :  { %1100 = vmatprep.mubr.msk.bf16.mxu0 %vm486_vm0, %v1203_v38  ;;  %1116 = vmatprep.mubr.msk.bf16.mxu1 %vm486_vm0, %v1205_v39 }
  0x95   :  { %672 = vmatmul.mubr.bf16.gmra.mrb[28].mxu0 %v1207_v40  ;;  %800 = vmatmul.mubr.bf16.gmra.mrb[28].mxu1 %v1208_v41 }
  0x96   :  { %1101 = vmatprep.mubr.msk.bf16.mxu0 %vm486_vm0, %v1209_v42  ;;  %1117 = vmatprep.mubr.msk.bf16.mxu1 %vm486_vm0, %v1211_v43 }
  0x9d   :  { %680 = vmatmul.mubr.bf16.gmra.mrb[32].mxu0 %v1213_v44  ;;  %808 = vmatmul.mubr.bf16.gmra.mrb[32].mxu1 %v1214_v45 }
  0x9e   :  { %1102 = vmatprep.mubr.msk.bf16.mxu0 %vm486_vm0, %v1215_v46  ;;  %1118 = vmatprep.mubr.msk.bf16.mxu1 %vm486_vm0, %v1217_v47 }
  0xa5   :  { %688 = vmatmul.mubr.bf16.gmra.mrb[36].mxu0 %v1219_v48  ;;  %816 = vmatmul.mubr.bf16.gmra.mrb[36].mxu1 %v1220_v49 }
  0xa6   :  { %1103 = vmatprep.mubr.msk.bf16.mxu0 %vm486_vm0, %v1221_v50  ;;  %1119 = vmatprep.mubr.msk.bf16.mxu1 %vm486_vm0, %v1223_v51 }
  0xad   :  { %696 = vmatmul.mubr.bf16.gmra.mrb[40].mxu0 %v1225_v52  ;;  %824 = vmatmul.mubr.bf16.gmra.mrb[40].mxu1 %v1226_v53 }
  0xae   :  { %1104 = vmatprep.mubr.msk.bf16.mxu0 %vm486_vm0, %v1227_v54  ;;  %1120 = vmatprep.mubr.msk.bf16.mxu1 %vm486_vm0, %v1229_v55 }
  0xb5   :  { %704 = vmatmul.mubr.bf16.gmra.mrb[44].mxu0 %v1231_v56  ;;  %832 = vmatmul.mubr.bf16.gmra.mrb[44].mxu1 %v1232_v57 }
  0xb6   :  { %1105 = vmatprep.mubr.msk.bf16.mxu0 %vm486_vm0, %v1233_v58  ;;  %1121 = vmatprep.mubr.msk.bf16.mxu1 %vm486_vm0, %v1235_v59 }
  0xbd   :  { %712 = vmatmul.mubr.bf16.gmra.mrb[48].mxu0 %v1237_v60  ;;  %840 = vmatmul.mubr.bf16.gmra.mrb[48].mxu1 %v1238_v61 }
  0xbe   :  { %1106 = vmatprep.mubr.msk.bf16.mxu0 %vm486_vm0, %v1239_v62  ;;  %1122 = vmatprep.mubr.msk.bf16.mxu1 %vm486_vm0, %v1241_v63 }
  0xc5   :  { %720 = vmatmul.mubr.bf16.gmra.mrb[52].mxu0 %v1243_v0  ;;  %848 = vmatmul.mubr.bf16.gmra.mrb[52].mxu1 %v1244_v1 }
  0xc6   :  { %1107 = vmatprep.mubr.msk.bf16.mxu0 %vm486_vm0, %v1245_v2  ;;  %1123 = vmatprep.mubr.msk.bf16.mxu1 %vm486_vm0, %v1247_v3 }
  0xcd   :  { %728 = vmatmul.mubr.bf16.gmra.mrb[56].mxu0 %v1249_v4  ;;  %856 = vmatmul.mubr.bf16.gmra.mrb[56].mxu1 %v1250_v5 }
  0xce   :  { %1108 = vmatprep.mubr.msk.bf16.mxu0 %vm486_vm0, %v1251_v6  ;;  %1124 = vmatprep.mubr.msk.bf16.mxu1 %vm486_vm0, %v1253_v7 }
  0xd5   :  { %736 = vmatmul.mubr.bf16.gmra.mrb[60].mxu0 %v1255_v8  ;;  %864 = vmatmul.mubr.bf16.gmra.mrb[60].mxu1 %v1256_v9  ;;  %v1515_v8 = vld [vmem:[#allocation7] ss:$0 sm:$0xff] }
 0x130   :  { %v1451_v10 = vpop.f32.mrb[0].mxu0  ;;  %v1453_v11 = vpop.f32.mrb[0].mxu1 }
 0x131   :  { %v619_v12 = vpop.f32.mrb[1].mxu0  ;;  %v747_v13 = vpop.f32.mrb[1].mxu1 }
 0x132   :  { %v1455_v14 = vpop.f32.mrb[2].mxu0  ;;  %v1457_v15 = vpop.f32.mrb[2].mxu1  ;;  %v618_v13 = vadd.f32 %v1515_v8, %v1451_v10 }
 0x133   :  { %v622_v16 = vpop.f32.mrb[3].mxu0  ;;  %v750_v17 = vpop.f32.mrb[3].mxu1 }
 0x134   :  { %v746_v16 = vadd.f32 %v1515_v8, %v1453_v11  ;;  %v621_v17 = vadd.f32 %v1515_v8, %v1455_v14 }
 0x138   :  { %v1459_v18 = vpop.f32.mrb[4].mxu0  ;;  %v1461_v19 = vpop.f32.mrb[4].mxu1 }
 0x139   :  { %v627_v20 = vpop.f32.mrb[5].mxu0  ;;  %v755_v21 = vpop.f32.mrb[5].mxu1 }
 0x13a   :  { %v1463_v22 = vpop.f32.mrb[6].mxu0  ;;  %v1465_v23 = vpop.f32.mrb[6].mxu1  ;;  %v749_v20 = vadd.f32 %v1515_v8, %v1457_v15 }
 0x13b   :  { %v630_v24 = vpop.f32.mrb[7].mxu0  ;;  %v758_v25 = vpop.f32.mrb[7].mxu1 }
 0x140   :  { %v1467_v26 = vpop.f32.mrb[8].mxu0  ;;  %v1469_v27 = vpop.f32.mrb[8].mxu1 }
 0x141   :  { %v635_v28 = vpop.f32.mrb[9].mxu0  ;;  %v763_v29 = vpop.f32.mrb[9].mxu1 }
 0x142   :  { %v1471_v30 = vpop.f32.mrb[10].mxu0  ;;  %v1473_v31 = vpop.f32.mrb[10].mxu1 }
 0x143   :  { %v638_v32 = vpop.f32.mrb[11].mxu0  ;;  %v766_v33 = vpop.f32.mrb[11].mxu1 }
 0x144   :  { %v872_v33 = vmax.f32 %v618_v13, 0.0 }
 0x148   :  { %v1475_v34 = vpop.f32.mrb[12].mxu0  ;;  %v1477_v35 = vpop.f32.mrb[12].mxu1 }
 0x149   :  { %v643_v36 = vpop.f32.mrb[13].mxu0  ;;  %v771_v37 = vpop.f32.mrb[13].mxu1 }
 0x14a   :  { %v1479_v38 = vpop.f32.mrb[14].mxu0  ;;  %v1481_v39 = vpop.f32.mrb[14].mxu1  ;;  %v904_v36 = vmax.f32 %v746_v16, 0.0 }
 0x14b   :  { %v646_v40 = vpop.f32.mrb[15].mxu0  ;;  %v774_v41 = vpop.f32.mrb[15].mxu1 }
 0x150   :  { %v1483_v42 = vpop.f32.mrb[16].mxu0  ;;  %v1485_v43 = vpop.f32.mrb[16].mxu1 }
 0x151   :  { %v651_v44 = vpop.f32.mrb[17].mxu0  ;;  %v779_v45 = vpop.f32.mrb[17].mxu1 }
 0x152   :  { %v1487_v46 = vpop.f32.mrb[18].mxu0  ;;  %v1489_v47 = vpop.f32.mrb[18].mxu1  ;;  %v873_v45 = vmax.f32 %v621_v17, 0.0 }
 0x153   :  { %v654_v48 = vpop.f32.mrb[19].mxu0  ;;  %v782_v49 = vpop.f32.mrb[19].mxu1 }
 0x154   :  { %v905_v48 = vmax.f32 %v749_v20, 0.0 }
 0x158   :  { %v1491_v50 = vpop.f32.mrb[20].mxu0  ;;  %v1493_v51 = vpop.f32.mrb[20].mxu1 }
 0x159   :  { %v659_v52 = vpop.f32.mrb[21].mxu0  ;;  %v787_v53 = vpop.f32.mrb[21].mxu1 }
 0x15a   :  { %v1495_v54 = vpop.f32.mrb[22].mxu0  ;;  %v1497_v55 = vpop.f32.mrb[22].mxu1 }
 0x15b   :  { %v662_v56 = vpop.f32.mrb[23].mxu0  ;;  %v790_v57 = vpop.f32.mrb[23].mxu1 }
 0x15c   :  { %v626_v57 = vadd.f32 %v1515_v8, %v1459_v18 }
 0x15e   :  { %v874_v20 = vmax.f32 %v626_v57, 0.0 }
 0x160   :  { %v1499_v58 = vpop.f32.mrb[24].mxu0  ;;  %v1501_v59 = vpop.f32.mrb[24].mxu1 }
 0x161   :  { %v667_v60 = vpop.f32.mrb[25].mxu0  ;;  %v795_v61 = vpop.f32.mrb[25].mxu1 }
 0x162   :  { %v1503_v62 = vpop.f32.mrb[26].mxu0  ;;  %v1505_v63 = vpop.f32.mrb[26].mxu1  ;;  %v754_v60 = vadd.f32 %v1515_v8, %v1461_v19 }
 0x163   :  { %v670_v0 = vpop.f32.mrb[27].mxu0  ;;  %v798_v1 = vpop.f32.mrb[27].mxu1 }
 0x168   :  { %v1507_v2 = vpop.f32.mrb[28].mxu0  ;;  %v1509_v3 = vpop.f32.mrb[28].mxu1 }
 0x169   :  { %v675_v4 = vpop.f32.mrb[29].mxu0  ;;  %v803_v5 = vpop.f32.mrb[29].mxu1 }
 0x16a   :  { %v1511_v6 = vpop.f32.mrb[30].mxu0  ;;  %v1513_v7 = vpop.f32.mrb[30].mxu1  ;;  %v629_v4 = vadd.f32 %v1515_v8, %v1463_v22  ;;  %v757_v5 = vadd.f32 %v1515_v8, %v1465_v23 }
 0x16b   :  { %v678_v9 = vpop.f32.mrb[31].mxu0  ;;  %v806_v12 = vpop.f32.mrb[31].mxu1 }
 0x170   :  { %v681_v21 = vpop.f32.mrb[32].mxu0  ;;  %v809_v24 = vpop.f32.mrb[32].mxu1 }
 0x171   :  { %v682_v25 = vadd.f32 %v1515_v8, %v681_v21  ;;  %v810_v28 = vadd.f32 %v1515_v8, %v809_v24  ;;  %v683_v29 = vpop.f32.mrb[33].mxu0  ;;  %v811_v32 = vpop.f32.mrb[33].mxu1  ;;  %v906_v21 = vmax.f32 %v754_v60, 0.0 }
 0x172   :  { %v684_v10 = vpop.f32.mrb[34].mxu0  ;;  %v812_v37 = vpop.f32.mrb[34].mxu1 }
 0x173   :  { %v888_v40 = vmax.f32 %v682_v25, 0.0  ;;  %v920_v11 = vmax.f32 %v810_v28, 0.0  ;;  %v685_v41 = vadd.f32 %v1515_v8, %v684_v10  ;;  %v813_v14 = vadd.f32 %v1515_v8, %v812_v37  ;;  %v686_v44 = vpop.f32.mrb[35].mxu0  ;;  %v814_v15 = vpop.f32.mrb[35].mxu1 }
 0x174   :  { %v907_v10 = vmax.f32 %v757_v5, 0.0  ;;  %v762_v44 = vadd.f32 %v1515_v8, %v1469_v27 }
 0x175   :  { %v936_v49 = vmax.f32 %v872_v33, %v888_v40  ;;  %v952_v52 = vmax.f32 %v904_v36, %v920_v11  ;;  %v889_v53 = vmax.f32 %v685_v41, 0.0  ;;  %v921_v56 = vmax.f32 %v813_v14, 0.0 }
 0x176   :  { %v875_v36 = vmax.f32 %v629_v4, 0.0  ;;  %v634_v14 = vadd.f32 %v1515_v8, %v1467_v26 }
 0x177   :  { %v968_v61 = vmax.f32 %v936_v49, %v952_v52  ;;  %v937_v0 = vmax.f32 %v873_v45, %v889_v53  ;;  %v953_v1 = vmax.f32 %v905_v48, %v921_v56  ;;  %v637_v49 = vadd.f32 %v1515_v8, %v1471_v30 }
 0x178   :  { %v689_v9 = vpop.f32.mrb[36].mxu0  ;;  %v817_v12 = vpop.f32.mrb[36].mxu1  ;;  %v765_v52 = vadd.f32 %v1515_v8, %v1473_v31 }
 0x179   :  { %985 = vst.msk [vmem:[#allocation8] sm:$0xff] %vm984_vm1, %v968_v61  ;;  %v969_v13 = vmax.f32 %v937_v0, %v953_v1  ;;  %v690_v18 = vadd.f32 %v1515_v8, %v689_v9  ;;  %v818_v16 = vadd.f32 %v1515_v8, %v817_v12  ;;  %v691_v19 = vpop.f32.mrb[37].mxu0  ;;  %v819_v17 = vpop.f32.mrb[37].mxu1  ;;  %v876_v0 = vmax.f32 %v634_v14, 0.0 }
 0x17a   :  { %v692_v24 = vpop.f32.mrb[38].mxu0  ;;  %v820_v25 = vpop.f32.mrb[38].mxu1  ;;  %v908_v1 = vmax.f32 %v762_v44, 0.0  ;;  %v909_v19 = vmax.f32 %v765_v52, 0.0 }
 0x17b   :  { %986 = vst.msk [vmem:[#allocation8 + $0x8] sm:$0xff] %vm984_vm1, %v969_v13  ;;  %v890_v22 = vmax.f32 %v690_v18, 0.0  ;;  %v922_v28 = vmax.f32 %v818_v16, 0.0  ;;  %v693_v23 = vadd.f32 %v1515_v8, %v692_v24  ;;  %v821_v29 = vadd.f32 %v1515_v8, %v820_v25  ;;  %v694_v32 = vpop.f32.mrb[39].mxu0  ;;  %v822_v33 = vpop.f32.mrb[39].mxu1 }
 0x17c   :  { %v877_v16 = vmax.f32 %v637_v49, 0.0  ;;  %v642_v25 = vadd.f32 %v1515_v8, %v1475_v34  ;;  %v645_v32 = vadd.f32 %v1515_v8, %v1479_v38  ;;  %v773_v33 = vadd.f32 %v1515_v8, %v1481_v39 }
 0x17d   :  { %v938_v37 = vmax.f32 %v874_v20, %v890_v22  ;;  %v954_v40 = vmax.f32 %v906_v21, %v922_v28  ;;  %v891_v11 = vmax.f32 %v693_v23, 0.0  ;;  %v923_v41 = vmax.f32 %v821_v29, 0.0 }
 0x17e   :  { %v770_v22 = vadd.f32 %v1515_v8, %v1477_v35 }
 0x17f   :  { %v970_v15 = vmax.f32 %v938_v37, %v954_v40  ;;  %v939_v45 = vmax.f32 %v875_v36, %v891_v11  ;;  %v955_v48 = vmax.f32 %v907_v10, %v923_v41  ;;  %v878_v41 = vmax.f32 %v642_v25, 0.0 }
 0x180   :  { %v697_v53 = vpop.f32.mrb[40].mxu0  ;;  %v825_v56 = vpop.f32.mrb[40].mxu1  ;;  %v910_v14 = vmax.f32 %v770_v22, 0.0 }
 0x181   :  { %987 = vst.msk [vmem:[#allocation8 + $0x10] sm:$0xff] %vm984_vm1, %v970_v15  ;;  %v971_v57 = vmax.f32 %v939_v45, %v955_v48  ;;  %v698_v60 = vadd.f32 %v1515_v8, %v697_v53  ;;  %v826_v26 = vadd.f32 %v1515_v8, %v825_v56  ;;  %v699_v61 = vpop.f32.mrb[41].mxu0  ;;  %v827_v27 = vpop.f32.mrb[41].mxu1  ;;  %v879_v53 = vmax.f32 %v645_v32, 0.0 }
 0x182   :  { %v700_v4 = vpop.f32.mrb[42].mxu0  ;;  %v828_v5 = vpop.f32.mrb[42].mxu1  ;;  %v911_v56 = vmax.f32 %v773_v33, 0.0  ;;  %v650_v27 = vadd.f32 %v1515_v8, %v1483_v42 }
 0x183   :  { %988 = vst.msk [vmem:[#allocation8 + $0x18] sm:$0xff] %vm984_vm1, %v971_v57  ;;  %v892_v30 = vmax.f32 %v698_v60, 0.0  ;;  %v924_v9 = vmax.f32 %v826_v26, 0.0  ;;  %v701_v31 = vadd.f32 %v1515_v8, %v700_v4  ;;  %v829_v12 = vadd.f32 %v1515_v8, %v828_v5  ;;  %v702_v13 = vpop.f32.mrb[43].mxu0  ;;  %v830_v18 = vpop.f32.mrb[43].mxu1 }
 0x185   :  { %v940_v17 = vmax.f32 %v876_v0, %v892_v30  ;;  %v956_v20 = vmax.f32 %v908_v1, %v924_v9  ;;  %v893_v21 = vmax.f32 %v701_v31, 0.0  ;;  %v925_v24 = vmax.f32 %v829_v12, 0.0 }
 0x186   :  { %v778_v0 = vadd.f32 %v1515_v8, %v1485_v43  ;;  %v653_v30 = vadd.f32 %v1515_v8, %v1487_v46  ;;  %v781_v9 = vadd.f32 %v1515_v8, %v1489_v47 }
 0x187   :  { %v972_v28 = vmax.f32 %v940_v17, %v956_v20  ;;  %v941_v23 = vmax.f32 %v877_v16, %v893_v21  ;;  %v957_v29 = vmax.f32 %v909_v19, %v925_v24  ;;  %v880_v19 = vmax.f32 %v650_v27, 0.0 }
 0x188   :  { %v705_v36 = vpop.f32.mrb[44].mxu0  ;;  %v833_v10 = vpop.f32.mrb[44].mxu1  ;;  %v912_v17 = vmax.f32 %v778_v0, 0.0 }
 0x189   :  { %989 = vst.msk [vmem:[#allocation8 + $0x20] sm:$0xff] %vm984_vm1, %v972_v28  ;;  %v973_v37 = vmax.f32 %v941_v23, %v957_v29  ;;  %v706_v40 = vadd.f32 %v1515_v8, %v705_v36  ;;  %v834_v34 = vadd.f32 %v1515_v8, %v833_v10  ;;  %v707_v11 = vpop.f32.mrb[45].mxu0  ;;  %v835_v35 = vpop.f32.mrb[45].mxu1  ;;  %v881_v23 = vmax.f32 %v653_v30, 0.0 }
 0x18a   :  { %v708_v44 = vpop.f32.mrb[46].mxu0  ;;  %v836_v15 = vpop.f32.mrb[46].mxu1  ;;  %v913_v29 = vmax.f32 %v781_v9, 0.0  ;;  %v666_v30 = vadd.f32 %v1515_v8, %v1499_v58  ;;  %v794_v9 = vadd.f32 %v1515_v8, %v1501_v59 }
 0x18b   :  { %990 = vst.msk [vmem:[#allocation8 + $0x28] sm:$0xff] %vm984_vm1, %v973_v37  ;;  %v894_v38 = vmax.f32 %v706_v40, 0.0  ;;  %v926_v45 = vmax.f32 %v834_v34, 0.0  ;;  %v709_v39 = vadd.f32 %v1515_v8, %v708_v44  ;;  %v837_v48 = vadd.f32 %v1515_v8, %v836_v15  ;;  %v710_v49 = vpop.f32.mrb[47].mxu0  ;;  %v838_v52 = vpop.f32.mrb[47].mxu1 }
 0x18c   :  { %v658_v37 = vadd.f32 %v1515_v8, %v1491_v50  ;;  %v786_v40 = vadd.f32 %v1515_v8, %v1493_v51 }
 0x18d   :  { %v942_v57 = vmax.f32 %v878_v41, %v894_v38  ;;  %v958_v60 = vmax.f32 %v910_v14, %v926_v45  ;;  %v895_v26 = vmax.f32 %v709_v39, 0.0  ;;  %v927_v61 = vmax.f32 %v837_v48, 0.0 }
 0x18e   :  { %v661_v41 = vadd.f32 %v1515_v8, %v1495_v54  ;;  %v789_v14 = vadd.f32 %v1515_v8, %v1497_v55  ;;  %v882_v48 = vmax.f32 %v658_v37, 0.0  ;;  %v914_v49 = vmax.f32 %v786_v40, 0.0 }
 0x18f   :  { %v974_v1 = vmax.f32 %v942_v57, %v958_v60  ;;  %v943_v4 = vmax.f32 %v879_v53, %v895_v26  ;;  %v959_v5 = vmax.f32 %v911_v56, %v927_v61  ;;  %v674_v40 = vadd.f32 %v1515_v8, %v1507_v2 }
 0x190   :  { %v713_v31 = vpop.f32.mrb[48].mxu0  ;;  %v841_v12 = vpop.f32.mrb[48].mxu1  ;;  %v883_v61 = vmax.f32 %v661_v41, 0.0  ;;  %v915_v27 = vmax.f32 %v789_v14, 0.0  ;;  %v677_v14 = vadd.f32 %v1515_v8, %v1511_v6 }
 0x191   :  { %991 = vst.msk [vmem:[#allocation8 + $0x30] sm:$0xff] %vm984_vm1, %v974_v1  ;;  %v975_v13 = vmax.f32 %v943_v4, %v959_v5  ;;  %v714_v18 = vadd.f32 %v1515_v8, %v713_v31  ;;  %v842_v42 = vadd.f32 %v1515_v8, %v841_v12  ;;  %v715_v16 = vpop.f32.mrb[49].mxu0  ;;  %v843_v43 = vpop.f32.mrb[49].mxu1 }
 0x192   :  { %v716_v20 = vpop.f32.mrb[50].mxu0  ;;  %v844_v21 = vpop.f32.mrb[50].mxu1 }
 0x193   :  { %992 = vst.msk [vmem:[#allocation8 + $0x38] sm:$0xff] %vm984_vm1, %v975_v13  ;;  %v896_v46 = vmax.f32 %v714_v18, 0.0  ;;  %v928_v24 = vmax.f32 %v842_v42, 0.0  ;;  %v717_v47 = vadd.f32 %v1515_v8, %v716_v20  ;;  %v845_v25 = vadd.f32 %v1515_v8, %v844_v21  ;;  %v718_v22 = vpop.f32.mrb[51].mxu0  ;;  %v846_v28 = vpop.f32.mrb[51].mxu1 }
 0x194   :  { %v669_v18 = vadd.f32 %v1515_v8, %v1503_v62  ;;  %v797_v42 = vadd.f32 %v1515_v8, %v1505_v63  ;;  %v884_v21 = vmax.f32 %v666_v30, 0.0 }
 0x195   :  { %v944_v32 = vmax.f32 %v880_v19, %v896_v46  ;;  %v960_v33 = vmax.f32 %v912_v17, %v928_v24  ;;  %v897_v36 = vmax.f32 %v717_v47, 0.0  ;;  %v929_v10 = vmax.f32 %v845_v25, 0.0 }
 0x196   :  { %v916_v46 = vmax.f32 %v794_v9, 0.0 }
 0x197   :  { %v976_v34 = vmax.f32 %v944_v32, %v960_v33  ;;  %v945_v11 = vmax.f32 %v881_v23, %v897_v36  ;;  %v961_v35 = vmax.f32 %v913_v29, %v929_v10  ;;  %v885_v29 = vmax.f32 %v669_v18, 0.0 }
 0x198   :  { %v721_v44 = vpop.f32.mrb[52].mxu0  ;;  %v849_v15 = vpop.f32.mrb[52].mxu1  ;;  %v917_v32 = vmax.f32 %v797_v42, 0.0 }
 0x199   :  { %993 = vst.msk [vmem:[#allocation8 + $0x40] sm:$0xff] %vm984_vm1, %v976_v34  ;;  %v977_v38 = vmax.f32 %v945_v11, %v961_v35  ;;  %v722_v45 = vadd.f32 %v1515_v8, %v721_v44  ;;  %v850_v50 = vadd.f32 %v1515_v8, %v849_v15  ;;  %v723_v39 = vpop.f32.mrb[53].mxu0  ;;  %v851_v51 = vpop.f32.mrb[53].mxu1  ;;  %v802_v34 = vadd.f32 %v1515_v8, %v1509_v3 }
 0x19a   :  { %v724_v52 = vpop.f32.mrb[54].mxu0  ;;  %v852_v53 = vpop.f32.mrb[54].mxu1  ;;  %v805_v44 = vadd.f32 %v1515_v8, %v1513_v7  ;;  %v886_v51 = vmax.f32 %v674_v40, 0.0 }
 0x19b   :  { %994 = vst.msk [vmem:[#allocation8 + $0x48] sm:$0xff] %vm984_vm1, %v977_v38  ;;  %v898_v54 = vmax.f32 %v722_v45, 0.0  ;;  %v930_v56 = vmax.f32 %v850_v50, 0.0  ;;  %v725_v55 = vadd.f32 %v1515_v8, %v724_v52  ;;  %v853_v57 = vadd.f32 %v1515_v8, %v852_v53  ;;  %v726_v60 = vpop.f32.mrb[55].mxu0  ;;  %v854_v26 = vpop.f32.mrb[55].mxu1 }
 0x19c   :  { %v919_v60 = vmax.f32 %v805_v44, 0.0 }
 0x19d   :  { %v946_v0 = vmax.f32 %v882_v48, %v898_v54  ;;  %v962_v1 = vmax.f32 %v914_v49, %v930_v56  ;;  %v899_v4 = vmax.f32 %v725_v55, 0.0  ;;  %v931_v5 = vmax.f32 %v853_v57, 0.0 }
 0x19e   :  { %v918_v48 = vmax.f32 %v802_v34, 0.0  ;;  %v887_v57 = vmax.f32 %v677_v14, 0.0 }
 0x19f   :  { %v978_v31 = vmax.f32 %v946_v0, %v962_v1  ;;  %v947_v12 = vmax.f32 %v883_v61, %v899_v4  ;;  %v963_v13 = vmax.f32 %v915_v27, %v931_v5 }
 0x1a0   :  { %v729_v16 = vpop.f32.mrb[56].mxu0  ;;  %v857_v43 = vpop.f32.mrb[56].mxu1 }
 0x1a1   :  { %995 = vst.msk [vmem:[#allocation8 + $0x50] sm:$0xff] %vm984_vm1, %v978_v31  ;;  %v979_v19 = vmax.f32 %v947_v12, %v963_v13  ;;  %v730_v17 = vadd.f32 %v1515_v8, %v729_v16  ;;  %v858_v58 = vadd.f32 %v1515_v8, %v857_v43  ;;  %v731_v20 = vpop.f32.mrb[57].mxu0  ;;  %v859_v59 = vpop.f32.mrb[57].mxu1 }
 0x1a2   :  { %v732_v24 = vpop.f32.mrb[58].mxu0  ;;  %v860_v47 = vpop.f32.mrb[58].mxu1 }
 0x1a3   :  { %996 = vst.msk [vmem:[#allocation8 + $0x58] sm:$0xff] %vm984_vm1, %v979_v19  ;;  %v900_v62 = vmax.f32 %v730_v17, 0.0  ;;  %v932_v25 = vmax.f32 %v858_v58, 0.0  ;;  %v733_v63 = vadd.f32 %v1515_v8, %v732_v24  ;;  %v861_v22 = vadd.f32 %v1515_v8, %v860_v47  ;;  %v734_v28 = vpop.f32.mrb[59].mxu0  ;;  %v862_v23 = vpop.f32.mrb[59].mxu1 }
 0x1a5   :  { %v948_v33 = vmax.f32 %v884_v21, %v900_v62  ;;  %v964_v36 = vmax.f32 %v916_v46, %v932_v25  ;;  %v901_v10 = vmax.f32 %v733_v63, 0.0  ;;  %v933_v37 = vmax.f32 %v861_v22, 0.0 }
 0x1a7   :  { %v980_v11 = vmax.f32 %v948_v33, %v964_v36  ;;  %v949_v35 = vmax.f32 %v885_v29, %v901_v10  ;;  %v965_v41 = vmax.f32 %v917_v32, %v933_v37 }
 0x1a8   :  { %v737_v15 = vpop.f32.mrb[60].mxu0  ;;  %v865_v38 = vpop.f32.mrb[60].mxu1 }
 0x1a9   :  { %997 = vst.msk [vmem:[#allocation8 + $0x60] sm:$0xff] %vm984_vm1, %v980_v11  ;;  %v981_v45 = vmax.f32 %v949_v35, %v965_v41  ;;  %v738_v50 = vadd.f32 %v1515_v8, %v737_v15  ;;  %v866_v2 = vadd.f32 %v1515_v8, %v865_v38  ;;  %v739_v39 = vpop.f32.mrb[61].mxu0  ;;  %v867_v3 = vpop.f32.mrb[61].mxu1 }
 0x1aa   :  { %v740_v49 = vpop.f32.mrb[62].mxu0  ;;  %v868_v52 = vpop.f32.mrb[62].mxu1 }
 0x1ab   :  { %998 = vst.msk [vmem:[#allocation8 + $0x68] sm:$0xff] %vm984_vm1, %v981_v45  ;;  %v902_v6 = vmax.f32 %v738_v50, 0.0  ;;  %v934_v53 = vmax.f32 %v866_v2, 0.0  ;;  %v741_v7 = vadd.f32 %v1515_v8, %v740_v49  ;;  %v869_v54 = vadd.f32 %v1515_v8, %v868_v52  ;;  %v742_v56 = vpop.f32.mrb[63].mxu0  ;;  %v870_v55 = vpop.f32.mrb[63].mxu1 }
 0x1ad   :  { %v950_v26 = vmax.f32 %v886_v51, %v902_v6  ;;  %v966_v61 = vmax.f32 %v918_v48, %v934_v53  ;;  %v903_v27 = vmax.f32 %v741_v7, 0.0  ;;  %v935_v0 = vmax.f32 %v869_v54, 0.0 }
 0x1af   :  { %v982_v1 = vmax.f32 %v950_v26, %v966_v61  ;;  %v951_v4 = vmax.f32 %v887_v57, %v903_v27  ;;  %v967_v5 = vmax.f32 %v919_v60, %v935_v0 }
 0x1b1   :  { %999 = vst.msk [vmem:[#allocation8 + $0x70] sm:$0xff] %vm984_vm1, %v982_v1  ;;  %v983_v30 = vmax.f32 %v951_v4, %v967_v5 }
 0x1b3   :  { %1000 = vst.msk [vmem:[#allocation8 + $0x78] sm:$0xff] %vm984_vm1, %v983_v30 }
 0x1b4   :  { %1334 = shalt.err (!%p1331_p0)
}
 0x1b5   :  { %s1335_s28 = scalar_lea.hbm %s1647_s3, 2048 }
 0x1b6   :  { %p1336_p1 = scmp.ne.s32.totalorder %s1647_s3, %s1335_s28  ;;  %p1339_p2 = scmp.lt.u32.totalorder %s1335_s28, %s1647_s3 }
 0x1b8   :  { %p1341_p3 = pnand %p1339_p2, %p1336_p1 }
 0x1ba   :  { %1344 = shalt.err (!%p1341_p3)
}
 0x1bb   :  { %1012 = dma.vmem_to_hbm [thread:$0]  %s1007_s24, 2048, %s1647_s3, [#allocation4], %s1355_s1, %s1355_s1, %s1356_s9  }
 0x1bc   :  { %1349 = dma.done.wait [#allocation4], 2048  }
 0x1bd   :  { %1350 = vsyncadd [#allocation4], 4294965248 }
 0x1be   :  { %1016 = vsyncpa [#allocation3], 1 }
 0x1bf   :  { %1017 = vsyncpa [#allocation6], 1 }
 0x1c0   :  { %1018 = vsyncpa [#allocation4], 1 }

// kernel: polynomial_network_forward.5
= control target key start
LH: loop header
LB: loop body
LE: loop exit
PB: predicated region body
PF: predicated region fallthrough
CT: control target
= control target key end

     0   :  { %16 = vsyncpa [#allocation3], 0  ;;  %s9490_s0 = inlined_call_operand.hbm [shape: f32[2,2048], index: 0, kind: input, shape index: {}]   ;;  %s9491_s1 = inlined_call_operand.hbm [shape: bf16[2048,64], index: 1, kind: input, shape index: {}]   ;;  %s9492_s2 = inlined_call_operand.hbm [shape: bf16[3,2048,64], index: 2, kind: input, shape index: {}]   ;;  %s9493_s3 = inlined_call_operand.hbm [shape: f32[1,64], index: 3, kind: input, shape index: {}]   ;;  %s9494_s4 = inlined_call_operand.hbm [shape: f32[1,64], index: 4, kind: input, shape index: {}]   ;;  %s9495_s5 = inlined_call_operand.hbm [shape: f32[1,64], index: 5, kind: input, shape index: {}]   ;;  %s9496_s6 = inlined_call_operand.hbm [shape: bf16[64,10], index: 6, kind: input, shape index: {}]   ;;  %s9497_s7 = inlined_call_operand.hbm [shape: bf16[3,64,10], index: 7, kind: input, shape index: {}]   ;;  %s9498_s8 = inlined_call_operand.hbm [shape: f32[1,10], index: 8, kind: input, shape index: {}]   ;;  %s9499_s9 = inlined_call_operand.hbm [shape: f32[1,10], index: 9, kind: input, shape index: {}]   ;;  %s9500_s10 = inlined_call_operand.hbm [shape: f32[1,10], index: 10, kind: input, shape index: {}]   ;;  %s9501_s11 = inlined_call_operand.hbm [shape: f32[2,10], index: 11, kind: output, shape index: {}]  }
   0x1   :  { %17 = vsyncpa [#allocation6], 0 }
   0x2   :  { %18 = vsyncpa [#allocation9], 0 }
   0x3   :  { %19 = vsyncpa [#allocation12], 0 }
   0x4   :  { %20 = vsyncpa [#allocation15], 0 }
   0x5   :  { %21 = vsyncpa [#allocation18], 0 }
   0x6   :  { %22 = vsyncpa [#allocation4], 0  ;;  %s8797_s17 = smov [#allocation5]   ;;  %s8519_s21 = scalar_lea.hbm %s9491_s1, 16384 }
   0x7   :  { %s38_s18 = sshll.u32 %s8797_s17, 4  ;;  %p8520_p0 = scmp.ne.s32.totalorder %s9491_s1, %s8519_s21  ;;  %s39_s18 = int_to_ptr.vmem [resolvable:$true] %s38_s18 }
   0x8   :  { %p8523_p1 = scmp.lt.u32.totalorder %s8519_s21, %s9491_s1 }
   0xa   :  { %p8525_p2 = pnand %p8523_p1, %p8520_p0 }
   0xc   :  { %8528 = shalt.err (!%p8525_p2)
}
   0xd   :  { %s8529_s26 = scalar_lea.vmem %s39_s18, 16384  ;;  %p8534_p4 = scmp.lt.s32.totalorder %s39_s18, %s39_s18 }
   0xe   :  { %p8530_p3 = scmp.ne.s32.totalorder %s39_s18, %s8529_s26  ;;  %p8535_p5 = scmp.lt.s32.totalorder %s8529_s26, %s8529_s26 }
  0x10   :  { %p8536_p6 = por %p8535_p5, %p8534_p4 }
  0x12   :  { %p8537_p7 = pnand %p8536_p6, %p8530_p3 }
  0x14   :  { %8540 = shalt.err (!%p8537_p7)
}
  0x15   :  { %s8798_s27 = smov 64   ;;  %s8799_s28 = smov 4  }
  0x16   :  { %44 = dma.hbm_to_vmem [thread:$0]  %s9491_s1, 16384, %s39_s18, [#allocation6], %s8798_s27, %s8798_s27, %s8799_s28  }
  0x17   :  { %s8800_s12 = smov [#allocation8]   ;;  %s8801_s14 = smov [#allocation11]  }
  0x18   :  { %s63_s13 = sshll.u32 %s8800_s12, 4  ;;  %s83_s15 = sshll.u32 %s8801_s14, 4  ;;  %s64_s13 = int_to_ptr.vmem [resolvable:$true] %s63_s13  ;;  %s84_s15 = int_to_ptr.vmem [resolvable:$true] %s83_s15 }
  0x19   :  { %s8541_s19 = scalar_lea.hbm %s9493_s3, 16 }
  0x1a   :  { %p8542_p8 = scmp.ne.s32.totalorder %s9493_s3, %s8541_s19  ;;  %p8545_p9 = scmp.lt.u32.totalorder %s8541_s19, %s9493_s3 }
  0x1c   :  { %p8547_p10 = pnand %p8545_p9, %p8542_p8 }
  0x1e   :  { %8550 = shalt.err (!%p8547_p10)
}
  0x1f   :  { %s8551_s1 = scalar_lea.vmem %s64_s13, 16  ;;  %s8555_s18 = scalar_lea.vmem %s64_s13, 32 }
  0x20   :  { %p8552_p11 = scmp.ne.s32.totalorder %s64_s13, %s8551_s1  ;;  %p8556_p12 = scmp.lt.s32.totalorder %s64_s13, %s64_s13 }
  0x21   :  { %p8557_p13 = scmp.lt.s32.totalorder %s8555_s18, %s8551_s1 }
  0x23   :  { %p8558_p0 = por %p8557_p13, %p8556_p12 }
  0x25   :  { %p8559_p1 = pnand %p8558_p0, %p8552_p11 }
  0x27   :  { %8562 = shalt.err (!%p8559_p1)
}
  0x28   :  { %66 = dma.hbm_to_vmem [thread:$0]  %s9493_s3, 16, %s64_s13, [#allocation9]  }
  0x29   :  { %s8563_s30 = scalar_lea.hbm %s9495_s5, 16 }
  0x2a   :  { %p8564_p2 = scmp.ne.s32.totalorder %s9495_s5, %s8563_s30  ;;  %p8567_p3 = scmp.lt.u32.totalorder %s8563_s30, %s9495_s5 }
  0x2c   :  { %p8569_p4 = pnand %p8567_p3, %p8564_p2 }
  0x2e   :  { %8572 = shalt.err (!%p8569_p4)
}
  0x2f   :  { %s8573_s19 = scalar_lea.vmem %s84_s15, 16  ;;  %s8577_s20 = scalar_lea.vmem %s84_s15, 32 }
  0x30   :  { %p8574_p5 = scmp.ne.s32.totalorder %s84_s15, %s8573_s19  ;;  %p8578_p6 = scmp.lt.s32.totalorder %s84_s15, %s84_s15 }
  0x31   :  { %p8579_p7 = scmp.lt.s32.totalorder %s8577_s20, %s8573_s19 }
  0x33   :  { %p8580_p8 = por %p8579_p7, %p8578_p6 }
  0x35   :  { %p8581_p9 = pnand %p8580_p8, %p8574_p5 }
  0x37   :  { %8584 = shalt.err (!%p8581_p9)
}
  0x38   :  { %86 = dma.hbm_to_vmem [thread:$0]  %s9495_s5, 16, %s84_s15, [#allocation12]  }
  0x39   :  { %s8802_s21 = smov [#allocation14]   ;;  %s8803_s23 = smov [#allocation17]  }
  0x3a   :  { %s104_s22 = sshll.u32 %s8802_s21, 4  ;;  %s127_s1 = sshll.u32 %s8803_s23, 4  ;;  %s105_s22 = int_to_ptr.vmem [resolvable:$true] %s104_s22  ;;  %s128_s1 = int_to_ptr.vmem [resolvable:$true] %s127_s1 }
  0x3b   :  { %s8585_s25 = scalar_lea.hbm %s9497_s7, 1536 }
  0x3c   :  { %p8586_p10 = scmp.ne.s32.totalorder %s9497_s7, %s8585_s25  ;;  %p8589_p11 = scmp.lt.u32.totalorder %s8585_s25, %s9497_s7 }
  0x3e   :  { %p8591_p12 = pnand %p8589_p11, %p8586_p10 }
  0x40   :  { %8594 = shalt.err (!%p8591_p12)
}
  0x41   :  { %s8595_s5 = scalar_lea.vmem %s105_s22, 1536  ;;  %p8600_p0 = scmp.lt.s32.totalorder %s105_s22, %s105_s22 }
  0x42   :  { %p8596_p13 = scmp.ne.s32.totalorder %s105_s22, %s8595_s5  ;;  %p8601_p1 = scmp.lt.s32.totalorder %s8595_s5, %s8595_s5 }
  0x44   :  { %p8602_p2 = por %p8601_p1, %p8600_p0 }
  0x46   :  { %p8603_p3 = pnand %p8602_p2, %p8596_p13 }
  0x48   :  { %8606 = shalt.err (!%p8603_p3)
}
  0x49   :  { %110 = dma.hbm_to_vmem [thread:$0]  %s9497_s7, 1536, %s105_s22, [#allocation15], %s8798_s27, %s8798_s27, %s8799_s28  }
  0x4a   :  { %s8607_s19 = scalar_lea.hbm %s9499_s9, 16 }
  0x4b   :  { %p8608_p4 = scmp.ne.s32.totalorder %s9499_s9, %s8607_s19  ;;  %p8611_p5 = scmp.lt.u32.totalorder %s8607_s19, %s9499_s9 }
  0x4d   :  { %p8613_p6 = pnand %p8611_p5, %p8608_p4 }
  0x4f   :  { %8616 = shalt.err (!%p8613_p6)
}
  0x50   :  { %s8617_s23 = scalar_lea.vmem %s128_s1, 16  ;;  %s8621_s18 = scalar_lea.vmem %s128_s1, 32 }
  0x51   :  { %p8618_p7 = scmp.ne.s32.totalorder %s128_s1, %s8617_s23  ;;  %p8622_p8 = scmp.lt.s32.totalorder %s128_s1, %s128_s1 }
  0x52   :  { %p8623_p9 = scmp.lt.s32.totalorder %s8621_s18, %s8617_s23 }
  0x54   :  { %p8624_p10 = por %p8623_p9, %p8622_p8 }
  0x56   :  { %p8625_p11 = pnand %p8624_p10, %p8618_p7 }
  0x58   :  { %8628 = shalt.err (!%p8625_p11)
}
  0x59   :  { %130 = dma.hbm_to_vmem [thread:$0]  %s9499_s9, 16, %s128_s1, [#allocation18]  }
  0x5a   :  { %s8804_s24 = smov [#allocation2]   ;;  %s8805_s26 = smov [#allocation7]  }
  0x5b   :  { %s29_s25 = sshll.u32 %s8804_s24, 4  ;;  %s50_s29 = sshll.u32 %s8805_s26, 4  ;;  %s30_s25 = int_to_ptr.vmem [resolvable:$true] %s29_s25  ;;  %s51_s29 = int_to_ptr.vmem [resolvable:$true] %s50_s29 }
  0x5c   :  { %s8629_s5 = scalar_lea.hbm %s9490_s0, 512 }
  0x5d   :  { %p8630_p12 = scmp.ne.s32.totalorder %s9490_s0, %s8629_s5  ;;  %p8633_p13 = scmp.lt.u32.totalorder %s8629_s5, %s9490_s0 }
  0x5f   :  { %p8635_p0 = pnand %p8633_p13, %p8630_p12 }
  0x61   :  { %8638 = shalt.err (!%p8635_p0)
}
  0x62   :  { %s8639_s9 = scalar_lea.vmem %s30_s25, 512  ;;  %p8644_p2 = scmp.lt.s32.totalorder %s30_s25, %s30_s25 }
  0x63   :  { %p8640_p1 = scmp.ne.s32.totalorder %s30_s25, %s8639_s9  ;;  %p8645_p3 = scmp.lt.s32.totalorder %s8639_s9, %s8639_s9 }
  0x65   :  { %p8646_p4 = por %p8645_p3, %p8644_p2 }
  0x67   :  { %p8647_p5 = pnand %p8646_p4, %p8640_p1 }
  0x69   :  { %8650 = shalt.err (!%p8647_p5)
}
  0x6a   :  { %32 = dma.hbm_to_vmem [thread:$0]  %s9490_s0, 512, %s30_s25, [#allocation3]  }
  0x6b   :  { %s8651_s13 = scalar_lea.hbm %s9492_s2, 49152 }
  0x6c   :  { %p8652_p6 = scmp.ne.s32.totalorder %s9492_s2, %s8651_s13  ;;  %p8655_p7 = scmp.lt.u32.totalorder %s8651_s13, %s9492_s2 }
  0x6e   :  { %p8657_p8 = pnand %p8655_p7, %p8652_p6 }
  0x70   :  { %8660 = shalt.err (!%p8657_p8)
}
  0x71   :  { %s8661_s22 = scalar_lea.vmem %s51_s29, 49152  ;;  %p8666_p10 = scmp.lt.s32.totalorder %s51_s29, %s51_s29 }
  0x72   :  { %p8662_p9 = scmp.ne.s32.totalorder %s51_s29, %s8661_s22  ;;  %p8667_p11 = scmp.lt.s32.totalorder %s8661_s22, %s8661_s22 }
  0x74   :  { %p8668_p12 = por %p8667_p11, %p8666_p10 }
  0x76   :  { %p8669_p13 = pnand %p8668_p12, %p8662_p9 }
  0x78   :  { %8672 = shalt.err (!%p8669_p13)
}
  0x79   :  { %56 = dma.hbm_to_vmem [thread:$0]  %s9492_s2, 49152, %s51_s29, [#allocation6], %s8798_s27, %s8798_s27, %s8799_s28  }
  0x7a   :  { %s8806_s25 = smov [#allocation10]   ;;  %s8807_s30 = smov [#allocation13]  }
  0x7b   :  { %s73_s26 = sshll.u32 %s8806_s25, 4  ;;  %s92_s12 = sshll.u32 %s8807_s30, 4  ;;  %s74_s26 = int_to_ptr.vmem [resolvable:$true] %s73_s26  ;;  %s93_s12 = int_to_ptr.vmem [resolvable:$true] %s92_s12 }
  0x7c   :  { %s8673_s14 = scalar_lea.hbm %s9494_s4, 16 }
  0x7d   :  { %p8674_p0 = scmp.ne.s32.totalorder %s9494_s4, %s8673_s14  ;;  %p8677_p1 = scmp.lt.u32.totalorder %s8673_s14, %s9494_s4 }
  0x7f   :  { %p8679_p2 = pnand %p8677_p1, %p8674_p0 }
  0x81   :  { %8682 = shalt.err (!%p8679_p2)
}
  0x82   :  { %s8683_s2 = scalar_lea.vmem %s74_s26, 16  ;;  %s8687_s29 = scalar_lea.vmem %s74_s26, 32 }
  0x83   :  { %p8684_p3 = scmp.ne.s32.totalorder %s74_s26, %s8683_s2  ;;  %p8688_p4 = scmp.lt.s32.totalorder %s74_s26, %s74_s26 }
  0x84   :  { %p8689_p5 = scmp.lt.s32.totalorder %s8687_s29, %s8683_s2 }
  0x86   :  { %p8690_p6 = por %p8689_p5, %p8688_p4 }
  0x88   :  { %p8691_p7 = pnand %p8690_p6, %p8684_p3 }
  0x8a   :  { %8694 = shalt.err (!%p8691_p7)
}
  0x8b   :  { %76 = dma.hbm_to_vmem [thread:$0]  %s9494_s4, 16, %s74_s26, [#allocation9]  }
  0x8c   :  { %s8695_s21 = scalar_lea.hbm %s9496_s6, 512 }
  0x8d   :  { %p8696_p8 = scmp.ne.s32.totalorder %s9496_s6, %s8695_s21  ;;  %p8699_p9 = scmp.lt.u32.totalorder %s8695_s21, %s9496_s6 }
  0x8f   :  { %p8701_p10 = pnand %p8699_p9, %p8696_p8 }
  0x91   :  { %8704 = shalt.err (!%p8701_p10)
}
  0x92   :  { %s8705_s0 = scalar_lea.vmem %s93_s12, 512  ;;  %p8710_p12 = scmp.lt.s32.totalorder %s93_s12, %s93_s12 }
  0x93   :  { %p8706_p11 = scmp.ne.s32.totalorder %s93_s12, %s8705_s0  ;;  %p8711_p13 = scmp.lt.s32.totalorder %s8705_s0, %s8705_s0 }
  0x95   :  { %p8712_p0 = por %p8711_p13, %p8710_p12 }
  0x97   :  { %p8713_p1 = pnand %p8712_p0, %p8706_p11 }
  0x99   :  { %8716 = shalt.err (!%p8713_p1)
}
  0x9a   :  { %98 = dma.hbm_to_vmem [thread:$0]  %s9496_s6, 512, %s93_s12, [#allocation12], %s8798_s27, %s8798_s27, %s8799_s28  }
  0x9b   :  { %s8808_s25 = smov [#allocation16]   ;;  %s8809_s30 = smov [#allocation19]  }
  0x9c   :  { %s117_s26 = sshll.u32 %s8808_s25, 4  ;;  %s137_s5 = sshll.u32 %s8809_s30, 4  ;;  %s118_s26 = int_to_ptr.vmem [resolvable:$true] %s117_s26  ;;  %s138_s5 = int_to_ptr.vmem [resolvable:$true] %s137_s5 }
  0x9d   :  { %s8717_s16 = scalar_lea.hbm %s9498_s8, 16 }
  0x9e   :  { %p8718_p2 = scmp.ne.s32.totalorder %s9498_s8, %s8717_s16  ;;  %p8721_p3 = scmp.lt.u32.totalorder %s8717_s16, %s9498_s8 }
  0xa0   :  { %p8723_p4 = pnand %p8721_p3, %p8718_p2 }
  0xa2   :  { %8726 = shalt.err (!%p8723_p4)
}
  0xa3   :  { %s8727_s6 = scalar_lea.vmem %s118_s26, 16  ;;  %s8731_s27 = scalar_lea.vmem %s118_s26, 32 }
  0xa4   :  { %p8728_p5 = scmp.ne.s32.totalorder %s118_s26, %s8727_s6  ;;  %p8732_p6 = scmp.lt.s32.totalorder %s118_s26, %s118_s26 }
  0xa5   :  { %p8733_p7 = scmp.lt.s32.totalorder %s8731_s27, %s8727_s6 }
  0xa7   :  { %p8734_p8 = por %p8733_p7, %p8732_p6 }
  0xa9   :  { %p8735_p9 = pnand %p8734_p8, %p8728_p5 }
  0xab   :  { %8738 = shalt.err (!%p8735_p9)
}
  0xac   :  { %120 = dma.hbm_to_vmem [thread:$0]  %s9498_s8, 16, %s118_s26, [#allocation15]  }
  0xad   :  { %s8739_s20 = scalar_lea.hbm %s9500_s10, 16 }
  0xae   :  { %p8740_p10 = scmp.ne.s32.totalorder %s9500_s10, %s8739_s20  ;;  %p8743_p11 = scmp.lt.u32.totalorder %s8739_s20, %s9500_s10 }
  0xb0   :  { %p8745_p12 = pnand %p8743_p11, %p8740_p10 }
  0xb2   :  { %8748 = shalt.err (!%p8745_p12)
}
  0xb3   :  { %s8749_s18 = scalar_lea.vmem %s138_s5, 16  ;;  %s8753_s7 = scalar_lea.vmem %s138_s5, 32 }
  0xb4   :  { %p8750_p13 = scmp.ne.s32.totalorder %s138_s5, %s8749_s18  ;;  %p8754_p0 = scmp.lt.s32.totalorder %s138_s5, %s138_s5 }
  0xb5   :  { %p8755_p1 = scmp.lt.s32.totalorder %s8753_s7, %s8749_s18 }
  0xb7   :  { %p8756_p2 = por %p8755_p1, %p8754_p0 }
  0xb9   :  { %p8757_p3 = pnand %p8756_p2, %p8750_p13 }
  0xbb   :  { %8760 = shalt.err (!%p8757_p3)
}
  0xbc   :  { %140 = dma.hbm_to_vmem [thread:$0]  %s9500_s10, 16, %s138_s5, [#allocation18]  }
  0xbd   :  { %8783 = dma.done.wait [#allocation3], 512  }
  0xbe   :  { %8784 = vsyncadd [#allocation3], 4294966784 }
  0xbf   :  { %8785 = dma.done.wait [#allocation6], 65536  }
  0xc0   :  { %8786 = vsyncadd [#allocation6], 4294901760 }
  0xc1   :  { %8787 = dma.done.wait [#allocation9], 32  }
  0xc2   :  { %8788 = vsyncadd [#allocation9], 4294967264 }
  0xc3   :  { %8789 = dma.done.wait [#allocation12], 528  }
  0xc4   :  { %8790 = vsyncadd [#allocation12], 4294966768 }
  0xc5   :  { %8791 = dma.done.wait [#allocation15], 1552  }
  0xc6   :  { %8792 = vsyncadd [#allocation15], 4294965744 }
  0xc7   :  { %8793 = dma.done.wait [#allocation18], 32  }
  0xc8   :  { %8794 = vsyncadd [#allocation18], 4294967264  ;;  %v8810_v0 = vmov 1983009808   ;;  %v1218_v2 = vlaneseq  ;;  %v7975_v3 = vld [vmem:[#allocation5 + $0x40] sm:$0xff]   ;;  %v7977_v7 = vld [vmem:[#allocation5 + $0x48] sm:$0xff]  }
  0xc9   :  { %v1216_v1 = vunpack.c.l.s4 %v8810_v0  ;;  %v7976_v4 = vld [vmem:[#allocation5] sm:$0xff]   ;;  %7161 = vmatprep.subr.bf16.mxu1 %v7975_v3  ;;  %v7978_v8 = vld [vmem:[#allocation5 + $0x8] sm:$0xff]   ;;  %v7979_v9 = vld [vmem:[#allocation5 + $0x50] sm:$0xff]   ;;  %vm1402_vm0 = vcmask 1041408   ;;  %vm6185_vm1 = vcmask 517120   ;;  %vm8812_vm2 = vmmov 0  }
  0xca   :  { %v1219_v6 = vshrl.u32 %v1218_v2, 7  ;;  %7162 = vmatpush3.bf16.msra.mxu1 %v7976_v4  ;;  %v7980_v11 = vld [vmem:[#allocation5 + $0x10] sm:$0xff]   ;;  %v7981_v12 = vld [vmem:[#allocation5 + $0x58] sm:$0xff]   ;;  %v9020_v13 = vld [vmem:[#allocation2] sm:$0xff]  ;;  %vm6316_vm3 = vcmask 523264   ;;  %vm6567_vm4 = vcmask 74752  }
  0xcb   :  { %v1217_v5 = vunpack.c.0.s8 %v1216_v1  ;;  %7163 = vmatprep.subr.bf16.mxu1 %v7977_v7  ;;  %v9022_v14 = vld [vmem:[#allocation2 + $0x8] sm:$0xff]  ;;  %v9024_v15 = vld [vmem:[#allocation2 + $0x10] sm:$0xff]  ;;  %v9026_v16 = vld [vmem:[#allocation2 + $0x18] sm:$0xff]  ;;  %v1318_v17 = vcombine.high %v9020_v13, %v9020_v13  ;;  %s8813_s16 = smov [#allocation20]  }
  0xcc   :  { %v1335_v19 = vcombine.high %v9022_v14, %v9022_v14  ;;  %v1352_v21 = vcombine.high %v9024_v15, %v9024_v15  ;;  %v1369_v23 = vcombine.high %v9026_v16, %v9026_v16  ;;  %v7982_v25 = vld [vmem:[#allocation5 + $0x18] sm:$0xff]   ;;  %v7987_v34 = vld [vmem:[#allocation5 + $0x60] sm:$0xff]   ;;  %v7989_v48 = vld [vmem:[#allocation5 + $0x68] sm:$0xff]   ;;  %s6604_s17 = sshll.u32 %s8813_s16, 4  ;;  %s6605_s17 = int_to_ptr.vmem [resolvable:$true] %s6604_s17 }
  0xcd   :  { %v9018_v10 = vsub.s32 %v1217_v5, %v1219_v6  ;;  %v7988_v39 = vld [vmem:[#allocation5 + $0x20] sm:$0xff]   ;;  %v7990_v1 = vld [vmem:[#allocation5 + $0x28] sm:$0xff]   ;;  %v7991_v2 = vld [vmem:[#allocation5 + $0x70] sm:$0xff]   ;;  %s8761_s9 = scalar_lea.vmem %s6605_s17, 32  ;;  %p8766_p7 = scmp.lt.s32.totalorder %s6605_s17, %s6605_s17 }
  0xce   :  { %7164 = vmatpush3.bf16.msra.mxu1 %v7978_v8  ;;  %p8762_p6 = scmp.ne.s32.totalorder %s6605_s17, %s8761_s9  ;;  %p8767_p8 = scmp.lt.s32.totalorder %s8761_s9, %s8761_s9 }
  0xcf   :  { %7165 = vmatprep.subr.bf16.mxu1 %v7979_v9  ;;  %v1325_v18 = vrot.slane %v9020_v13, %v9018_v10  ;;  %v9036_v20 = vrot.slane %v9022_v14, %v9018_v10  ;;  %v9042_v22 = vrot.slane %v9024_v15, %v9018_v10  ;;  %v9048_v24 = vrot.slane %v9026_v16, %v9018_v10 }
  0xd0   :  { %v1332_v26 = vrot.slane %v1318_v17, %v9018_v10  ;;  %v1349_v28 = vrot.slane %v1335_v19, %v9018_v10  ;;  %v9055_v30 = vrot.slane %v1352_v21, %v9018_v10  ;;  %v9060_v32 = vrot.slane %v1369_v23, %v9018_v10  ;;  %p8768_p9 = por %p8767_p8, %p8766_p7 }
  0xd1   :  { %v1333_v27 = vcombine.high %v1325_v18, %v1325_v18  ;;  %v1350_v29 = vcombine.high %v9036_v20, %v9036_v20  ;;  %v1367_v31 = vcombine.high %v9042_v22, %v9042_v22  ;;  %v9064_v33 = vcombine.high %v9048_v24, %v9048_v24 }
  0xd2   :  { %7166 = vmatpush3.bf16.msra.mxu1 %v7980_v11  ;;  %v1334_v35 = vcombine.high %v1332_v26, %v1332_v26  ;;  %v1351_v36 = vcombine.high %v1349_v28, %v1349_v28  ;;  %v1403_v37 = vsel %vm1402_vm0, %v1325_v18, inf  ;;  %v1368_v40 = vcombine.high %v9055_v30, %v9055_v30  ;;  %p8769_p10 = pnand %p8768_p9, %p8762_p6 }
  0xd3   :  { %7167 = vmatprep.subr.bf16.mxu1 %v7981_v12  ;;  %v1404_v38 = vsel %vm1402_vm0, %v1333_v27, inf  ;;  %v9072_v41 = vcombine.high %v9060_v32, %v9060_v32  ;;  %v1405_v42 = vsel %vm1402_vm0, %v1332_v26, inf  ;;  %v1407_v43 = vsel %vm1402_vm0, %v9036_v20, inf  ;;  %v7992_v12 = vld [vmem:[#allocation5 + $0x30] sm:$0xff]  }
  0xd4   :  { %v1406_v44 = vsel %vm1402_vm0, %v1334_v35, inf  ;;  %v1408_v45 = vmin.f32 %v1403_v37, %v1407_v43  ;;  %v1409_v46 = vsel %vm1402_vm0, %v1350_v29, inf  ;;  %v1411_v47 = vsel %vm1402_vm0, %v1349_v28, inf }
  0xd5   :  { %v1410_v49 = vmin.f32 %v1404_v38, %v1409_v46  ;;  %v1412_v50 = vmin.f32 %v1405_v42, %v1411_v47  ;;  %v1413_v51 = vsel %vm1402_vm0, %v1351_v36, inf  ;;  %v1415_v52 = vsel %vm1402_vm0, %v9042_v22, inf  ;;  %v7994_v47 = vld [vmem:[#allocation5 + $0x38] sm:$0xff]  }
  0xd6   :  { %7168 = vmatpush3.bf16.msra.mxu1 %v7982_v25  ;;  %v1414_v53 = vmin.f32 %v1406_v44, %v1413_v51  ;;  %v1416_v54 = vmin.f32 %v1408_v45, %v1415_v52  ;;  %v1417_v55 = vsel %vm1402_vm0, %v1367_v31, inf  ;;  %v1419_v56 = vsel %vm1402_vm0, %v9055_v30, inf  ;;  %v7993_v25 = vld [vmem:[#allocation5 + $0x78] sm:$0xff]  }
  0xd7   :  { %7169 = vmatprep.subr.bf16.mxu1 %v7987_v34  ;;  %v1418_v57 = vmin.f32 %v1410_v49, %v1417_v55  ;;  %v1420_v58 = vmin.f32 %v1412_v50, %v1419_v56  ;;  %v1421_v59 = vsel %vm1402_vm0, %v1368_v40, inf  ;;  %v1423_v60 = vsel %vm1402_vm0, %v9048_v24, inf }
  0xd8   :  { %v1422_v61 = vmin.f32 %v1414_v53, %v1421_v59  ;;  %v1424_v62 = vmin.f32 %v1416_v54, %v1423_v60  ;;  %v1425_v63 = vsel %vm1402_vm0, %v9064_v33, inf  ;;  %v1427_v0 = vsel %vm1402_vm0, %v9060_v32, inf }
  0xd9   :  { %v1426_v3 = vmin.f32 %v1418_v57, %v1425_v63  ;;  %v1428_v4 = vmin.f32 %v1420_v58, %v1427_v0  ;;  %v1429_v5 = vsel %vm1402_vm0, %v9072_v41, inf  ;;  %v1443_v6 = vsel %vm1402_vm0, %v1325_v18, -inf  ;;  %v7996_v58 = vld [vmem:[#allocation5 + $0x80] sm:$0xff]  }
  0xda   :  { %7170 = vmatpush3.bf16.msra.mxu1 %v7988_v39  ;;  %v1430_v7 = vmin.f32 %v1422_v61, %v1429_v5  ;;  %v1444_v8 = vsel %vm1402_vm0, %v1333_v27, -inf  ;;  %v1445_v9 = vsel %vm1402_vm0, %v1332_v26, -inf  ;;  %v1446_v11 = vsel %vm1402_vm0, %v1334_v35, -inf  ;;  %v7998_v61 = vld [vmem:[#allocation5 + $0x88] sm:$0xff]   ;;  %v8011_v63 = vld [vmem:[#allocation5 + $0x140] sm:$0xff]  }
  0xdb   :  { %7171 = vmatprep.subr.bf16.mxu1 %v7989_v48  ;;  %v1431_v17 = vmin.f32 %v1424_v62, %v1426_v3  ;;  %v1447_v19 = vsel %vm1402_vm0, %v9036_v20, -inf  ;;  %v1449_v21 = vsel %vm1402_vm0, %v1350_v29, -inf  ;;  %v1451_v23 = vsel %vm1402_vm0, %v1349_v28, -inf  ;;  %7205 = vmatprep.subr.bf16.mxu0 %v8011_v63  ;;  %v8000_v3 = vld [vmem:[#allocation5 + $0x90] sm:$0xff]   ;;  %v8016_v5 = vld [vmem:[#allocation5 + $0x108] sm:$0xff]  }
  0xdc   :  { %v1432_v34 = vmin.f32 %v1428_v4, %v1430_v7  ;;  %v1448_v18 = vmax.f32 %v1443_v6, %v1447_v19  ;;  %v1450_v37 = vmax.f32 %v1444_v8, %v1449_v21  ;;  %v1452_v38 = vmax.f32 %v1445_v9, %v1451_v23  ;;  %v8015_v4 = vld [vmem:[#allocation5 + $0x148] sm:$0xff]   ;;  %v8001_v6 = vld [vmem:[#allocation5 + $0xd8] sm:$0xff]   ;;  %v8019_v8 = vld [vmem:[#allocation5 + $0x150] sm:$0xff]  }
  0xdd   :  { %v1453_v27 = vsel %vm1402_vm0, %v1351_v36, -inf  ;;  %v1455_v26 = vsel %vm1402_vm0, %v9042_v22, -inf  ;;  %v1457_v35 = vsel %vm1402_vm0, %v1367_v31, -inf  ;;  %v1459_v20 = vsel %vm1402_vm0, %v9055_v30, -inf  ;;  %v8002_v7 = vld [vmem:[#allocation5 + $0x98] sm:$0xff]   ;;  %v8020_v9 = vld [vmem:[#allocation5 + $0x110] sm:$0xff]  }
  0xde   :  { %7172 = vmatpush3.bf16.msra.mxu1 %v7990_v1  ;;  %v1433_v29 = vmin.f32 %v1431_v17, %v1432_v34  ;;  %v1454_v39 = vmax.f32 %v1446_v11, %v1453_v27  ;;  %v1456_v28 = vmax.f32 %v1448_v18, %v1455_v26  ;;  %v1458_v42 = vmax.f32 %v1450_v37, %v1457_v35  ;;  %v8012_v1 = vld [vmem:[#allocation5 + $0x100] sm:$0xff]   ;;  %v8023_v17 = vld [vmem:[#allocation5 + $0x158] sm:$0xff]   ;;  %v8005_v21 = vld [vmem:[#allocation5 + $0xe8] sm:$0xff]  }
  0xdf   :  { %7173 = vmatprep.subr.bf16.mxu1 %v7991_v2  ;;  %v1460_v43 = vmax.f32 %v1452_v38, %v1459_v20  ;;  %v1461_v44 = vsel %vm1402_vm0, %v1368_v40, -inf  ;;  %v1463_v45 = vsel %vm1402_vm0, %v9048_v24, -inf  ;;  %v1465_v36 = vsel %vm1402_vm0, %v9064_v33, -inf  ;;  %v7995_v24 = vld [vmem:[#allocation5 + $0xc0] sm:$0xff]   ;;  %v7999_v2 = vld [vmem:[#allocation5 + $0xd0] sm:$0xff]   ;;  %7206 = vmatpush3.bf16.msra.mxu0 %v8012_v1  ;;  %v8024_v19 = vld [vmem:[#allocation5 + $0x118] sm:$0xff]  }
  0xe0   :  { %1434 = vmin.xlane.f32.xlu0 %v1433_v29  ;;  %v1462_v22 = vmax.f32 %v1454_v39, %v1461_v44  ;;  %v1464_v31 = vmax.f32 %v1456_v28, %v1463_v45  ;;  %v1466_v46 = vmax.f32 %v1458_v42, %v1465_v36  ;;  %v1467_v30 = vsel %vm1402_vm0, %v9060_v32, -inf  ;;  %7207 = vmatprep.subr.bf16.mxu0 %v8015_v4  ;;  %v8003_v11 = vld [vmem:[#allocation5 + $0xe0] sm:$0xff]   ;;  %v8006_v23 = vld [vmem:[#allocation5 + $0xa8] sm:$0xff]   ;;  %v8007_v37 = vld [vmem:[#allocation5 + $0xf0] sm:$0xff]  }
  0xe1   :  { %v1468_v48 = vmax.f32 %v1460_v43, %v1467_v30  ;;  %v1469_v49 = vsel %vm1402_vm0, %v9072_v41, -inf  ;;  %v1206_v40 = vmax.f32 %v9020_v13, 0.0  ;;  %v9121_v53 = vmax.f32 %v9022_v14, 0.0  ;;  %v7997_v14 = vld [vmem:[#allocation5 + $0xc8] sm:$0xff]   ;;  %v8028_v34 = vld [vmem:[#allocation5 + $0x120] sm:$0xff]   ;;  %v8008_v38 = vld [vmem:[#allocation5 + $0xb0] sm:$0xff]  }
  0xe2   :  { %7174 = vmatpush3.bf16.msra.mxu1 %v7992_v12  ;;  %v1470_v50 = vmax.f32 %v1462_v22, %v1469_v49  ;;  %v1471_v51 = vmax.f32 %v1464_v31, %v1466_v46  ;;  %v8004_v12 = vld [vmem:[#allocation5 + $0xa0] sm:$0xff]   ;;  %v8031_v27 = vld [vmem:[#allocation5 + $0x168] sm:$0xff]   ;;  %v9137_v26 = vmax.f32 %v9024_v15, 0.0  ;;  %v8009_v29 = vld [vmem:[#allocation5 + $0xf8] sm:$0xff]  }
  0xe3   :  { %7175 = vmatprep.subr.bf16.mxu1 %v7993_v25  ;;  %v1214_v33 = vcombine.high %v1206_v40, %v1206_v40  ;;  %v1221_v52 = vrot.slane %v1206_v40, %v9018_v10  ;;  %v9128_v13 = vrot.slane %v9121_v53, %v9018_v10  ;;  %7208 = vmatpush3.bf16.msra.mxu0 %v8016_v5  ;;  %v8027_v25 = vld [vmem:[#allocation5 + $0x160] sm:$0xff]   ;;  %v8032_v35 = vld [vmem:[#allocation5 + $0x128] sm:$0xff]   ;;  %v8010_v39 = vld [vmem:[#allocation5 + $0xb8] sm:$0xff]  }
  0xe4   :  { %v1472_v54 = vmax.f32 %v1468_v48, %v1470_v50  ;;  %7209 = vmatprep.subr.bf16.mxu0 %v8019_v8  ;;  %v1231_v18 = vcombine.high %v9121_v53, %v9121_v53  ;;  %v8035_v28 = vld [vmem:[#allocation5 + $0x170] sm:$0xff]   ;;  %v9144_v42 = vrot.slane %v9137_v26, %v9018_v10  ;;  %v8013_v44 = vld [vmem:[#allocation5 + $0x1c0] sm:$0xff]   ;;  %v8039_v22 = vld [vmem:[#allocation5 + $0x178] sm:$0xff]  }
  0xe5   :  { %v1229_v32 = vcombine.high %v1221_v52, %v1221_v52  ;;  %v9124_v55 = vrot.slane %v1214_v33, %v9018_v10  ;;  %v1298_v56 = vpack.c.bf16 %v1221_v52, %v1221_v52  ;;  %v1246_v60 = vcombine.high %v9128_v13, %v9128_v13  ;;  %v8036_v43 = vld [vmem:[#allocation5 + $0x130] sm:$0xff]   ;;  %v8014_v45 = vld [vmem:[#allocation5 + $0x180] sm:$0xff]   ;;  %v8040_v46 = vld [vmem:[#allocation5 + $0x138] sm:$0xff]  }
  0xe6   :  { %7176 = vmatpush3.bf16.msra.mxu1 %v7994_v47  ;;  %v1473_v41 = vmax.f32 %v1471_v51, %v1472_v54  ;;  %v9140_v20 = vrot.slane %v1231_v18, %v9018_v10  ;;  %v1263_v31 = vcombine.high %v9144_v42, %v9144_v42  ;;  %v8017_v47 = vld [vmem:[#allocation5 + $0x1c8] sm:$0xff]   ;;  %v1302_v49 = vpack.c.bf16 %v9128_v13, %v9128_v13  ;;  %v8043_v40 = vld [vmem:[#allocation5 + $0x240] sm:$0xff]   ;;  %v8021_v51 = vld [vmem:[#allocation5 + $0x1d0] sm:$0xff]  }
  0xe7   :  { %7183 = vmatprep.subr.bf16.mxu1 %v7995_v24  ;;  %v1299_v57 = vpack.c.bf16 %v1229_v32, %v1229_v32  ;;  %v1230_v59 = vcombine.high %v9124_v55, %v9124_v55  ;;  %v1303_v0 = vpack.c.bf16 %v1246_v60, %v1246_v60  ;;  %7210 = vmatpush3.bf16.msra.mxu0 %v8020_v9  ;;  %v8018_v48 = vld [vmem:[#allocation5 + $0x188] sm:$0xff]   ;;  %v8044_v50 = vld [vmem:[#allocation5 + $0x200] sm:$0xff]   ;;  %v8022_v33 = vld [vmem:[#allocation5 + $0x190] sm:$0xff]  }
  0xe8   :  { %1474 = vmax.xlane.f32.xlu0 %v1473_v41  ;;  %7211 = vmatprep.subr.bf16.mxu0 %v8023_v17  ;;  %v1247_v15 = vcombine.high %v9140_v20, %v9140_v20  ;;  %v1300_v36 = vpack.c.bf16 %v9124_v55, %v9124_v55  ;;  %v1307_v24 = vpack.c.bf16 %v1263_v31, %v1263_v31  ;;  %v8047_v52 = vld [vmem:[#allocation5 + $0x248] sm:$0xff]   ;;  %v8025_v54 = vld [vmem:[#allocation5 + $0x1d8] sm:$0xff]   ;;  %v8051_v55 = vld [vmem:[#allocation5 + $0x250] sm:$0xff]  }
  0xe9   :  { %2318 = vmatprep.mubr.bf16.mxu1 %v1299_v57  ;;  %v1301_v62 = vpack.c.bf16 %v1230_v59, %v1230_v59  ;;  %2398 = vmatprep.mubr.bf16.mxu0 %v1303_v0  ;;  %v8048_v53 = vld [vmem:[#allocation5 + $0x208] sm:$0xff]   ;;  %v8026_v32 = vld [vmem:[#allocation5 + $0x198] sm:$0xff]   ;;  %v8052_v41 = vld [vmem:[#allocation5 + $0x210] sm:$0xff]   ;;  %v1304_v17 = vpack.c.bf16 %v9140_v20, %v9140_v20 }
  0xea   :  { %2319 = vmatmul.mubr.bf16.vlgmr.msra.gmra.mrb[0].mxu1 %v1298_v56  ;;  %v1305_v30 = vpack.c.bf16 %v1247_v15, %v1247_v15  ;;  %v8029_v56 = vld [vmem:[#allocation5 + $0x1e0] sm:$0xff]   ;;  %v8055_v57 = vld [vmem:[#allocation5 + $0x258] sm:$0xff]   ;;  %v8033_v59 = vld [vmem:[#allocation5 + $0x1e8] sm:$0xff]  }
  0xeb   :  { %7184 = vmatpush3.bf16.msra.mxu1 %v7996_v58  ;;  %2358 = vmatprep.mubr.bf16.mxu1 %v1301_v62  ;;  %v8030_v13 = vld [vmem:[#allocation5 + $0x1a0] sm:$0xff]   ;;  %v8056_v58 = vld [vmem:[#allocation5 + $0x218] sm:$0xff]   ;;  %v1248_v62 = vcombine.high %v9137_v26, %v9137_v26  ;;  %v8037_v63 = vld [vmem:[#allocation5 + $0x1f0] sm:$0xff]  }
  0xec   :  { %7185 = vmatprep.subr.bf16.mxu1 %v7997_v14  ;;  %7212 = vmatpush3.bf16.msra.mxu0 %v8024_v19  ;;  %v8034_v14 = vld [vmem:[#allocation5 + $0x1a8] sm:$0xff]   ;;  %v8059_v60 = vld [vmem:[#allocation5 + $0x260] sm:$0xff]   ;;  %v8038_v0 = vld [vmem:[#allocation5 + $0x1b0] sm:$0xff]  }
  0xed   :  { %7213 = vmatprep.subr.bf16.mxu0 %v8027_v25  ;;  %v8063_v1 = vld [vmem:[#allocation5 + $0x268] sm:$0xff]   ;;  %v9160_v4 = vrot.slane %v1248_v62, %v9018_v10  ;;  %v8041_v5 = vld [vmem:[#allocation5 + $0x1f8] sm:$0xff]   ;;  %v8068_v9 = vld [vmem:[#allocation5 + $0x230] sm:$0xff]  }
  0xee   :  { %v8071_v19 = vld [vmem:[#allocation5 + $0x278] sm:$0xff]   ;;  %v8050_v18 = vld [vmem:[#allocation5 + $0x288] sm:$0xff]   ;;  %v8076_v26 = vld [vmem:[#allocation5 + $0x300] sm:$0xff]  }
  0xef   :  { %7186 = vmatpush3.bf16.msra.mxu1 %v7998_v61  ;;  %v8060_v61 = vld [vmem:[#allocation5 + $0x220] sm:$0xff]   ;;  %v8054_v20 = vld [vmem:[#allocation5 + $0x290] sm:$0xff]   ;;  %v8065_v31 = vld [vmem:[#allocation5 + $0x2e8] sm:$0xff]  }
  0xf0   :  { %7187 = vmatprep.subr.bf16.mxu1 %v7999_v2  ;;  %7214 = vmatpush3.bf16.msra.mxu0 %v8028_v34  ;;  %v9157_v2 = vmax.f32 %v9026_v16, 0.0  ;;  %v1264_v16 = vcombine.high %v9160_v4, %v9160_v4  ;;  %v8049_v34 = vld [vmem:[#allocation5 + $0x2c8] sm:$0xff]   ;;  %v8084_v15 = vld [vmem:[#allocation5 + $0x310] sm:$0xff]   ;;  %v8108_v62 = vld [vmem:[#allocation7] sm:$0xff]  }
  0xf1   :  { %7215 = vmatprep.subr.bf16.mxu0 %v8031_v27 }
  0xf2   :  { %v9164_v8 = vrot.slane %v9157_v2, %v9018_v10  ;;  %v1309_v25 = vpack.c.bf16 %v1264_v16, %v1264_v16  ;;  %v8120_v16 = vld [vmem:[#allocation7 + $0x18] sm:$0xff]  }
  0xf3   :  { %7188 = vmatpush3.bf16.msra.mxu1 %v8000_v3  ;;  %v8064_v3 = vld [vmem:[#allocation5 + $0x228] sm:$0xff]  }
  0xf4   :  { %7189 = vmatprep.subr.bf16.mxu1 %v8001_v6  ;;  %7216 = vmatpush3.bf16.msra.mxu0 %v8032_v35  ;;  %v8042_v6 = vld [vmem:[#allocation5 + $0x1b8] sm:$0xff]   ;;  %v8053_v35 = vld [vmem:[#allocation5 + $0x2d0] sm:$0xff]  }
  0xf5   :  { %7217 = vmatprep.subr.bf16.mxu0 %v8035_v28  ;;  %v8057_v28 = vld [vmem:[#allocation5 + $0x2d8] sm:$0xff]  }
  0xf7   :  { %7190 = vmatpush3.bf16.msra.mxu1 %v8002_v7  ;;  %v8067_v7 = vld [vmem:[#allocation5 + $0x270] sm:$0xff]  }
  0xf8   :  { %7191 = vmatprep.subr.bf16.mxu1 %v8003_v11  ;;  %7218 = vmatpush3.bf16.msra.mxu0 %v8036_v43  ;;  %v8045_v11 = vld [vmem:[#allocation5 + $0x2c0] sm:$0xff]   ;;  %v8083_v43 = vld [vmem:[#allocation5 + $0x350] sm:$0xff]  }
  0xf9   :  { %7219 = vmatprep.subr.bf16.mxu0 %v8039_v22  ;;  %v8088_v22 = vld [vmem:[#allocation5 + $0x318] sm:$0xff]  }
  0xfb   :  { %7192 = vmatpush3.bf16.msra.mxu1 %v8004_v12  ;;  %v8046_v12 = vld [vmem:[#allocation5 + $0x280] sm:$0xff]  }
  0xfc   :  { %7193 = vmatprep.subr.bf16.mxu1 %v8005_v21  ;;  %7220 = vmatpush3.bf16.msra.mxu0 %v8040_v46  ;;  %v1280_v21 = vcombine.high %v9164_v8, %v9164_v8  ;;  %v8066_v46 = vld [vmem:[#allocation5 + $0x2a8] sm:$0xff]  }
  0xfd   :  { %7249 = vmatprep.subr.bf16.mxu0 %v8043_v40  ;;  %v8070_v40 = vld [vmem:[#allocation5 + $0x2b0] sm:$0xff]  }
  0xfe   :  { %v1311_v27 = vpack.c.bf16 %v1280_v21, %v1280_v21  ;;  %v8124_v21 = vld [vmem:[#allocation7 + $0x20] sm:$0xff]  }
  0xff   :  { %7194 = vmatpush3.bf16.msra.mxu1 %v8006_v23  ;;  %2399 = vmatmul.mubr.bf16.vlgmr.msra.gmra.mrb[0].mxu0 %v1302_v49  ;;  %v8072_v23 = vld [vmem:[#allocation5 + $0x238] sm:$0xff]   ;;  %v8069_v49 = vld [vmem:[#allocation5 + $0x2f0] sm:$0xff]  }
 0x100   :  { %7195 = vmatprep.subr.bf16.mxu1 %v8007_v37  ;;  %7250 = vmatpush3.bf16.msra.mxu0 %v8044_v50  ;;  %v1306_v37 = vpack.c.bf16 %v9144_v42, %v9144_v42  ;;  %v8058_v42 = vld [vmem:[#allocation5 + $0x298] sm:$0xff]   ;;  %v8096_v50 = vld [vmem:[#allocation5 + $0x328] sm:$0xff]  }
 0x101   :  { %2478 = vmatprep.mubr.bf16.mxu0 %v1307_v24  ;;  %7251 = vmatprep.subr.bf16.mxu0 %v8047_v52  ;;  %v8095_v24 = vld [vmem:[#allocation5 + $0x368] sm:$0xff]   ;;  %v8074_v52 = vld [vmem:[#allocation5 + $0x2b8] sm:$0xff]  }
 0x103   :  { %7196 = vmatpush3.bf16.msra.mxu1 %v8008_v38  ;;  %v8075_v38 = vld [vmem:[#allocation5 + $0x340] sm:$0xff]  }
 0x104   :  { %7197 = vmatprep.subr.bf16.mxu1 %v8009_v29  ;;  %7252 = vmatpush3.bf16.msra.mxu0 %v8048_v53  ;;  %v8079_v29 = vld [vmem:[#allocation5 + $0x348] sm:$0xff]   ;;  %v8099_v53 = vld [vmem:[#allocation5 + $0x370] sm:$0xff]  }
 0x105   :  { %7253 = vmatprep.subr.bf16.mxu0 %v8051_v55  ;;  %v8077_v55 = vld [vmem:[#allocation5 + $0x3c0] sm:$0xff]  }
 0x107   :  { %7198 = vmatpush3.bf16.msra.mxu1 %v8010_v39  ;;  %v8080_v39 = vld [vmem:[#allocation5 + $0x308] sm:$0xff]  }
 0x108   :  { %7227 = vmatprep.subr.bf16.mxu1 %v8013_v44  ;;  %7254 = vmatpush3.bf16.msra.mxu0 %v8052_v41  ;;  %v8061_v44 = vld [vmem:[#allocation5 + $0x2e0] sm:$0xff]  }
 0x109   :  { %7255 = vmatprep.subr.bf16.mxu0 %v8055_v57  ;;  %v8078_v41 = vld [vmem:[#allocation5 + $0x380] sm:$0xff]   ;;  %v8104_v57 = vld [vmem:[#allocation5 + $0x338] sm:$0xff]  }
 0x10a   :  { %2359 = vmatmul.mubr.bf16.vlgmr.msra.gmra.mrb[4].mxu1 %v1300_v36  ;;  %v8087_v36 = vld [vmem:[#allocation5 + $0x358] sm:$0xff]  }
 0x10b   :  { %7228 = vmatpush3.bf16.msra.mxu1 %v8014_v45  ;;  %2438 = vmatprep.mubr.bf16.mxu1 %v1305_v30  ;;  %v8062_v45 = vld [vmem:[#allocation5 + $0x2a0] sm:$0xff]  }
 0x10c   :  { %7229 = vmatprep.subr.bf16.mxu1 %v8017_v47  ;;  %7256 = vmatpush3.bf16.msra.mxu0 %v8056_v58  ;;  %v8091_v30 = vld [vmem:[#allocation5 + $0x360] sm:$0xff]  }
 0x10d   :  { %7257 = vmatprep.subr.bf16.mxu0 %v8059_v60  ;;  %v8092_v47 = vld [vmem:[#allocation5 + $0x320] sm:$0xff]   ;;  %v1310_v60 = vpack.c.bf16 %v9164_v8, %v9164_v8 }
 0x10e   :  { %v8094_v8 = vld [vmem:[#allocation5 + $0x3a0] sm:$0xff]  }
 0x10f   :  { %7230 = vmatpush3.bf16.msra.mxu1 %v8018_v48  ;;  %v1265_v48 = vcombine.high %v9157_v2, %v9157_v2  ;;  %v8112_v2 = vld [vmem:[#allocation7 + $0x8] sm:$0xff]  }
 0x110   :  { %7231 = vmatprep.subr.bf16.mxu1 %v8021_v51  ;;  %7258 = vmatpush3.bf16.msra.mxu0 %v8060_v61  ;;  %v8107_v61 = vld [vmem:[#allocation7 + $0x40] sm:$0xff]  }
 0x111   :  { %7259 = vmatprep.subr.bf16.mxu0 %v8063_v1  ;;  %v9177_v51 = vrot.slane %v1265_v48, %v9018_v10  ;;  %v8111_v1 = vld [vmem:[#allocation7 + $0x48] sm:$0xff]  }
 0x113   :  { %7232 = vmatpush3.bf16.msra.mxu1 %v8022_v33  ;;  %v8073_v33 = vld [vmem:[#allocation5 + $0x2f8] sm:$0xff]  }
 0x114   :  { %7233 = vmatprep.subr.bf16.mxu1 %v8025_v54  ;;  %7260 = vmatpush3.bf16.msra.mxu0 %v8064_v3  ;;  %v8100_v54 = vld [vmem:[#allocation5 + $0x330] sm:$0xff]   ;;  %v8089_v3 = vld [vmem:[#allocation5 + $0x3d8] sm:$0xff]  }
 0x115   :  { %7261 = vmatprep.subr.bf16.mxu0 %v8067_v7  ;;  %v8093_v7 = vld [vmem:[#allocation5 + $0x3e0] sm:$0xff]  }
 0x117   :  { %7234 = vmatpush3.bf16.msra.mxu1 %v8026_v32  ;;  %v1281_v32 = vcombine.high %v9177_v51, %v9177_v51 }
 0x118   :  { %7235 = vmatprep.subr.bf16.mxu1 %v8029_v56  ;;  %7262 = vmatpush3.bf16.msra.mxu0 %v8068_v9  ;;  %v1308_v56 = vpack.c.bf16 %v9160_v4, %v9160_v4  ;;  %v8090_v4 = vld [vmem:[#allocation5 + $0x398] sm:$0xff]  }
 0x119   :  { %7263 = vmatprep.subr.bf16.mxu0 %v8071_v19  ;;  %v1313_v58 = vpack.c.bf16 %v1281_v32, %v1281_v32  ;;  %v8119_v9 = vld [vmem:[#allocation7 + $0x58] sm:$0xff]   ;;  %v8123_v19 = vld [vmem:[#allocation7 + $0x60] sm:$0xff]  }
 0x11b   :  { %7236 = vmatpush3.bf16.msra.mxu1 %v8030_v13  ;;  %v8103_v13 = vld [vmem:[#allocation5 + $0x378] sm:$0xff]  }
 0x11c   :  { %7237 = vmatprep.subr.bf16.mxu1 %v8033_v59  ;;  %7264 = vmatpush3.bf16.msra.mxu0 %v8072_v23  ;;  %v8081_v59 = vld [vmem:[#allocation5 + $0x3c8] sm:$0xff]   ;;  %v8102_v23 = vld [vmem:[#allocation5 + $0x3b0] sm:$0xff]  }
 0x11d   :  { %7293 = vmatprep.subr.bf16.mxu0 %v8075_v38  ;;  %v1312_v38 = vpack.c.bf16 %v9177_v51, %v9177_v51  ;;  %v8131_v51 = vld [vmem:[#allocation7 + $0x70] sm:$0xff]  }
 0x11f   :  { %7238 = vmatpush3.bf16.msra.mxu1 %v8034_v14  ;;  %2479 = vmatmul.mubr.bf16.vlgmr.msra.gmra.mrb[4].mxu0 %v1306_v37  ;;  %v8082_v14 = vld [vmem:[#allocation5 + $0x388] sm:$0xff]   ;;  %v8110_v37 = vld [vmem:[#allocation7 + $0x80] sm:$0xff]  }
 0x120   :  { %7239 = vmatprep.subr.bf16.mxu1 %v8037_v63  ;;  %7294 = vmatpush3.bf16.msra.mxu0 %v8076_v26  ;;  %v8085_v63 = vld [vmem:[#allocation5 + $0x3d0] sm:$0xff]   ;;  %v8114_v26 = vld [vmem:[#allocation7 + $0x88] sm:$0xff]  }
 0x121   :  { %2558 = vmatprep.mubr.bf16.mxu0 %v1311_v27  ;;  %7295 = vmatprep.subr.bf16.mxu0 %v8079_v29  ;;  %v8113_v27 = vld [vmem:[#allocation7 + $0xc8] sm:$0xff]   ;;  %v8118_v29 = vld [vmem:[#allocation7 + $0x90] sm:$0xff]  }
 0x123   :  { %7240 = vmatpush3.bf16.msra.mxu1 %v8038_v0  ;;  %v8086_v0 = vld [vmem:[#allocation5 + $0x390] sm:$0xff]  }
 0x124   :  { %7241 = vmatprep.subr.bf16.mxu1 %v8041_v5  ;;  %7296 = vmatpush3.bf16.msra.mxu0 %v8080_v39  ;;  %v8115_v5 = vld [vmem:[#allocation7 + $0x50] sm:$0xff]  }
 0x125   :  { %7297 = vmatprep.subr.bf16.mxu0 %v8083_v43 }
 0x127   :  { %7242 = vmatpush3.bf16.msra.mxu1 %v8042_v6  ;;  %v8116_v6 = vld [vmem:[#allocation7 + $0x10] sm:$0xff]  }
 0x128   :  { %7271 = vmatprep.subr.bf16.mxu1 %v8045_v11  ;;  %7298 = vmatpush3.bf16.msra.mxu0 %v8084_v15  ;;  %v8097_v11 = vld [vmem:[#allocation5 + $0x3e8] sm:$0xff]   ;;  %v8122_v15 = vld [vmem:[#allocation7 + $0x98] sm:$0xff]  }
 0x129   :  { %7299 = vmatprep.subr.bf16.mxu0 %v8087_v36  ;;  %v8125_v36 = vld [vmem:[#allocation7 + $0xe0] sm:$0xff]  }
 0x12a   :  { %2439 = vmatmul.mubr.bf16.vlgmr.msra.gmra.mrb[8].mxu1 %v1304_v17  ;;  %v8101_v17 = vld [vmem:[#allocation5 + $0x3f0] sm:$0xff]  }
 0x12b   :  { %7272 = vmatpush3.bf16.msra.mxu1 %v8046_v12  ;;  %2518 = vmatprep.mubr.bf16.mxu1 %v1309_v25  ;;  %v8098_v12 = vld [vmem:[#allocation5 + $0x3a8] sm:$0xff]   ;;  %v8105_v25 = vld [vmem:[#allocation5 + $0x3f8] sm:$0xff]  }
 0x12c   :  { %7273 = vmatprep.subr.bf16.mxu1 %v8049_v34  ;;  %7300 = vmatpush3.bf16.msra.mxu0 %v8088_v22  ;;  %v8106_v34 = vld [vmem:[#allocation5 + $0x3b8] sm:$0xff]  }
 0x12d   :  { %7301 = vmatprep.subr.bf16.mxu0 %v8091_v30  ;;  %v8127_v30 = vld [vmem:[#allocation7 + $0x68] sm:$0xff]  }
 0x12f   :  { %7274 = vmatpush3.bf16.msra.mxu1 %v8050_v18  ;;  %v8109_v18 = vld [vmem:[#allocation7 + $0xc0] sm:$0xff]  }
 0x130   :  { %7275 = vmatprep.subr.bf16.mxu1 %v8053_v35  ;;  %7302 = vmatpush3.bf16.msra.mxu0 %v8092_v47  ;;  %v8117_v35 = vld [vmem:[#allocation7 + $0xd0] sm:$0xff]  }
 0x131   :  { %7303 = vmatprep.subr.bf16.mxu0 %v8095_v24 }
 0x133   :  { %7276 = vmatpush3.bf16.msra.mxu1 %v8054_v20 }
 0x134   :  { %7277 = vmatprep.subr.bf16.mxu1 %v8057_v28  ;;  %7304 = vmatpush3.bf16.msra.mxu0 %v8096_v50  ;;  %v8121_v28 = vld [vmem:[#allocation7 + $0xd8] sm:$0xff]   ;;  %v8130_v50 = vld [vmem:[#allocation7 + $0xa8] sm:$0xff]  }
 0x135   :  { %7305 = vmatprep.subr.bf16.mxu0 %v8099_v53  ;;  %v8133_v53 = vld [vmem:[#allocation7 + $0xf0] sm:$0xff]  }
 0x137   :  { %7278 = vmatpush3.bf16.msra.mxu1 %v8058_v42 }
 0x138   :  { %7279 = vmatprep.subr.bf16.mxu1 %v8061_v44  ;;  %7306 = vmatpush3.bf16.msra.mxu0 %v8100_v54  ;;  %v8135_v54 = vld [vmem:[#allocation7 + $0x78] sm:$0xff]  }
 0x139   :  { %7307 = vmatprep.subr.bf16.mxu0 %v8103_v13 }
 0x13b   :  { %7280 = vmatpush3.bf16.msra.mxu1 %v8062_v45 }
 0x13c   :  { %7281 = vmatprep.subr.bf16.mxu1 %v8065_v31  ;;  %7308 = vmatpush3.bf16.msra.mxu0 %v8104_v57  ;;  %v8138_v57 = vld [vmem:[#allocation7 + $0xb8] sm:$0xff]  }
 0x13d   :  { %7337 = vmatprep.subr.bf16.mxu0 %v8107_v61 }
 0x13f   :  { %7282 = vmatpush3.bf16.msra.mxu1 %v8066_v46  ;;  %2559 = vmatmul.mubr.bf16.vlgmr.msra.gmra.mrb[8].mxu0 %v1310_v60  ;;  %v8126_v46 = vld [vmem:[#allocation7 + $0xa0] sm:$0xff]  }
 0x140   :  { %7283 = vmatprep.subr.bf16.mxu1 %v8069_v49  ;;  %7338 = vmatpush3.bf16.msra.mxu0 %v8108_v62  ;;  %v8128_v49 = vld [vmem:[#allocation7 + $0x28] sm:$0xff]  }
 0x141   :  { %7339 = vmatprep.subr.bf16.mxu0 %v8111_v1 }
 0x143   :  { %7284 = vmatpush3.bf16.msra.mxu1 %v8070_v40  ;;  %v8129_v40 = vld [vmem:[#allocation7 + $0xe8] sm:$0xff]  }
 0x144   :  { %7285 = vmatprep.subr.bf16.mxu1 %v8073_v33  ;;  %7340 = vmatpush3.bf16.msra.mxu0 %v8112_v2  ;;  %v6622_v2 = vld [vmem:[#allocation8] ss:$0 sm:$0xff] }
 0x145   :  { %7341 = vmatprep.subr.bf16.mxu0 %v8115_v5 }
 0x147   :  { %7286 = vmatpush3.bf16.msra.mxu1 %v8074_v52  ;;  %v8132_v52 = vld [vmem:[#allocation7 + $0x30] sm:$0xff]  }
 0x148   :  { %7315 = vmatprep.subr.bf16.mxu1 %v8077_v55  ;;  %7342 = vmatpush3.bf16.msra.mxu0 %v8116_v6  ;;  %v8134_v55 = vld [vmem:[#allocation7 + $0xb0] sm:$0xff]  }
 0x149   :  { %7343 = vmatprep.subr.bf16.mxu0 %v8119_v9 }
 0x14a   :  { %2519 = vmatmul.mubr.bf16.vlgmr.msra.gmra.mrb[12].mxu1 %v1308_v56  ;;  %v8137_v56 = vld [vmem:[#allocation7 + $0xf8] sm:$0xff]  }
 0x14b   :  { %7316 = vmatpush3.bf16.msra.mxu1 %v8078_v41  ;;  %2598 = vmatprep.mubr.bf16.mxu1 %v1313_v58  ;;  %v8136_v41 = vld [vmem:[#allocation7 + $0x38] sm:$0xff]   ;;  %v8139_v58 = vld [vmem:[#allocation7 + $0x140] sm:$0xff]  }
 0x14c   :  { %7317 = vmatprep.subr.bf16.mxu1 %v8081_v59  ;;  %7344 = vmatpush3.bf16.msra.mxu0 %v8120_v16  ;;  %v8141_v59 = vld [vmem:[#allocation7 + $0x1c0] sm:$0xff]  }
 0x14d   :  { %7345 = vmatprep.subr.bf16.mxu0 %v8123_v19 }
 0x14f   :  { %7318 = vmatpush3.bf16.msra.mxu1 %v8082_v14 }
 0x150   :  { %7319 = vmatprep.subr.bf16.mxu1 %v8085_v63  ;;  %7346 = vmatpush3.bf16.msra.mxu0 %v8124_v21 }
 0x151   :  { %7347 = vmatprep.subr.bf16.mxu0 %v8127_v30 }
 0x153   :  { %7320 = vmatpush3.bf16.msra.mxu1 %v8086_v0 }
 0x154   :  { %7321 = vmatprep.subr.bf16.mxu1 %v8089_v3  ;;  %7348 = vmatpush3.bf16.msra.mxu0 %v8128_v49 }
 0x155   :  { %7349 = vmatprep.subr.bf16.mxu0 %v8131_v51 }
 0x157   :  { %7322 = vmatpush3.bf16.msra.mxu1 %v8090_v4 }
 0x158   :  { %7323 = vmatprep.subr.bf16.mxu1 %v8093_v7  ;;  %7350 = vmatpush3.bf16.msra.mxu0 %v8132_v52 }
 0x159   :  { %7351 = vmatprep.subr.bf16.mxu0 %v8135_v54 }
 0x15b   :  { %7324 = vmatpush3.bf16.msra.mxu1 %v8094_v8 }
 0x15c   :  { %7325 = vmatprep.subr.bf16.mxu1 %v8097_v11  ;;  %7352 = vmatpush3.bf16.msra.mxu0 %v8136_v41 }
 0x15d   :  { %7381 = vmatprep.subr.bf16.mxu0 %v8139_v58 }
 0x15f   :  { %7326 = vmatpush3.bf16.msra.mxu1 %v8098_v12 }
 0x160   :  { %7327 = vmatprep.subr.bf16.mxu1 %v8101_v17 }
 0x163   :  { %7328 = vmatpush3.bf16.msra.mxu1 %v8102_v23 }
 0x164   :  { %7329 = vmatprep.subr.bf16.mxu1 %v8105_v25  ;;  %v8515_v25 = vld [vmem:[#allocation2] sm:$0xff] }
 0x167   :  { %7330 = vmatpush3.bf16.msra.mxu1 %v8106_v34 }
 0x168   :  { %7359 = vmatprep.subr.bf16.mxu1 %v8109_v18  ;;  %v8516_v18 = vld [vmem:[#allocation2 + $0x8] sm:$0xff] }
 0x16a   :  { %2599 = vmatmul.mubr.bf16.vlgmr.msra.gmra.mrb[16].mxu1 %v1312_v38  ;;  %v8517_v38 = vld [vmem:[#allocation2 + $0x18] sm:$0xff] }
 0x16b   :  { %7360 = vmatpush3.bf16.msra.mxu1 %v8110_v37 }
 0x16c   :  { %7361 = vmatprep.subr.bf16.mxu1 %v8113_v27 }
 0x16d   :  { %v1435_v20 = vpop.xlane.xlu0 %1434 }
 0x16e   :  { %v1436_v39 = vrot.slane %v1435_v20, 4 }
 0x16f   :  { %7362 = vmatpush3.bf16.msra.mxu1 %v8114_v26 }
 0x170   :  { %v1437_v42 = vmin.f32 %v1435_v20, %v1436_v39  ;;  %7363 = vmatprep.subr.bf16.mxu1 %v8117_v35 }
 0x172   :  { %v1438_v43 = vrot.slane %v1437_v42, 2 }
 0x173   :  { %7364 = vmatpush3.bf16.msra.mxu1 %v8118_v29 }
 0x174   :  { %v1439_v44 = vmin.f32 %v1437_v42, %v1438_v43  ;;  %7365 = vmatprep.subr.bf16.mxu1 %v8121_v28 }
 0x175   :  { %v1475_v45 = vpop.xlane.xlu0 %1474 }
 0x176   :  { %v1476_v22 = vrot.slane %v1475_v45, 4  ;;  %v1440_v31 = vrot.slane %v1439_v44, 1 }
 0x177   :  { %7366 = vmatpush3.bf16.msra.mxu1 %v8122_v15 }
 0x178   :  { %v1477_v47 = vmax.f32 %v1475_v45, %v1476_v22  ;;  %v1441_v48 = vmin.f32 %v1439_v44, %v1440_v31  ;;  %7367 = vmatprep.subr.bf16.mxu1 %v8125_v36 }
 0x17a   :  { %v1478_v24 = vrot.slane %v1477_v47, 2  ;;  %7946 = vpush %v1441_v48 }
 0x17b   :  { %7368 = vmatpush3.bf16.msra.mxu1 %v8126_v46 }
 0x17c   :  { %v1479_v33 = vmax.f32 %v1477_v47, %v1478_v24  ;;  %7369 = vmatprep.subr.bf16.mxu1 %v8129_v40  ;;  %v8140_v40 = vld [vmem:[#allocation7 + $0x100] sm:$0xff]  }
 0x17e   :  { %v1480_v32 = vrot.slane %v1479_v33, 1 }
 0x17f   :  { %7370 = vmatpush3.bf16.msra.mxu1 %v8130_v50 }
 0x180   :  { %v1481_v13 = vmax.f32 %v1479_v33, %v1480_v32  ;;  %7371 = vmatprep.subr.bf16.mxu1 %v8133_v53  ;;  %v8518_v33 = vld [vmem:[#allocation2 + $0x10] sm:$0xff]  ;;  %v8142_v32 = vld [vmem:[#allocation7 + $0x180] sm:$0xff]  }
 0x182   :  { %7948 = vpush %v1481_v13 }
 0x183   :  { %7372 = vmatpush3.bf16.msra.mxu1 %v8134_v55  ;;  %v8143_v55 = vld [vmem:[#allocation7 + $0x148] sm:$0xff]  }
 0x184   :  { %7373 = vmatprep.subr.bf16.mxu1 %v8137_v56 }
 0x187   :  { %7374 = vmatpush3.bf16.msra.mxu1 %v8138_v57 }
 0x188   :  { %7403 = vmatprep.subr.bf16.mxu1 %v8141_v59 }
 0x1ab   :  { %s7947_s10 = spop %7946 }
 0x1ac   :  { %v1490_v23 = vstv %s7947_s10 }
 0x1ad   :  { %v1491_v34 = vsub.f32 %v8515_v25, %v1490_v23  ;;  %v1492_v37 = vsub.f32 %v8516_v18, %v1490_v23  ;;  %v1494_v27 = vsub.f32 %v8517_v38, %v1490_v23  ;;  %v1493_v52 = vsub.f32 %v8518_v33, %v1490_v23  ;;  %v8154_v23 = vld [vmem:[#allocation7 + $0x198] sm:$0xff]   ;;  %v8157_v25 = vld [vmem:[#allocation7 + $0x1e0] sm:$0xff]  }
 0x1ae   :  { %v8156_v38 = vld [vmem:[#allocation7 + $0x120] sm:$0xff]  }
 0x1b3   :  { %s7949_s0 = spop %7948 }
 0x1b4   :  { %s1483_s4 = ssub.f32 %s7949_s0, %s7947_s10 }
 0x1b6   :  { %p1484_p4 = scmp.gt.f32.partialorder %s1483_s4, 0.0 }
 0x1b8   :  { %s9503_s4 = smov (!%p1484_p4, %s1483_s4), 1.0 }
 0x1b9   :  { %v1486_v14 = vstv %s9503_s4 }
 0x1ba   :  { %8507 = vrcp.f32 %v1486_v14 }
 0x1bd   :  { %v7177_v60 = vpop.f32.mrb[0].mxu1 }
 0x1be   :  { %v7178_v61 = vpop.f32.mrb[1].mxu1 }
 0x1bf   :  { %v7179_v62 = vadd.f32 %v7178_v61, %v7177_v60  ;;  %v7180_v63 = vpop.f32.mrb[2].mxu1 }
 0x1c0   :  { %v7181_v0 = vpop.f32.mrb[3].mxu1  ;;  %v8145_v63 = vld [vmem:[#allocation7 + $0x1c8] sm:$0xff]  }
 0x1c1   :  { %v2321_v3 = vadd.f32 %v7179_v62, %v6622_v2  ;;  %v8144_v62 = vld [vmem:[#allocation7 + $0x108] sm:$0xff]   ;;  %v8147_v2 = vld [vmem:[#allocation7 + $0x150] sm:$0xff]  }
 0x1c4   :  { %v8508_v1 = vpop.eup %8507 }
 0x1c5   :  { %7950 = vpush %v8508_v1 }
 0x1d2   :  { %v7221_v8 = vpop.f32.mrb[0].mxu0 }
 0x1d3   :  { %v7222_v11 = vpop.f32.mrb[1].mxu0 }
 0x1d4   :  { %v7223_v12 = vadd.f32 %v7222_v11, %v7221_v8  ;;  %v7224_v17 = vpop.f32.mrb[2].mxu0  ;;  %v8150_v8 = vld [vmem:[#allocation7 + $0x190] sm:$0xff]  }
 0x1d5   :  { %v7225_v19 = vpop.f32.mrb[3].mxu0 }
 0x1d6   :  { %v8152_v19 = vld [vmem:[#allocation7 + $0x118] sm:$0xff]  }
 0x1dd   :  { %v7199_v4 = vpop.f32.mrb[4].mxu1 }
 0x1de   :  { %v7200_v5 = vpop.f32.mrb[5].mxu1 }
 0x1df   :  { %v7201_v6 = vadd.f32 %v7200_v5, %v7199_v4  ;;  %v7202_v7 = vpop.f32.mrb[6].mxu1  ;;  %v8146_v4 = vld [vmem:[#allocation7 + $0x188] sm:$0xff]   ;;  %v8149_v5 = vld [vmem:[#allocation7 + $0x1d0] sm:$0xff]  }
 0x1e0   :  { %v7203_v9 = vpop.f32.mrb[7].mxu1  ;;  %v8151_v7 = vld [vmem:[#allocation7 + $0x158] sm:$0xff]  }
 0x1e1   :  { %v2361_v16 = vadd.f32 %v7201_v6, %v2321_v3  ;;  %v8148_v6 = vld [vmem:[#allocation7 + $0x110] sm:$0xff]   ;;  %v8153_v9 = vld [vmem:[#allocation7 + $0x1d8] sm:$0xff]  }
 0x1e3   :  { %v2401_v21 = vadd.f32 %v7223_v12, %v2361_v16 }
 0x1f2   :  { %v7265_v46 = vpop.f32.mrb[4].mxu0 }
 0x1f3   :  { %v7266_v49 = vpop.f32.mrb[5].mxu0 }
 0x1f4   :  { %v7268_v51 = vpop.f32.mrb[6].mxu0  ;;  %v7267_v14 = vadd.f32 %v7266_v49, %v7265_v46  ;;  %v8171_v49 = vld [vmem:[#allocation7 + $0x240] sm:$0xff]  }
 0x1f5   :  { %v7269_v41 = vpop.f32.mrb[7].mxu0 }
 0x1f6   :  { %s7951_s24 = spop %7950 }
 0x1f7   :  { %s1489_s25 = smul.f32 2.0, %s7951_s24 }
 0x1f9   :  { %v1495_v26 = vstv %s1489_s25 }
 0x1fa   :  { %v1496_v35 = vmul.f32 %v1495_v26, %v1491_v34  ;;  %v1497_v20 = vmul.f32 %v1495_v26, %v1492_v37  ;;  %v9187_v29 = vmul.f32 %v1495_v26, %v1494_v27  ;;  %v1498_v57 = vmul.f32 %v1495_v26, %v1493_v52  ;;  %v8159_v27 = vld [vmem:[#allocation7 + $0x168] sm:$0xff]  }
 0x1fc   :  { %v9189_v39 = vadd.f32 -1.0, %v1496_v35  ;;  %v9191_v28 = vadd.f32 -1.0, %v1497_v20  ;;  %v9213_v3 = vadd.f32 -1.0, %v1498_v57  ;;  %v9228_v17 = vadd.f32 -1.0, %v9187_v29  ;;  %v8158_v35 = vld [vmem:[#allocation7 + $0x1a0] sm:$0xff]   ;;  %v8161_v20 = vld [vmem:[#allocation7 + $0x1e8] sm:$0xff]  }
 0x1fd   :  { %v7243_v42 = vpop.f32.mrb[8].mxu1  ;;  %v8160_v29 = vld [vmem:[#allocation7 + $0x128] sm:$0xff]  }
 0x1fe   :  { %v7244_v43 = vpop.f32.mrb[9].mxu1  ;;  %v2617_v15 = vrot.slane %v9189_v39, %v9018_v10  ;;  %v2610_v44 = vcombine.high %v9189_v39, %v9189_v39  ;;  %v9199_v45 = vrot.slane %v9191_v28, %v9018_v10  ;;  %v2627_v36 = vcombine.high %v9191_v28, %v9191_v28 }
 0x1ff   :  { %v7246_v22 = vpop.f32.mrb[10].mxu1  ;;  %v7245_v31 = vadd.f32 %v7244_v43, %v7243_v42  ;;  %v9217_v16 = vmul.f32 %v9189_v39, %v9189_v39  ;;  %v9221_v11 = vmul.f32 %v9191_v28, %v9191_v28  ;;  %v9225_v12 = vmul.f32 %v9213_v3, %v9213_v3  ;;  %v8162_v42 = vld [vmem:[#allocation7 + $0x1a8] sm:$0xff]   ;;  %v8165_v43 = vld [vmem:[#allocation7 + $0x1f0] sm:$0xff]  }
 0x200   :  { %v7247_v30 = vpop.f32.mrb[11].mxu1  ;;  %v2625_v47 = vcombine.high %v2617_v15, %v2617_v15  ;;  %v2624_v48 = vrot.slane %v2610_v44, %v9018_v10  ;;  %v2642_v24 = vcombine.high %v9199_v45, %v9199_v45  ;;  %v9207_v50 = vrot.slane %v2627_v36, %v9018_v10  ;;  %v8167_v44 = vld [vmem:[#allocation7 + $0x178] sm:$0xff]   ;;  %v8166_v22 = vld [vmem:[#allocation7 + $0x1b0] sm:$0xff]  }
 0x201   :  { %v2694_v56 = vpack.c.bf16 %v2617_v15, %v2617_v15  ;;  %v2441_v59 = vadd.f32 %v7245_v31, %v2401_v21  ;;  %v8155_v21 = vld [vmem:[#allocation7 + $0x160] sm:$0xff]   ;;  %v9232_v34 = vmul.f32 %v9189_v39, %v9217_v16  ;;  %v9236_v18 = vmul.f32 %v9191_v28, %v9221_v11  ;;  %v8163_v39 = vld [vmem:[#allocation7 + $0x170] sm:$0xff]   ;;  %v8169_v30 = vld [vmem:[#allocation7 + $0x1f8] sm:$0xff]  }
 0x202   :  { %v2695_v53 = vpack.c.bf16 %v2625_v47, %v2625_v47  ;;  %v2626_v54 = vcombine.high %v2624_v48, %v2624_v48  ;;  %v2643_v13 = vcombine.high %v9207_v50, %v9207_v50  ;;  %v2699_v60 = vpack.c.bf16 %v2642_v24, %v2642_v24  ;;  %v8164_v15 = vld [vmem:[#allocation7 + $0x130] sm:$0xff]  }
 0x203   :  { %v2696_v61 = vpack.c.bf16 %v2624_v48, %v2624_v48  ;;  %v9211_v0 = vadd.f32 %v7267_v14, %v2441_v59  ;;  %v9240_v37 = vmul.f32 %v9213_v3, %v9225_v12  ;;  %v9244_v26 = vmul.f32 %v9228_v17, %v9228_v17  ;;  %v8168_v48 = vld [vmem:[#allocation7 + $0x138] sm:$0xff]   ;;  %v8175_v14 = vld [vmem:[#allocation7 + $0x248] sm:$0xff]  }
 0x204   :  { %3510 = vmatprep.mubr.bf16.mxu0 %v2695_v53  ;;  %v2697_v58 = vpack.c.bf16 %v2626_v54, %v2626_v54  ;;  %v2701_v1 = vpack.c.bf16 %v2643_v13, %v2643_v13  ;;  %v2644_v36 = vcombine.high %v9213_v3, %v9213_v3  ;;  %v9254_v31 = vrot.slane %v9213_v3, %v9018_v10  ;;  %v8170_v53 = vld [vmem:[#allocation7 + $0x1b8] sm:$0xff]   ;;  %v8172_v54 = vld [vmem:[#allocation7 + $0x200] sm:$0xff]  }
 0x205   :  { %3511 = vmatmul.mubr.bf16.vlgmr.msra.gmra.mrb[12].mxu0 %v2694_v56  ;;  %v9248_v28 = vmul.f32 %v9228_v17, %v9244_v26  ;;  %v8173_v56 = vld [vmem:[#allocation7 + $0x2c0] sm:$0xff]  }
 0x206   :  { %7382 = vmatpush3.bf16.msra.mxu0 %v8140_v40  ;;  %3550 = vmatprep.mubr.bf16.mxu1 %v2697_v58  ;;  %v9257_v40 = vrot.slane %v2644_v36, %v9018_v10  ;;  %v8174_v58 = vld [vmem:[#allocation7 + $0x280] sm:$0xff]   ;;  %v8198_v36 = vld [vmem:[#allocation7 + $0x2b0] sm:$0xff]  }
 0x207   :  { %3590 = vmatprep.mubr.bf16.mxu0 %v2699_v60  ;;  %3551 = vmatmul.mubr.bf16.vlgmr.msra.gmra.mrb[20].mxu1 %v2696_v61  ;;  %v2698_v61 = vpack.c.bf16 %v9199_v45, %v9199_v45  ;;  %v8178_v45 = vld [vmem:[#allocation7 + $0x288] sm:$0xff]  }
 0x208   :  { %7404 = vmatpush3.bf16.msra.mxu1 %v8142_v32  ;;  %7383 = vmatprep.subr.bf16.mxu0 %v8143_v55  ;;  %v2659_v32 = vcombine.high %v9254_v31, %v9254_v31  ;;  %v2660_v59 = vcombine.high %v9257_v40, %v9257_v40 }
 0x209   :  { %3630 = vmatprep.mubr.bf16.mxu1 %v2701_v1  ;;  %7405 = vmatprep.subr.bf16.mxu1 %v8145_v63  ;;  %v8176_v1 = vld [vmem:[#allocation7 + $0x208] sm:$0xff]  }
 0x20a   :  { %7384 = vmatpush3.bf16.msra.mxu0 %v8144_v62  ;;  %v2703_v63 = vpack.c.bf16 %v2659_v32, %v2659_v32  ;;  %v2705_v3 = vpack.c.bf16 %v2660_v59, %v2660_v59  ;;  %v8205_v32 = vld [vmem:[#allocation7 + $0x3c0] sm:$0xff]   ;;  %v2704_v59 = vpack.c.bf16 %v9257_v40, %v9257_v40  ;;  %v8216_v40 = vld [vmem:[#allocation7 + $0x318] sm:$0xff]  }
 0x20b   :  { %7385 = vmatprep.subr.bf16.mxu0 %v8147_v2  ;;  %v8177_v2 = vld [vmem:[#allocation7 + $0x2c8] sm:$0xff]  }
 0x20c   :  { %7406 = vmatpush3.bf16.msra.mxu1 %v8146_v4  ;;  %v8179_v4 = vld [vmem:[#allocation7 + $0x250] sm:$0xff]  }
 0x20d   :  { %7407 = vmatprep.subr.bf16.mxu1 %v8149_v5  ;;  %v8181_v5 = vld [vmem:[#allocation7 + $0x2d0] sm:$0xff]  }
 0x20e   :  { %7386 = vmatpush3.bf16.msra.mxu0 %v8148_v6  ;;  %v8180_v6 = vld [vmem:[#allocation7 + $0x210] sm:$0xff]  }
 0x20f   :  { %7387 = vmatprep.subr.bf16.mxu0 %v8151_v7  ;;  %v8183_v7 = vld [vmem:[#allocation7 + $0x258] sm:$0xff]  }
 0x210   :  { %7408 = vmatpush3.bf16.msra.mxu1 %v8150_v8  ;;  %v8185_v8 = vld [vmem:[#allocation7 + $0x2d8] sm:$0xff]  }
 0x211   :  { %7409 = vmatprep.subr.bf16.mxu1 %v8153_v9  ;;  %v8184_v9 = vld [vmem:[#allocation7 + $0x218] sm:$0xff]  }
 0x212   :  { %7388 = vmatpush3.bf16.msra.mxu0 %v8152_v19  ;;  %v7309_v33 = vpop.f32.mrb[8].mxu0  ;;  %v8187_v19 = vld [vmem:[#allocation7 + $0x260] sm:$0xff]  }
 0x213   :  { %7389 = vmatprep.subr.bf16.mxu0 %v8155_v21  ;;  %v7310_v41 = vpop.f32.mrb[9].mxu0  ;;  %v8186_v21 = vld [vmem:[#allocation7 + $0x298] sm:$0xff]  }
 0x214   :  { %7410 = vmatpush3.bf16.msra.mxu1 %v8154_v23  ;;  %v7311_v13 = vadd.f32 %v7310_v41, %v7309_v33  ;;  %v7312_v57 = vpop.f32.mrb[10].mxu0  ;;  %v8189_v23 = vld [vmem:[#allocation7 + $0x2e0] sm:$0xff]  }
 0x215   :  { %7411 = vmatprep.subr.bf16.mxu1 %v8157_v25  ;;  %v7313_v60 = vpop.f32.mrb[11].mxu0  ;;  %v8188_v25 = vld [vmem:[#allocation7 + $0x220] sm:$0xff]   ;;  %v2702_v57 = vpack.c.bf16 %v9254_v31, %v9254_v31  ;;  %v8212_v31 = vld [vmem:[#allocation7 + $0x310] sm:$0xff]  }
 0x216   :  { %7390 = vmatpush3.bf16.msra.mxu0 %v8156_v38  ;;  %v8191_v38 = vld [vmem:[#allocation7 + $0x268] sm:$0xff]   ;;  %v8206_v41 = vld [vmem:[#allocation7 + $0x380] sm:$0xff]  }
 0x217   :  { %7391 = vmatprep.subr.bf16.mxu0 %v8159_v27  ;;  %v8190_v27 = vld [vmem:[#allocation7 + $0x2a0] sm:$0xff]   ;;  %v8209_v60 = vld [vmem:[#allocation7 + $0x3c8] sm:$0xff]  }
 0x218   :  { %7412 = vmatpush3.bf16.msra.mxu1 %v8158_v35  ;;  %v8193_v35 = vld [vmem:[#allocation7 + $0x2e8] sm:$0xff]  }
 0x219   :  { %7413 = vmatprep.subr.bf16.mxu1 %v8161_v20  ;;  %v8192_v20 = vld [vmem:[#allocation7 + $0x228] sm:$0xff]  }
 0x21a   :  { %7392 = vmatpush3.bf16.msra.mxu0 %v8160_v29  ;;  %v8195_v29 = vld [vmem:[#allocation7 + $0x270] sm:$0xff]  }
 0x21b   :  { %7393 = vmatprep.subr.bf16.mxu0 %v8163_v39  ;;  %v8194_v39 = vld [vmem:[#allocation7 + $0x2a8] sm:$0xff]  }
 0x21c   :  { %7414 = vmatpush3.bf16.msra.mxu1 %v8162_v42  ;;  %v8197_v42 = vld [vmem:[#allocation7 + $0x2f0] sm:$0xff]  }
 0x21d   :  { %v7287_v46 = vpop.f32.mrb[12].mxu1  ;;  %7415 = vmatprep.subr.bf16.mxu1 %v8165_v43  ;;  %v8196_v43 = vld [vmem:[#allocation7 + $0x230] sm:$0xff]  }
 0x21e   :  { %v7288_v47 = vpop.f32.mrb[13].mxu1  ;;  %7394 = vmatpush3.bf16.msra.mxu0 %v8164_v15  ;;  %v8199_v15 = vld [vmem:[#allocation7 + $0x278] sm:$0xff]  }
 0x21f   :  { %v7289_v24 = vadd.f32 %v7288_v47, %v7287_v46  ;;  %v7290_v51 = vpop.f32.mrb[14].mxu1  ;;  %7395 = vmatprep.subr.bf16.mxu0 %v8167_v44  ;;  %v2661_v44 = vcombine.high %v9228_v17, %v9228_v17 }
 0x220   :  { %v7291_v52 = vpop.f32.mrb[15].mxu1  ;;  %7416 = vmatpush3.bf16.msra.mxu1 %v8166_v22  ;;  %v9274_v22 = vrot.slane %v9228_v17, %v9018_v10 }
 0x221   :  { %v2521_v55 = vadd.f32 %v7289_v24, %v9211_v0  ;;  %7417 = vmatprep.subr.bf16.mxu1 %v8169_v30  ;;  %v2700_v0 = vpack.c.bf16 %v9207_v50, %v9207_v50  ;;  %v8182_v50 = vld [vmem:[#allocation7 + $0x290] sm:$0xff]   ;;  %v8201_v30 = vld [vmem:[#allocation7 + $0x2f8] sm:$0xff]   ;;  %v9277_v24 = vrot.slane %v2661_v44, %v9018_v10  ;;  %v8203_v52 = vld [vmem:[#allocation7 + $0x340] sm:$0xff]  }
 0x222   :  { %7396 = vmatpush3.bf16.msra.mxu0 %v8168_v48  ;;  %v8200_v48 = vld [vmem:[#allocation7 + $0x238] sm:$0xff]   ;;  %v2676_v17 = vcombine.high %v9274_v22, %v9274_v22  ;;  %v8236_v44 = vld [vmem:[#allocation7 + $0x400] sm:$0xff]  }
 0x223   :  { %7425 = vmatprep.subr.bf16.mxu0 %v8171_v49  ;;  %v9266_v62 = vadd.f32 %v7311_v13, %v2521_v55  ;;  %v8202_v49 = vld [vmem:[#allocation7 + $0x2b8] sm:$0xff]   ;;  %v8207_v13 = vld [vmem:[#allocation7 + $0x348] sm:$0xff]  }
 0x224   :  { %7418 = vmatpush3.bf16.msra.mxu1 %v8170_v53 }
 0x225   :  { %3591 = vmatmul.mubr.bf16.vlgmr.msra.gmra.mrb[16].mxu0 %v2698_v61  ;;  %7447 = vmatprep.subr.bf16.mxu1 %v8173_v56  ;;  %v2677_v56 = vcombine.high %v9277_v24, %v9277_v24 }
 0x226   :  { %7426 = vmatpush3.bf16.msra.mxu0 %v8172_v54  ;;  %3670 = vmatprep.mubr.bf16.mxu0 %v2703_v63  ;;  %v8204_v54 = vld [vmem:[#allocation7 + $0x300] sm:$0xff]   ;;  %v8211_v63 = vld [vmem:[#allocation7 + $0x350] sm:$0xff]  }
 0x227   :  { %3631 = vmatmul.mubr.bf16.vlgmr.msra.gmra.mrb[24].mxu1 %v2700_v0  ;;  %7427 = vmatprep.subr.bf16.mxu0 %v8175_v14  ;;  %v8208_v14 = vld [vmem:[#allocation7 + $0x308] sm:$0xff]   ;;  %v2709_v61 = vpack.c.bf16 %v2677_v56, %v2677_v56  ;;  %v8213_v0 = vld [vmem:[#allocation7 + $0x3d0] sm:$0xff]   ;;  %v8247_v56 = vld [vmem:[#allocation7 + $0x458] sm:$0xff]  }
 0x228   :  { %7448 = vmatpush3.bf16.msra.mxu1 %v8174_v58  ;;  %3710 = vmatprep.mubr.bf16.mxu1 %v2705_v3  ;;  %v2707_v58 = vpack.c.bf16 %v2676_v17, %v2676_v17  ;;  %v8217_v3 = vld [vmem:[#allocation7 + $0x3d8] sm:$0xff]   ;;  %v8243_v17 = vld [vmem:[#allocation7 + $0x450] sm:$0xff]  }
 0x229   :  { %7449 = vmatprep.subr.bf16.mxu1 %v8177_v2  ;;  %v8215_v2 = vld [vmem:[#allocation7 + $0x358] sm:$0xff]  }
 0x22a   :  { %7428 = vmatpush3.bf16.msra.mxu0 %v8176_v1  ;;  %v8214_v1 = vld [vmem:[#allocation7 + $0x390] sm:$0xff]  }
 0x22b   :  { %7429 = vmatprep.subr.bf16.mxu0 %v8179_v4  ;;  %v8218_v4 = vld [vmem:[#allocation7 + $0x398] sm:$0xff]  }
 0x22c   :  { %7450 = vmatpush3.bf16.msra.mxu1 %v8178_v45  ;;  %v8219_v45 = vld [vmem:[#allocation7 + $0x360] sm:$0xff]  }
 0x22d   :  { %7451 = vmatprep.subr.bf16.mxu1 %v8181_v5  ;;  %v8220_v5 = vld [vmem:[#allocation7 + $0x320] sm:$0xff]  }
 0x22e   :  { %7430 = vmatpush3.bf16.msra.mxu0 %v8180_v6  ;;  %v8221_v6 = vld [vmem:[#allocation7 + $0x3e0] sm:$0xff]  }
 0x22f   :  { %7431 = vmatprep.subr.bf16.mxu0 %v8183_v7  ;;  %v8222_v7 = vld [vmem:[#allocation7 + $0x3a0] sm:$0xff]  }
 0x230   :  { %7452 = vmatpush3.bf16.msra.mxu1 %v8182_v50  ;;  %v8223_v50 = vld [vmem:[#allocation7 + $0x368] sm:$0xff]  }
 0x231   :  { %7453 = vmatprep.subr.bf16.mxu1 %v8185_v8  ;;  %v8224_v8 = vld [vmem:[#allocation7 + $0x328] sm:$0xff]  }
 0x232   :  { %7432 = vmatpush3.bf16.msra.mxu0 %v8184_v9  ;;  %v8225_v9 = vld [vmem:[#allocation7 + $0x3e8] sm:$0xff]  }
 0x233   :  { %7433 = vmatprep.subr.bf16.mxu0 %v8187_v19  ;;  %v8226_v19 = vld [vmem:[#allocation7 + $0x3a8] sm:$0xff]  }
 0x234   :  { %7454 = vmatpush3.bf16.msra.mxu1 %v8186_v21  ;;  %v8227_v21 = vld [vmem:[#allocation7 + $0x370] sm:$0xff]  }
 0x235   :  { %7455 = vmatprep.subr.bf16.mxu1 %v8189_v23  ;;  %v8228_v23 = vld [vmem:[#allocation7 + $0x330] sm:$0xff]  }
 0x236   :  { %7434 = vmatpush3.bf16.msra.mxu0 %v8188_v25  ;;  %v8229_v25 = vld [vmem:[#allocation7 + $0x3f0] sm:$0xff]  }
 0x237   :  { %7435 = vmatprep.subr.bf16.mxu0 %v8191_v38  ;;  %v8230_v38 = vld [vmem:[#allocation7 + $0x3b0] sm:$0xff]  }
 0x238   :  { %7456 = vmatpush3.bf16.msra.mxu1 %v8190_v27  ;;  %v8231_v27 = vld [vmem:[#allocation7 + $0x378] sm:$0xff]  }
 0x239   :  { %7457 = vmatprep.subr.bf16.mxu1 %v8193_v35  ;;  %v3803_v35 = vcombine.high %v9217_v16, %v9217_v16 }
 0x23a   :  { %7436 = vmatpush3.bf16.msra.mxu0 %v8192_v20  ;;  %v8233_v20 = vld [vmem:[#allocation7 + $0x3f8] sm:$0xff]  }
 0x23b   :  { %7437 = vmatprep.subr.bf16.mxu0 %v8195_v29  ;;  %v9294_v29 = vrot.slane %v9217_v16, %v9018_v10 }
 0x23c   :  { %7458 = vmatpush3.bf16.msra.mxu1 %v8194_v39  ;;  %v8232_v39 = vld [vmem:[#allocation7 + $0x338] sm:$0xff]  }
 0x23d   :  { %v7331_v46 = vpop.f32.mrb[16].mxu1  ;;  %7459 = vmatprep.subr.bf16.mxu1 %v8197_v42  ;;  %v9297_v42 = vrot.slane %v3803_v35, %v9018_v10 }
 0x23e   :  { %v7332_v47 = vpop.f32.mrb[17].mxu1  ;;  %7438 = vmatpush3.bf16.msra.mxu0 %v8196_v43  ;;  %v8234_v43 = vld [vmem:[#allocation7 + $0x3b8] sm:$0xff]  }
 0x23f   :  { %v7333_v51 = vadd.f32 %v7332_v47, %v7331_v46  ;;  %v7334_v33 = vpop.f32.mrb[18].mxu1  ;;  %7439 = vmatprep.subr.bf16.mxu0 %v8199_v15  ;;  %v8235_v15 = vld [vmem:[#allocation7 + $0x440] sm:$0xff]   ;;  %v3819_v16 = vcombine.high %v9297_v42, %v9297_v42  ;;  %v8239_v47 = vld [vmem:[#allocation7 + $0x448] sm:$0xff]   ;;  %v3889_v35 = vpack.c.bf16 %v9297_v42, %v9297_v42  ;;  %v8280_v42 = vld [vmem:[#allocation7 + $0x518] sm:$0xff]  }
 0x240   :  { %v7335_v53 = vpop.f32.mrb[19].mxu1  ;;  %7460 = vmatpush3.bf16.msra.mxu1 %v8198_v36  ;;  %v3818_v36 = vcombine.high %v9294_v29, %v9294_v29  ;;  %v8237_v46 = vld [vmem:[#allocation7 + $0x4c0] sm:$0xff]   ;;  %v8240_v33 = vld [vmem:[#allocation7 + $0x408] sm:$0xff]  }
 0x241   :  { %v9282_v55 = vadd.f32 %v7333_v51, %v9266_v62  ;;  %7461 = vmatprep.subr.bf16.mxu1 %v8201_v30  ;;  %v8210_v62 = vld [vmem:[#allocation7 + $0x388] sm:$0xff]   ;;  %v8238_v30 = vld [vmem:[#allocation7 + $0x480] sm:$0xff]   ;;  %v2708_v51 = vpack.c.bf16 %v9277_v24, %v9277_v24  ;;  %v3890_v53 = vpack.c.bf16 %v3819_v16, %v3819_v16  ;;  %v8248_v24 = vld [vmem:[#allocation7 + $0x418] sm:$0xff]  }
 0x242   :  { %7440 = vmatpush3.bf16.msra.mxu0 %v8200_v48  ;;  %v2706_v48 = vpack.c.bf16 %v9274_v22, %v9274_v22  ;;  %v8244_v22 = vld [vmem:[#allocation7 + $0x410] sm:$0xff]   ;;  %v8281_v16 = vld [vmem:[#allocation7 + $0x5d8] sm:$0xff]  }
 0x243   :  { %7469 = vmatprep.subr.bf16.mxu0 %v8203_v52  ;;  %v8241_v52 = vld [vmem:[#allocation7 + $0x4c8] sm:$0xff]  }
 0x244   :  { %7462 = vmatpush3.bf16.msra.mxu1 %v8202_v49  ;;  %v3888_v49 = vpack.c.bf16 %v3818_v36, %v3818_v36  ;;  %v8277_v36 = vld [vmem:[#allocation7 + $0x5d0] sm:$0xff]  }
 0x245   :  { %3671 = vmatmul.mubr.bf16.vlgmr.msra.gmra.mrb[20].mxu0 %v2702_v57  ;;  %7491 = vmatprep.subr.bf16.mxu1 %v8205_v32  ;;  %v8245_v32 = vld [vmem:[#allocation7 + $0x4d0] sm:$0xff]   ;;  %v8250_v57 = vld [vmem:[#allocation7 + $0x498] sm:$0xff]  }
 0x246   :  { %7470 = vmatpush3.bf16.msra.mxu0 %v8204_v54  ;;  %3750 = vmatprep.mubr.bf16.mxu0 %v2707_v58  ;;  %v8242_v54 = vld [vmem:[#allocation7 + $0x488] sm:$0xff]   ;;  %v8251_v58 = vld [vmem:[#allocation7 + $0x460] sm:$0xff]  }
 0x247   :  { %3711 = vmatmul.mubr.bf16.vlgmr.msra.gmra.mrb[28].mxu1 %v2704_v59  ;;  %7471 = vmatprep.subr.bf16.mxu0 %v8207_v13  ;;  %v8249_v13 = vld [vmem:[#allocation7 + $0x4d8] sm:$0xff]   ;;  %v8252_v59 = vld [vmem:[#allocation7 + $0x420] sm:$0xff]  }
 0x248   :  { %7492 = vmatpush3.bf16.msra.mxu1 %v8206_v41  ;;  %3790 = vmatprep.mubr.bf16.mxu1 %v2709_v61  ;;  %v8246_v41 = vld [vmem:[#allocation7 + $0x490] sm:$0xff]   ;;  %v8255_v61 = vld [vmem:[#allocation7 + $0x468] sm:$0xff]  }
 0x249   :  { %7493 = vmatprep.subr.bf16.mxu1 %v8209_v60  ;;  %v8254_v60 = vld [vmem:[#allocation7 + $0x4a0] sm:$0xff]  }
 0x24a   :  { %7472 = vmatpush3.bf16.msra.mxu0 %v8208_v14  ;;  %v8253_v14 = vld [vmem:[#allocation7 + $0x4e0] sm:$0xff]  }
 0x24b   :  { %7473 = vmatprep.subr.bf16.mxu0 %v8211_v63  ;;  %v8257_v63 = vld [vmem:[#allocation7 + $0x4e8] sm:$0xff]  }
 0x24c   :  { %7494 = vmatpush3.bf16.msra.mxu1 %v8210_v62  ;;  %v8256_v62 = vld [vmem:[#allocation7 + $0x428] sm:$0xff]  }
 0x24d   :  { %7495 = vmatprep.subr.bf16.mxu1 %v8213_v0  ;;  %v8259_v0 = vld [vmem:[#allocation7 + $0x470] sm:$0xff]  }
 0x24e   :  { %7474 = vmatpush3.bf16.msra.mxu0 %v8212_v31  ;;  %v8258_v31 = vld [vmem:[#allocation7 + $0x4a8] sm:$0xff]  }
 0x24f   :  { %7475 = vmatprep.subr.bf16.mxu0 %v8215_v2  ;;  %v8261_v2 = vld [vmem:[#allocation7 + $0x4f0] sm:$0xff]  }
 0x250   :  { %7496 = vmatpush3.bf16.msra.mxu1 %v8214_v1  ;;  %v8260_v1 = vld [vmem:[#allocation7 + $0x430] sm:$0xff]  }
 0x251   :  { %7497 = vmatprep.subr.bf16.mxu1 %v8217_v3  ;;  %v3820_v3 = vcombine.high %v9221_v11, %v9221_v11 }
 0x252   :  { %7476 = vmatpush3.bf16.msra.mxu0 %v8216_v40  ;;  %v8263_v40 = vld [vmem:[#allocation7 + $0x478] sm:$0xff]  }
 0x253   :  { %7477 = vmatprep.subr.bf16.mxu0 %v8219_v45  ;;  %v8265_v45 = vld [vmem:[#allocation7 + $0x4f8] sm:$0xff]  }
 0x254   :  { %7498 = vmatpush3.bf16.msra.mxu1 %v8218_v4  ;;  %v8262_v4 = vld [vmem:[#allocation7 + $0x4b0] sm:$0xff]  }
 0x255   :  { %7499 = vmatprep.subr.bf16.mxu1 %v8221_v6  ;;  %v8264_v6 = vld [vmem:[#allocation7 + $0x438] sm:$0xff]  }
 0x256   :  { %7478 = vmatpush3.bf16.msra.mxu0 %v8220_v5  ;;  %v9311_v5 = vrot.slane %v9221_v11, %v9018_v10 }
 0x257   :  { %7479 = vmatprep.subr.bf16.mxu0 %v8223_v50  ;;  %v8266_v50 = vld [vmem:[#allocation7 + $0x4b8] sm:$0xff]  }
 0x258   :  { %7500 = vmatpush3.bf16.msra.mxu1 %v8222_v7  ;;  %v9314_v7 = vrot.slane %v3820_v3, %v9018_v10 }
 0x259   :  { %7501 = vmatprep.subr.bf16.mxu1 %v8225_v9  ;;  %v8268_v9 = vld [vmem:[#allocation7 + $0x500] sm:$0xff]  }
 0x25a   :  { %7480 = vmatpush3.bf16.msra.mxu0 %v8224_v8  ;;  %v8267_v8 = vld [vmem:[#allocation7 + $0x540] sm:$0xff]   ;;  %v3836_v11 = vcombine.high %v9314_v7, %v9314_v7  ;;  %v3893_v3 = vpack.c.bf16 %v9314_v7, %v9314_v7  ;;  %v8312_v7 = vld [vmem:[#allocation7 + $0x618] sm:$0xff]  }
 0x25b   :  { %7481 = vmatprep.subr.bf16.mxu0 %v8227_v21  ;;  %v8269_v21 = vld [vmem:[#allocation7 + $0x5c0] sm:$0xff]  }
 0x25c   :  { %7502 = vmatpush3.bf16.msra.mxu1 %v8226_v19  ;;  %v3835_v19 = vcombine.high %v9311_v5, %v9311_v5 }
 0x25d   :  { %7503 = vmatprep.subr.bf16.mxu1 %v8229_v25  ;;  %v8271_v25 = vld [vmem:[#allocation7 + $0x548] sm:$0xff]  }
 0x25e   :  { %7482 = vmatpush3.bf16.msra.mxu0 %v8228_v23  ;;  %v8270_v23 = vld [vmem:[#allocation7 + $0x580] sm:$0xff]  }
 0x25f   :  { %7483 = vmatprep.subr.bf16.mxu0 %v8231_v27  ;;  %v3892_v27 = vpack.c.bf16 %v3835_v19, %v3835_v19  ;;  %v8310_v19 = vld [vmem:[#allocation7 + $0x690] sm:$0xff]  }
 0x260   :  { %7504 = vmatpush3.bf16.msra.mxu1 %v8230_v38  ;;  %v3887_v38 = vpack.c.bf16 %v9294_v29, %v9294_v29  ;;  %v8276_v29 = vld [vmem:[#allocation7 + $0x510] sm:$0xff]  }
 0x261   :  { %7505 = vmatprep.subr.bf16.mxu1 %v8233_v20  ;;  %v8272_v20 = vld [vmem:[#allocation7 + $0x508] sm:$0xff]  }
 0x262   :  { %7484 = vmatpush3.bf16.msra.mxu0 %v8232_v39  ;;  %v8273_v39 = vld [vmem:[#allocation7 + $0x5c8] sm:$0xff]  }
 0x263   :  { %7513 = vmatprep.subr.bf16.mxu0 %v8235_v15  ;;  %v8274_v15 = vld [vmem:[#allocation7 + $0x588] sm:$0xff]  }
 0x264   :  { %7506 = vmatpush3.bf16.msra.mxu1 %v8234_v43  ;;  %v3894_v43 = vpack.c.bf16 %v3836_v11, %v3836_v11  ;;  %v8314_v11 = vld [vmem:[#allocation7 + $0x698] sm:$0xff]  }
 0x265   :  { %3751 = vmatmul.mubr.bf16.vlgmr.msra.gmra.mrb[24].mxu0 %v2706_v48  ;;  %7535 = vmatprep.subr.bf16.mxu1 %v8237_v46  ;;  %v8278_v46 = vld [vmem:[#allocation7 + $0x590] sm:$0xff]   ;;  %v8283_v48 = vld [vmem:[#allocation7 + $0x560] sm:$0xff]  }
 0x266   :  { %7514 = vmatpush3.bf16.msra.mxu0 %v8236_v44  ;;  %4703 = vmatprep.mubr.bf16.mxu0 %v3888_v49  ;;  %v8275_v44 = vld [vmem:[#allocation7 + $0x550] sm:$0xff]   ;;  %v8284_v49 = vld [vmem:[#allocation7 + $0x520] sm:$0xff]  }
 0x267   :  { %3791 = vmatmul.mubr.bf16.vlgmr.msra.gmra.mrb[32].mxu1 %v2708_v51  ;;  %7515 = vmatprep.subr.bf16.mxu0 %v8239_v47  ;;  %v8282_v47 = vld [vmem:[#allocation7 + $0x598] sm:$0xff]   ;;  %v8285_v51 = vld [vmem:[#allocation7 + $0x5e0] sm:$0xff]  }
 0x268   :  { %7536 = vmatpush3.bf16.msra.mxu1 %v8238_v30  ;;  %4743 = vmatprep.mubr.bf16.mxu1 %v3890_v53  ;;  %v8279_v30 = vld [vmem:[#allocation7 + $0x558] sm:$0xff]   ;;  %v8288_v53 = vld [vmem:[#allocation7 + $0x528] sm:$0xff]  }
 0x269   :  { %7537 = vmatprep.subr.bf16.mxu1 %v8241_v52  ;;  %v8287_v52 = vld [vmem:[#allocation7 + $0x568] sm:$0xff]  }
 0x26a   :  { %7516 = vmatpush3.bf16.msra.mxu0 %v8240_v33  ;;  %v8286_v33 = vld [vmem:[#allocation7 + $0x5a0] sm:$0xff]  }
 0x26b   :  { %7517 = vmatprep.subr.bf16.mxu0 %v8243_v17  ;;  %v8290_v17 = vld [vmem:[#allocation7 + $0x5a8] sm:$0xff]  }
 0x26c   :  { %7538 = vmatpush3.bf16.msra.mxu1 %v8242_v54  ;;  %v8289_v54 = vld [vmem:[#allocation7 + $0x5e8] sm:$0xff]  }
 0x26d   :  { %7539 = vmatprep.subr.bf16.mxu1 %v8245_v32  ;;  %v8292_v32 = vld [vmem:[#allocation7 + $0x530] sm:$0xff]  }
 0x26e   :  { %7518 = vmatpush3.bf16.msra.mxu0 %v8244_v22  ;;  %v8291_v22 = vld [vmem:[#allocation7 + $0x570] sm:$0xff]  }
 0x26f   :  { %7519 = vmatprep.subr.bf16.mxu0 %v8247_v56  ;;  %v8295_v56 = vld [vmem:[#allocation7 + $0x578] sm:$0xff]  }
 0x270   :  { %7540 = vmatpush3.bf16.msra.mxu1 %v8246_v41  ;;  %v8293_v41 = vld [vmem:[#allocation7 + $0x5f0] sm:$0xff]  }
 0x271   :  { %7541 = vmatprep.subr.bf16.mxu1 %v8249_v13  ;;  %v8294_v13 = vld [vmem:[#allocation7 + $0x5b0] sm:$0xff]  }
 0x272   :  { %7520 = vmatpush3.bf16.msra.mxu0 %v8248_v24  ;;  %v3837_v24 = vcombine.high %v9225_v12, %v9225_v12 }
 0x273   :  { %7521 = vmatprep.subr.bf16.mxu0 %v8251_v58  ;;  %v9328_v58 = vrot.slane %v9225_v12, %v9018_v10 }
 0x274   :  { %7542 = vmatpush3.bf16.msra.mxu1 %v8250_v57  ;;  %v8297_v57 = vld [vmem:[#allocation7 + $0x5f8] sm:$0xff]  }
 0x275   :  { %7543 = vmatprep.subr.bf16.mxu1 %v8253_v14  ;;  %v9331_v14 = vrot.slane %v3837_v24, %v9018_v10  ;;  %v8336_v24 = vld [vmem:[#allocation7 + $0x708] sm:$0xff]  }
 0x276   :  { %7522 = vmatpush3.bf16.msra.mxu0 %v8252_v59  ;;  %v8296_v59 = vld [vmem:[#allocation7 + $0x538] sm:$0xff]  }
 0x277   :  { %7523 = vmatprep.subr.bf16.mxu0 %v8255_v61  ;;  %v8299_v61 = vld [vmem:[#allocation7 + $0x640] sm:$0xff]   ;;  %v3853_v12 = vcombine.high %v9331_v14, %v9331_v14 }
 0x278   :  { %7544 = vmatpush3.bf16.msra.mxu1 %v8254_v60  ;;  %v8298_v60 = vld [vmem:[#allocation7 + $0x5b8] sm:$0xff]  }
 0x279   :  { %7545 = vmatprep.subr.bf16.mxu1 %v8257_v63  ;;  %v3852_v63 = vcombine.high %v9328_v58, %v9328_v58 }
 0x27a   :  { %7524 = vmatpush3.bf16.msra.mxu0 %v8256_v62  ;;  %v8300_v62 = vld [vmem:[#allocation7 + $0x600] sm:$0xff]  }
 0x27b   :  { %7525 = vmatprep.subr.bf16.mxu0 %v8259_v0  ;;  %v8302_v0 = vld [vmem:[#allocation7 + $0x680] sm:$0xff]  }
 0x27c   :  { %7546 = vmatpush3.bf16.msra.mxu1 %v8258_v31  ;;  %v8301_v31 = vld [vmem:[#allocation7 + $0x6c0] sm:$0xff]  }
 0x27d   :  { %7547 = vmatprep.subr.bf16.mxu1 %v8261_v2  ;;  %v3891_v2 = vpack.c.bf16 %v9311_v5, %v9311_v5  ;;  %v8308_v5 = vld [vmem:[#allocation7 + $0x610] sm:$0xff]  }
 0x27e   :  { %7526 = vmatpush3.bf16.msra.mxu0 %v8260_v1  ;;  %v8303_v1 = vld [vmem:[#allocation7 + $0x648] sm:$0xff]  }
 0x27f   :  { %7527 = vmatprep.subr.bf16.mxu0 %v8263_v40  ;;  %v3896_v40 = vpack.c.bf16 %v3852_v63, %v3852_v63  ;;  %v8345_v63 = vld [vmem:[#allocation7 + $0x7d8] sm:$0xff]  }
 0x280   :  { %7548 = vmatpush3.bf16.msra.mxu1 %v8262_v4  ;;  %v8304_v4 = vld [vmem:[#allocation7 + $0x608] sm:$0xff]  }
 0x281   :  { %7549 = vmatprep.subr.bf16.mxu1 %v8265_v45  ;;  %v8305_v45 = vld [vmem:[#allocation7 + $0x6c8] sm:$0xff]  }
 0x282   :  { %7528 = vmatpush3.bf16.msra.mxu0 %v8264_v6  ;;  %v3898_v6 = vpack.c.bf16 %v3853_v12, %v3853_v12  ;;  %v8346_v12 = vld [vmem:[#allocation7 + $0x798] sm:$0xff]  }
 0x283   :  { %7557 = vmatprep.subr.bf16.mxu0 %v8267_v8  ;;  %v8307_v8 = vld [vmem:[#allocation7 + $0x650] sm:$0xff]  }
 0x284   :  { %7550 = vmatpush3.bf16.msra.mxu1 %v8266_v50  ;;  %v8306_v50 = vld [vmem:[#allocation7 + $0x688] sm:$0xff]  }
 0x285   :  { %4704 = vmatmul.mubr.bf16.vlgmr.msra.gmra.mrb[28].mxu0 %v3887_v38  ;;  %7579 = vmatprep.subr.bf16.mxu1 %v8269_v21  ;;  %v8311_v21 = vld [vmem:[#allocation7 + $0x658] sm:$0xff]   ;;  %v8316_v38 = vld [vmem:[#allocation7 + $0x620] sm:$0xff]  }
 0x286   :  { %7558 = vmatpush3.bf16.msra.mxu0 %v8268_v9  ;;  %4783 = vmatprep.mubr.bf16.mxu0 %v3892_v27  ;;  %v8309_v9 = vld [vmem:[#allocation7 + $0x6d0] sm:$0xff]   ;;  %v8317_v27 = vld [vmem:[#allocation7 + $0x6e0] sm:$0xff]  }
 0x287   :  { %4744 = vmatmul.mubr.bf16.vlgmr.msra.gmra.mrb[36].mxu1 %v3889_v35  ;;  %7559 = vmatprep.subr.bf16.mxu0 %v8271_v25  ;;  %v8315_v25 = vld [vmem:[#allocation7 + $0x660] sm:$0xff]  }
 0x288   :  { %7580 = vmatpush3.bf16.msra.mxu1 %v8270_v23  ;;  %4823 = vmatprep.mubr.bf16.mxu1 %v3894_v43  ;;  %v8313_v23 = vld [vmem:[#allocation7 + $0x6d8] sm:$0xff]   ;;  %v8318_v35 = vld [vmem:[#allocation7 + $0x6a0] sm:$0xff]   ;;  %v8321_v43 = vld [vmem:[#allocation7 + $0x6e8] sm:$0xff]  }
 0x289   :  { %7581 = vmatprep.subr.bf16.mxu1 %v8273_v39  ;;  %v8320_v39 = vld [vmem:[#allocation7 + $0x628] sm:$0xff]  }
 0x28a   :  { %7560 = vmatpush3.bf16.msra.mxu0 %v8272_v20  ;;  %v8319_v20 = vld [vmem:[#allocation7 + $0x668] sm:$0xff]  }
 0x28b   :  { %7561 = vmatprep.subr.bf16.mxu0 %v8275_v44  ;;  %v8323_v44 = vld [vmem:[#allocation7 + $0x670] sm:$0xff]  }
 0x28c   :  { %7582 = vmatpush3.bf16.msra.mxu1 %v8274_v15  ;;  %v8322_v15 = vld [vmem:[#allocation7 + $0x6a8] sm:$0xff]  }
 0x28d   :  { %7583 = vmatprep.subr.bf16.mxu1 %v8277_v36  ;;  %v8325_v36 = vld [vmem:[#allocation7 + $0x6f0] sm:$0xff]  }
 0x28e   :  { %7562 = vmatpush3.bf16.msra.mxu0 %v8276_v29  ;;  %v8324_v29 = vld [vmem:[#allocation7 + $0x630] sm:$0xff]  }
 0x28f   :  { %7563 = vmatprep.subr.bf16.mxu0 %v8279_v30  ;;  %v8326_v30 = vld [vmem:[#allocation7 + $0x6b0] sm:$0xff]  }
 0x290   :  { %7584 = vmatpush3.bf16.msra.mxu1 %v8278_v46  ;;  %v8327_v46 = vld [vmem:[#allocation7 + $0x678] sm:$0xff]  }
 0x291   :  { %7585 = vmatprep.subr.bf16.mxu1 %v8281_v16  ;;  %v8328_v16 = vld [vmem:[#allocation7 + $0x638] sm:$0xff]  }
 0x292   :  { %7564 = vmatpush3.bf16.msra.mxu0 %v8280_v42  ;;  %v3854_v42 = vcombine.high %v9244_v26, %v9244_v26 }
 0x293   :  { %7565 = vmatprep.subr.bf16.mxu0 %v8283_v48  ;;  %v9345_v48 = vrot.slane %v9244_v26, %v9018_v10 }
 0x294   :  { %7586 = vmatpush3.bf16.msra.mxu1 %v8282_v47  ;;  %v8329_v47 = vld [vmem:[#allocation7 + $0x6f8] sm:$0xff]  }
 0x295   :  { %7587 = vmatprep.subr.bf16.mxu1 %v8285_v51  ;;  %v9348_v51 = vrot.slane %v3854_v42, %v9018_v10  ;;  %v8362_v42 = vld [vmem:[#allocation7 + $0x7b8] sm:$0xff]  }
 0x296   :  { %7566 = vmatpush3.bf16.msra.mxu0 %v8284_v49  ;;  %v8331_v49 = vld [vmem:[#allocation7 + $0x740] sm:$0xff]  }
 0x297   :  { %7567 = vmatprep.subr.bf16.mxu0 %v8287_v52  ;;  %v3869_v52 = vcombine.high %v9345_v48, %v9345_v48  ;;  %v3870_v26 = vcombine.high %v9348_v51, %v9348_v51 }
 0x298   :  { %7588 = vmatpush3.bf16.msra.mxu1 %v8286_v33  ;;  %v8330_v33 = vld [vmem:[#allocation7 + $0x6b8] sm:$0xff]  }
 0x299   :  { %7589 = vmatprep.subr.bf16.mxu1 %v8289_v54  ;;  %v8332_v54 = vld [vmem:[#allocation7 + $0x700] sm:$0xff]  }
 0x29a   :  { %7568 = vmatpush3.bf16.msra.mxu0 %v8288_v53  ;;  %v8333_v53 = vld [vmem:[#allocation7 + $0x7c0] sm:$0xff]  }
 0x29b   :  { %7569 = vmatprep.subr.bf16.mxu0 %v8291_v22  ;;  %v3895_v22 = vpack.c.bf16 %v9328_v58, %v9328_v58  ;;  %v8338_v58 = vld [vmem:[#allocation7 + $0x788] sm:$0xff]  }
 0x29c   :  { %7590 = vmatpush3.bf16.msra.mxu1 %v8290_v17  ;;  %v8334_v17 = vld [vmem:[#allocation7 + $0x780] sm:$0xff]  }
 0x29d   :  { %7591 = vmatprep.subr.bf16.mxu1 %v8293_v41  ;;  %v3900_v41 = vpack.c.bf16 %v3869_v52, %v3869_v52  ;;  %v8367_v52 = vld [vmem:[#allocation7 + $0x848] sm:$0xff]  }
 0x29e   :  { %7570 = vmatpush3.bf16.msra.mxu0 %v8292_v32  ;;  %v8335_v32 = vld [vmem:[#allocation7 + $0x748] sm:$0xff]  }
 0x29f   :  { %7571 = vmatprep.subr.bf16.mxu0 %v8295_v56  ;;  %v3897_v56 = vpack.c.bf16 %v9331_v14, %v9331_v14  ;;  %v8342_v14 = vld [vmem:[#allocation7 + $0x790] sm:$0xff]  }
 0x2a0   :  { %7592 = vmatpush3.bf16.msra.mxu1 %v8294_v13  ;;  %v8337_v13 = vld [vmem:[#allocation7 + $0x7c8] sm:$0xff]  }
 0x2a1   :  { %7593 = vmatprep.subr.bf16.mxu1 %v8297_v57  ;;  %v3902_v57 = vpack.c.bf16 %v3870_v26, %v3870_v26  ;;  %v8369_v26 = vld [vmem:[#allocation7 + $0x8c8] sm:$0xff]  }
 0x2a2   :  { %7572 = vmatpush3.bf16.msra.mxu0 %v8296_v59  ;;  %v8339_v59 = vld [vmem:[#allocation7 + $0x750] sm:$0xff]  }
 0x2a3   :  { %7601 = vmatprep.subr.bf16.mxu0 %v8299_v61  ;;  %v8340_v61 = vld [vmem:[#allocation7 + $0x710] sm:$0xff]  }
 0x2a4   :  { %7594 = vmatpush3.bf16.msra.mxu1 %v8298_v60  ;;  %v8341_v60 = vld [vmem:[#allocation7 + $0x7d0] sm:$0xff]  }
 0x2a5   :  { %4784 = vmatmul.mubr.bf16.vlgmr.msra.gmra.mrb[32].mxu0 %v3891_v2  ;;  %7623 = vmatprep.subr.bf16.mxu1 %v8301_v31  ;;  %v8344_v31 = vld [vmem:[#allocation7 + $0x718] sm:$0xff]   ;;  %v8348_v2 = vld [vmem:[#allocation7 + $0x720] sm:$0xff]  }
 0x2a6   :  { %7602 = vmatpush3.bf16.msra.mxu0 %v8300_v62  ;;  %4863 = vmatprep.mubr.bf16.mxu0 %v3896_v40  ;;  %v8343_v62 = vld [vmem:[#allocation7 + $0x758] sm:$0xff]   ;;  %v8351_v40 = vld [vmem:[#allocation7 + $0x768] sm:$0xff]  }
 0x2a7   :  { %4824 = vmatmul.mubr.bf16.vlgmr.msra.gmra.mrb[40].mxu1 %v3893_v3  ;;  %7603 = vmatprep.subr.bf16.mxu0 %v8303_v1  ;;  %v8349_v1 = vld [vmem:[#allocation7 + $0x7e0] sm:$0xff]  }
 0x2a8   :  { %7624 = vmatpush3.bf16.msra.mxu1 %v8302_v0  ;;  %4903 = vmatprep.mubr.bf16.mxu1 %v3898_v6  ;;  %v8347_v0 = vld [vmem:[#allocation7 + $0x760] sm:$0xff]   ;;  %v8355_v6 = vld [vmem:[#allocation7 + $0x770] sm:$0xff]  }
 0x2a9   :  { %7625 = vmatprep.subr.bf16.mxu1 %v8305_v45  ;;  %v8350_v3 = vld [vmem:[#allocation7 + $0x7a0] sm:$0xff]   ;;  %v8352_v45 = vld [vmem:[#allocation7 + $0x728] sm:$0xff]  }
 0x2aa   :  { %7604 = vmatpush3.bf16.msra.mxu0 %v8304_v4  ;;  %v8353_v4 = vld [vmem:[#allocation7 + $0x7e8] sm:$0xff]  }
 0x2ab   :  { %7605 = vmatprep.subr.bf16.mxu0 %v8307_v8  ;;  %v8354_v8 = vld [vmem:[#allocation7 + $0x7a8] sm:$0xff]  }
 0x2ac   :  { %7626 = vmatpush3.bf16.msra.mxu1 %v8306_v50 }
 0x2ad   :  { %7627 = vmatprep.subr.bf16.mxu1 %v8309_v9  ;;  %v8357_v9 = vld [vmem:[#allocation7 + $0x7f0] sm:$0xff]  }
 0x2ae   :  { %7606 = vmatpush3.bf16.msra.mxu0 %v8308_v5 }
 0x2af   :  { %7607 = vmatprep.subr.bf16.mxu0 %v8311_v21 }
 0x2b0   :  { %7628 = vmatpush3.bf16.msra.mxu1 %v8310_v19 }
 0x2b1   :  { %7629 = vmatprep.subr.bf16.mxu1 %v8313_v23  ;;  %v8356_v23 = vld [vmem:[#allocation7 + $0x730] sm:$0xff]  }
 0x2b2   :  { %7608 = vmatpush3.bf16.msra.mxu0 %v8312_v7 }
 0x2b3   :  { %7609 = vmatprep.subr.bf16.mxu0 %v8315_v25 }
 0x2b4   :  { %7630 = vmatpush3.bf16.msra.mxu1 %v8314_v11  ;;  %v4996_v11 = vcombine.high %v9232_v34, %v9232_v34 }
 0x2b5   :  { %7631 = vmatprep.subr.bf16.mxu1 %v8317_v27  ;;  %v8359_v27 = vld [vmem:[#allocation7 + $0x778] sm:$0xff]  }
 0x2b6   :  { %7610 = vmatpush3.bf16.msra.mxu0 %v8316_v38 }
 0x2b7   :  { %7611 = vmatprep.subr.bf16.mxu0 %v8319_v20 }
 0x2b8   :  { %7632 = vmatpush3.bf16.msra.mxu1 %v8318_v35 }
 0x2b9   :  { %7633 = vmatprep.subr.bf16.mxu1 %v8321_v43  ;;  %v9362_v43 = vrot.slane %v9232_v34, %v9018_v10  ;;  %v8365_v34 = vld [vmem:[#allocation7 + $0x8c0] sm:$0xff]  }
 0x2ba   :  { %7612 = vmatpush3.bf16.msra.mxu0 %v8320_v39  ;;  %v8358_v39 = vld [vmem:[#allocation7 + $0x7b0] sm:$0xff]  }
 0x2bb   :  { %7613 = vmatprep.subr.bf16.mxu0 %v8323_v44  ;;  %v8361_v44 = vld [vmem:[#allocation7 + $0x7f8] sm:$0xff]  }
 0x2bc   :  { %7634 = vmatpush3.bf16.msra.mxu1 %v8322_v15 }
 0x2bd   :  { %7635 = vmatprep.subr.bf16.mxu1 %v8325_v36  ;;  %v8360_v36 = vld [vmem:[#allocation7 + $0x738] sm:$0xff]  }
 0x2be   :  { %7614 = vmatpush3.bf16.msra.mxu0 %v8324_v29 }
 0x2bf   :  { %7615 = vmatprep.subr.bf16.mxu0 %v8327_v46  ;;  %v9367_v46 = vrot.slane %v4996_v11, %v9018_v10  ;;  %v8390_v11 = vld [vmem:[#allocation7 + $0x8b0] sm:$0xff]  }
 0x2c0   :  { %7636 = vmatpush3.bf16.msra.mxu1 %v8326_v30  ;;  %v8363_v30 = vld [vmem:[#allocation7 + $0x840] sm:$0xff]  }
 0x2c1   :  { %7637 = vmatprep.subr.bf16.mxu1 %v8329_v47  ;;  %v8364_v47 = vld [vmem:[#allocation7 + $0x800] sm:$0xff]  }
 0x2c2   :  { %7616 = vmatpush3.bf16.msra.mxu0 %v8328_v16  ;;  %v5011_v16 = vcombine.high %v9362_v43, %v9362_v43 }
 0x2c3   :  { %7645 = vmatprep.subr.bf16.mxu0 %v8331_v49  ;;  %v5012_v49 = vcombine.high %v9367_v46, %v9367_v46 }
 0x2c4   :  { %7638 = vmatpush3.bf16.msra.mxu1 %v8330_v33  ;;  %v3899_v33 = vpack.c.bf16 %v9345_v48, %v9345_v48  ;;  %v8370_v48 = vld [vmem:[#allocation7 + $0x888] sm:$0xff]  }
 0x2c5   :  { %4864 = vmatmul.mubr.bf16.vlgmr.msra.gmra.mrb[36].mxu0 %v3895_v22  ;;  %7667 = vmatprep.subr.bf16.mxu1 %v8333_v53  ;;  %v5081_v53 = vpack.c.bf16 %v5011_v16, %v5011_v16  ;;  %v5083_v22 = vpack.c.bf16 %v5012_v49, %v5012_v49  ;;  %v8399_v16 = vld [vmem:[#allocation7 + $0x948] sm:$0xff]   ;;  %v5082_v49 = vpack.c.bf16 %v9367_v46, %v9367_v46  ;;  %v8406_v46 = vld [vmem:[#allocation7 + $0x990] sm:$0xff]  }
 0x2c6   :  { %7646 = vmatpush3.bf16.msra.mxu0 %v8332_v54  ;;  %4943 = vmatprep.mubr.bf16.mxu0 %v3900_v41  ;;  %v8366_v54 = vld [vmem:[#allocation7 + $0x880] sm:$0xff]   ;;  %v8371_v41 = vld [vmem:[#allocation7 + $0x850] sm:$0xff]  }
 0x2c7   :  { %4904 = vmatmul.mubr.bf16.vlgmr.msra.gmra.mrb[44].mxu1 %v3897_v56  ;;  %7647 = vmatprep.subr.bf16.mxu0 %v8335_v32  ;;  %v8368_v32 = vld [vmem:[#allocation7 + $0x808] sm:$0xff]   ;;  %v8373_v56 = vld [vmem:[#allocation7 + $0x8d0] sm:$0xff]  }
 0x2c8   :  { %7668 = vmatpush3.bf16.msra.mxu1 %v8334_v17  ;;  %4983 = vmatprep.mubr.bf16.mxu1 %v3902_v57  ;;  %v3901_v17 = vpack.c.bf16 %v9348_v51, %v9348_v51  ;;  %v8374_v51 = vld [vmem:[#allocation7 + $0x890] sm:$0xff]   ;;  %v8377_v57 = vld [vmem:[#allocation7 + $0x8d8] sm:$0xff]  }
 0x2c9   :  { %7669 = vmatprep.subr.bf16.mxu1 %v8337_v13  ;;  %v8375_v13 = vld [vmem:[#allocation7 + $0x858] sm:$0xff]  }
 0x2ca   :  { %7648 = vmatpush3.bf16.msra.mxu0 %v8336_v24  ;;  %v8372_v24 = vld [vmem:[#allocation7 + $0x810] sm:$0xff]  }
 0x2cb   :  { %7649 = vmatprep.subr.bf16.mxu0 %v8339_v59  ;;  %v8376_v59 = vld [vmem:[#allocation7 + $0x818] sm:$0xff]  }
 0x2cc   :  { %7670 = vmatpush3.bf16.msra.mxu1 %v8338_v58  ;;  %v8379_v58 = vld [vmem:[#allocation7 + $0x860] sm:$0xff]  }
 0x2cd   :  { %7671 = vmatprep.subr.bf16.mxu1 %v8341_v60  ;;  %v8378_v60 = vld [vmem:[#allocation7 + $0x898] sm:$0xff]  }
 0x2ce   :  { %7650 = vmatpush3.bf16.msra.mxu0 %v8340_v61  ;;  %v8381_v61 = vld [vmem:[#allocation7 + $0x8e0] sm:$0xff]  }
 0x2cf   :  { %7651 = vmatprep.subr.bf16.mxu0 %v8343_v62  ;;  %v8380_v62 = vld [vmem:[#allocation7 + $0x820] sm:$0xff]  }
 0x2d0   :  { %7672 = vmatpush3.bf16.msra.mxu1 %v8342_v14  ;;  %v8383_v14 = vld [vmem:[#allocation7 + $0x868] sm:$0xff]  }
 0x2d1   :  { %7673 = vmatprep.subr.bf16.mxu1 %v8345_v63  ;;  %v8382_v63 = vld [vmem:[#allocation7 + $0x8a0] sm:$0xff]  }
 0x2d2   :  { %7652 = vmatpush3.bf16.msra.mxu0 %v8344_v31  ;;  %v8385_v31 = vld [vmem:[#allocation7 + $0x8e8] sm:$0xff]  }
 0x2d3   :  { %7653 = vmatprep.subr.bf16.mxu0 %v8347_v0  ;;  %v8384_v0 = vld [vmem:[#allocation7 + $0x828] sm:$0xff]  }
 0x2d4   :  { %7674 = vmatpush3.bf16.msra.mxu1 %v8346_v12  ;;  %v8387_v12 = vld [vmem:[#allocation7 + $0x870] sm:$0xff]  }
 0x2d5   :  { %7675 = vmatprep.subr.bf16.mxu1 %v8349_v1 }
 0x2d6   :  { %7654 = vmatpush3.bf16.msra.mxu0 %v8348_v2  ;;  %v8386_v2 = vld [vmem:[#allocation7 + $0x8a8] sm:$0xff]  }
 0x2d7   :  { %7655 = vmatprep.subr.bf16.mxu0 %v8351_v40 }
 0x2d8   :  { %7676 = vmatpush3.bf16.msra.mxu1 %v8350_v3  ;;  %v7353_v50 = vpop.f32.mrb[12].mxu0  ;;  %v8389_v3 = vld [vmem:[#allocation7 + $0x8f0] sm:$0xff]  }
 0x2d9   :  { %v7354_v5 = vpop.f32.mrb[13].mxu0  ;;  %7677 = vmatprep.subr.bf16.mxu1 %v8353_v4 }
 0x2da   :  { %v7355_v19 = vadd.f32 %v7354_v5, %v7353_v50  ;;  %7656 = vmatpush3.bf16.msra.mxu0 %v8352_v45  ;;  %v7356_v21 = vpop.f32.mrb[14].mxu0  ;;  %v7375_v7 = vpop.f32.mrb[20].mxu1  ;;  %v8388_v50 = vld [vmem:[#allocation7 + $0x830] sm:$0xff]  }
 0x2db   :  { %v7357_v25 = vpop.f32.mrb[15].mxu0  ;;  %v7376_v38 = vpop.f32.mrb[21].mxu1  ;;  %7657 = vmatprep.subr.bf16.mxu0 %v8355_v6 }
 0x2dc   :  { %v7377_v35 = vadd.f32 %v7376_v38, %v7375_v7  ;;  %7678 = vmatpush3.bf16.msra.mxu1 %v8354_v8  ;;  %v7378_v20 = vpop.f32.mrb[22].mxu1  ;;  %v5013_v8 = vcombine.high %v9236_v18, %v9236_v18  ;;  %v9382_v25 = vrot.slane %v9236_v18, %v9018_v10  ;;  %v8397_v18 = vld [vmem:[#allocation7 + $0x9c0] sm:$0xff]  }
 0x2dd   :  { %v7379_v15 = vpop.f32.mrb[23].mxu1  ;;  %7679 = vmatprep.subr.bf16.mxu1 %v8357_v9  ;;  %v8392_v20 = vld [vmem:[#allocation7 + $0x838] sm:$0xff]  }
 0x2de   :  { %v9364_v29 = vadd.f32 %v7377_v35, %v7355_v19  ;;  %7658 = vmatpush3.bf16.msra.mxu0 %v8356_v23  ;;  %v8391_v19 = vld [vmem:[#allocation7 + $0x878] sm:$0xff]   ;;  %v8395_v15 = vld [vmem:[#allocation7 + $0x940] sm:$0xff]  }
 0x2df   :  { %7659 = vmatprep.subr.bf16.mxu0 %v8359_v27  ;;  %v8393_v27 = vld [vmem:[#allocation7 + $0x8f8] sm:$0xff]  }
 0x2e0   :  { %7680 = vmatpush3.bf16.msra.mxu1 %v8358_v39  ;;  %v9387_v39 = vrot.slane %v5013_v8, %v9018_v10  ;;  %v8422_v8 = vld [vmem:[#allocation7 + $0x9b0] sm:$0xff]  }
 0x2e1   :  { %7681 = vmatprep.subr.bf16.mxu1 %v8361_v44  ;;  %v8394_v44 = vld [vmem:[#allocation7 + $0x8b8] sm:$0xff]  }
 0x2e2   :  { %7660 = vmatpush3.bf16.msra.mxu0 %v8360_v36  ;;  %v8396_v36 = vld [vmem:[#allocation7 + $0x900] sm:$0xff]  }
 0x2e3   :  { %7689 = vmatprep.subr.bf16.mxu0 %v8363_v30  ;;  %v5029_v30 = vcombine.high %v9387_v39, %v9387_v39 }
 0x2e4   :  { %7682 = vmatpush3.bf16.msra.mxu1 %v8362_v42  ;;  %v5080_v42 = vpack.c.bf16 %v9362_v43, %v9362_v43  ;;  %v8402_v43 = vld [vmem:[#allocation7 + $0x988] sm:$0xff]  }
 0x2e5   :  { %4944 = vmatmul.mubr.bf16.vlgmr.msra.gmra.mrb[40].mxu0 %v3899_v33  ;;  %7711 = vmatprep.subr.bf16.mxu1 %v8365_v34  ;;  %v8401_v33 = vld [vmem:[#allocation7 + $0x9c8] sm:$0xff]  }
 0x2e6   :  { %7690 = vmatpush3.bf16.msra.mxu0 %v8364_v47  ;;  %5896 = vmatprep.mubr.bf16.mxu0 %v5081_v53  ;;  %v8398_v47 = vld [vmem:[#allocation7 + $0x980] sm:$0xff]   ;;  %v8400_v53 = vld [vmem:[#allocation7 + $0x908] sm:$0xff]  }
 0x2e7   :  { %4984 = vmatmul.mubr.bf16.vlgmr.msra.gmra.mrb[48].mxu1 %v3901_v17  ;;  %7691 = vmatprep.subr.bf16.mxu0 %v8367_v52  ;;  %v5087_v52 = vpack.c.bf16 %v5029_v30, %v5029_v30  ;;  %v8405_v17 = vld [vmem:[#allocation7 + $0x9d0] sm:$0xff]   ;;  %v8433_v30 = vld [vmem:[#allocation7 + $0xac8] sm:$0xff]  }
 0x2e8   :  { %7712 = vmatpush3.bf16.msra.mxu1 %v8366_v54  ;;  %5936 = vmatprep.mubr.bf16.mxu1 %v5083_v22  ;;  %v8403_v54 = vld [vmem:[#allocation7 + $0x950] sm:$0xff]   ;;  %v8407_v22 = vld [vmem:[#allocation7 + $0x958] sm:$0xff]  }
 0x2e9   :  { %7713 = vmatprep.subr.bf16.mxu1 %v8369_v26  ;;  %v8404_v26 = vld [vmem:[#allocation7 + $0x910] sm:$0xff]  }
 0x2ea   :  { %7692 = vmatpush3.bf16.msra.mxu0 %v8368_v32  ;;  %v8409_v32 = vld [vmem:[#allocation7 + $0x9d8] sm:$0xff]  }
 0x2eb   :  { %7693 = vmatprep.subr.bf16.mxu0 %v8371_v41  ;;  %v8408_v41 = vld [vmem:[#allocation7 + $0x918] sm:$0xff]  }
 0x2ec   :  { %7714 = vmatpush3.bf16.msra.mxu1 %v8370_v48  ;;  %v8411_v48 = vld [vmem:[#allocation7 + $0x960] sm:$0xff]  }
 0x2ed   :  { %7715 = vmatprep.subr.bf16.mxu1 %v8373_v56  ;;  %v8410_v56 = vld [vmem:[#allocation7 + $0x998] sm:$0xff]  }
 0x2ee   :  { %7694 = vmatpush3.bf16.msra.mxu0 %v8372_v24  ;;  %v8413_v24 = vld [vmem:[#allocation7 + $0x9e0] sm:$0xff]  }
 0x2ef   :  { %7695 = vmatprep.subr.bf16.mxu0 %v8375_v13  ;;  %v8412_v13 = vld [vmem:[#allocation7 + $0x920] sm:$0xff]  }
 0x2f0   :  { %7716 = vmatpush3.bf16.msra.mxu1 %v8374_v51  ;;  %v8415_v51 = vld [vmem:[#allocation7 + $0x968] sm:$0xff]  }
 0x2f1   :  { %7717 = vmatprep.subr.bf16.mxu1 %v8377_v57  ;;  %v8414_v57 = vld [vmem:[#allocation7 + $0x9a0] sm:$0xff]  }
 0x2f2   :  { %7696 = vmatpush3.bf16.msra.mxu0 %v8376_v59  ;;  %v8417_v59 = vld [vmem:[#allocation7 + $0x9e8] sm:$0xff]  }
 0x2f3   :  { %7697 = vmatprep.subr.bf16.mxu0 %v8379_v58  ;;  %v8416_v58 = vld [vmem:[#allocation7 + $0x928] sm:$0xff]  }
 0x2f4   :  { %7718 = vmatpush3.bf16.msra.mxu1 %v8378_v60  ;;  %v8419_v60 = vld [vmem:[#allocation7 + $0x970] sm:$0xff]  }
 0x2f5   :  { %7719 = vmatprep.subr.bf16.mxu1 %v8381_v61 }
 0x2f6   :  { %7698 = vmatpush3.bf16.msra.mxu0 %v8380_v62  ;;  %v8418_v62 = vld [vmem:[#allocation7 + $0x9a8] sm:$0xff]  }
 0x2f7   :  { %7699 = vmatprep.subr.bf16.mxu0 %v8383_v14 }
 0x2f8   :  { %v7397_v1 = vpop.f32.mrb[16].mxu0  ;;  %7720 = vmatpush3.bf16.msra.mxu1 %v8382_v63  ;;  %v8421_v63 = vld [vmem:[#allocation7 + $0x9f0] sm:$0xff]  }
 0x2f9   :  { %v7398_v40 = vpop.f32.mrb[17].mxu0  ;;  %7721 = vmatprep.subr.bf16.mxu1 %v8385_v31 }
 0x2fa   :  { %v7399_v4 = vadd.f32 %v7398_v40, %v7397_v1  ;;  %v7400_v45 = vpop.f32.mrb[18].mxu0  ;;  %v7419_v6 = vpop.f32.mrb[24].mxu1  ;;  %7700 = vmatpush3.bf16.msra.mxu0 %v8384_v0  ;;  %v8420_v1 = vld [vmem:[#allocation7 + $0x930] sm:$0xff]  }
 0x2fb   :  { %v7401_v5 = vpop.f32.mrb[19].mxu0  ;;  %v7420_v9 = vpop.f32.mrb[25].mxu1  ;;  %7701 = vmatprep.subr.bf16.mxu0 %v8387_v12 }
 0x2fc   :  { %v3593_v21 = vadd.f32 %v7399_v4, %v9364_v29  ;;  %v7421_v7 = vadd.f32 %v7420_v9, %v7419_v6  ;;  %v7422_v23 = vpop.f32.mrb[26].mxu1  ;;  %7722 = vmatpush3.bf16.msra.mxu1 %v8386_v2  ;;  %v5028_v29 = vcombine.high %v9382_v25, %v9382_v25  ;;  %v5030_v2 = vcombine.high %v9240_v37, %v9240_v37  ;;  %v8423_v4 = vld [vmem:[#allocation7 + $0x978] sm:$0xff]  }
 0x2fd   :  { %v7423_v38 = vpop.f32.mrb[27].mxu1  ;;  %7723 = vmatprep.subr.bf16.mxu1 %v8389_v3  ;;  %v9402_v5 = vrot.slane %v9240_v37, %v9018_v10  ;;  %v8429_v37 = vld [vmem:[#allocation7 + $0xac0] sm:$0xff]  }
 0x2fe   :  { %v9384_v35 = vadd.f32 %v7421_v7, %v3593_v21  ;;  %7702 = vmatpush3.bf16.msra.mxu0 %v8388_v50  ;;  %v5085_v34 = vpack.c.bf16 %v5028_v29, %v5028_v29  ;;  %v8424_v7 = vld [vmem:[#allocation7 + $0x938] sm:$0xff]   ;;  %v9407_v23 = vrot.slane %v5030_v2, %v9018_v10  ;;  %v9422_v2 = vrot.slane %v9248_v28, %v9018_v10 }
 0x2ff   :  { %7703 = vmatprep.subr.bf16.mxu0 %v8391_v19  ;;  %v8425_v19 = vld [vmem:[#allocation7 + $0x9f8] sm:$0xff]  }
 0x300   :  { %7724 = vmatpush3.bf16.msra.mxu1 %v8390_v11  ;;  %v8427_v11 = vld [vmem:[#allocation7 + $0xa40] sm:$0xff]   ;;  %v8426_v38 = vld [vmem:[#allocation7 + $0x9b8] sm:$0xff]  }
 0x301   :  { %7725 = vmatprep.subr.bf16.mxu1 %v8393_v27  ;;  %v5045_v27 = vcombine.high %v9402_v5, %v9402_v5 }
 0x302   :  { %7704 = vmatpush3.bf16.msra.mxu0 %v8392_v20  ;;  %v5046_v20 = vcombine.high %v9407_v23, %v9407_v23 }
 0x303   :  { %7733 = vmatprep.subr.bf16.mxu0 %v8395_v15  ;;  %v5084_v15 = vpack.c.bf16 %v9382_v25, %v9382_v25  ;;  %v5089_v29 = vpack.c.bf16 %v5045_v27, %v5045_v27  ;;  %v8434_v25 = vld [vmem:[#allocation7 + $0xa88] sm:$0xff]   ;;  %v5090_v27 = vpack.c.bf16 %v9407_v23, %v9407_v23  ;;  %v8470_v23 = vld [vmem:[#allocation7 + $0xb90] sm:$0xff]  }
 0x304   :  { %7726 = vmatpush3.bf16.msra.mxu1 %v8394_v44  ;;  %v8431_v44 = vld [vmem:[#allocation7 + $0xa48] sm:$0xff]  }
 0x305   :  { %5897 = vmatmul.mubr.bf16.vlgmr.msra.gmra.mrb[44].mxu0 %v5080_v42  ;;  %7755 = vmatprep.subr.bf16.mxu1 %v8397_v18  ;;  %v8430_v18 = vld [vmem:[#allocation7 + $0xa80] sm:$0xff]   ;;  %v5091_v42 = vpack.c.bf16 %v5046_v20, %v5046_v20  ;;  %v8464_v20 = vld [vmem:[#allocation7 + $0xb08] sm:$0xff]  }
 0x306   :  { %7734 = vmatpush3.bf16.msra.mxu0 %v8396_v36  ;;  %5976 = vmatprep.mubr.bf16.mxu0 %v5085_v34  ;;  %v5086_v36 = vpack.c.bf16 %v9387_v39, %v9387_v39  ;;  %v8435_v34 = vld [vmem:[#allocation7 + $0xa50] sm:$0xff]  }
 0x307   :  { %5937 = vmatmul.mubr.bf16.vlgmr.msra.gmra.mrb[52].mxu1 %v5082_v49  ;;  %7735 = vmatprep.subr.bf16.mxu0 %v8399_v16  ;;  %v8432_v16 = vld [vmem:[#allocation7 + $0xa08] sm:$0xff]   ;;  %v8436_v49 = vld [vmem:[#allocation7 + $0xa10] sm:$0xff]  }
 0x308   :  { %7756 = vmatpush3.bf16.msra.mxu1 %v8398_v47  ;;  %6016 = vmatprep.mubr.bf16.mxu1 %v5087_v52  ;;  %v8437_v47 = vld [vmem:[#allocation7 + $0xad0] sm:$0xff]   ;;  %v8441_v52 = vld [vmem:[#allocation7 + $0xad8] sm:$0xff]  }
 0x309   :  { %7757 = vmatprep.subr.bf16.mxu1 %v8401_v33  ;;  %v8439_v33 = vld [vmem:[#allocation7 + $0xa58] sm:$0xff]   ;;  %v8438_v39 = vld [vmem:[#allocation7 + $0xa90] sm:$0xff]  }
 0x30a   :  { %7736 = vmatpush3.bf16.msra.mxu0 %v8400_v53  ;;  %v8440_v53 = vld [vmem:[#allocation7 + $0xa18] sm:$0xff]  }
 0x30b   :  { %7737 = vmatprep.subr.bf16.mxu0 %v8403_v54  ;;  %v8443_v54 = vld [vmem:[#allocation7 + $0xa60] sm:$0xff]  }
 0x30c   :  { %7758 = vmatpush3.bf16.msra.mxu1 %v8402_v43  ;;  %v8442_v43 = vld [vmem:[#allocation7 + $0xa98] sm:$0xff]  }
 0x30d   :  { %7759 = vmatprep.subr.bf16.mxu1 %v8405_v17  ;;  %v8445_v17 = vld [vmem:[#allocation7 + $0xae0] sm:$0xff]  }
 0x30e   :  { %7738 = vmatpush3.bf16.msra.mxu0 %v8404_v26  ;;  %v8444_v26 = vld [vmem:[#allocation7 + $0xa20] sm:$0xff]  }
 0x30f   :  { %7739 = vmatprep.subr.bf16.mxu0 %v8407_v22  ;;  %v8447_v22 = vld [vmem:[#allocation7 + $0xa68] sm:$0xff]  }
 0x310   :  { %7760 = vmatpush3.bf16.msra.mxu1 %v8406_v46  ;;  %v8446_v46 = vld [vmem:[#allocation7 + $0xaa0] sm:$0xff]  }
 0x311   :  { %7761 = vmatprep.subr.bf16.mxu1 %v8409_v32  ;;  %v8449_v32 = vld [vmem:[#allocation7 + $0xae8] sm:$0xff]  }
 0x312   :  { %7740 = vmatpush3.bf16.msra.mxu0 %v8408_v41  ;;  %v8448_v41 = vld [vmem:[#allocation7 + $0xa28] sm:$0xff]  }
 0x313   :  { %7741 = vmatprep.subr.bf16.mxu0 %v8411_v48  ;;  %v8451_v48 = vld [vmem:[#allocation7 + $0xa70] sm:$0xff]  }
 0x314   :  { %7762 = vmatpush3.bf16.msra.mxu1 %v8410_v56 }
 0x315   :  { %7763 = vmatprep.subr.bf16.mxu1 %v8413_v24  ;;  %v8450_v24 = vld [vmem:[#allocation7 + $0xaa8] sm:$0xff]  }
 0x316   :  { %7742 = vmatpush3.bf16.msra.mxu0 %v8412_v13 }
 0x317   :  { %7743 = vmatprep.subr.bf16.mxu0 %v8415_v51  ;;  %v8453_v51 = vld [vmem:[#allocation7 + $0xaf0] sm:$0xff]  }
 0x318   :  { %v7441_v61 = vpop.f32.mrb[20].mxu0  ;;  %7764 = vmatpush3.bf16.msra.mxu1 %v8414_v57 }
 0x319   :  { %v7442_v14 = vpop.f32.mrb[21].mxu0  ;;  %7765 = vmatprep.subr.bf16.mxu1 %v8417_v59 }
 0x31a   :  { %v7443_v31 = vadd.f32 %v7442_v14, %v7441_v61  ;;  %v7444_v0 = vpop.f32.mrb[22].mxu0  ;;  %v7463_v12 = vpop.f32.mrb[28].mxu1  ;;  %7744 = vmatpush3.bf16.msra.mxu0 %v8416_v58  ;;  %v5047_v61 = vcombine.high %v9248_v28, %v9248_v28  ;;  %v5062_v28 = vcombine.high %v9422_v2, %v9422_v2 }
 0x31b   :  { %v7445_v40 = vpop.f32.mrb[23].mxu0  ;;  %v7464_v3 = vpop.f32.mrb[29].mxu1  ;;  %7745 = vmatprep.subr.bf16.mxu0 %v8419_v60  ;;  %v8452_v60 = vld [vmem:[#allocation7 + $0xa30] sm:$0xff]  }
 0x31c   :  { %v3673_v45 = vadd.f32 %v7443_v31, %v9384_v35  ;;  %v7465_v6 = vadd.f32 %v7464_v3, %v7463_v12  ;;  %v7466_v50 = vpop.f32.mrb[30].mxu1  ;;  %7766 = vmatpush3.bf16.msra.mxu1 %v8418_v62  ;;  %v8428_v35 = vld [vmem:[#allocation7 + $0xa00] sm:$0xff]   ;;  %v8457_v3 = vld [vmem:[#allocation7 + $0xaf8] sm:$0xff]  }
 0x31d   :  { %v7467_v9 = vpop.f32.mrb[31].mxu1  ;;  %7767 = vmatprep.subr.bf16.mxu1 %v8421_v63  ;;  %v8455_v63 = vld [vmem:[#allocation7 + $0xa78] sm:$0xff]   ;;  %v8459_v50 = vld [vmem:[#allocation7 + $0xb40] sm:$0xff]  }
 0x31e   :  { %v9404_v21 = vadd.f32 %v7465_v6, %v3673_v45  ;;  %7746 = vmatpush3.bf16.msra.mxu0 %v8420_v1  ;;  %v8454_v1 = vld [vmem:[#allocation7 + $0xab0] sm:$0xff]   ;;  %v8456_v45 = vld [vmem:[#allocation7 + $0xa38] sm:$0xff]   ;;  %v9425_v6 = vrot.slane %v5047_v61, %v9018_v10  ;;  %v5088_v10 = vpack.c.bf16 %v9402_v5, %v9402_v5  ;;  %v8466_v5 = vld [vmem:[#allocation7 + $0xb88] sm:$0xff]  }
 0x31f   :  { %7747 = vmatprep.subr.bf16.mxu0 %v8423_v4  ;;  %v8458_v9 = vld [vmem:[#allocation7 + $0xab8] sm:$0xff]  }
 0x320   :  { %7768 = vmatpush3.bf16.msra.mxu1 %v8422_v8  ;;  %v8490_v61 = vld [vmem:[#allocation7 + $0xbb8] sm:$0xff]  }
 0x321   :  { %7769 = vmatprep.subr.bf16.mxu1 %v8425_v19  ;;  %v8461_v19 = vld [vmem:[#allocation7 + $0xbc0] sm:$0xff]  }
 0x322   :  { %7748 = vmatpush3.bf16.msra.mxu0 %v8424_v7  ;;  %v5063_v7 = vcombine.high %v9425_v6, %v9425_v6 }
 0x323   :  { %7777 = vmatprep.subr.bf16.mxu0 %v8427_v11  ;;  %v8463_v11 = vld [vmem:[#allocation7 + $0xb48] sm:$0xff]  }
 0x324   :  { %7770 = vmatpush3.bf16.msra.mxu1 %v8426_v38  ;;  %v8462_v38 = vld [vmem:[#allocation7 + $0xb80] sm:$0xff]  }
 0x325   :  { %5977 = vmatmul.mubr.bf16.vlgmr.msra.gmra.mrb[48].mxu0 %v5084_v15  ;;  %7799 = vmatprep.subr.bf16.mxu1 %v8429_v37  ;;  %v8465_v37 = vld [vmem:[#allocation7 + $0xbc8] sm:$0xff]   ;;  %v8467_v15 = vld [vmem:[#allocation7 + $0xb50] sm:$0xff]  }
 0x326   :  { %7778 = vmatpush3.bf16.msra.mxu0 %v8428_v35  ;;  %6056 = vmatprep.mubr.bf16.mxu0 %v5089_v29  ;;  %v5095_v35 = vpack.c.bf16 %v5063_v7, %v5063_v7  ;;  %v8468_v29 = vld [vmem:[#allocation7 + $0xb10] sm:$0xff]  }
 0x327   :  { %6017 = vmatmul.mubr.bf16.vlgmr.msra.gmra.mrb[56].mxu1 %v5086_v36  ;;  %7779 = vmatprep.subr.bf16.mxu0 %v8431_v44  ;;  %v8469_v44 = vld [vmem:[#allocation7 + $0xbd0] sm:$0xff]   ;;  %v8473_v36 = vld [vmem:[#allocation7 + $0xbd8] sm:$0xff]  }
 0x328   :  { %7800 = vmatpush3.bf16.msra.mxu1 %v8430_v18  ;;  %6096 = vmatprep.mubr.bf16.mxu1 %v5091_v42  ;;  %v8471_v18 = vld [vmem:[#allocation7 + $0xb58] sm:$0xff]   ;;  %v8475_v42 = vld [vmem:[#allocation7 + $0xb60] sm:$0xff]  }
 0x329   :  { %7801 = vmatprep.subr.bf16.mxu1 %v8433_v30  ;;  %v8472_v30 = vld [vmem:[#allocation7 + $0xb18] sm:$0xff]  }
 0x32a   :  { %7780 = vmatpush3.bf16.msra.mxu0 %v8432_v16  ;;  %v8474_v16 = vld [vmem:[#allocation7 + $0xb98] sm:$0xff]  }
 0x32b   :  { %7781 = vmatprep.subr.bf16.mxu0 %v8435_v34  ;;  %v8477_v34 = vld [vmem:[#allocation7 + $0xbe0] sm:$0xff]  }
 0x32c   :  { %7802 = vmatpush3.bf16.msra.mxu1 %v8434_v25  ;;  %v8476_v25 = vld [vmem:[#allocation7 + $0xb20] sm:$0xff]  }
 0x32d   :  { %7803 = vmatprep.subr.bf16.mxu1 %v8437_v47  ;;  %v8479_v47 = vld [vmem:[#allocation7 + $0xb68] sm:$0xff]  }
 0x32e   :  { %7782 = vmatpush3.bf16.msra.mxu0 %v8436_v49  ;;  %v8478_v49 = vld [vmem:[#allocation7 + $0xba0] sm:$0xff]  }
 0x32f   :  { %7783 = vmatprep.subr.bf16.mxu0 %v8439_v33  ;;  %v8481_v33 = vld [vmem:[#allocation7 + $0xbe8] sm:$0xff]  }
 0x330   :  { %7804 = vmatpush3.bf16.msra.mxu1 %v8438_v39  ;;  %v8480_v39 = vld [vmem:[#allocation7 + $0xb28] sm:$0xff]  }
 0x331   :  { %7805 = vmatprep.subr.bf16.mxu1 %v8441_v52  ;;  %v8483_v52 = vld [vmem:[#allocation7 + $0xb70] sm:$0xff]  }
 0x332   :  { %7784 = vmatpush3.bf16.msra.mxu0 %v8440_v53 }
 0x333   :  { %7785 = vmatprep.subr.bf16.mxu0 %v8443_v54  ;;  %v8482_v54 = vld [vmem:[#allocation7 + $0xba8] sm:$0xff]  }
 0x334   :  { %7806 = vmatpush3.bf16.msra.mxu1 %v8442_v43 }
 0x335   :  { %7807 = vmatprep.subr.bf16.mxu1 %v8445_v17  ;;  %v8485_v17 = vld [vmem:[#allocation7 + $0xbf0] sm:$0xff]  }
 0x336   :  { %7786 = vmatpush3.bf16.msra.mxu0 %v8444_v26 }
 0x337   :  { %7787 = vmatprep.subr.bf16.mxu0 %v8447_v22 }
 0x338   :  { %v7485_v56 = vpop.f32.mrb[24].mxu0  ;;  %7808 = vmatpush3.bf16.msra.mxu1 %v8446_v46 }
 0x339   :  { %v7486_v13 = vpop.f32.mrb[25].mxu0  ;;  %7809 = vmatprep.subr.bf16.mxu1 %v8449_v32  ;;  %v8484_v32 = vld [vmem:[#allocation7 + $0xb30] sm:$0xff]  }
 0x33a   :  { %v7487_v57 = vadd.f32 %v7486_v13, %v7485_v56  ;;  %v7488_v59 = vpop.f32.mrb[26].mxu0  ;;  %v7507_v58 = vpop.f32.mrb[32].mxu1  ;;  %7788 = vmatpush3.bf16.msra.mxu0 %v8448_v41  ;;  %v8487_v56 = vld [vmem:[#allocation7 + $0xb78] sm:$0xff]  }
 0x33b   :  { %v7489_v62 = vpop.f32.mrb[27].mxu0  ;;  %v7508_v14 = vpop.f32.mrb[33].mxu1  ;;  %7789 = vmatprep.subr.bf16.mxu0 %v8451_v48  ;;  %v8489_v59 = vld [vmem:[#allocation7 + $0xbf8] sm:$0xff]  }
 0x33c   :  { %v3753_v31 = vadd.f32 %v7487_v57, %v9404_v21  ;;  %v7509_v0 = vadd.f32 %v7508_v14, %v7507_v58  ;;  %v7510_v12 = vpop.f32.mrb[34].mxu1  ;;  %7810 = vmatpush3.bf16.msra.mxu1 %v8450_v24  ;;  %v8460_v21 = vld [vmem:[#allocation7 + $0xb00] sm:$0xff]   ;;  %v5092_v62 = vpack.c.bf16 %v9422_v2, %v9422_v2  ;;  %v5094_v14 = vpack.c.bf16 %v9425_v6, %v9425_v6 }
 0x33d   :  { %v7511_v40 = vpop.f32.mrb[35].mxu1  ;;  %7811 = vmatprep.subr.bf16.mxu1 %v8453_v51  ;;  %v8486_v51 = vld [vmem:[#allocation7 + $0xbb0] sm:$0xff]  }
 0x33e   :  { %v3793_v4 = vadd.f32 %v7509_v0, %v3753_v31  ;;  %7790 = vmatpush3.bf16.msra.mxu0 %v8452_v60  ;;  %v8488_v60 = vld [vmem:[#allocation7 + $0xb38] sm:$0xff]  }
 0x33f   :  { %7791 = vmatprep.subr.bf16.mxu0 %v8455_v63 }
 0x340   :  { %v9428_v8 = vadd.f32 %v3793_v4, %v9282_v55  ;;  %7812 = vmatpush3.bf16.msra.mxu1 %v8454_v1  ;;  %v5093_v55 = vpack.c.bf16 %v5062_v28, %v5062_v28 }
 0x341   :  { %7813 = vmatprep.subr.bf16.mxu1 %v8457_v3 }
 0x342   :  { %7792 = vmatpush3.bf16.msra.mxu0 %v8456_v45 }
 0x343   :  { %7821 = vmatprep.subr.bf16.mxu0 %v8459_v50 }
 0x344   :  { %7814 = vmatpush3.bf16.msra.mxu1 %v8458_v9 }
 0x345   :  { %6057 = vmatmul.mubr.bf16.vlgmr.msra.gmra.mrb[52].mxu0 %v5088_v10  ;;  %7843 = vmatprep.subr.bf16.mxu1 %v8461_v19 }
 0x346   :  { %7822 = vmatpush3.bf16.msra.mxu0 %v8460_v21  ;;  %6136 = vmatprep.mubr.bf16.mxu0 %v5093_v55 }
 0x347   :  { %6097 = vmatmul.mubr.bf16.vlgmr.msra.gmra.mrb[60].mxu1 %v5090_v27  ;;  %7823 = vmatprep.subr.bf16.mxu0 %v8463_v11 }
 0x348   :  { %7844 = vmatpush3.bf16.msra.mxu1 %v8462_v38  ;;  %6176 = vmatprep.mubr.bf16.mxu1 %v5095_v35 }
 0x349   :  { %7845 = vmatprep.subr.bf16.mxu1 %v8465_v37 }
 0x34a   :  { %7824 = vmatpush3.bf16.msra.mxu0 %v8464_v20 }
 0x34b   :  { %7825 = vmatprep.subr.bf16.mxu0 %v8467_v15 }
 0x34c   :  { %7846 = vmatpush3.bf16.msra.mxu1 %v8466_v5 }
 0x34d   :  { %7847 = vmatprep.subr.bf16.mxu1 %v8469_v44 }
 0x34e   :  { %7826 = vmatpush3.bf16.msra.mxu0 %v8468_v29 }
 0x34f   :  { %7827 = vmatprep.subr.bf16.mxu0 %v8471_v18 }
 0x350   :  { %7848 = vmatpush3.bf16.msra.mxu1 %v8470_v23 }
 0x351   :  { %7849 = vmatprep.subr.bf16.mxu1 %v8473_v36 }
 0x352   :  { %7828 = vmatpush3.bf16.msra.mxu0 %v8472_v30 }
 0x353   :  { %7829 = vmatprep.subr.bf16.mxu0 %v8475_v42 }
 0x354   :  { %7850 = vmatpush3.bf16.msra.mxu1 %v8474_v16 }
 0x355   :  { %7851 = vmatprep.subr.bf16.mxu1 %v8477_v34 }
 0x356   :  { %7830 = vmatpush3.bf16.msra.mxu0 %v8476_v25 }
 0x357   :  { %7831 = vmatprep.subr.bf16.mxu0 %v8479_v47 }
 0x358   :  { %v7529_v53 = vpop.f32.mrb[28].mxu0  ;;  %7852 = vmatpush3.bf16.msra.mxu1 %v8478_v49 }
 0x359   :  { %v7530_v43 = vpop.f32.mrb[29].mxu0  ;;  %7853 = vmatprep.subr.bf16.mxu1 %v8481_v33 }
 0x35a   :  { %v7531_v26 = vadd.f32 %v7530_v43, %v7529_v53  ;;  %v7532_v22 = vpop.f32.mrb[30].mxu0  ;;  %v7551_v46 = vpop.f32.mrb[36].mxu1  ;;  %7832 = vmatpush3.bf16.msra.mxu0 %v8480_v39 }
 0x35b   :  { %v7533_v41 = vpop.f32.mrb[31].mxu0  ;;  %v7552_v48 = vpop.f32.mrb[37].mxu1  ;;  %7833 = vmatprep.subr.bf16.mxu0 %v8483_v52 }
 0x35c   :  { %v7553_v24 = vadd.f32 %v7552_v48, %v7551_v46  ;;  %v7554_v13 = vpop.f32.mrb[38].mxu1  ;;  %7854 = vmatpush3.bf16.msra.mxu1 %v8482_v54 }
 0x35d   :  { %v7555_v57 = vpop.f32.mrb[39].mxu1  ;;  %7855 = vmatprep.subr.bf16.mxu1 %v8485_v17 }
 0x35e   :  { %v4746_v58 = vadd.f32 %v7553_v24, %v7531_v26  ;;  %7834 = vmatpush3.bf16.msra.mxu0 %v8484_v32 }
 0x35f   :  { %7835 = vmatprep.subr.bf16.mxu0 %v8487_v56 }
 0x360   :  { %7856 = vmatpush3.bf16.msra.mxu1 %v8486_v51 }
 0x361   :  { %7857 = vmatprep.subr.bf16.mxu1 %v8489_v59 }
 0x362   :  { %7836 = vmatpush3.bf16.msra.mxu0 %v8488_v60 }
 0x364   :  { %7858 = vmatpush3.bf16.msra.mxu1 %v8490_v61 }
 0x365   :  { %6137 = vmatmul.mubr.bf16.vlgmr.msra.gmra.mrb[56].mxu0 %v5092_v62 }
 0x367   :  { %6177 = vmatmul.mubr.bf16.vlgmr.msra.gmra.mrb[64].mxu1 %v5094_v14 }
 0x378   :  { %v7573_v63 = vpop.f32.mrb[32].mxu0 }
 0x379   :  { %v7574_v31 = vpop.f32.mrb[33].mxu0 }
 0x37a   :  { %v7575_v0 = vadd.f32 %v7574_v31, %v7573_v63  ;;  %v7576_v12 = vpop.f32.mrb[34].mxu0  ;;  %v7595_v1 = vpop.f32.mrb[40].mxu1 }
 0x37b   :  { %v7577_v40 = vpop.f32.mrb[35].mxu0  ;;  %v7596_v3 = vpop.f32.mrb[41].mxu1 }
 0x37c   :  { %v4786_v4 = vadd.f32 %v7575_v0, %v4746_v58  ;;  %v7597_v45 = vadd.f32 %v7596_v3, %v7595_v1  ;;  %v7598_v50 = vpop.f32.mrb[42].mxu1 }
 0x37d   :  { %v7599_v9 = vpop.f32.mrb[43].mxu1 }
 0x37e   :  { %v4826_v28 = vadd.f32 %v7597_v45, %v4786_v4 }
 0x398   :  { %v7617_v19 = vpop.f32.mrb[36].mxu0 }
 0x399   :  { %v7618_v2 = vpop.f32.mrb[37].mxu0 }
 0x39a   :  { %v7619_v21 = vadd.f32 %v7618_v2, %v7617_v19  ;;  %v7620_v7 = vpop.f32.mrb[38].mxu0  ;;  %v7639_v10 = vpop.f32.mrb[44].mxu1 }
 0x39b   :  { %v7621_v11 = vpop.f32.mrb[39].mxu0  ;;  %v7640_v6 = vpop.f32.mrb[45].mxu1 }
 0x39c   :  { %v4866_v55 = vadd.f32 %v7619_v21, %v4826_v28  ;;  %v7641_v38 = vadd.f32 %v7640_v6, %v7639_v10  ;;  %v7642_v27 = vpop.f32.mrb[46].mxu1 }
 0x39d   :  { %v7643_v37 = vpop.f32.mrb[47].mxu1 }
 0x39e   :  { %v4906_v35 = vadd.f32 %v7641_v38, %v4866_v55 }
 0x3b8   :  { %v7661_v20 = vpop.f32.mrb[40].mxu0 }
 0x3b9   :  { %v7662_v15 = vpop.f32.mrb[41].mxu0 }
 0x3ba   :  { %v7663_v5 = vadd.f32 %v7662_v15, %v7661_v20  ;;  %v7664_v44 = vpop.f32.mrb[42].mxu0  ;;  %v7683_v29 = vpop.f32.mrb[48].mxu1 }
 0x3bb   :  { %v7665_v18 = vpop.f32.mrb[43].mxu0  ;;  %v7684_v23 = vpop.f32.mrb[49].mxu1  ;;  %v8491_v44 = vld [vmem:[#allocation13] sm:$0xff]  }
 0x3bc   :  { %v4946_v36 = vadd.f32 %v7663_v5, %v4906_v35  ;;  %v7685_v30 = vadd.f32 %v7684_v23, %v7683_v29  ;;  %v7686_v42 = vpop.f32.mrb[50].mxu1  ;;  %v8811_v29 = vmov 0.0   ;;  %v8492_v18 = vld [vmem:[#allocation13 + $0x8] sm:$0xff]   ;;  %v8493_v23 = vld [vmem:[#allocation13 + $0x10] sm:$0xff]  }
 0x3bd   :  { %v7687_v16 = vpop.f32.mrb[51].mxu1  ;;  %7885 = vmatprep.subr.bf16.mxu0 %v8811_v29  ;;  %7893 = vmatprep.mubr.msk.bf16.mxu0 %vm8812_vm2, %v8811_v29 }
 0x3be   :  { %v4986_v34 = vadd.f32 %v7685_v30, %v4946_v36  ;;  %7886 = vmatpush3.bf16.msra.mxu0 %v8491_v44  ;;  %v8494_v36 = vld [vmem:[#allocation13 + $0x18] sm:$0xff]  }
 0x3bf   :  { %7887 = vmatprep.subr.bf16.mxu0 %v8811_v29 }
 0x3c0   :  { %v4991_v25 = vadd.f32 %v4986_v34, %v9428_v8 }
 0x3c2   :  { %7888 = vmatpush3.bf16.msra.mxu0 %v8492_v18 }
 0x3c3   :  { %7889 = vmatprep.subr.bf16.mxu0 %v8811_v29 }
 0x3c6   :  { %7890 = vmatpush3.bf16.msra.mxu0 %v8493_v23 }
 0x3c7   :  { %7891 = vmatprep.subr.bf16.mxu0 %v8811_v29 }
 0x3ca   :  { %7892 = vmatpush3.bf16.msra.mxu0 %v8494_v36 }
 0x3cb   :  { %7897 = vmatprep.subr.bf16.mxu0 %v8811_v29 }
 0x3d8   :  { %v7705_v47 = vpop.f32.mrb[44].mxu0 }
 0x3d9   :  { %v7706_v49 = vpop.f32.mrb[45].mxu0 }
 0x3da   :  { %v7707_v33 = vadd.f32 %v7706_v49, %v7705_v47  ;;  %v7708_v39 = vpop.f32.mrb[46].mxu0  ;;  %v7727_v52 = vpop.f32.mrb[52].mxu1  ;;  %v7136_v49 = vld [vmem:[#allocation11] ss:$0 sm:$0xff] }
 0x3db   :  { %v7709_v53 = vpop.f32.mrb[47].mxu0  ;;  %v7728_v54 = vpop.f32.mrb[53].mxu1 }
 0x3dc   :  { %v7729_v43 = vadd.f32 %v7728_v54, %v7727_v52  ;;  %v7730_v17 = vpop.f32.mrb[54].mxu1 }
 0x3dd   :  { %v7731_v26 = vpop.f32.mrb[55].mxu1 }
 0x3de   :  { %v5939_v22 = vadd.f32 %v7729_v43, %v7707_v33  ;;  %v8495_v26 = vld [vmem:[#allocation14] sm:$0xff]  }
 0x3f8   :  { %v7749_v46 = vpop.f32.mrb[48].mxu0 }
 0x3f9   :  { %v7750_v32 = vpop.f32.mrb[49].mxu0 }
 0x3fa   :  { %v7751_v41 = vadd.f32 %v7750_v32, %v7749_v46  ;;  %v7752_v48 = vpop.f32.mrb[50].mxu0  ;;  %v7771_v56 = vpop.f32.mrb[56].mxu1 }
 0x3fb   :  { %v7753_v24 = vpop.f32.mrb[51].mxu0  ;;  %v7772_v13 = vpop.f32.mrb[57].mxu1 }
 0x3fc   :  { %v5979_v51 = vadd.f32 %v7751_v41, %v5939_v22  ;;  %v7773_v8 = vadd.f32 %v7772_v13, %v7771_v56  ;;  %v7774_v57 = vpop.f32.mrb[58].mxu1  ;;  %v8496_v22 = vld [vmem:[#allocation14 + $0x8] sm:$0xff]  }
 0x3fd   :  { %v7775_v59 = vpop.f32.mrb[59].mxu1 }
 0x3fe   :  { %v6019_v58 = vadd.f32 %v7773_v8, %v5979_v51 }
 0x418   :  { %v7793_v60 = vpop.f32.mrb[52].mxu0 }
 0x419   :  { %v7794_v61 = vpop.f32.mrb[53].mxu0 }
 0x41a   :  { %v7795_v62 = vadd.f32 %v7794_v61, %v7793_v60  ;;  %v7796_v14 = vpop.f32.mrb[54].mxu0  ;;  %v7815_v63 = vpop.f32.mrb[60].mxu1 }
 0x41b   :  { %v7797_v31 = vpop.f32.mrb[55].mxu0  ;;  %v7816_v0 = vpop.f32.mrb[61].mxu1  ;;  %v8498_v14 = vld [vmem:[#allocation14 + $0x18] sm:$0xff]  }
 0x41c   :  { %v6059_v12 = vadd.f32 %v7795_v62, %v6019_v58  ;;  %v7817_v1 = vadd.f32 %v7816_v0, %v7815_v63  ;;  %v7818_v40 = vpop.f32.mrb[62].mxu1  ;;  %v8497_v62 = vld [vmem:[#allocation14 + $0x10] sm:$0xff]  }
 0x41d   :  { %v7819_v3 = vpop.f32.mrb[63].mxu1 }
 0x41e   :  { %v6099_v4 = vadd.f32 %v7817_v1, %v6059_v12 }
 0x438   :  { %v7837_v45 = vpop.f32.mrb[56].mxu0 }
 0x439   :  { %v7838_v50 = vpop.f32.mrb[57].mxu0 }
 0x43a   :  { %v7839_v9 = vadd.f32 %v7838_v50, %v7837_v45  ;;  %v7840_v28 = vpop.f32.mrb[58].mxu0  ;;  %v7859_v19 = vpop.f32.mrb[64].mxu1  ;;  %v8500_v50 = vld [vmem:[#allocation14 + $0x28] sm:$0xff]  }
 0x43b   :  { %v7841_v2 = vpop.f32.mrb[59].mxu0  ;;  %v7860_v21 = vpop.f32.mrb[65].mxu1  ;;  %v8502_v28 = vld [vmem:[#allocation14 + $0x38] sm:$0xff]  }
 0x43c   :  { %v6139_v7 = vadd.f32 %v7839_v9, %v6099_v4  ;;  %v7861_v10 = vadd.f32 %v7860_v21, %v7859_v19  ;;  %v7862_v11 = vpop.f32.mrb[66].mxu1  ;;  %v8499_v4 = vld [vmem:[#allocation14 + $0x20] sm:$0xff]   ;;  %v8501_v9 = vld [vmem:[#allocation14 + $0x30] sm:$0xff]  }
 0x43d   :  { %v7863_v6 = vpop.f32.mrb[67].mxu1  ;;  %v8503_v2 = vld [vmem:[#allocation14 + $0x40] sm:$0xff]   ;;  %v8506_v11 = vld [vmem:[#allocation14 + $0x58] sm:$0xff]  }
 0x43e   :  { %v6179_v55 = vadd.f32 %v7861_v10, %v6139_v7  ;;  %v8504_v7 = vld [vmem:[#allocation14 + $0x48] sm:$0xff]   ;;  %v8505_v10 = vld [vmem:[#allocation14 + $0x50] sm:$0xff]  }
 0x440   :  { %v6184_v38 = vadd.f32 %v6179_v55, %v4991_v25  ;;  %v7135_v25 = vld [vmem:[#allocation10] ss:$0 sm:$0xff] }
 0x442   :  { %v6186_v27 = vsel %vm6185_vm1, %v6184_v38, 0.0 }
 0x443   :  { %6187 = vadd.xlane.f32.xlu1 %v6186_v27 }
 0x4d0   :  { %v6188_v37 = vpop.xlane.xlu1 %6187 }
 0x4d1   :  { %v6190_v35 = vmul.f32 0.015625, %v6188_v37 }
 0x4d3   :  { %v6191_v20 = vsub.f32 %v6184_v38, %v6190_v35  ;;  %v7138_v38 = vld [vmem:[#allocation16] ss:$0 sm:$0xff] }
 0x4d5   :  { %v6192_v15 = vmul.f32 %v6191_v20, %v6191_v20 }
 0x4d7   :  { %v6193_v5 = vsel %vm6185_vm1, %v6192_v15, 0.0 }
 0x4d8   :  { %6194 = vadd.xlane.f32.xlu1 %v6193_v5 }
 0x565   :  { %v6195_v30 = vpop.xlane.xlu1 %6194 }
 0x566   :  { %v6196_v42 = vmul.f32 0.015625, %v6195_v30 }
 0x568   :  { %v6197_v16 = vadd.f32 1e-05, %v6196_v42 }
 0x56a   :  { %8509 = vrsqrt.f32 %v6197_v16 }
 0x574   :  { %v8510_v34 = vpop.eup %8509 }
 0x575   :  { %v6199_v47 = vmul.f32 %v8510_v34, %v6191_v20 }
 0x577   :  { %v6206_v33 = vmul.f32 %v7135_v25, %v6199_v47  ;;  %v7159_v25 = vld [vmem:[#allocation17] ss:$0 sm:$0xff] }
 0x579   :  { %v6213_v39 = vadd.f32 %v7136_v49, %v6206_v33  ;;  %v7160_v49 = vld [vmem:[#allocation19] ss:$0 sm:$0xff] }
 0x57b   :  { %v6214_v52 = vmax.f32 %v6213_v39, 0.0 }
 0x57d   :  { %v6262_v53 = vsel %vm6185_vm1, %v6214_v52, -inf  ;;  %v6252_v54 = vsel %vm6185_vm1, %v6214_v52, inf  ;;  %v6250_v43 = vmax.f32 %v6214_v52, 0.0 }
 0x57e   :  { %6263 = vmax.xlane.f32.xlu1 %v6262_v53  ;;  %6253 = vmin.xlane.f32.xlu0 %v6252_v54 }
 0x57f   :  { %v6251_v17 = vpack.c.bf16 %v6250_v43, %v6250_v43 }
 0x581   :  { %7894 = vmatmul.mubr.msk.bf16.vlgmr.msra.gmra.mrb[60].mxu0 %vm6316_vm3, %v6251_v17 }
 0x582   :  { %7905 = vmatprep.mubr.msk.bf16.mxu0 %vm8812_vm2, %v8811_v29  ;;  %7898 = vmatpush3.bf16.msra.mxu0 %v8495_v26 }
 0x583   :  { %7899 = vmatprep.subr.bf16.mxu0 %v8811_v29 }
 0x586   :  { %7900 = vmatpush3.bf16.msra.mxu0 %v8496_v22 }
 0x587   :  { %7901 = vmatprep.subr.bf16.mxu0 %v8811_v29 }
 0x58a   :  { %7902 = vmatpush3.bf16.msra.mxu0 %v8497_v62 }
 0x58b   :  { %7903 = vmatprep.subr.bf16.mxu0 %v8811_v29 }
 0x58e   :  { %7904 = vmatpush3.bf16.msra.mxu0 %v8498_v14 }
 0x58f   :  { %7909 = vmatprep.subr.bf16.mxu0 %v8811_v29 }
 0x60b   :  { %v6264_v46 = vpop.xlane.xlu1 %6263  ;;  %v6254_v32 = vpop.xlane.xlu0 %6253 }
 0x60c   :  { %v6265_v41 = vrot.slane %v6264_v46, 4  ;;  %v6255_v48 = vrot.slane %v6254_v32, 4 }
 0x60e   :  { %v6266_v56 = vmax.f32 %v6264_v46, %v6265_v41  ;;  %v6256_v24 = vmin.f32 %v6254_v32, %v6255_v48 }
 0x610   :  { %v6267_v13 = vrot.slane %v6266_v56, 2  ;;  %v6257_v51 = vrot.slane %v6256_v24, 2 }
 0x612   :  { %v6258_v8 = vmin.f32 %v6256_v24, %v6257_v51  ;;  %v6268_v57 = vmax.f32 %v6266_v56, %v6267_v13 }
 0x614   :  { %v6259_v59 = vrot.slane %v6258_v8, 1  ;;  %v6269_v58 = vrot.slane %v6268_v57, 1 }
 0x616   :  { %v6260_v60 = vmin.f32 %v6258_v8, %v6259_v59  ;;  %v6270_v61 = vmax.f32 %v6268_v57, %v6269_v58 }
 0x618   :  { %7952 = vpush %v6260_v60 }
 0x619   :  { %7954 = vpush %v6270_v61 }
 0x649   :  { %s7953_s26 = spop %7952 }
 0x64a   :  { %s7955_s30 = spop %7954  ;;  %v6279_v0 = vstv %s7953_s26 }
 0x64b   :  { %s6272_s5 = ssub.f32 %s7955_s30, %s7953_s26  ;;  %v6280_v12 = vsub.f32 %v6214_v52, %v6279_v0 }
 0x64d   :  { %p6273_p5 = scmp.gt.f32.partialorder %s6272_s5, 0.0 }
 0x64f   :  { %s9505_s5 = smov (!%p6273_p5, %s6272_s5), 1.0 }
 0x650   :  { %v6275_v63 = vstv %s9505_s5 }
 0x651   :  { %8511 = vrcp.f32 %v6275_v63 }
 0x65b   :  { %v8512_v31 = vpop.eup %8511 }
 0x65c   :  { %7956 = vpush %v8512_v31 }
 0x68d   :  { %s7957_s15 = spop %7956 }
 0x68e   :  { %s6278_s14 = smul.f32 2.0, %s7957_s15 }
 0x690   :  { %v6281_v1 = vstv %s6278_s14 }
 0x691   :  { %v6282_v40 = vmul.f32 %v6281_v1, %v6280_v12 }
 0x693   :  { %v7137_v3 = vadd.f32 -1.0, %v6282_v40 }
 0x695   :  { %v6360_v45 = vpack.c.bf16 %v7137_v3, %v7137_v3  ;;  %v6284_v19 = vmul.f32 %v7137_v3, %v7137_v3 }
 0x697   :  { %7906 = vmatmul.mubr.msk.bf16.vlgmr.msra.gmra.mrb[60].mxu0 %vm6316_vm3, %v6360_v45  ;;  %v6429_v21 = vpack.c.bf16 %v6284_v19, %v6284_v19  ;;  %v6285_v6 = vmul.f32 %v7137_v3, %v6284_v19 }
 0x698   :  { %7910 = vmatpush3.bf16.msra.mxu0 %v8499_v4  ;;  %7917 = vmatprep.mubr.msk.bf16.mxu0 %vm8812_vm2, %v8811_v29 }
 0x699   :  { %7911 = vmatprep.subr.bf16.mxu0 %v8811_v29  ;;  %v6498_v55 = vpack.c.bf16 %v6285_v6, %v6285_v6 }
 0x69c   :  { %7912 = vmatpush3.bf16.msra.mxu0 %v8500_v50 }
 0x69d   :  { %7913 = vmatprep.subr.bf16.mxu0 %v8811_v29 }
 0x6a0   :  { %7914 = vmatpush3.bf16.msra.mxu0 %v8501_v9 }
 0x6a1   :  { %7915 = vmatprep.subr.bf16.mxu0 %v8811_v29 }
 0x6a4   :  { %7916 = vmatpush3.bf16.msra.mxu0 %v8502_v28 }
 0x6a5   :  { %7921 = vmatprep.subr.bf16.mxu0 %v8811_v29 }
 0x6a7   :  { %7918 = vmatmul.mubr.msk.bf16.vlgmr.msra.gmra.mrb[60].mxu0 %vm6316_vm3, %v6429_v21 }
 0x6a8   :  { %7922 = vmatpush3.bf16.msra.mxu0 %v8503_v2  ;;  %7929 = vmatprep.mubr.msk.bf16.mxu0 %vm8812_vm2, %v8811_v29 }
 0x6a9   :  { %7923 = vmatprep.subr.bf16.mxu0 %v8811_v29 }
 0x6ac   :  { %7924 = vmatpush3.bf16.msra.mxu0 %v8504_v7 }
 0x6ad   :  { %7925 = vmatprep.subr.bf16.mxu0 %v8811_v29 }
 0x6b0   :  { %7926 = vmatpush3.bf16.msra.mxu0 %v8505_v10 }
 0x6b1   :  { %7927 = vmatprep.subr.bf16.mxu0 %v8811_v29 }
 0x6b4   :  { %7928 = vmatpush3.bf16.msra.mxu0 %v8506_v11 }
 0x6b7   :  { %7930 = vmatmul.mubr.msk.bf16.vlgmr.msra.gmra.mrb[60].mxu0 %vm6316_vm3, %v6498_v55 }
 0x78a   :  { %v6560_v27 = vpop.f32.mrb[60].mxu0 }
 0x78b   :  { %v7933_v37 = vadd.f32 %v7138_v38, %v6560_v27  ;;  %v7931_v35 = vpop.f32.mrb[61].mxu0 }
 0x78c   :  { %v6563_v20 = vpop.f32.mrb[62].mxu0 }
 0x78d   :  { %v7932_v15 = vpop.f32.mrb[63].mxu0  ;;  %v6568_v5 = vsel %vm6567_vm4, %v7933_v37, 0.0 }
 0x78e   :  { %6569 = vadd.xlane.f32.xlu0 %v6568_v5 }
 0x81b   :  { %v6570_v44 = vpop.xlane.xlu0 %6569 }
 0x81c   :  { %v6572_v18 = vmul.f32 0.1, %v6570_v44 }
 0x81e   :  { %v6573_v23 = vsub.f32 %v7933_v37, %v6572_v18 }
 0x820   :  { %v6574_v36 = vmul.f32 %v6573_v23, %v6573_v23 }
 0x822   :  { %v6575_v29 = vsel %vm6567_vm4, %v6574_v36, 0.0 }
 0x823   :  { %6576 = vadd.xlane.f32.xlu1 %v6575_v29 }
 0x8b0   :  { %v6577_v30 = vpop.xlane.xlu1 %6576 }
 0x8b1   :  { %v6578_v42 = vmul.f32 0.1, %v6577_v30 }
 0x8b3   :  { %v6579_v16 = vadd.f32 1e-05, %v6578_v42 }
 0x8b5   :  { %8513 = vrsqrt.f32 %v6579_v16 }
 0x8bf   :  { %v8514_v34 = vpop.eup %8513 }
 0x8c0   :  { %v6581_v47 = vmul.f32 %v8514_v34, %v6573_v23 }
 0x8c2   :  { %v6588_v33 = vmul.f32 %v7159_v25, %v6581_v47 }
 0x8c4   :  { %v6595_v39 = vadd.f32 %v7160_v49, %v6588_v33 }
 0x8c6   :  { %v6596_v52 = vmax.f32 %v6595_v39, 0.0 }
 0x8c8   :  { %6597 = vst.msk [vmem:[#allocation20] sm:$0x3] %vm6567_vm4, %v6596_v52 }
 0x8c9   :  { %8772 = shalt.err (!%p8769_p10)
}
 0x8ca   :  { %s8773_s6 = scalar_lea.hbm %s9501_s11, 32 }
 0x8cb   :  { %p8774_p11 = scmp.ne.s32.totalorder %s9501_s11, %s8773_s6  ;;  %p8777_p12 = scmp.lt.u32.totalorder %s8773_s6, %s9501_s11 }
 0x8cd   :  { %p8779_p13 = pnand %p8777_p12, %p8774_p11 }
 0x8cf   :  { %8782 = shalt.err (!%p8779_p13)
}
 0x8d0   :  { %6607 = dma.vmem_to_hbm [thread:$0]  %s6605_s17, 32, %s9501_s11, [#allocation4]  }
 0x8d1   :  { %8795 = dma.done.wait [#allocation4], 32  }
 0x8d2   :  { %8796 = vsyncadd [#allocation4], 4294967264 }
 0x8d3   :  { %6611 = vsyncpa [#allocation3], 1 }
 0x8d4   :  { %6612 = vsyncpa [#allocation6], 1 }
 0x8d5   :  { %6613 = vsyncpa [#allocation9], 1 }
 0x8d6   :  { %6614 = vsyncpa [#allocation12], 1 }
 0x8d7   :  { %6615 = vsyncpa [#allocation15], 1 }
 0x8d8   :  { %6616 = vsyncpa [#allocation18], 1 }
 0x8d9   :  { %6617 = vsyncpa [#allocation4], 1 }

</bundles_post_ra>
